<compile_context>
chip_gen: v7x
topology: tpu7x:2x2x1
jax: 0.10.0
libtpu: 0.0.40
codegen_flags: <defaults>
</compile_context>

<pallas_src>
import jax
import jax.numpy as jnp
from jax.experimental import pallas as pl
from jax.experimental.pallas import tpu as pltpu


_PAD = 8  # spare flattened rows so kw-shifted adds never index past the slab


def _mosaic_params(dimension_semantics):
    cp_cls = getattr(pltpu, "CompilerParams", None) or getattr(pltpu, "TPUCompilerParams")
    return cp_cls(dimension_semantics=dimension_semantics,
                  vmem_limit_bytes=48 * 1024 * 1024)


# ----------------------- fused conv + ReLU + 2x2 pool -----------------------

def _make_conv_pool_kernel(*, W, Wo, Wp, K, Cin, Cout, RB):
    OB = 2 * RB            # conv output rows produced per grid step
    SLAB = OB * W + _PAD   # full-width flattened rows of the kh-stacked slab

    def kernel(x_ref, wk_ref, b_ref, o_ref, xs_ref):
        j = pl.program_id(1)
        row0 = j * (OB * W)                      # flat (h*W) offset of first conv row

        # on-chip "im2col over kh": K shifted copies into the VMEM scratch
        for kh in range(K):
            xs_ref[:, kh * Cin:(kh + 1) * Cin] = x_ref[pl.ds(row0 + kh * W, SLAB), :]

        # single MXU matmul contracts (kh, ci); kw taps folded in via shifted adds
        a = jnp.dot(xs_ref[...], wk_ref[...], preferred_element_type=jnp.float32)
        y = a[0:OB * W, 0:Cout]
        for kw in range(1, K):
            y = y + a[kw:kw + OB * W, kw * Cout:(kw + 1) * Cout]
        y = jnp.maximum(y + b_ref[...], 0.0)     # bias + ReLU; row q = oh_local*W + ow

        # fused 2x2 max-pool epilogue: row-pair max, col-pair max, 0/1 decimation matmul
        r_idx = jax.lax.broadcasted_iota(jnp.int32, (Wp, Wo - 1), 1)
        t_idx = jax.lax.broadcasted_iota(jnp.int32, (Wp, Wo - 1), 0)
        sel = (r_idx == 2 * t_idx).astype(jnp.float32)          # sel[t, 2t] = 1
        for p in range(RB):
            r0 = y[(2 * p) * W:(2 * p) * W + Wo, :]
            r1 = y[(2 * p + 1) * W:(2 * p + 1) * W + Wo, :]
            m = jnp.maximum(r0, r1)                             # (Wo, Cout)
            d = jnp.maximum(m[:-1, :], m[1:, :])                # d[2t] = max of col pair t
            o_ref[p, :, :] = jnp.dot(sel, d, preferred_element_type=jnp.float32)

    return kernel


def conv_relu_pool(x_nhwc, w_pt, b, *, rows_per_step):
    """Fused valid KxK conv (stride 1) + bias + ReLU + 2x2 max-pool (one kernel)."""
    B, H, W, Cin = x_nhwc.shape
    Cout, Cin_w, K, _ = w_pt.shape
    assert Cin == Cin_w
    Ho, Wo = H - K + 1, W - K + 1
    Hp, Wp = Ho // 2, Wo // 2
    RB = rows_per_step
    assert Hp % RB == 0 and Ho == 2 * Hp and Wo == 2 * Wp
    OB = 2 * RB
    L = H * W

    x2 = x_nhwc.reshape(B, L, Cin)                                    # contiguous reshape
    x2 = jnp.pad(x2, ((0, 0), (0, _PAD), (0, 0)))                     # (B, L+PAD, Cin)
    # rows indexed by (kh, ci), cols by (kw, co) — matches in-kernel contraction
    wk = jnp.transpose(w_pt, (2, 1, 3, 0)).reshape(K * Cin, K * Cout)
    b2 = b.reshape(1, Cout)

    kernel = _make_conv_pool_kernel(W=W, Wo=Wo, Wp=Wp, K=K, Cin=Cin, Cout=Cout, RB=RB)

    return pl.pallas_call(
        kernel,
        out_shape=jax.ShapeDtypeStruct((B, Hp, Wp, Cout), jnp.float32),
        grid=(B, Hp // RB),
        in_specs=[
            pl.BlockSpec((None, L + _PAD, Cin), lambda bi, j: (bi, 0, 0)),   # whole image (reused over j)
            pl.BlockSpec((K * Cin, K * Cout), lambda bi, j: (0, 0)),
            pl.BlockSpec((1, Cout), lambda bi, j: (0, 0)),
        ],
        out_specs=pl.BlockSpec((None, RB, Wp, Cout), lambda bi, j: (bi, j, 0, 0)),
        scratch_shapes=[pltpu.VMEM((OB * W + _PAD, K * Cin), jnp.float32)],
        compiler_params=_mosaic_params(("parallel", "parallel")),
    )(x2, wk, b2)


# ------------------------------- fused MLP ----------------------------------

def _mlp_kernel(x_ref, w1_ref, b1_ref, w2_ref, b2_ref, w3_ref, b3_ref, o_ref):
    h = jnp.dot(x_ref[...], w1_ref[...], preferred_element_type=jnp.float32) + b1_ref[...]
    h = jnp.maximum(h, 0.0)
    h = jnp.dot(h, w2_ref[...], preferred_element_type=jnp.float32) + b2_ref[...]
    h = jnp.maximum(h, 0.0)
    o_ref[...] = jnp.dot(h, w3_ref[...], preferred_element_type=jnp.float32) + b3_ref[...]


def mlp_forward(x, w1, b1, w2, b2, w3, b3, n_out):
    B, F = x.shape
    NP = w1.shape[1]                   # padded width (128)
    BM = B if B <= 128 else 128        # tile batch if it ever grows
    assert B % BM == 0
    out = pl.pallas_call(
        _mlp_kernel,
        out_shape=jax.ShapeDtypeStruct((B, NP), jnp.float32),
        grid=(B // BM,),
        in_specs=[
            pl.BlockSpec((BM, F), lambda m: (m, 0)),
            pl.BlockSpec((F, NP), lambda m: (0, 0)),
            pl.BlockSpec((1, NP), lambda m: (0, 0)),
            pl.BlockSpec((NP, NP), lambda m: (0, 0)),
            pl.BlockSpec((1, NP), lambda m: (0, 0)),
            pl.BlockSpec((NP, NP), lambda m: (0, 0)),
            pl.BlockSpec((1, NP), lambda m: (0, 0)),
        ],
        out_specs=pl.BlockSpec((BM, NP), lambda m: (m, 0)),
        compiler_params=_mosaic_params(("parallel",)),
    )(x, w1, b1, w2, b2, w3, b3)
    return out[:, :n_out]


# ------------------------------- full network -------------------------------

def network_forward(x_nchw, prep):
    x = jnp.transpose(x_nchw, (0, 2, 3, 1))                                   # NCHW -> NHWC (once, tiny)
    x = conv_relu_pool(x, prep["conv1_w"], prep["conv1_b"], rows_per_step=2)  # (B, 38, 38, 6)
    x = conv_relu_pool(x, prep["conv2_w"], prep["conv2_b"], rows_per_step=1)  # (B, 17, 17, 16)
    x = x.reshape(x.shape[0], -1)        # NHWC flatten; fc1 rows were pre-permuted to match
    return mlp_forward(x, prep["fc1_w_p"], prep["fc1_b_p"],
                       prep["fc2_w_p"], prep["fc2_b_p"],
                       prep["fc3_w_p"], prep["fc3_b_p"], n_out=10)            # (B, 10)


def init_params(key):
    """Deterministic PyTorch-default-style init, PyTorch weight layouts."""
    ks = jax.random.split(key, 10)

    def u(k, shape, fan_in):
        bound = 1.0 / jnp.sqrt(float(fan_in))
        return jax.random.uniform(k, shape, jnp.float32, -bound, bound)

    return {
        "conv1_w": u(ks[0], (6, 3, 5, 5), 3 * 5 * 5),
        "conv1_b": u(ks[1], (6,), 3 * 5 * 5),
        "conv2_w": u(ks[2], (16, 6, 5, 5), 6 * 5 * 5),
        "conv2_b": u(ks[3], (16,), 6 * 5 * 5),
        "fc1_w": u(ks[4], (120, 16 * 17 * 17), 16 * 17 * 17),
        "fc1_b": u(ks[5], (120,), 16 * 17 * 17),
        "fc2_w": u(ks[6], (84, 120), 120),
        "fc2_b": u(ks[7], (84,), 120),
        "fc3_w": u(ks[8], (10, 84), 84),
        "fc3_b": u(ks[9], (10,), 84),
    }


def prepare_params(params):
    """One-time reformatting (outside the forward):
       - fc weights transposed to (in, out); fc1 rows permuted from the PyTorch
         (C, H, W) flatten order to our NHWC (H, W, C) flatten order,
       - fc widths zero-padded to 128 for lane-dense MXU tiles / stores."""
    C2, Hs, Ws = 16, 17, 17
    NP = 128

    def pad_to(a, rows, cols):
        return jnp.pad(a, ((0, rows - a.shape[0]), (0, cols - a.shape[1])))

    hh, ww, cc = jnp.meshgrid(jnp.arange(Hs), jnp.arange(Ws), jnp.arange(C2), indexing="ij")
    perm = (cc * (Hs * Ws) + hh * Ws + ww).reshape(-1)     # NHWC flat idx -> torch flat idx
    w1 = params["fc1_w"].T[perm, :]                         # (4624, 120), NHWC-row-ordered

    prep = dict(params)
    prep["fc1_w_p"] = pad_to(w1, w1.shape[0], NP)
    prep["fc1_b_p"] = pad_to(params["fc1_b"].reshape(1, -1), 1, NP)
    prep["fc2_w_p"] = pad_to(params["fc2_w"].T, NP, NP)
    prep["fc2_b_p"] = pad_to(params["fc2_b"].reshape(1, -1), 1, NP)
    prep["fc3_w_p"] = pad_to(params["fc3_w"].T, NP, NP)
    prep["fc3_b_p"] = pad_to(params["fc3_b"].reshape(1, -1), 1, NP)
    return prep


if __name__ == "__main__":
    key = jax.random.PRNGKey(0)
    k_params, k_x = jax.random.split(key)
    params = init_params(k_params)
    prep = prepare_params(params)
    # fc1 = 16*17*17 forces an 80x80 spatial input; keep batch small (2).
    x = jax.random.normal(k_x, (2, 3, 80, 80), jnp.float32)

    out = jax.jit(network_forward)(x, prep)
    out = jax.block_until_ready(out)

    assert out.shape == (2, 10)
    assert bool(jnp.all(jnp.isfinite(out)))
    print("KERNEL_OK")
</pallas_src>

<mosaic_0001>
module attributes {stable_mosaic.version = 11 : i64} {
  func.func @kernel(%arg0: i32, %arg1: i32, %arg2: memref<1x6408x3xf32, #tpu.memory_space<vmem>>, %arg3: memref<15x30xf32, #tpu.memory_space<vmem>>, %arg4: memref<1x6xf32, #tpu.memory_space<vmem>>, %arg5: memref<1x2x38x6xf32, #tpu.memory_space<vmem>>, %arg6: memref<328x15xf32, #tpu.memory_space<vmem>>) attributes {dimension_semantics = [#tpu.dimension_semantics<parallel>, #tpu.dimension_semantics<parallel>], iteration_bounds = array<i64: 2, 19>, scalar_prefetch = 0 : i64, scratch_operands = 1 : i64, tpu.core_type = #tpu.core_type<tc>, window_params = [{transform_indices = @transform_0, window_bounds = array<i64: 1, 6408, 3>}, {pipeline_mode = #tpu.pipeline_mode<synchronous>, transform_indices = @transform_1, window_bounds = array<i64: 15, 30>}, {pipeline_mode = #tpu.pipeline_mode<synchronous>, transform_indices = @transform_2, window_bounds = array<i64: 1, 6>}, {transform_indices = @transform_3, window_bounds = array<i64: 1, 2, 38, 6>}]} {
    %c320_i32 = arith.constant 320 : i32
    %0 = arith.muli %arg1, %c320_i32 : i32
    %c0_i32 = arith.constant 0 : i32
    %1 = arith.addi %0, %c0_i32 : i32
    %c0 = arith.constant 0 : index
    %2 = arith.index_cast %1 : i32 to index
    %c0_0 = arith.constant 0 : index
    %3 = vector.load %arg2[%c0, %2, %c0_0] : memref<1x6408x3xf32, #tpu.memory_space<vmem>>, vector<1x328x3xf32>
    %4 = vector.shape_cast %3 : vector<1x328x3xf32> to vector<328x3xf32>
    %c0_1 = arith.constant 0 : index
    %c0_2 = arith.constant 0 : index
    %5 = vector.load %arg6[%c0_1, %c0_2] : memref<328x15xf32, #tpu.memory_space<vmem>>, vector<328x3xf32>
    tpu.vector_store %arg6[%c0_1, %c0_2], %4 {strides = array<i32>} : memref<328x15xf32, #tpu.memory_space<vmem>>, vector<328x3xf32>,
    %c80_i32 = arith.constant 80 : i32
    %6 = arith.addi %0, %c80_i32 : i32
    %c0_3 = arith.constant 0 : index
    %7 = arith.index_cast %6 : i32 to index
    %c0_4 = arith.constant 0 : index
    %8 = vector.load %arg2[%c0_3, %7, %c0_4] : memref<1x6408x3xf32, #tpu.memory_space<vmem>>, vector<1x328x3xf32>
    %9 = vector.shape_cast %8 : vector<1x328x3xf32> to vector<328x3xf32>
    %c0_5 = arith.constant 0 : index
    %c3 = arith.constant 3 : index
    %10 = vector.load %arg6[%c0_5, %c3] : memref<328x15xf32, #tpu.memory_space<vmem>>, vector<328x3xf32>
    tpu.vector_store %arg6[%c0_5, %c3], %9 {strides = array<i32>} : memref<328x15xf32, #tpu.memory_space<vmem>>, vector<328x3xf32>,
    %c160_i32 = arith.constant 160 : i32
    %11 = arith.addi %0, %c160_i32 : i32
    %c0_6 = arith.constant 0 : index
    %12 = arith.index_cast %11 : i32 to index
    %c0_7 = arith.constant 0 : index
    %13 = vector.load %arg2[%c0_6, %12, %c0_7] : memref<1x6408x3xf32, #tpu.memory_space<vmem>>, vector<1x328x3xf32>
    %14 = vector.shape_cast %13 : vector<1x328x3xf32> to vector<328x3xf32>
    %c0_8 = arith.constant 0 : index
    %c6 = arith.constant 6 : index
    %15 = vector.load %arg6[%c0_8, %c6] : memref<328x15xf32, #tpu.memory_space<vmem>>, vector<328x3xf32>
    tpu.vector_store %arg6[%c0_8, %c6], %14 {strides = array<i32>} : memref<328x15xf32, #tpu.memory_space<vmem>>, vector<328x3xf32>,
    %c240_i32 = arith.constant 240 : i32
    %16 = arith.addi %0, %c240_i32 : i32
    %c0_9 = arith.constant 0 : index
    %17 = arith.index_cast %16 : i32 to index
    %c0_10 = arith.constant 0 : index
    %18 = vector.load %arg2[%c0_9, %17, %c0_10] : memref<1x6408x3xf32, #tpu.memory_space<vmem>>, vector<1x328x3xf32>
    %19 = vector.shape_cast %18 : vector<1x328x3xf32> to vector<328x3xf32>
    %c0_11 = arith.constant 0 : index
    %c9 = arith.constant 9 : index
    %20 = vector.load %arg6[%c0_11, %c9] : memref<328x15xf32, #tpu.memory_space<vmem>>, vector<328x3xf32>
    tpu.vector_store %arg6[%c0_11, %c9], %19 {strides = array<i32>} : memref<328x15xf32, #tpu.memory_space<vmem>>, vector<328x3xf32>,
    %c320_i32_12 = arith.constant 320 : i32
    %21 = arith.addi %0, %c320_i32_12 : i32
    %c0_13 = arith.constant 0 : index
    %22 = arith.index_cast %21 : i32 to index
    %c0_14 = arith.constant 0 : index
    %23 = vector.load %arg2[%c0_13, %22, %c0_14] : memref<1x6408x3xf32, #tpu.memory_space<vmem>>, vector<1x328x3xf32>
    %24 = vector.shape_cast %23 : vector<1x328x3xf32> to vector<328x3xf32>
    %c0_15 = arith.constant 0 : index
    %c12 = arith.constant 12 : index
    %25 = vector.load %arg6[%c0_15, %c12] : memref<328x15xf32, #tpu.memory_space<vmem>>, vector<328x3xf32>
    tpu.vector_store %arg6[%c0_15, %c12], %24 {strides = array<i32>} : memref<328x15xf32, #tpu.memory_space<vmem>>, vector<328x3xf32>,
    %c0_16 = arith.constant 0 : index
    %c0_17 = arith.constant 0 : index
    %26 = vector.load %arg6[%c0_16, %c0_17] : memref<328x15xf32, #tpu.memory_space<vmem>>, vector<328x15xf32>
    %c0_18 = arith.constant 0 : index
    %c0_19 = arith.constant 0 : index
    %27 = vector.load %arg3[%c0_18, %c0_19] : memref<15x30xf32, #tpu.memory_space<vmem>>, vector<15x30xf32>
    %cst = arith.constant dense<0.000000e+00> : vector<328x30xf32>
    %28 = tpu.matmul %26, %27, %cst {dimension_numbers = #tpu.dot_dimension_numbers<[1], [0], [0], [1], [0, 0, 1, 1], [], []>} : vector<328x15xf32>, vector<15x30xf32>, vector<328x30xf32> -> vector<328x30xf32>
    %29 = vector.extract_strided_slice %28 {offsets = [0, 0], sizes = [320, 6], strides = [1, 1]} : vector<328x30xf32> to vector<320x6xf32>
    %30 = vector.extract_strided_slice %28 {offsets = [1, 6], sizes = [320, 6], strides = [1, 1]} : vector<328x30xf32> to vector<320x6xf32>
    %31 = arith.addf %29, %30 : vector<320x6xf32>
    %32 = vector.extract_strided_slice %28 {offsets = [2, 12], sizes = [320, 6], strides = [1, 1]} : vector<328x30xf32> to vector<320x6xf32>
    %33 = arith.addf %31, %32 : vector<320x6xf32>
    %34 = vector.extract_strided_slice %28 {offsets = [3, 18], sizes = [320, 6], strides = [1, 1]} : vector<328x30xf32> to vector<320x6xf32>
    %35 = arith.addf %33, %34 : vector<320x6xf32>
    %36 = vector.extract_strided_slice %28 {offsets = [4, 24], sizes = [320, 6], strides = [1, 1]} : vector<328x30xf32> to vector<320x6xf32>
    %37 = arith.addf %35, %36 : vector<320x6xf32>
    %c0_20 = arith.constant 0 : index
    %c0_21 = arith.constant 0 : index
    %38 = vector.load %arg4[%c0_20, %c0_21] : memref<1x6xf32, #tpu.memory_space<vmem>>, vector<1x6xf32>
    %39 = vector.broadcast %38 : vector<1x6xf32> to vector<320x6xf32>
    %40 = arith.addf %37, %39 : vector<320x6xf32>
    %cst_22 = arith.constant 0.000000e+00 : f32
    %41 = vector.broadcast %cst_22 : f32 to vector<320x6xf32>
    %42 = arith.maximumf %40, %41 : vector<320x6xf32>
    %43 = tpu.iota {dimensions = array<i32: 1>} : vector<38x75xi32>
    %44 = tpu.iota {dimensions = array<i32: 0>} : vector<38x75xi32>
    %c2_i32 = arith.constant 2 : i32
    %45 = vector.broadcast %c2_i32 : i32 to vector<38x75xi32>
    %46 = arith.muli %45, %44 : vector<38x75xi32>
    %47 = arith.cmpi eq, %43, %46 : vector<38x75xi32>
    %48 = arith.extui %47 : vector<38x75xi1> to vector<38x75xi32>
    %49 = arith.sitofp %48 : vector<38x75xi32> to vector<38x75xf32>
    %50 = vector.extract_strided_slice %42 {offsets = [0, 0], sizes = [76, 6], strides = [1, 1]} : vector<320x6xf32> to vector<76x6xf32>
    %51 = vector.extract_strided_slice %42 {offsets = [80, 0], sizes = [76, 6], strides = [1, 1]} : vector<320x6xf32> to vector<76x6xf32>
    %52 = arith.maximumf %50, %51 : vector<76x6xf32>
    %53 = vector.extract_strided_slice %52 {offsets = [0, 0], sizes = [75, 6], strides = [1, 1]} : vector<76x6xf32> to vector<75x6xf32>
    %54 = vector.extract_strided_slice %52 {offsets = [1, 0], sizes = [75, 6], strides = [1, 1]} : vector<76x6xf32> to vector<75x6xf32>
    %55 = arith.maximumf %53, %54 : vector<75x6xf32>
    %cst_23 = arith.constant dense<0.000000e+00> : vector<38x6xf32>
    %56 = tpu.matmul %49, %55, %cst_23 {dimension_numbers = #tpu.dot_dimension_numbers<[1], [0], [0], [1], [0, 0, 1, 1], [], []>} : vector<38x75xf32>, vector<75x6xf32>, vector<38x6xf32> -> vector<38x6xf32>
    %c0_24 = arith.constant 0 : index
    %c0_25 = arith.constant 0 : index
    %c0_26 = arith.constant 0 : index
    %c0_27 = arith.constant 0 : index
    %57 = vector.load %arg5[%c0_24, %c0_25, %c0_26, %c0_27] : memref<1x2x38x6xf32, #tpu.memory_space<vmem>>, vector<1x1x38x6xf32>
    %58 = vector.shape_cast %57 : vector<1x1x38x6xf32> to vector<38x6xf32>
    %59 = vector.shape_cast %56 : vector<38x6xf32> to vector<1x1x38x6xf32>
    tpu.vector_store %arg5[%c0_24, %c0_25, %c0_26, %c0_27], %59 {strides = array<i32>} : memref<1x2x38x6xf32, #tpu.memory_space<vmem>>, vector<1x1x38x6xf32>,
    %60 = vector.extract_strided_slice %42 {offsets = [160, 0], sizes = [76, 6], strides = [1, 1]} : vector<320x6xf32> to vector<76x6xf32>
    %61 = vector.extract_strided_slice %42 {offsets = [240, 0], sizes = [76, 6], strides = [1, 1]} : vector<320x6xf32> to vector<76x6xf32>
    %62 = arith.maximumf %60, %61 : vector<76x6xf32>
    %63 = vector.extract_strided_slice %62 {offsets = [0, 0], sizes = [75, 6], strides = [1, 1]} : vector<76x6xf32> to vector<75x6xf32>
    %64 = vector.extract_strided_slice %62 {offsets = [1, 0], sizes = [75, 6], strides = [1, 1]} : vector<76x6xf32> to vector<75x6xf32>
    %65 = arith.maximumf %63, %64 : vector<75x6xf32>
    %cst_28 = arith.constant dense<0.000000e+00> : vector<38x6xf32>
    %66 = tpu.matmul %49, %65, %cst_28 {dimension_numbers = #tpu.dot_dimension_numbers<[1], [0], [0], [1], [0, 0, 1, 1], [], []>} : vector<38x75xf32>, vector<75x6xf32>, vector<38x6xf32> -> vector<38x6xf32>
    %c0_29 = arith.constant 0 : index
    %c1 = arith.constant 1 : index
    %c0_30 = arith.constant 0 : index
    %c0_31 = arith.constant 0 : index
    %67 = vector.load %arg5[%c0_29, %c1, %c0_30, %c0_31] : memref<1x2x38x6xf32, #tpu.memory_space<vmem>>, vector<1x1x38x6xf32>
    %68 = vector.shape_cast %67 : vector<1x1x38x6xf32> to vector<38x6xf32>
    %69 = vector.shape_cast %66 : vector<38x6xf32> to vector<1x1x38x6xf32>
    tpu.vector_store %arg5[%c0_29, %c1, %c0_30, %c0_31], %69 {strides = array<i32>} : memref<1x2x38x6xf32, #tpu.memory_space<vmem>>, vector<1x1x38x6xf32>,
    return
  }
  func.func @transform_0(%arg0: i32, %arg1: i32) -> (i32, i32, i32) {
    %c0_i32 = arith.constant 0 : i32
    %c0_i32_0 = arith.constant 0 : i32
    %c0_i32_1 = arith.constant 0 : i32
    return %arg0, %c0_i32, %c0_i32_0 : i32, i32, i32
  }
  func.func @transform_1(%arg0: i32, %arg1: i32) -> (i32, i32) {
    %c0_i32 = arith.constant 0 : i32
    %c0_i32_0 = arith.constant 0 : i32
    %c0_i32_1 = arith.constant 0 : i32
    return %c0_i32, %c0_i32_0 : i32, i32
  }
  func.func @transform_2(%arg0: i32, %arg1: i32) -> (i32, i32) {
    %c0_i32 = arith.constant 0 : i32
    %c0_i32_0 = arith.constant 0 : i32
    %c0_i32_1 = arith.constant 0 : i32
    return %c0_i32, %c0_i32_0 : i32, i32
  }
  func.func @transform_3(%arg0: i32, %arg1: i32) -> (i32, i32, i32, i32) {
    %c0_i32 = arith.constant 0 : i32
    %c0_i32_0 = arith.constant 0 : i32
    %c0_i32_1 = arith.constant 0 : i32
    return %arg0, %arg1, %c0_i32, %c0_i32_0 : i32, i32, i32, i32
  }
}

module attributes {stable_mosaic.version = 11 : i64} {
  func.func @kernel(%arg0: i32, %arg1: i32, %arg2: memref<1x1452x6xf32, #tpu.memory_space<vmem>>, %arg3: memref<30x80xf32, #tpu.memory_space<vmem>>, %arg4: memref<1x16xf32, #tpu.memory_space<vmem>>, %arg5: memref<1x1x17x16xf32, #tpu.memory_space<vmem>>, %arg6: memref<84x30xf32, #tpu.memory_space<vmem>>) attributes {dimension_semantics = [#tpu.dimension_semantics<parallel>, #tpu.dimension_semantics<parallel>], iteration_bounds = array<i64: 2, 17>, scalar_prefetch = 0 : i64, scratch_operands = 1 : i64, tpu.core_type = #tpu.core_type<tc>, window_params = [{transform_indices = @transform_0, window_bounds = array<i64: 1, 1452, 6>}, {pipeline_mode = #tpu.pipeline_mode<synchronous>, transform_indices = @transform_1, window_bounds = array<i64: 30, 80>}, {pipeline_mode = #tpu.pipeline_mode<synchronous>, transform_indices = @transform_2, window_bounds = array<i64: 1, 16>}, {transform_indices = @transform_3, window_bounds = array<i64: 1, 1, 17, 16>}]} {
    %c76_i32 = arith.constant 76 : i32
    %0 = arith.muli %arg1, %c76_i32 : i32
    %c0_i32 = arith.constant 0 : i32
    %1 = arith.addi %0, %c0_i32 : i32
    %c0 = arith.constant 0 : index
    %2 = arith.index_cast %1 : i32 to index
    %c0_0 = arith.constant 0 : index
    %3 = vector.load %arg2[%c0, %2, %c0_0] : memref<1x1452x6xf32, #tpu.memory_space<vmem>>, vector<1x84x6xf32>
    %4 = vector.shape_cast %3 : vector<1x84x6xf32> to vector<84x6xf32>
    %c0_1 = arith.constant 0 : index
    %c0_2 = arith.constant 0 : index
    %5 = vector.load %arg6[%c0_1, %c0_2] : memref<84x30xf32, #tpu.memory_space<vmem>>, vector<84x6xf32>
    tpu.vector_store %arg6[%c0_1, %c0_2], %4 {strides = array<i32>} : memref<84x30xf32, #tpu.memory_space<vmem>>, vector<84x6xf32>,
    %c38_i32 = arith.constant 38 : i32
    %6 = arith.addi %0, %c38_i32 : i32
    %c0_3 = arith.constant 0 : index
    %7 = arith.index_cast %6 : i32 to index
    %c0_4 = arith.constant 0 : index
    %8 = vector.load %arg2[%c0_3, %7, %c0_4] : memref<1x1452x6xf32, #tpu.memory_space<vmem>>, vector<1x84x6xf32>
    %9 = vector.shape_cast %8 : vector<1x84x6xf32> to vector<84x6xf32>
    %c0_5 = arith.constant 0 : index
    %c6 = arith.constant 6 : index
    %10 = vector.load %arg6[%c0_5, %c6] : memref<84x30xf32, #tpu.memory_space<vmem>>, vector<84x6xf32>
    tpu.vector_store %arg6[%c0_5, %c6], %9 {strides = array<i32>} : memref<84x30xf32, #tpu.memory_space<vmem>>, vector<84x6xf32>,
    %c76_i32_6 = arith.constant 76 : i32
    %11 = arith.addi %0, %c76_i32_6 : i32
    %c0_7 = arith.constant 0 : index
    %12 = arith.index_cast %11 : i32 to index
    %c0_8 = arith.constant 0 : index
    %13 = vector.load %arg2[%c0_7, %12, %c0_8] : memref<1x1452x6xf32, #tpu.memory_space<vmem>>, vector<1x84x6xf32>
    %14 = vector.shape_cast %13 : vector<1x84x6xf32> to vector<84x6xf32>
    %c0_9 = arith.constant 0 : index
    %c12 = arith.constant 12 : index
    %15 = vector.load %arg6[%c0_9, %c12] : memref<84x30xf32, #tpu.memory_space<vmem>>, vector<84x6xf32>
    tpu.vector_store %arg6[%c0_9, %c12], %14 {strides = array<i32>} : memref<84x30xf32, #tpu.memory_space<vmem>>, vector<84x6xf32>,
    %c114_i32 = arith.constant 114 : i32
    %16 = arith.addi %0, %c114_i32 : i32
    %c0_10 = arith.constant 0 : index
    %17 = arith.index_cast %16 : i32 to index
    %c0_11 = arith.constant 0 : index
    %18 = vector.load %arg2[%c0_10, %17, %c0_11] : memref<1x1452x6xf32, #tpu.memory_space<vmem>>, vector<1x84x6xf32>
    %19 = vector.shape_cast %18 : vector<1x84x6xf32> to vector<84x6xf32>
    %c0_12 = arith.constant 0 : index
    %c18 = arith.constant 18 : index
    %20 = vector.load %arg6[%c0_12, %c18] : memref<84x30xf32, #tpu.memory_space<vmem>>, vector<84x6xf32>
    tpu.vector_store %arg6[%c0_12, %c18], %19 {strides = array<i32>} : memref<84x30xf32, #tpu.memory_space<vmem>>, vector<84x6xf32>,
    %c152_i32 = arith.constant 152 : i32
    %21 = arith.addi %0, %c152_i32 : i32
    %c0_13 = arith.constant 0 : index
    %22 = arith.index_cast %21 : i32 to index
    %c0_14 = arith.constant 0 : index
    %23 = vector.load %arg2[%c0_13, %22, %c0_14] : memref<1x1452x6xf32, #tpu.memory_space<vmem>>, vector<1x84x6xf32>
    %24 = vector.shape_cast %23 : vector<1x84x6xf32> to vector<84x6xf32>
    %c0_15 = arith.constant 0 : index
    %c24 = arith.constant 24 : index
    %25 = vector.load %arg6[%c0_15, %c24] : memref<84x30xf32, #tpu.memory_space<vmem>>, vector<84x6xf32>
    tpu.vector_store %arg6[%c0_15, %c24], %24 {strides = array<i32>} : memref<84x30xf32, #tpu.memory_space<vmem>>, vector<84x6xf32>,
    %c0_16 = arith.constant 0 : index
    %c0_17 = arith.constant 0 : index
    %26 = vector.load %arg6[%c0_16, %c0_17] : memref<84x30xf32, #tpu.memory_space<vmem>>, vector<84x30xf32>
    %c0_18 = arith.constant 0 : index
    %c0_19 = arith.constant 0 : index
    %27 = vector.load %arg3[%c0_18, %c0_19] : memref<30x80xf32, #tpu.memory_space<vmem>>, vector<30x80xf32>
    %cst = arith.constant dense<0.000000e+00> : vector<84x80xf32>
    %28 = tpu.matmul %26, %27, %cst {dimension_numbers = #tpu.dot_dimension_numbers<[1], [0], [0], [1], [0, 0, 1, 1], [], []>} : vector<84x30xf32>, vector<30x80xf32>, vector<84x80xf32> -> vector<84x80xf32>
    %29 = vector.extract_strided_slice %28 {offsets = [0, 0], sizes = [76, 16], strides = [1, 1]} : vector<84x80xf32> to vector<76x16xf32>
    %30 = vector.extract_strided_slice %28 {offsets = [1, 16], sizes = [76, 16], strides = [1, 1]} : vector<84x80xf32> to vector<76x16xf32>
    %31 = arith.addf %29, %30 : vector<76x16xf32>
    %32 = vector.extract_strided_slice %28 {offsets = [2, 32], sizes = [76, 16], strides = [1, 1]} : vector<84x80xf32> to vector<76x16xf32>
    %33 = arith.addf %31, %32 : vector<76x16xf32>
    %34 = vector.extract_strided_slice %28 {offsets = [3, 48], sizes = [76, 16], strides = [1, 1]} : vector<84x80xf32> to vector<76x16xf32>
    %35 = arith.addf %33, %34 : vector<76x16xf32>
    %36 = vector.extract_strided_slice %28 {offsets = [4, 64], sizes = [76, 16], strides = [1, 1]} : vector<84x80xf32> to vector<76x16xf32>
    %37 = arith.addf %35, %36 : vector<76x16xf32>
    %c0_20 = arith.constant 0 : index
    %c0_21 = arith.constant 0 : index
    %38 = vector.load %arg4[%c0_20, %c0_21] : memref<1x16xf32, #tpu.memory_space<vmem>>, vector<1x16xf32>
    %39 = vector.broadcast %38 : vector<1x16xf32> to vector<76x16xf32>
    %40 = arith.addf %37, %39 : vector<76x16xf32>
    %cst_22 = arith.constant 0.000000e+00 : f32
    %41 = vector.broadcast %cst_22 : f32 to vector<76x16xf32>
    %42 = arith.maximumf %40, %41 : vector<76x16xf32>
    %43 = tpu.iota {dimensions = array<i32: 1>} : vector<17x33xi32>
    %44 = tpu.iota {dimensions = array<i32: 0>} : vector<17x33xi32>
    %c2_i32 = arith.constant 2 : i32
    %45 = vector.broadcast %c2_i32 : i32 to vector<17x33xi32>
    %46 = arith.muli %45, %44 : vector<17x33xi32>
    %47 = arith.cmpi eq, %43, %46 : vector<17x33xi32>
    %48 = arith.extui %47 : vector<17x33xi1> to vector<17x33xi32>
    %49 = arith.sitofp %48 : vector<17x33xi32> to vector<17x33xf32>
    %50 = vector.extract_strided_slice %42 {offsets = [0, 0], sizes = [34, 16], strides = [1, 1]} : vector<76x16xf32> to vector<34x16xf32>
    %51 = vector.extract_strided_slice %42 {offsets = [38, 0], sizes = [34, 16], strides = [1, 1]} : vector<76x16xf32> to vector<34x16xf32>
    %52 = arith.maximumf %50, %51 : vector<34x16xf32>
    %53 = vector.extract_strided_slice %52 {offsets = [0, 0], sizes = [33, 16], strides = [1, 1]} : vector<34x16xf32> to vector<33x16xf32>
    %54 = vector.extract_strided_slice %52 {offsets = [1, 0], sizes = [33, 16], strides = [1, 1]} : vector<34x16xf32> to vector<33x16xf32>
    %55 = arith.maximumf %53, %54 : vector<33x16xf32>
    %cst_23 = arith.constant dense<0.000000e+00> : vector<17x16xf32>
    %56 = tpu.matmul %49, %55, %cst_23 {dimension_numbers = #tpu.dot_dimension_numbers<[1], [0], [0], [1], [0, 0, 1, 1], [], []>} : vector<17x33xf32>, vector<33x16xf32>, vector<17x16xf32> -> vector<17x16xf32>
    %c0_24 = arith.constant 0 : index
    %c0_25 = arith.constant 0 : index
    %c0_26 = arith.constant 0 : index
    %c0_27 = arith.constant 0 : index
    %57 = vector.load %arg5[%c0_24, %c0_25, %c0_26, %c0_27] : memref<1x1x17x16xf32, #tpu.memory_space<vmem>>, vector<1x1x17x16xf32>
    %58 = vector.shape_cast %57 : vector<1x1x17x16xf32> to vector<17x16xf32>
    %59 = vector.shape_cast %56 : vector<17x16xf32> to vector<1x1x17x16xf32>
    tpu.vector_store %arg5[%c0_24, %c0_25, %c0_26, %c0_27], %59 {strides = array<i32>} : memref<1x1x17x16xf32, #tpu.memory_space<vmem>>, vector<1x1x17x16xf32>,
    return
  }
  func.func @transform_0(%arg0: i32, %arg1: i32) -> (i32, i32, i32) {
    %c0_i32 = arith.constant 0 : i32
    %c0_i32_0 = arith.constant 0 : i32
    %c0_i32_1 = arith.constant 0 : i32
    return %arg0, %c0_i32, %c0_i32_0 : i32, i32, i32
  }
  func.func @transform_1(%arg0: i32, %arg1: i32) -> (i32, i32) {
    %c0_i32 = arith.constant 0 : i32
    %c0_i32_0 = arith.constant 0 : i32
    %c0_i32_1 = arith.constant 0 : i32
    return %c0_i32, %c0_i32_0 : i32, i32
  }
  func.func @transform_2(%arg0: i32, %arg1: i32) -> (i32, i32) {
    %c0_i32 = arith.constant 0 : i32
    %c0_i32_0 = arith.constant 0 : i32
    %c0_i32_1 = arith.constant 0 : i32
    return %c0_i32, %c0_i32_0 : i32, i32
  }
  func.func @transform_3(%arg0: i32, %arg1: i32) -> (i32, i32, i32, i32) {
    %c0_i32 = arith.constant 0 : i32
    %c0_i32_0 = arith.constant 0 : i32
    %c0_i32_1 = arith.constant 0 : i32
    return %arg0, %arg1, %c0_i32, %c0_i32_0 : i32, i32, i32, i32
  }
}

module attributes {stable_mosaic.version = 11 : i64} {
  func.func @_mlp_kernel(%arg0: i32, %arg1: memref<2x4624xf32, #tpu.memory_space<vmem>>, %arg2: memref<4624x128xf32, #tpu.memory_space<vmem>>, %arg3: memref<1x128xf32, #tpu.memory_space<vmem>>, %arg4: memref<128x128xf32, #tpu.memory_space<vmem>>, %arg5: memref<1x128xf32, #tpu.memory_space<vmem>>, %arg6: memref<128x128xf32, #tpu.memory_space<vmem>>, %arg7: memref<1x128xf32, #tpu.memory_space<vmem>>, %arg8: memref<2x128xf32, #tpu.memory_space<vmem>>) attributes {dimension_semantics = [#tpu.dimension_semantics<parallel>], iteration_bounds = array<i64: 1>, scalar_prefetch = 0 : i64, scratch_operands = 0 : i64, tpu.core_type = #tpu.core_type<tc>, window_params = [{transform_indices = @transform_0, window_bounds = array<i64: 2, 4624>}, {pipeline_mode = #tpu.pipeline_mode<synchronous>, transform_indices = @transform_1, window_bounds = array<i64: 4624, 128>}, {pipeline_mode = #tpu.pipeline_mode<synchronous>, transform_indices = @transform_2, window_bounds = array<i64: 1, 128>}, {pipeline_mode = #tpu.pipeline_mode<synchronous>, transform_indices = @transform_3, window_bounds = array<i64: 128, 128>}, {pipeline_mode = #tpu.pipeline_mode<synchronous>, transform_indices = @transform_4, window_bounds = array<i64: 1, 128>}, {pipeline_mode = #tpu.pipeline_mode<synchronous>, transform_indices = @transform_5, window_bounds = array<i64: 128, 128>}, {pipeline_mode = #tpu.pipeline_mode<synchronous>, transform_indices = @transform_6, window_bounds = array<i64: 1, 128>}, {transform_indices = @transform_7, window_bounds = array<i64: 2, 128>}]} {
    %c0 = arith.constant 0 : index
    %c0_0 = arith.constant 0 : index
    %0 = vector.load %arg1[%c0, %c0_0] : memref<2x4624xf32, #tpu.memory_space<vmem>>, vector<2x4624xf32>
    %c0_1 = arith.constant 0 : index
    %c0_2 = arith.constant 0 : index
    %1 = vector.load %arg2[%c0_1, %c0_2] : memref<4624x128xf32, #tpu.memory_space<vmem>>, vector<4624x128xf32>
    %cst = arith.constant dense<0.000000e+00> : vector<2x128xf32>
    %2 = tpu.matmul %0, %1, %cst {dimension_numbers = #tpu.dot_dimension_numbers<[1], [0], [0], [1], [0, 0, 1, 1], [], []>} : vector<2x4624xf32>, vector<4624x128xf32>, vector<2x128xf32> -> vector<2x128xf32>
    %c0_3 = arith.constant 0 : index
    %c0_4 = arith.constant 0 : index
    %3 = vector.load %arg3[%c0_3, %c0_4] : memref<1x128xf32, #tpu.memory_space<vmem>>, vector<1x128xf32>
    %4 = vector.broadcast %3 : vector<1x128xf32> to vector<2x128xf32>
    %5 = arith.addf %2, %4 : vector<2x128xf32>
    %cst_5 = arith.constant 0.000000e+00 : f32
    %6 = vector.broadcast %cst_5 : f32 to vector<2x128xf32>
    %7 = arith.maximumf %5, %6 : vector<2x128xf32>
    %c0_6 = arith.constant 0 : index
    %c0_7 = arith.constant 0 : index
    %8 = vector.load %arg4[%c0_6, %c0_7] : memref<128x128xf32, #tpu.memory_space<vmem>>, vector<128x128xf32>
    %cst_8 = arith.constant dense<0.000000e+00> : vector<2x128xf32>
    %9 = tpu.matmul %7, %8, %cst_8 {dimension_numbers = #tpu.dot_dimension_numbers<[1], [0], [0], [1], [0, 0, 1, 1], [], []>} : vector<2x128xf32>, vector<128x128xf32>, vector<2x128xf32> -> vector<2x128xf32>
    %c0_9 = arith.constant 0 : index
    %c0_10 = arith.constant 0 : index
    %10 = vector.load %arg5[%c0_9, %c0_10] : memref<1x128xf32, #tpu.memory_space<vmem>>, vector<1x128xf32>
    %11 = vector.broadcast %10 : vector<1x128xf32> to vector<2x128xf32>
    %12 = arith.addf %9, %11 : vector<2x128xf32>
    %cst_11 = arith.constant 0.000000e+00 : f32
    %13 = vector.broadcast %cst_11 : f32 to vector<2x128xf32>
    %14 = arith.maximumf %12, %13 : vector<2x128xf32>
    %c0_12 = arith.constant 0 : index
    %c0_13 = arith.constant 0 : index
    %15 = vector.load %arg6[%c0_12, %c0_13] : memref<128x128xf32, #tpu.memory_space<vmem>>, vector<128x128xf32>
    %cst_14 = arith.constant dense<0.000000e+00> : vector<2x128xf32>
    %16 = tpu.matmul %14, %15, %cst_14 {dimension_numbers = #tpu.dot_dimension_numbers<[1], [0], [0], [1], [0, 0, 1, 1], [], []>} : vector<2x128xf32>, vector<128x128xf32>, vector<2x128xf32> -> vector<2x128xf32>
    %c0_15 = arith.constant 0 : index
    %c0_16 = arith.constant 0 : index
    %17 = vector.load %arg7[%c0_15, %c0_16] : memref<1x128xf32, #tpu.memory_space<vmem>>, vector<1x128xf32>
    %18 = vector.broadcast %17 : vector<1x128xf32> to vector<2x128xf32>
    %19 = arith.addf %16, %18 : vector<2x128xf32>
    %c0_17 = arith.constant 0 : index
    %c0_18 = arith.constant 0 : index
    %20 = vector.load %arg8[%c0_17, %c0_18] : memref<2x128xf32, #tpu.memory_space<vmem>>, vector<2x128xf32>
    tpu.vector_store %arg8[%c0_17, %c0_18], %19 {strides = array<i32>} : memref<2x128xf32, #tpu.memory_space<vmem>>, vector<2x128xf32>,
    return
  }
  func.func @transform_0(%arg0: i32) -> (i32, i32) {
    %c0_i32 = arith.constant 0 : i32
    %c0_i32_0 = arith.constant 0 : i32
    return %arg0, %c0_i32 : i32, i32
  }
  func.func @transform_1(%arg0: i32) -> (i32, i32) {
    %c0_i32 = arith.constant 0 : i32
    %c0_i32_0 = arith.constant 0 : i32
    %c0_i32_1 = arith.constant 0 : i32
    return %c0_i32, %c0_i32_0 : i32, i32
  }
  func.func @transform_2(%arg0: i32) -> (i32, i32) {
    %c0_i32 = arith.constant 0 : i32
    %c0_i32_0 = arith.constant 0 : i32
    %c0_i32_1 = arith.constant 0 : i32
    return %c0_i32, %c0_i32_0 : i32, i32
  }
  func.func @transform_3(%arg0: i32) -> (i32, i32) {
    %c0_i32 = arith.constant 0 : i32
    %c0_i32_0 = arith.constant 0 : i32
    %c0_i32_1 = arith.constant 0 : i32
    return %c0_i32, %c0_i32_0 : i32, i32
  }
  func.func @transform_4(%arg0: i32) -> (i32, i32) {
    %c0_i32 = arith.constant 0 : i32
    %c0_i32_0 = arith.constant 0 : i32
    %c0_i32_1 = arith.constant 0 : i32
    return %c0_i32, %c0_i32_0 : i32, i32
  }
  func.func @transform_5(%arg0: i32) -> (i32, i32) {
    %c0_i32 = arith.constant 0 : i32
    %c0_i32_0 = arith.constant 0 : i32
    %c0_i32_1 = arith.constant 0 : i32
    return %c0_i32, %c0_i32_0 : i32, i32
  }
  func.func @transform_6(%arg0: i32) -> (i32, i32) {
    %c0_i32 = arith.constant 0 : i32
    %c0_i32_0 = arith.constant 0 : i32
    %c0_i32_1 = arith.constant 0 : i32
    return %c0_i32, %c0_i32_0 : i32, i32
  }
  func.func @transform_7(%arg0: i32) -> (i32, i32) {
    %c0_i32 = arith.constant 0 : i32
    %c0_i32_0 = arith.constant 0 : i32
    return %arg0, %c0_i32 : i32, i32
  }
}

</mosaic_0001>

<bundles_post_ra>
// kernel: network_forward.3
= control target key start
LH: loop header
LB: loop body
LE: loop exit
PB: predicated region body
PF: predicated region fallthrough
CT: control target
= control target key end

     0   :  { %s3954_s12 = smov 0   ;;  %s3956_s13 = smov 0   ;;  %s6249_s0 = inlined_call_operand.vmem [shape: f32[2,6408,3], index: 0, kind: input, shape index: {}]   ;;  %s6250_s1 = inlined_call_operand.vmem [shape: f32[15,30], index: 1, kind: input, shape index: {}]   ;;  %s6251_s2 = inlined_call_operand.vmem [shape: f32[1,6], index: 2, kind: input, shape index: {}]   ;;  %s6252_s3 = inlined_call_operand.vmem [shape: f32[2,38,38,6], index: 3, kind: output, shape index: {}]  }
   0x1   :  { %s3958_s14 = smov 0   ;;  %s3960_s15 = smov 0  }
   0x2   :  { %s3962_s16 = smov 0  }
   0x3 LB: > { %s22_s17 = sadd.s32 1, %s3912_s14  ;;  %s25_s18 = sadd.s32 1, %s3916_s15  ;;  %s3920_s16 = sphi %s3962_s16, %s13_s16   ;;  %s3916_s15 = sphi %s3960_s15, %s6440_s15   ;;  %s3912_s14 = sphi %s3958_s14, %s6439_s14   ;;  %s3908_s13 = sphi %s3956_s13, %s6438_s13   ;;  %s3904_s12 = sphi %s3954_s12, %s6437_s12  }
   0x4   : > { %p23_p0 = scmp.ge.s32.totalorder %s22_s17, 19  ;;  %p3283_p1 = scmp.ge.s32.totalorder %s3920_s16, 1 }
   0x5   : > { %p151_p2 = scmp.lt.s32.totalorder %s3920_s16, 39 }
   0x6   : > { %s6442_s17 = smov (%p23_p0, %s22_s17), 0  ;;  %s6444_s18 = smov (!%p23_p0, %s25_s18), %s3916_s15 }
   0x7   : > { %p152_p3 = pnand %p3283_p1, %p151_p2  ;;  %p27_p4 = scmp.ge.s32.totalorder %s6444_s18, 2 }
   0x9   : > { %s6446_s18 = smov (%p27_p4, %s6444_s18), 0  ;;  %155 = sbr.rel (%p152_p3) target bundleno = 1157 (0x485), region = 32 }
  0x10   : > { %p180_p5 = scmp.lt.s32.totalorder %s3908_s13, 1  ;;  %s196_s19 = smul.u32 320, %s3904_s12  ;;  %vm239_vm0 = vcmask 23552   ;;  %v1318_v0 = vld [vmem:[%s6250_s1] sm:$0xff]  ;;  %v1319_v1 = vld [vmem:[%s6250_s1 + $0x8] sm:$0x7f] }
  0x11   : > { %vm1444_vm1 = vcmask 1046528   ;;  %v3789_v4 = vpack.c.bf16 %v1319_v1, %v1318_v0  ;;  %s3922_s29 = smov 3   ;;  %s3923_s30 = smov 9   ;;  %vm3924_vm2 = vmmov 1   ;;  %v6259_v8 = vmov 0.0|0.0  }
  0x12   : > { %s6448_s13 = smov (!%p180_p5, %s3908_s13), 1  ;;  %vm3790_vm3 = vmpackc.low %vm1444_vm1, %vm3924_vm2  ;;  %3788 = vmatprep.subr.bf16.mxu0 %v6259_v8  ;;  %3824 = vmatprep.subr.bf16.mxu1 %v6259_v8  ;;  %vm3926_vm4 = vmmov 0   ;;  %v6253_v11 = vmov 0.0   ;;  %s3928_s4 = smov 6   ;;  %vm488_vm5 = vcmask 48152   ;;  %vm737_vm6 = vcmask 72752  }
  0x13   : > { %s3826_s20 = smul.u32 6408, %s6448_s13  ;;  %3791 = vmatpush3.bf16.msk.msra.mxu0 %vm3790_vm3, %v3789_v4  ;;  %3825 = vmatpush3.bf16.msk.msra.mxu1 %vm3790_vm3, %v3789_v4  ;;  %s3929_s5 = smov 12   ;;  %vm986_vm7 = vcmask 97352   ;;  %vm1235_vm8 = vcmask 121952   ;;  %vm1320_vm9 = vcmask 121856   ;;  %vm2000_vm10 = vcmask 1045504  }
  0x14   : > { %3595 = vmatprep.mubr.msk.f32.mxu0 %vm3926_vm4, %v6253_v11  ;;  %3673 = vmatprep.mubr.msk.f32.mxu1 %vm3926_vm4, %v6253_v11  ;;  %vm2242_vm11 = vcmask 1044480   ;;  %vm2484_vm12 = vcmask 1043456   ;;  %s3930_s6 = smov 122   ;;  %s3931_s7 = smov 116   ;;  %vm2916_vm13 = vcmask 1042432  }
  0x15   : > { %s184_s23 = scalar_lea.vmem %s6249_s0, %s3826_s20  ;;  %3792 = vmatprep.subr.bf16.mxu1 %v6259_v8  ;;  %s3932_s8 = smov 110   ;;  %vm6015_vm14 = vmpackc.low %vm2916_vm13, %vm3924_vm2 }
  0x16   : > { %s3993_s24 = scalar_lea.vmem %s184_s23, %s196_s19  ;;  %s3933_s9 = smov 104  }
  0x17   : > { %v3287_v2 = vld [vmem:[%s3993_s24 + $0x50] sm:$0xff]  ;;  %v3288_v5 = vld [vmem:[%s3993_s24 + $0x58] sm:$0xff]  ;;  %v4013_v6 = vld [vmem:[%s3993_s24 + $0xa0] sm:$0xff]  ;;  %s3285_s21 = sshll.u32 %s3904_s12, 1  ;;  %s3828_s22 = smul.u32 190, %s6448_s13 }
  0x18   : > { %v4003_v3 = vld [vmem:[%s3993_s24 + $0xf0] sm:$0xff]  ;;  %365 = vrot.lane.b32.xlu0 %v3287_v2, %s3922_s29  ;;  %250 = vst.msk [vmem:[#allocation2 + $0x50] sm:$0xff] %vm239_vm0, %v3287_v2  ;;  %v4016_v7 = vld [vmem:[%s3993_s24 + $0x140] sm:$0xff]  ;;  %251 = vst.msk [vmem:[#allocation2 + $0x58] sm:$0xff] %vm239_vm0, %v3288_v5  ;;  %p188_p6 = scmp.lt.s32.totalorder %s3285_s21, 37 }
  0x19   : > { %863 = vrot.lane.b32.xlu1 %v4003_v3, %s3923_s30  ;;  %v3289_v9 = vld [vmem:[%s3993_s24 + $0x60] sm:$0xff]  ;;  %v3290_v10 = vld [vmem:[%s3993_s24 + $0x68] sm:$0xff]  ;;  %v3291_v13 = vld [vmem:[%s3993_s24 + $0x70] sm:$0xff] }
  0x1a   : > { %252 = vst.msk [vmem:[#allocation2 + $0x60] sm:$0xff] %vm239_vm0, %v3289_v9  ;;  %253 = vst.msk [vmem:[#allocation2 + $0x68] sm:$0xff] %vm239_vm0, %v3290_v10  ;;  %v4034_v12 = vld [vmem:[%s3993_s24 + $0xa8] sm:$0xff]  ;;  %v3292_v14 = vld [vmem:[%s3993_s24 + $0x78] sm:$0xff]  ;;  %s6450_s21 = smov (!%p188_p6, %s3285_s21), 37 }
  0x1b   : > { %254 = vst.msk [vmem:[#allocation2 + $0x70] sm:$0xff] %vm239_vm0, %v3291_v13  ;;  %v4041_v15 = vld [vmem:[%s3993_s24 + $0x80] sm:$0xff]  ;;  %255 = vst.msk [vmem:[#allocation2 + $0x78] sm:$0xff] %vm239_vm0, %v3292_v14  ;;  %v4048_v16 = vld [vmem:[%s3993_s24 + $0xf8] sm:$0xff]  ;;  %s3827_s23 = smul.u32 5, %s6450_s21 }
  0x1c   : > { %614 = vrot.lane.b32.xlu0 %v4013_v6, %s3928_s4  ;;  %v4051_v17 = vld [vmem:[%s3993_s24 + $0xd0] sm:$0xff]  ;;  %256 = vst.msk [vmem:[#allocation2 + $0x80] sm:$0xff] %vm239_vm0, %v4041_v15  ;;  %v4056_v18 = vld [vmem:[%s3993_s24 + $0x148] sm:$0xff]  ;;  %v4062_v20 = vld [vmem:[%s3993_s24 + $0xd8] sm:$0xff] }
  0x1d   : > { %1112 = vrot.lane.b32.xlu1 %v4016_v7, %s3929_s5  ;;  %v4059_v19 = vld [vmem:[%s3993_s24 + $0x88] sm:$0xff]  ;;  %266 = vst.msk [vmem:[#allocation2 + $0xd0] sm:$0xff] %vm239_vm0, %v4051_v17  ;;  %v4067_v21 = vld [vmem:[%s3993_s24 + $0x90] sm:$0xff]  ;;  %267 = vst.msk [vmem:[#allocation2 + $0xd8] sm:$0xff] %vm239_vm0, %v4062_v20 }
  0x1e   : > { %257 = vst.msk [vmem:[#allocation2 + $0x88] sm:$0xff] %vm239_vm0, %v4059_v19  ;;  %v4074_v22 = vld [vmem:[%s3993_s24 + $0xe0] sm:$0xff]  ;;  %258 = vst.msk [vmem:[#allocation2 + $0x90] sm:$0xff] %vm239_vm0, %v4067_v21  ;;  %v4083_v23 = vld [vmem:[%s3993_s24 + $0xe8] sm:$0xff] }
  0x1f   : > { %268 = vst.msk [vmem:[#allocation2 + $0xe0] sm:$0xff] %vm239_vm0, %v4074_v22  ;;  %v4088_v24 = vld [vmem:[%s3993_s24 + $0xb0] sm:$0xff]  ;;  %269 = vst.msk [vmem:[#allocation2 + $0xe8] sm:$0xff] %vm239_vm0, %v4083_v23  ;;  %v198_v25 = vld [vmem:[%s3993_s24] sm:$0xff] }
  0x20   : > { %367 = vrot.lane.b32.xlu0 %v3288_v5, %s3922_s29  ;;  %v199_v26 = vld [vmem:[%s3993_s24 + $0x8] sm:$0xff]  ;;  %240 = vst.msk [vmem:[#allocation2] sm:$0xff] %vm239_vm0, %v198_v25  ;;  %v200_v27 = vld [vmem:[%s3993_s24 + $0x10] sm:$0xff]  ;;  %v201_v28 = vld [vmem:[%s3993_s24 + $0x18] sm:$0xff] }
  0x21   : > { %616 = vrot.lane.b32.xlu1 %v4034_v12, %s3928_s4  ;;  %241 = vst.msk [vmem:[#allocation2 + $0x8] sm:$0xff] %vm239_vm0, %v199_v26  ;;  %v4102_v29 = vld [vmem:[%s3993_s24 + $0x100] sm:$0xff]  ;;  %v4105_v30 = vld [vmem:[%s3993_s24 + $0x150] sm:$0xff]  ;;  %242 = vst.msk [vmem:[#allocation2 + $0x10] sm:$0xff] %vm239_vm0, %v200_v27 }
  0x22   : > { %243 = vst.msk [vmem:[#allocation2 + $0x18] sm:$0xff] %vm239_vm0, %v201_v28  ;;  %v202_v31 = vld [vmem:[%s3993_s24 + $0x20] sm:$0xff]  ;;  %v4116_v32 = vld [vmem:[%s3993_s24 + $0xb8] sm:$0xff]  ;;  %v4122_v33 = vld [vmem:[%s3993_s24 + $0x108] sm:$0xff] }
  0x23   : > { %244 = vst.msk [vmem:[#allocation2 + $0x20] sm:$0xff] %vm239_vm0, %v202_v31  ;;  %v4125_v34 = vld [vmem:[%s3993_s24 + $0x158] sm:$0xff]  ;;  %v203_v35 = vld [vmem:[%s3993_s24 + $0x28] sm:$0xff]  ;;  %v4134_v36 = vld [vmem:[%s3993_s24 + $0xc0] sm:$0xff] }
  0x24   : > { %865 = vrot.lane.b32.xlu0 %v4048_v16, %s3923_s30  ;;  %245 = vst.msk [vmem:[#allocation2 + $0x28] sm:$0xff] %vm239_vm0, %v203_v35  ;;  %v4140_v37 = vld [vmem:[%s3993_s24 + $0x110] sm:$0xff]  ;;  %v4143_v38 = vld [vmem:[%s3993_s24 + $0x160] sm:$0xff]  ;;  %v4152_v40 = vld [vmem:[%s3993_s24 + $0xc8] sm:$0xff] }
  0x25   : > { %1114 = vrot.lane.b32.xlu1 %v4056_v18, %s3929_s5  ;;  %v204_v39 = vld [vmem:[%s3993_s24 + $0x30] sm:$0xff]  ;;  %v4158_v41 = vld [vmem:[%s3993_s24 + $0x118] sm:$0xff]  ;;  %v4161_v42 = vld [vmem:[%s3993_s24 + $0x168] sm:$0xff] }
  0x26   : > { %246 = vst.msk [vmem:[#allocation2 + $0x30] sm:$0xff] %vm239_vm0, %v204_v39  ;;  %v205_v43 = vld [vmem:[%s3993_s24 + $0x38] sm:$0xff]  ;;  %v4174_v44 = vld [vmem:[%s3993_s24 + $0x120] sm:$0xff]  ;;  %v4177_v45 = vld [vmem:[%s3993_s24 + $0x170] sm:$0xff] }
  0x27   : > { %247 = vst.msk [vmem:[#allocation2 + $0x38] sm:$0xff] %vm239_vm0, %v205_v43  ;;  %v206_v46 = vld [vmem:[%s3993_s24 + $0x40] sm:$0xff]  ;;  %v4190_v47 = vld [vmem:[%s3993_s24 + $0x128] sm:$0xff]  ;;  %v4193_v48 = vld [vmem:[%s3993_s24 + $0x178] sm:$0xff] }
  0x28   : > { %369 = vrot.lane.b32.xlu0 %v3289_v9, %s3922_s29  ;;  %248 = vst.msk [vmem:[#allocation2 + $0x40] sm:$0xff] %vm239_vm0, %v206_v46  ;;  %v207_v49 = vld [vmem:[%s3993_s24 + $0x48] sm:$0xff]  ;;  %v4206_v50 = vld [vmem:[%s3993_s24 + $0x130] sm:$0xff]  ;;  %v4209_v51 = vld [vmem:[%s3993_s24 + $0x180] sm:$0xff] }
  0x29   : > { %618 = vrot.lane.b32.xlu1 %v4088_v24, %s3928_s4  ;;  %249 = vst.msk [vmem:[#allocation2 + $0x48] sm:$0xff] %vm239_vm0, %v207_v49  ;;  %v3296_v52 = vld [vmem:[%s3993_s24 + $0x98] sm:$0xff]  ;;  %v4223_v54 = vld [vmem:[%s3993_s24 + $0x188] sm:$0xff]  ;;  %v4234_v55 = vld [vmem:[%s3993_s24 + $0x190] sm:$0xff] }
  0x2a   : > { %v4220_v53 = vld [vmem:[%s3993_s24 + $0x138] sm:$0xff]  ;;  %v4256_v57 = vld [vmem:[%s3993_s24 + $0x1a0] sm:$0xff]  ;;  %v4267_v58 = vld [vmem:[%s3993_s24 + $0x1a8] sm:$0xff] }
  0x2b   : > { %v4245_v56 = vld [vmem:[%s3993_s24 + $0x198] sm:$0xff]  ;;  %v4283_v61 = vld [vmem:[%s3993_s24 + $0x1c0] sm:$0xff]  ;;  %v4293_v0 = vld [vmem:[%s3993_s24 + $0x1b0] sm:$0xff] }
  0x2c   : > { %867 = vrot.lane.b32.xlu0 %v4102_v29, %s3923_s30  ;;  %v4296_v1 = vld [vmem:[%s3993_s24 + $0x210] sm:$0xff]  ;;  %v4335_v26 = vld [vmem:[%s3993_s24 + $0x218] sm:$0xff] }
  0x2d   : > { %1116 = vrot.lane.b32.xlu1 %v4105_v30, %s3929_s5  ;;  %v4359_v39 = vld [vmem:[%s3993_s24 + $0x1d0] sm:$0xff] }
  0x30   : > { %371 = vrot.lane.b32.xlu0 %v3290_v10, %s3922_s29 }
  0x31   : > { %620 = vrot.lane.b32.xlu1 %v4116_v32, %s3928_s4 }
  0x34   : > { %869 = vrot.lane.b32.xlu0 %v4122_v33, %s3923_s30 }
  0x35   : > { %1118 = vrot.lane.b32.xlu1 %v4125_v34, %s3929_s5 }
  0x38   : > { %373 = vrot.lane.b32.xlu0 %v3291_v13, %s3922_s29 }
  0x39   : > { %622 = vrot.lane.b32.xlu1 %v4134_v36, %s3928_s4 }
  0x3c   : > { %871 = vrot.lane.b32.xlu0 %v4140_v37, %s3923_s30 }
  0x3d   : > { %1120 = vrot.lane.b32.xlu1 %v4143_v38, %s3929_s5 }
  0x40   : > { %375 = vrot.lane.b32.xlu0 %v3292_v14, %s3922_s29 }
  0x41   : > { %624 = vrot.lane.b32.xlu1 %v4152_v40, %s3928_s4 }
  0x44   : > { %873 = vrot.lane.b32.xlu0 %v4158_v41, %s3923_s30 }
  0x45   : > { %1122 = vrot.lane.b32.xlu1 %v4161_v42, %s3929_s5 }
  0x48   : > { %377 = vrot.lane.b32.xlu0 %v4041_v15, %s3922_s29  ;;  %v4320_v15 = vld [vmem:[%s3993_s24 + $0x1c8] sm:$0xff] }
  0x49   : > { %626 = vrot.lane.b32.xlu1 %v4051_v17, %s3928_s4 }
  0x4c   : > { %875 = vrot.lane.b32.xlu0 %v4174_v44, %s3923_s30 }
  0x4d   : > { %1124 = vrot.lane.b32.xlu1 %v4177_v45, %s3929_s5 }
  0x50   : > { %379 = vrot.lane.b32.xlu0 %v4059_v19, %s3922_s29 }
  0x51   : > { %628 = vrot.lane.b32.xlu1 %v4062_v20, %s3928_s4 }
  0x54   : > { %877 = vrot.lane.b32.xlu0 %v4190_v47, %s3923_s30 }
  0x55   : > { %1126 = vrot.lane.b32.xlu1 %v4193_v48, %s3929_s5 }
  0x58   : > { %381 = vrot.lane.b32.xlu0 %v4067_v21, %s3922_s29  ;;  %v4328_v21 = vld [vmem:[%s3993_s24 + $0x1b8] sm:$0xff] }
  0x59   : > { %630 = vrot.lane.b32.xlu1 %v4074_v22, %s3928_s4 }
  0x5c   : > { %879 = vrot.lane.b32.xlu0 %v4206_v50, %s3923_s30 }
  0x5d   : > { %1128 = vrot.lane.b32.xlu1 %v4209_v51, %s3929_s5 }
  0x60   : > { %383 = vrot.lane.b32.xlu0 %v3296_v52, %s3922_s29  ;;  %v4381_v52 = vld [vmem:[%s3993_s24 + $0x118] sm:$0xff] }
  0x61   : > { %632 = vrot.lane.b32.xlu1 %v4083_v23, %s3928_s4  ;;  %275 = vst.msk [vmem:[#allocation2 + $0x118] sm:$0xff] %vm239_vm0, %v4381_v52 }
  0x64   : > { %881 = vrot.lane.b32.xlu0 %v4220_v53, %s3923_s30 }
  0x65   : > { %1130 = vrot.lane.b32.xlu1 %v4223_v54, %s3929_s5 }
  0x68   : > { %385 = vrot.lane.b32.xlu0 %v4013_v6, %s3922_s29 }
  0x69   : > { %634 = vrot.lane.b32.xlu1 %v4003_v3, %s3928_s4 }
  0x6c   : > { %883 = vrot.lane.b32.xlu0 %v4016_v7, %s3923_s30 }
  0x6d   : > { %1132 = vrot.lane.b32.xlu1 %v4234_v55, %s3929_s5 }
  0x70   : > { %387 = vrot.lane.b32.xlu0 %v4034_v12, %s3922_s29 }
  0x71   : > { %636 = vrot.lane.b32.xlu1 %v4048_v16, %s3928_s4 }
  0x74   : > { %885 = vrot.lane.b32.xlu0 %v4056_v18, %s3923_s30 }
  0x75   : > { %1134 = vrot.lane.b32.xlu1 %v4245_v56, %s3929_s5 }
  0x78   : > { %389 = vrot.lane.b32.xlu0 %v4088_v24, %s3922_s29 }
  0x79   : > { %638 = vrot.lane.b32.xlu1 %v4102_v29, %s3928_s4 }
  0x7c   : > { %887 = vrot.lane.b32.xlu0 %v4105_v30, %s3923_s30 }
  0x7d   : > { %1136 = vrot.lane.b32.xlu1 %v4256_v57, %s3929_s5 }
  0x80   : > { %391 = vrot.lane.b32.xlu0 %v4116_v32, %s3922_s29 }
  0x81   : > { %640 = vrot.lane.b32.xlu1 %v4122_v33, %s3928_s4 }
  0x84   : > { %889 = vrot.lane.b32.xlu0 %v4125_v34, %s3923_s30 }
  0x85   : > { %1138 = vrot.lane.b32.xlu1 %v4267_v58, %s3929_s5 }
  0x88   : > { %393 = vrot.lane.b32.xlu0 %v4134_v36, %s3922_s29 }
  0x89   : > { %417 = vrot.lane.b32.xlu1 %v4174_v44, %s3922_s29 }
  0x8a   : > { %v366_v59 = vpop.permute.xlu0 %365 }
  0x8b   : > { %v864_v60 = vpop.permute.xlu1 %863  ;;  %489 = vst.msk [vmem:[#allocation2] sm:$0xff] %vm488_vm5, %v366_v59 }
  0x8c   : > { %642 = vrot.lane.b32.xlu0 %v4140_v37, %s3928_s4 }
  0x8d   : > { %666 = vrot.lane.b32.xlu1 %v4177_v45, %s3928_s4 }
  0x8e   : > { %v615_v62 = vpop.permute.xlu0 %614 }
  0x8f   : > { %v1113_v63 = vpop.permute.xlu1 %1112  ;;  %738 = vst.msk [vmem:[#allocation2] sm:$0xff] %vm737_vm6, %v615_v62 }
  0x90   : > { %987 = vst.msk [vmem:[#allocation2] sm:$0xff] %vm986_vm7, %v864_v60  ;;  %891 = vrot.lane.b32.xlu0 %v4143_v38, %s3923_s30 }
  0x91   : > { %915 = vrot.lane.b32.xlu1 %v4283_v61, %s3923_s30  ;;  %1236 = vst.msk [vmem:[#allocation2] sm:$0xff] %vm1235_vm8, %v1113_v63  ;;  %v4400_v63 = vld [vmem:[%s3993_s24 + $0x1d8] sm:$0xff] }
  0x92   : > { %v368_v2 = vpop.permute.xlu0 %367 }
  0x93   : > { %v617_v4 = vpop.permute.xlu1 %616  ;;  %490 = vst.msk [vmem:[#allocation2 + $0x8] sm:$0xff] %vm488_vm5, %v368_v2 }
  0x94   : > { %739 = vst.msk [vmem:[#allocation2 + $0x8] sm:$0xff] %vm737_vm6, %v617_v4  ;;  %1140 = vrot.lane.b32.xlu0 %v4293_v0, %s3929_s5 }
  0x95   : > { %1164 = vrot.lane.b32.xlu1 %v4296_v1, %s3929_s5 }
  0x96   : > { %v866_v5 = vpop.permute.xlu0 %865 }
  0x97   : > { %v1115_v6 = vpop.permute.xlu1 %1114  ;;  %988 = vst.msk [vmem:[#allocation2 + $0x8] sm:$0xff] %vm986_vm7, %v866_v5  ;;  %v4412_v5 = vld [vmem:[%s3993_s24 + $0x228] sm:$0xff] }
  0x98   : > { %1237 = vst.msk [vmem:[#allocation2 + $0x8] sm:$0xff] %vm1235_vm8, %v1115_v6  ;;  %395 = vrot.lane.b32.xlu0 %v4152_v40, %s3922_s29  ;;  %v1277_v9 = vld [vmem:[#allocation2] sm:$0xff] }
  0x99   : > { %419 = vrot.lane.b32.xlu1 %v4190_v47, %s3922_s29  ;;  %3596 = vmatmul.mubr.msk.f32.vlgmr.msra.gmra.mrb[0].mxu0 %vm1320_vm9, %v1277_v9 }
  0x9a   : > { %v370_v10 = vpop.permute.xlu0 %369  ;;  %3598 = vmatprep.mubr.msk.f32.mxu0 %vm3926_vm4, %v6253_v11 }
  0x9b   : > { %v619_v12 = vpop.permute.xlu1 %618  ;;  %491 = vst.msk [vmem:[#allocation2 + $0x10] sm:$0xff] %vm488_vm5, %v370_v10  ;;  %v217_v10 = vld [vmem:[%s3993_s24 + $0x98] sm:$0xff] }
  0x9c   : > { %740 = vst.msk [vmem:[#allocation2 + $0x10] sm:$0xff] %vm737_vm6, %v619_v12  ;;  %644 = vrot.lane.b32.xlu0 %v4158_v41, %s3928_s4 }
  0x9d   : > { %668 = vrot.lane.b32.xlu1 %v4193_v48, %s3928_s4  ;;  %259 = vst.msk [vmem:[#allocation2 + $0x98] sm:$0xff] %vm239_vm0, %v217_v10  ;;  %v3442_v10 = vld [vmem:[%s3993_s24 + $0x240] sm:$0xff] }
  0x9e   : > { %v868_v13 = vpop.permute.xlu0 %867 }
  0x9f   : > { %v1117_v14 = vpop.permute.xlu1 %1116  ;;  %989 = vst.msk [vmem:[#allocation2 + $0x10] sm:$0xff] %vm986_vm7, %v868_v13  ;;  %v1278_v19 = vld [vmem:[#allocation2 + $0x8] sm:$0xff] }
  0xa0   : > { %1238 = vst.msk [vmem:[#allocation2 + $0x10] sm:$0xff] %vm1235_vm8, %v1117_v14  ;;  %893 = vrot.lane.b32.xlu0 %v4161_v42, %s3923_s30  ;;  %3599 = vmatmul.mubr.msk.f32.gmra.mrb[2].mxu0 %vm1320_vm9, %v1278_v19  ;;  %v228_v14 = vld [vmem:[%s3993_s24 + $0xf0] sm:$0xff] }
  0xa1   : > { %3601 = vmatprep.mubr.msk.f32.mxu0 %vm3926_vm4, %v6253_v11  ;;  %917 = vrot.lane.b32.xlu1 %v4320_v15, %s3923_s30  ;;  %270 = vst.msk [vmem:[#allocation2 + $0xf0] sm:$0xff] %vm239_vm0, %v228_v14  ;;  %v220_v14 = vld [vmem:[%s3993_s24 + $0xb0] sm:$0xff] }
  0xa2   : > { %v372_v24 = vpop.permute.xlu0 %371  ;;  %262 = vst.msk [vmem:[#allocation2 + $0xb0] sm:$0xff] %vm239_vm0, %v220_v14 }
  0xa3   : > { %v621_v25 = vpop.permute.xlu1 %620  ;;  %492 = vst.msk [vmem:[#allocation2 + $0x18] sm:$0xff] %vm488_vm5, %v372_v24  ;;  %v4440_v24 = vld [vmem:[%s3993_s24 + $0x1e0] sm:$0xff] }
  0xa4   : > { %741 = vst.msk [vmem:[#allocation2 + $0x18] sm:$0xff] %vm737_vm6, %v621_v25  ;;  %1142 = vrot.lane.b32.xlu0 %v4328_v21, %s3929_s5 }
  0xa5   : > { %1166 = vrot.lane.b32.xlu1 %v4335_v26, %s3929_s5 }
  0xa6   : > { %v870_v27 = vpop.permute.xlu0 %869 }
  0xa7   : > { %v1119_v28 = vpop.permute.xlu1 %1118  ;;  %990 = vst.msk [vmem:[#allocation2 + $0x18] sm:$0xff] %vm986_vm7, %v870_v27  ;;  %v1279_v31 = vld [vmem:[#allocation2 + $0x10] sm:$0xff] }
  0xa8   : > { %1239 = vst.msk [vmem:[#allocation2 + $0x18] sm:$0xff] %vm1235_vm8, %v1119_v28  ;;  %397 = vrot.lane.b32.xlu0 %v4051_v17, %s3922_s29  ;;  %3602 = vmatmul.mubr.msk.f32.gmra.mrb[4].mxu0 %vm1320_vm9, %v1279_v31  ;;  %v4452_v28 = vld [vmem:[%s3993_s24 + $0x230] sm:$0xff] }
  0xa9   : > { %3604 = vmatprep.mubr.msk.f32.mxu0 %vm3926_vm4, %v6253_v11  ;;  %421 = vrot.lane.b32.xlu1 %v4206_v50, %s3922_s29 }
  0xaa   : > { %v374_v32 = vpop.permute.xlu0 %373 }
  0xab   : > { %v623_v35 = vpop.permute.xlu1 %622  ;;  %493 = vst.msk [vmem:[#allocation2 + $0x20] sm:$0xff] %vm488_vm5, %v374_v32 }
  0xac   : > { %742 = vst.msk [vmem:[#allocation2 + $0x20] sm:$0xff] %vm737_vm6, %v623_v35  ;;  %646 = vrot.lane.b32.xlu0 %v4174_v44, %s3928_s4  ;;  %v4371_v44 = vld [vmem:[%s3993_s24 + $0x220] sm:$0xff] }
  0xad   : > { %670 = vrot.lane.b32.xlu1 %v4209_v51, %s3928_s4  ;;  %v218_v35 = vld [vmem:[%s3993_s24 + $0xa0] sm:$0xff] }
  0xae   : > { %v872_v17 = vpop.permute.xlu0 %871  ;;  %260 = vst.msk [vmem:[#allocation2 + $0xa0] sm:$0xff] %vm239_vm0, %v218_v35 }
  0xaf   : > { %v1121_v36 = vpop.permute.xlu1 %1120  ;;  %991 = vst.msk [vmem:[#allocation2 + $0x20] sm:$0xff] %vm986_vm7, %v872_v17  ;;  %v1280_v40 = vld [vmem:[#allocation2 + $0x18] sm:$0xff] }
  0xb0   : > { %1240 = vst.msk [vmem:[#allocation2 + $0x20] sm:$0xff] %vm1235_vm8, %v1121_v36  ;;  %895 = vrot.lane.b32.xlu0 %v4177_v45, %s3923_s30  ;;  %3605 = vmatmul.mubr.msk.f32.gmra.mrb[6].mxu0 %vm1320_vm9, %v1280_v40  ;;  %v229_v40 = vld [vmem:[%s3993_s24 + $0xf8] sm:$0xff] }
  0xb1   : > { %3607 = vmatprep.mubr.msk.f32.mxu0 %vm3926_vm4, %v6253_v11  ;;  %919 = vrot.lane.b32.xlu1 %v4359_v39, %s3923_s30  ;;  %271 = vst.msk [vmem:[#allocation2 + $0xf8] sm:$0xff] %vm239_vm0, %v229_v40  ;;  %v221_v40 = vld [vmem:[%s3993_s24 + $0xb8] sm:$0xff] }
  0xb2   : > { %v376_v41 = vpop.permute.xlu0 %375  ;;  %263 = vst.msk [vmem:[#allocation2 + $0xb8] sm:$0xff] %vm239_vm0, %v221_v40 }
  0xb3   : > { %v625_v43 = vpop.permute.xlu1 %624  ;;  %494 = vst.msk [vmem:[#allocation2 + $0x28] sm:$0xff] %vm488_vm5, %v376_v41 }
  0xb4   : > { %743 = vst.msk [vmem:[#allocation2 + $0x28] sm:$0xff] %vm737_vm6, %v625_v43  ;;  %1144 = vrot.lane.b32.xlu0 %v4283_v61, %s3929_s5  ;;  %v4480_v43 = vld [vmem:[%s3993_s24 + $0x1e8] sm:$0xff] }
  0xb5   : > { %1168 = vrot.lane.b32.xlu1 %v4371_v44, %s3929_s5 }
  0xb6   : > { %v874_v45 = vpop.permute.xlu0 %873 }
  0xb7   : > { %v1123_v46 = vpop.permute.xlu1 %1122  ;;  %992 = vst.msk [vmem:[#allocation2 + $0x28] sm:$0xff] %vm986_vm7, %v874_v45  ;;  %v1281_v49 = vld [vmem:[#allocation2 + $0x20] sm:$0xff] }
  0xb8   : > { %1241 = vst.msk [vmem:[#allocation2 + $0x28] sm:$0xff] %vm1235_vm8, %v1123_v46  ;;  %399 = vrot.lane.b32.xlu0 %v4062_v20, %s3922_s29  ;;  %3608 = vmatmul.mubr.msk.f32.gmra.mrb[8].mxu0 %vm1320_vm9, %v1281_v49  ;;  %v3441_v49 = vld [vmem:[%s3993_s24 + $0x238] sm:$0xff] }
  0xb9   : > { %3610 = vmatprep.mubr.msk.f32.mxu0 %vm3926_vm4, %v6253_v11  ;;  %423 = vrot.lane.b32.xlu1 %v4220_v53, %s3922_s29 }
  0xba   : > { %v378_v59 = vpop.permute.xlu0 %377 }
  0xbb   : > { %v627_v60 = vpop.permute.xlu1 %626  ;;  %495 = vst.msk [vmem:[#allocation2 + $0x30] sm:$0xff] %vm488_vm5, %v378_v59 }
  0xbc   : > { %744 = vst.msk [vmem:[#allocation2 + $0x30] sm:$0xff] %vm737_vm6, %v627_v60  ;;  %648 = vrot.lane.b32.xlu0 %v4190_v47, %s3928_s4 }
  0xbd   : > { %672 = vrot.lane.b32.xlu1 %v4223_v54, %s3928_s4 }
  0xbe   : > { %v876_v20 = vpop.permute.xlu0 %875 }
  0xbf   : > { %v1125_v62 = vpop.permute.xlu1 %1124  ;;  %993 = vst.msk [vmem:[#allocation2 + $0x30] sm:$0xff] %vm986_vm7, %v876_v20  ;;  %v1282_v2 = vld [vmem:[#allocation2 + $0x28] sm:$0xff] }
  0xc0   : > { %1242 = vst.msk [vmem:[#allocation2 + $0x30] sm:$0xff] %vm1235_vm8, %v1125_v62  ;;  %897 = vrot.lane.b32.xlu0 %v4193_v48, %s3923_s30  ;;  %3611 = vmatmul.mubr.msk.f32.gmra.mrb[10].mxu0 %vm1320_vm9, %v1282_v2  ;;  %v219_v20 = vld [vmem:[%s3993_s24 + $0xa8] sm:$0xff] }
  0xc1   : > { %3613 = vmatprep.mubr.msk.f32.mxu0 %vm3926_vm4, %v6253_v11  ;;  %921 = vrot.lane.b32.xlu1 %v4400_v63, %s3923_s30  ;;  %261 = vst.msk [vmem:[#allocation2 + $0xa8] sm:$0xff] %vm239_vm0, %v219_v20 }
  0xc2   : > { %v380_v47 = vpop.permute.xlu0 %379 }
  0xc3   : > { %v629_v4 = vpop.permute.xlu1 %628  ;;  %496 = vst.msk [vmem:[#allocation2 + $0x38] sm:$0xff] %vm488_vm5, %v380_v47  ;;  %v230_v47 = vld [vmem:[%s3993_s24 + $0x100] sm:$0xff] }
  0xc4   : > { %745 = vst.msk [vmem:[#allocation2 + $0x38] sm:$0xff] %vm737_vm6, %v629_v4  ;;  %1146 = vrot.lane.b32.xlu0 %v4320_v15, %s3929_s5 }
  0xc5   : > { %1170 = vrot.lane.b32.xlu1 %v4412_v5, %s3929_s5  ;;  %272 = vst.msk [vmem:[#allocation2 + $0x100] sm:$0xff] %vm239_vm0, %v230_v47 }
  0xc6   : > { %v878_v48 = vpop.permute.xlu0 %877 }
  0xc7   : > { %v1127_v6 = vpop.permute.xlu1 %1126  ;;  %994 = vst.msk [vmem:[#allocation2 + $0x38] sm:$0xff] %vm986_vm7, %v878_v48  ;;  %v1283_v9 = vld [vmem:[#allocation2 + $0x30] sm:$0xff] }
  0xc8   : > { %1243 = vst.msk [vmem:[#allocation2 + $0x38] sm:$0xff] %vm1235_vm8, %v1127_v6  ;;  %401 = vrot.lane.b32.xlu0 %v4074_v22, %s3922_s29  ;;  %3614 = vmatmul.mubr.msk.f32.gmra.mrb[12].mxu0 %vm1320_vm9, %v1283_v9  ;;  %v4517_v48 = vld [vmem:[%s3993_s24 + $0x1f0] sm:$0xff] }
  0xc9   : > { %3616 = vmatprep.mubr.msk.f32.mxu0 %vm3926_vm4, %v6253_v11  ;;  %425 = vrot.lane.b32.xlu1 %v4016_v7, %s3922_s29 }
  0xca   : > { %v382_v12 = vpop.permute.xlu0 %381 }
  0xcb   : > { %v631_v13 = vpop.permute.xlu1 %630  ;;  %497 = vst.msk [vmem:[#allocation2 + $0x40] sm:$0xff] %vm488_vm5, %v382_v12 }
  0xcc   : > { %746 = vst.msk [vmem:[#allocation2 + $0x40] sm:$0xff] %vm737_vm6, %v631_v13  ;;  %650 = vrot.lane.b32.xlu0 %v4206_v50, %s3928_s4 }
  0xcd   : > { %674 = vrot.lane.b32.xlu1 %v4234_v55, %s3928_s4 }
  0xce   : > { %v880_v22 = vpop.permute.xlu0 %879 }
  0xcf   : > { %v1129_v19 = vpop.permute.xlu1 %1128  ;;  %995 = vst.msk [vmem:[#allocation2 + $0x40] sm:$0xff] %vm986_vm7, %v880_v22  ;;  %v1284_v25 = vld [vmem:[#allocation2 + $0x38] sm:$0xff] }
  0xd0   : > { %1244 = vst.msk [vmem:[#allocation2 + $0x40] sm:$0xff] %vm1235_vm8, %v1129_v19  ;;  %899 = vrot.lane.b32.xlu0 %v4209_v51, %s3923_s30  ;;  %3617 = vmatmul.mubr.msk.f32.gmra.mrb[14].mxu0 %vm1320_vm9, %v1284_v25  ;;  %v231_v25 = vld [vmem:[%s3993_s24 + $0x108] sm:$0xff] }
  0xd1   : > { %3619 = vmatprep.mubr.msk.f32.mxu0 %vm3926_vm4, %v6253_v11  ;;  %923 = vrot.lane.b32.xlu1 %v4440_v24, %s3923_s30  ;;  %273 = vst.msk [vmem:[#allocation2 + $0x108] sm:$0xff] %vm239_vm0, %v231_v25  ;;  %v3353_v25 = vld [vmem:[%s3993_s24 + $0x168] sm:$0xff] }
  0xd2   : > { %v384_v50 = vpop.permute.xlu0 %383 }
  0xd3   : > { %v633_v27 = vpop.permute.xlu1 %632  ;;  %498 = vst.msk [vmem:[#allocation2 + $0x48] sm:$0xff] %vm488_vm5, %v384_v50 }
  0xd4   : > { %747 = vst.msk [vmem:[#allocation2 + $0x48] sm:$0xff] %vm737_vm6, %v633_v27  ;;  %1148 = vrot.lane.b32.xlu0 %v4359_v39, %s3929_s5  ;;  %v4554_v27 = vld [vmem:[%s3993_s24 + $0x1f8] sm:$0xff] }
  0xd5   : > { %1172 = vrot.lane.b32.xlu1 %v4452_v28, %s3929_s5 }
  0xd6   : > { %v882_v51 = vpop.permute.xlu0 %881 }
  0xd7   : > { %v1131_v31 = vpop.permute.xlu1 %1130  ;;  %996 = vst.msk [vmem:[#allocation2 + $0x48] sm:$0xff] %vm986_vm7, %v882_v51  ;;  %v1285_v32 = vld [vmem:[#allocation2 + $0x40] sm:$0xff] }
  0xd8   : > { %1245 = vst.msk [vmem:[#allocation2 + $0x48] sm:$0xff] %vm1235_vm8, %v1131_v31  ;;  %403 = vrot.lane.b32.xlu0 %v4083_v23, %s3922_s29  ;;  %3620 = vmatmul.mubr.msk.f32.gmra.mrb[16].mxu0 %vm1320_vm9, %v1285_v32  ;;  %v3443_v32 = vld [vmem:[%s3993_s24 + $0x248] sm:$0xff] }
  0xd9   : > { %3622 = vmatprep.mubr.msk.f32.mxu0 %vm3926_vm4, %v6253_v11  ;;  %427 = vrot.lane.b32.xlu1 %v4056_v18, %s3922_s29 }
  0xda   : > { %v386_v17 = vpop.permute.xlu0 %385 }
  0xdb   : > { %v635_v36 = vpop.permute.xlu1 %634  ;;  %499 = vst.msk [vmem:[#allocation2 + $0x50] sm:$0xff] %vm488_vm5, %v386_v17 }
  0xdc   : > { %748 = vst.msk [vmem:[#allocation2 + $0x50] sm:$0xff] %vm737_vm6, %v635_v36  ;;  %652 = vrot.lane.b32.xlu0 %v4220_v53, %s3928_s4 }
  0xdd   : > { %676 = vrot.lane.b32.xlu1 %v4245_v56, %s3928_s4 }
  0xde   : > { %v884_v23 = vpop.permute.xlu0 %883 }
  0xdf   : > { %v1133_v41 = vpop.permute.xlu1 %1132  ;;  %997 = vst.msk [vmem:[#allocation2 + $0x50] sm:$0xff] %vm986_vm7, %v884_v23  ;;  %v1286_v45 = vld [vmem:[#allocation2 + $0x48] sm:$0xff]  ;;  %v232_v23 = vld [vmem:[%s3993_s24 + $0x110] sm:$0xff] }
  0xe0   : > { %1246 = vst.msk [vmem:[#allocation2 + $0x50] sm:$0xff] %vm1235_vm8, %v1133_v41  ;;  %901 = vrot.lane.b32.xlu0 %v4223_v54, %s3923_s30  ;;  %3623 = vmatmul.mubr.msk.f32.gmra.mrb[18].mxu0 %vm1320_vm9, %v1286_v45  ;;  %v4588_v45 = vld [vmem:[%s3993_s24 + $0x200] sm:$0xff] }
  0xe1   : > { %3625 = vmatprep.mubr.msk.f32.mxu0 %vm3926_vm4, %v6253_v11  ;;  %925 = vrot.lane.b32.xlu1 %v4480_v43, %s3923_s30  ;;  %274 = vst.msk [vmem:[#allocation2 + $0x110] sm:$0xff] %vm239_vm0, %v232_v23 }
  0xe2   : > { %v388_v53 = vpop.permute.xlu0 %387 }
  0xe3   : > { %v637_v46 = vpop.permute.xlu1 %636  ;;  %500 = vst.msk [vmem:[#allocation2 + $0x58] sm:$0xff] %vm488_vm5, %v388_v53 }
  0xe4   : > { %749 = vst.msk [vmem:[#allocation2 + $0x58] sm:$0xff] %vm737_vm6, %v637_v46  ;;  %1150 = vrot.lane.b32.xlu0 %v4400_v63, %s3929_s5  ;;  %v3444_v46 = vld [vmem:[%s3993_s24 + $0x250] sm:$0xff] }
  0xe5   : > { %1174 = vrot.lane.b32.xlu1 %v3441_v49, %s3929_s5 }
  0xe6   : > { %v886_v54 = vpop.permute.xlu0 %885 }
  0xe7   : > { %v1135_v59 = vpop.permute.xlu1 %1134  ;;  %998 = vst.msk [vmem:[#allocation2 + $0x58] sm:$0xff] %vm986_vm7, %v886_v54  ;;  %v1287_v60 = vld [vmem:[#allocation2 + $0x50] sm:$0xff] }
  0xe8   : > { %1247 = vst.msk [vmem:[#allocation2 + $0x58] sm:$0xff] %vm1235_vm8, %v1135_v59  ;;  %405 = vrot.lane.b32.xlu0 %v4003_v3, %s3922_s29  ;;  %3626 = vmatmul.mubr.msk.f32.gmra.mrb[20].mxu0 %vm1320_vm9, %v1287_v60  ;;  %v222_v60 = vld [vmem:[%s3993_s24 + $0xc0] sm:$0xff] }
  0xe9   : > { %3628 = vmatprep.mubr.msk.f32.mxu0 %vm3926_vm4, %v6253_v11  ;;  %429 = vrot.lane.b32.xlu1 %v4105_v30, %s3922_s29  ;;  %264 = vst.msk [vmem:[#allocation2 + $0xc0] sm:$0xff] %vm239_vm0, %v222_v60 }
  0xea   : > { %v390_v62 = vpop.permute.xlu0 %389 }
  0xeb   : > { %v639_v2 = vpop.permute.xlu1 %638  ;;  %501 = vst.msk [vmem:[#allocation2 + $0x60] sm:$0xff] %vm488_vm5, %v390_v62 }
  0xec   : > { %750 = vst.msk [vmem:[#allocation2 + $0x60] sm:$0xff] %vm737_vm6, %v639_v2  ;;  %654 = vrot.lane.b32.xlu0 %v4016_v7, %s3928_s4  ;;  %v4623_v2 = vld [vmem:[%s3993_s24 + $0x208] sm:$0xff] }
  0xed   : > { %678 = vrot.lane.b32.xlu1 %v4256_v57, %s3928_s4 }
  0xee   : > { %v888_v3 = vpop.permute.xlu0 %887 }
  0xef   : > { %v1137_v4 = vpop.permute.xlu1 %1136  ;;  %999 = vst.msk [vmem:[#allocation2 + $0x60] sm:$0xff] %vm986_vm7, %v888_v3  ;;  %v1288_v6 = vld [vmem:[#allocation2 + $0x58] sm:$0xff] }
  0xf0   : > { %1248 = vst.msk [vmem:[#allocation2 + $0x60] sm:$0xff] %vm1235_vm8, %v1137_v4  ;;  %903 = vrot.lane.b32.xlu0 %v4234_v55, %s3923_s30  ;;  %3629 = vmatmul.mubr.msk.f32.gmra.mrb[22].mxu0 %vm1320_vm9, %v1288_v6  ;;  %v3445_v3 = vld [vmem:[%s3993_s24 + $0x258] sm:$0xff] }
  0xf1   : > { %3631 = vmatprep.mubr.msk.f32.mxu0 %vm3926_vm4, %v6253_v11  ;;  %927 = vrot.lane.b32.xlu1 %v4517_v48, %s3923_s30 }
  0xf2   : > { %v392_v7 = vpop.permute.xlu0 %391 }
  0xf3   : > { %v641_v9 = vpop.permute.xlu1 %640  ;;  %502 = vst.msk [vmem:[#allocation2 + $0x68] sm:$0xff] %vm488_vm5, %v392_v7 }
  0xf4   : > { %751 = vst.msk [vmem:[#allocation2 + $0x68] sm:$0xff] %vm737_vm6, %v641_v9  ;;  %1152 = vrot.lane.b32.xlu0 %v4440_v24, %s3929_s5  ;;  %v223_v9 = vld [vmem:[%s3993_s24 + $0xc8] sm:$0xff] }
  0xf5   : > { %1176 = vrot.lane.b32.xlu1 %v3442_v10, %s3929_s5  ;;  %265 = vst.msk [vmem:[#allocation2 + $0xc8] sm:$0xff] %vm239_vm0, %v223_v9 }
  0xf6   : > { %v890_v55 = vpop.permute.xlu0 %889 }
  0xf7   : > { %v1139_v12 = vpop.permute.xlu1 %1138  ;;  %1000 = vst.msk [vmem:[#allocation2 + $0x68] sm:$0xff] %vm986_vm7, %v890_v55  ;;  %v1289_v13 = vld [vmem:[#allocation2 + $0x60] sm:$0xff] }
  0xf8   : > { %1249 = vst.msk [vmem:[#allocation2 + $0x68] sm:$0xff] %vm1235_vm8, %v1139_v12  ;;  %407 = vrot.lane.b32.xlu0 %v4048_v16, %s3922_s29  ;;  %3632 = vmatmul.mubr.msk.f32.gmra.mrb[24].mxu0 %vm1320_vm9, %v1289_v13  ;;  %v234_v55 = vld [vmem:[%s3993_s24 + $0x120] sm:$0xff] }
  0xf9   : > { %3634 = vmatprep.mubr.msk.f32.mxu0 %vm3926_vm4, %v6253_v11  ;;  %431 = vrot.lane.b32.xlu1 %v4125_v34, %s3922_s29  ;;  %276 = vst.msk [vmem:[#allocation2 + $0x120] sm:$0xff] %vm239_vm0, %v234_v55 }
  0xfa   : > { %v394_v22 = vpop.permute.xlu0 %393 }
  0xfb   : > { %v418_v19 = vpop.permute.xlu1 %417  ;;  %503 = vst.msk [vmem:[#allocation2 + $0x70] sm:$0xff] %vm488_vm5, %v394_v22 }
  0xfc   : > { %515 = vst.msk [vmem:[#allocation2 + $0xd0] sm:$0xff] %vm488_vm5, %v418_v19  ;;  %656 = vrot.lane.b32.xlu0 %v4056_v18, %s3928_s4  ;;  %v3324_v19 = vld [vmem:[%s3993_s24 + $0x178] sm:$0xff] }
  0xfd   : > { %680 = vrot.lane.b32.xlu1 %v4267_v58, %s3928_s4 }
  0xfe   : > { %v643_v16 = vpop.permute.xlu0 %642 }
  0xff   : > { %v667_v50 = vpop.permute.xlu1 %666  ;;  %752 = vst.msk [vmem:[#allocation2 + $0x70] sm:$0xff] %vm737_vm6, %v643_v16  ;;  %v1290_v51 = vld [vmem:[#allocation2 + $0x68] sm:$0xff] }
 0x100   : > { %764 = vst.msk [vmem:[#allocation2 + $0xd0] sm:$0xff] %vm737_vm6, %v667_v50  ;;  %905 = vrot.lane.b32.xlu0 %v4245_v56, %s3923_s30  ;;  %3635 = vmatmul.mubr.msk.f32.gmra.mrb[26].mxu0 %vm1320_vm9, %v1290_v51 }
 0x101   : > { %3637 = vmatprep.mubr.msk.f32.mxu0 %vm3926_vm4, %v6253_v11  ;;  %929 = vrot.lane.b32.xlu1 %v4554_v27, %s3923_s30 }
 0x102   : > { %v892_v18 = vpop.permute.xlu0 %891 }
 0x103   : > { %v916_v31 = vpop.permute.xlu1 %915  ;;  %1001 = vst.msk [vmem:[#allocation2 + $0x70] sm:$0xff] %vm986_vm7, %v892_v18 }
 0x104   : > { %1013 = vst.msk [vmem:[#allocation2 + $0xd0] sm:$0xff] %vm986_vm7, %v916_v31  ;;  %1154 = vrot.lane.b32.xlu0 %v4480_v43, %s3929_s5  ;;  %v3447_v31 = vld [vmem:[%s3993_s24 + $0x268] sm:$0xff] }
 0x105   : > { %1178 = vrot.lane.b32.xlu1 %v3443_v32, %s3929_s5 }
 0x106   : > { %v1141_v56 = vpop.permute.xlu0 %1140 }
 0x107   : > { %v1165_v35 = vpop.permute.xlu1 %1164  ;;  %1250 = vst.msk [vmem:[#allocation2 + $0x70] sm:$0xff] %vm1235_vm8, %v1141_v56  ;;  %v3325_v56 = vld [vmem:[%s3993_s24 + $0x180] sm:$0xff] }
 0x108   : > { %1262 = vst.msk [vmem:[#allocation2 + $0xd0] sm:$0xff] %vm1235_vm8, %v1165_v35  ;;  %409 = vrot.lane.b32.xlu0 %v4102_v29, %s3922_s29 }
 0x109   : > { %433 = vrot.lane.b32.xlu1 %v4143_v38, %s3922_s29 }
 0x10a   : > { %v396_v17 = vpop.permute.xlu0 %395 }
 0x10b   : > { %v420_v36 = vpop.permute.xlu1 %419  ;;  %504 = vst.msk [vmem:[#allocation2 + $0x78] sm:$0xff] %vm488_vm5, %v396_v17 }
 0x10c   : > { %516 = vst.msk [vmem:[#allocation2 + $0xd8] sm:$0xff] %vm488_vm5, %v420_v36  ;;  %658 = vrot.lane.b32.xlu0 %v4105_v30, %s3928_s4  ;;  %v3448_v36 = vld [vmem:[%s3993_s24 + $0x270] sm:$0xff] }
 0x10d   : > { %682 = vrot.lane.b32.xlu1 %v4293_v0, %s3928_s4 }
 0x10e   : > { %v645_v29 = vpop.permute.xlu0 %644  ;;  %v1291_v41 = vld [vmem:[#allocation2 + $0x70] sm:$0xff] }
 0x10f   : > { %v669_v43 = vpop.permute.xlu1 %668  ;;  %v1303_v53 = vld [vmem:[#allocation2 + $0xd0] sm:$0xff]  ;;  %753 = vst.msk [vmem:[#allocation2 + $0x78] sm:$0xff] %vm737_vm6, %v645_v29  ;;  %3638 = vmatmul.mubr.msk.f32.gmra.mrb[28].mxu0 %vm1320_vm9, %v1291_v41  ;;  %v3326_v41 = vld [vmem:[%s3993_s24 + $0x188] sm:$0xff] }
 0x110   : > { %765 = vst.msk [vmem:[#allocation2 + $0xd8] sm:$0xff] %vm737_vm6, %v669_v43  ;;  %3674 = vmatmul.mubr.msk.f32.vlgmr.msra.gmra.mrb[0].mxu1 %vm1320_vm9, %v1303_v53  ;;  %907 = vrot.lane.b32.xlu0 %v4256_v57, %s3923_s30  ;;  %v3449_v53 = vld [vmem:[%s3993_s24 + $0x278] sm:$0xff] }
 0x111   : > { %3640 = vmatprep.mubr.msk.f32.mxu0 %vm3926_vm4, %v6253_v11  ;;  %931 = vrot.lane.b32.xlu1 %v4588_v45, %s3923_s30 }
 0x112   : > { %3676 = vmatprep.mubr.msk.f32.mxu1 %vm3926_vm4, %v6253_v11  ;;  %v894_v30 = vpop.permute.xlu0 %893 }
 0x113   : > { %1002 = vst.msk [vmem:[#allocation2 + $0x78] sm:$0xff] %vm986_vm7, %v894_v30  ;;  %v918_v49 = vpop.permute.xlu1 %917 }
 0x114   : > { %1156 = vrot.lane.b32.xlu0 %v4517_v48, %s3929_s5  ;;  %1014 = vst.msk [vmem:[#allocation2 + $0xd8] sm:$0xff] %vm986_vm7, %v918_v49  ;;  %v3323_v48 = vld [vmem:[%s3993_s24 + $0x170] sm:$0xff] }
 0x115   : > { %1180 = vrot.lane.b32.xlu1 %v3444_v46, %s3929_s5  ;;  %v3327_v49 = vld [vmem:[%s3993_s24 + $0x190] sm:$0xff] }
 0x116   : > { %v1143_v57 = vpop.permute.xlu0 %1142 }
 0x117   : > { %1251 = vst.msk [vmem:[#allocation2 + $0x78] sm:$0xff] %vm1235_vm8, %v1143_v57  ;;  %v1167_v54 = vpop.permute.xlu1 %1166  ;;  %v237_v57 = vld [vmem:[%s3993_s24 + $0x138] sm:$0xff] }
 0x118   : > { %411 = vrot.lane.b32.xlu0 %v4122_v33, %s3922_s29  ;;  %1263 = vst.msk [vmem:[#allocation2 + $0xd8] sm:$0xff] %vm1235_vm8, %v1167_v54 }
 0x119   : > { %435 = vrot.lane.b32.xlu1 %v4161_v42, %s3922_s29  ;;  %279 = vst.msk [vmem:[#allocation2 + $0x138] sm:$0xff] %vm239_vm0, %v237_v57 }
 0x11a   : > { %v398_v59 = vpop.permute.xlu0 %397 }
 0x11b   : > { %505 = vst.msk [vmem:[#allocation2 + $0x80] sm:$0xff] %vm488_vm5, %v398_v59  ;;  %v422_v20 = vpop.permute.xlu1 %421 }
 0x11c   : > { %660 = vrot.lane.b32.xlu0 %v4125_v34, %s3928_s4  ;;  %517 = vst.msk [vmem:[#allocation2 + $0xe0] sm:$0xff] %vm488_vm5, %v422_v20 }
 0x11d   : > { %684 = vrot.lane.b32.xlu1 %v4328_v21, %s3928_s4 }
 0x11e   : > { %v647_v33 = vpop.permute.xlu0 %646  ;;  %v1292_v62 = vld [vmem:[#allocation2 + $0x78] sm:$0xff] }
 0x11f   : > { %754 = vst.msk [vmem:[#allocation2 + $0x80] sm:$0xff] %vm737_vm6, %v647_v33  ;;  %3641 = vmatmul.mubr.msk.f32.gmra.mrb[30].mxu0 %vm1320_vm9, %v1292_v62  ;;  %v671_v42 = vpop.permute.xlu1 %670  ;;  %v1304_v47 = vld [vmem:[#allocation2 + $0xd8] sm:$0xff]  ;;  %v238_v62 = vld [vmem:[%s3993_s24 + $0x140] sm:$0xff] }
 0x120   : > { %909 = vrot.lane.b32.xlu0 %v4267_v58, %s3923_s30  ;;  %3643 = vmatprep.mubr.msk.f32.mxu0 %vm3926_vm4, %v6253_v11  ;;  %766 = vst.msk [vmem:[#allocation2 + $0xe0] sm:$0xff] %vm737_vm6, %v671_v42 }
 0x121   : > { %3677 = vmatmul.mubr.msk.f32.gmra.mrb[2].mxu1 %vm1320_vm9, %v1304_v47  ;;  %933 = vrot.lane.b32.xlu1 %v4623_v2, %s3923_s30  ;;  %280 = vst.msk [vmem:[#allocation2 + $0x140] sm:$0xff] %vm239_vm0, %v238_v62 }
 0x122   : > { %v896_v34 = vpop.permute.xlu0 %895  ;;  %3679 = vmatprep.mubr.msk.f32.mxu1 %vm3926_vm4, %v6253_v11 }
 0x123   : > { %1003 = vst.msk [vmem:[#allocation2 + $0x80] sm:$0xff] %vm986_vm7, %v896_v34  ;;  %v920_v4 = vpop.permute.xlu1 %919 }
 0x124   : > { %1158 = vrot.lane.b32.xlu0 %v4554_v27, %s3929_s5  ;;  %1015 = vst.msk [vmem:[#allocation2 + $0xe0] sm:$0xff] %vm986_vm7, %v920_v4 }
 0x125   : > { %1182 = vrot.lane.b32.xlu1 %v3445_v3, %s3929_s5 }
 0x126   : > { %v1145_v58 = vpop.permute.xlu0 %1144 }
 0x127   : > { %1252 = vst.msk [vmem:[#allocation2 + $0x80] sm:$0xff] %vm1235_vm8, %v1145_v58  ;;  %v1169_v6 = vpop.permute.xlu1 %1168 }
 0x128   : > { %413 = vrot.lane.b32.xlu0 %v4140_v37, %s3922_s29  ;;  %1264 = vst.msk [vmem:[#allocation2 + $0xe0] sm:$0xff] %vm1235_vm8, %v1169_v6 }
 0x129   : > { %437 = vrot.lane.b32.xlu1 %v3323_v48, %s3922_s29 }
 0x12a   : > { %v400_v7 = vpop.permute.xlu0 %399 }
 0x12b   : > { %506 = vst.msk [vmem:[#allocation2 + $0x88] sm:$0xff] %vm488_vm5, %v400_v7  ;;  %v424_v10 = vpop.permute.xlu1 %423 }
 0x12c   : > { %662 = vrot.lane.b32.xlu0 %v4143_v38, %s3928_s4  ;;  %518 = vst.msk [vmem:[#allocation2 + $0xe8] sm:$0xff] %vm488_vm5, %v424_v10 }
 0x12d   : > { %686 = vrot.lane.b32.xlu1 %v4283_v61, %s3928_s4  ;;  %v3446_v61 = vld [vmem:[%s3993_s24 + $0x260] sm:$0xff] }
 0x12e   : > { %v649_v37 = vpop.permute.xlu0 %648  ;;  %v1293_v12 = vld [vmem:[#allocation2 + $0x80] sm:$0xff] }
 0x12f   : > { %755 = vst.msk [vmem:[#allocation2 + $0x88] sm:$0xff] %vm737_vm6, %v649_v37  ;;  %3644 = vmatmul.mubr.msk.f32.gmra.mrb[32].mxu0 %vm1320_vm9, %v1293_v12  ;;  %v673_v13 = vpop.permute.xlu1 %672  ;;  %v1305_v14 = vld [vmem:[#allocation2 + $0xe0] sm:$0xff] }
 0x130   : > { %911 = vrot.lane.b32.xlu0 %v4293_v0, %s3923_s30  ;;  %3646 = vmatprep.mubr.msk.f32.mxu0 %vm3926_vm4, %v6253_v11  ;;  %767 = vst.msk [vmem:[#allocation2 + $0xe8] sm:$0xff] %vm737_vm6, %v673_v13 }
 0x131   : > { %3680 = vmatmul.mubr.msk.f32.gmra.mrb[4].mxu1 %vm1320_vm9, %v1305_v14  ;;  %935 = vrot.lane.b32.xlu1 %v4296_v1, %s3923_s30 }
 0x132   : > { %v898_v38 = vpop.permute.xlu0 %897  ;;  %3682 = vmatprep.mubr.msk.f32.mxu1 %vm3926_vm4, %v6253_v11 }
 0x133   : > { %1004 = vst.msk [vmem:[#allocation2 + $0x88] sm:$0xff] %vm986_vm7, %v898_v38  ;;  %v922_v22 = vpop.permute.xlu1 %921 }
 0x134   : > { %1160 = vrot.lane.b32.xlu0 %v4588_v45, %s3929_s5  ;;  %1016 = vst.msk [vmem:[#allocation2 + $0xe8] sm:$0xff] %vm986_vm7, %v922_v22  ;;  %v236_v45 = vld [vmem:[%s3993_s24 + $0x130] sm:$0xff] }
 0x135   : > { %1184 = vrot.lane.b32.xlu1 %v3446_v61, %s3929_s5  ;;  %278 = vst.msk [vmem:[#allocation2 + $0x130] sm:$0xff] %vm239_vm0, %v236_v45 }
 0x136   : > { %v1147_v0 = vpop.permute.xlu0 %1146 }
 0x137   : > { %1253 = vst.msk [vmem:[#allocation2 + $0x88] sm:$0xff] %vm1235_vm8, %v1147_v0  ;;  %v1171_v1 = vpop.permute.xlu1 %1170 }
 0x138   : > { %415 = vrot.lane.b32.xlu0 %v4381_v52, %s3922_s29  ;;  %1265 = vst.msk [vmem:[#allocation2 + $0xe8] sm:$0xff] %vm1235_vm8, %v1171_v1 }
 0x139   : > { %439 = vrot.lane.b32.xlu1 %v3324_v19, %s3922_s29 }
 0x13a   : > { %v402_v16 = vpop.permute.xlu0 %401 }
 0x13b   : > { %507 = vst.msk [vmem:[#allocation2 + $0x90] sm:$0xff] %vm488_vm5, %v402_v16  ;;  %v426_v50 = vpop.permute.xlu1 %425 }
 0x13c   : > { %664 = vrot.lane.b32.xlu0 %v3353_v25, %s3928_s4  ;;  %519 = vst.msk [vmem:[#allocation2 + $0xf0] sm:$0xff] %vm488_vm5, %v426_v50 }
 0x13d   : > { %688 = vrot.lane.b32.xlu1 %v4320_v15, %s3928_s4 }
 0x13e   : > { %v651_v27 = vpop.permute.xlu0 %650  ;;  %v1294_v52 = vld [vmem:[#allocation2 + $0x88] sm:$0xff] }
 0x13f   : > { %756 = vst.msk [vmem:[#allocation2 + $0x90] sm:$0xff] %vm737_vm6, %v651_v27  ;;  %3647 = vmatmul.mubr.msk.f32.gmra.mrb[34].mxu0 %vm1320_vm9, %v1294_v52  ;;  %v675_v51 = vpop.permute.xlu1 %674  ;;  %v1306_v18 = vld [vmem:[#allocation2 + $0xe8] sm:$0xff] }
 0x140   : > { %913 = vrot.lane.b32.xlu0 %v4328_v21, %s3923_s30  ;;  %3649 = vmatprep.mubr.msk.f32.mxu0 %vm3926_vm4, %v6253_v11  ;;  %768 = vst.msk [vmem:[#allocation2 + $0xf0] sm:$0xff] %vm737_vm6, %v675_v51  ;;  %v235_v21 = vld [vmem:[%s3993_s24 + $0x128] sm:$0xff] }
 0x141   : > { %3683 = vmatmul.mubr.msk.f32.gmra.mrb[6].mxu1 %vm1320_vm9, %v1306_v18  ;;  %937 = vrot.lane.b32.xlu1 %v4335_v26, %s3923_s30  ;;  %277 = vst.msk [vmem:[#allocation2 + $0x128] sm:$0xff] %vm239_vm0, %v235_v21  ;;  %vm2900_vm0 = vcmask 613376  }
 0x142   : > { %v900_v15 = vpop.permute.xlu0 %899  ;;  %3685 = vmatprep.mubr.msk.f32.mxu1 %vm3926_vm4, %v6253_v11 }
 0x143   : > { %1005 = vst.msk [vmem:[#allocation2 + $0x90] sm:$0xff] %vm986_vm7, %v900_v15  ;;  %v924_v32 = vpop.permute.xlu1 %923 }
 0x144   : > { %1162 = vrot.lane.b32.xlu0 %v4623_v2, %s3929_s5  ;;  %1017 = vst.msk [vmem:[#allocation2 + $0xf0] sm:$0xff] %vm986_vm7, %v924_v32 }
 0x145   : > { %1186 = vrot.lane.b32.xlu1 %v3447_v31, %s3929_s5 }
 0x146   : > { %v1149_v26 = vpop.permute.xlu0 %1148 }
 0x147   : > { %1254 = vst.msk [vmem:[#allocation2 + $0x90] sm:$0xff] %vm1235_vm8, %v1149_v26  ;;  %v1173_v35 = vpop.permute.xlu1 %1172 }
 0x148   : > { %1266 = vst.msk [vmem:[#allocation2 + $0xf0] sm:$0xff] %vm1235_vm8, %v1173_v35  ;;  %441 = vrot.lane.b32.xlu0 %v3325_v56, %s3922_s29 }
 0x149   : > { %690 = vrot.lane.b32.xlu1 %v4359_v39, %s3928_s4 }
 0x14a   : > { %v404_v17 = vpop.permute.xlu0 %403 }
 0x14b   : > { %508 = vst.msk [vmem:[#allocation2 + $0x98] sm:$0xff] %vm488_vm5, %v404_v17  ;;  %v428_v40 = vpop.permute.xlu1 %427 }
 0x14c   : > { %520 = vst.msk [vmem:[#allocation2 + $0xf8] sm:$0xff] %vm488_vm5, %v428_v40  ;;  %939 = vrot.lane.b32.xlu0 %v4371_v44, %s3923_s30 }
 0x14d   : > { %1188 = vrot.lane.b32.xlu1 %v3448_v36, %s3929_s5 }
 0x14e   : > { %v653_v23 = vpop.permute.xlu0 %652  ;;  %v1295_v29 = vld [vmem:[#allocation2 + $0x90] sm:$0xff] }
 0x14f   : > { %757 = vst.msk [vmem:[#allocation2 + $0x98] sm:$0xff] %vm737_vm6, %v653_v23  ;;  %3650 = vmatmul.mubr.msk.f32.gmra.mrb[36].mxu0 %vm1320_vm9, %v1295_v29  ;;  %v677_v39 = vpop.permute.xlu1 %676  ;;  %v1307_v43 = vld [vmem:[#allocation2 + $0xf0] sm:$0xff] }
 0x150   : > { %3652 = vmatprep.mubr.msk.f32.mxu0 %vm3926_vm4, %v6253_v11  ;;  %769 = vst.msk [vmem:[#allocation2 + $0xf8] sm:$0xff] %vm737_vm6, %v677_v39  ;;  %3686 = vmatmul.mubr.msk.f32.gmra.mrb[8].mxu1 %vm1320_vm9, %v1307_v43 }
 0x151   : > { %443 = vrot.lane.b32.xlu0 %v3326_v41, %s3922_s29  ;;  %692 = vrot.lane.b32.xlu1 %v4400_v63, %s3928_s4 }
 0x152   : > { %v902_v44 = vpop.permute.xlu0 %901  ;;  %3688 = vmatprep.mubr.msk.f32.mxu1 %vm3926_vm4, %v6253_v11 }
 0x153   : > { %1006 = vst.msk [vmem:[#allocation2 + $0x98] sm:$0xff] %vm986_vm7, %v902_v44  ;;  %v926_v30 = vpop.permute.xlu1 %925 }
 0x154   : > { %1018 = vst.msk [vmem:[#allocation2 + $0xf8] sm:$0xff] %vm986_vm7, %v926_v30 }
 0x155   : > { %941 = vrot.lane.b32.xlu0 %v4412_v5, %s3923_s30  ;;  %1190 = vrot.lane.b32.xlu1 %v3449_v53, %s3929_s5  ;;  %v3450_v5 = vld [vmem:[%s3993_s24 + $0x280] sm:$0xff]  ;;  %s192_s24 = sadd.s32 %s3828_s22, %s3827_s23 }
 0x156   : > { %v1151_v46 = vpop.permute.xlu0 %1150  ;;  %s3286_s25 = sshll.u32 %s192_s24, 3 }
 0x157   : > { %1255 = vst.msk [vmem:[#allocation2 + $0x98] sm:$0xff] %vm1235_vm8, %v1151_v46  ;;  %v1175_v63 = vpop.permute.xlu1 %1174  ;;  %s6212_s28 = scalar_lea.vmem %s6252_s3, %s3286_s25 }
 0x158   : > { %1267 = vst.msk [vmem:[#allocation2 + $0xf8] sm:$0xff] %vm1235_vm8, %v1175_v63 }
 0x159   : > { %445 = vrot.lane.b32.xlu0 %v3327_v49, %s3922_s29  ;;  %694 = vrot.lane.b32.xlu1 %v4440_v24, %s3928_s4 }
 0x15a   : > { %v406_v54 = vpop.permute.xlu0 %405 }
 0x15b   : > { %509 = vst.msk [vmem:[#allocation2 + $0xa0] sm:$0xff] %vm488_vm5, %v406_v54  ;;  %v430_v59 = vpop.permute.xlu1 %429 }
 0x15c   : > { %521 = vst.msk [vmem:[#allocation2 + $0x100] sm:$0xff] %vm488_vm5, %v430_v59 }
 0x15d   : > { %943 = vrot.lane.b32.xlu0 %v4452_v28, %s3923_s30  ;;  %1192 = vrot.lane.b32.xlu1 %v3450_v5, %s3929_s5 }
 0x15e   : > { %v655_v60 = vpop.permute.xlu0 %654  ;;  %v1296_v20 = vld [vmem:[#allocation2 + $0x98] sm:$0xff] }
 0x15f   : > { %758 = vst.msk [vmem:[#allocation2 + $0xa0] sm:$0xff] %vm737_vm6, %v655_v60  ;;  %3653 = vmatmul.mubr.msk.f32.gmra.mrb[38].mxu0 %vm1320_vm9, %v1296_v20  ;;  %v679_v33 = vpop.permute.xlu1 %678  ;;  %v1308_v24 = vld [vmem:[#allocation2 + $0xf8] sm:$0xff] }
 0x160   : > { %3655 = vmatprep.mubr.msk.f32.mxu0 %vm3926_vm4, %v6253_v11  ;;  %770 = vst.msk [vmem:[#allocation2 + $0x100] sm:$0xff] %vm737_vm6, %v679_v33  ;;  %3689 = vmatmul.mubr.msk.f32.gmra.mrb[10].mxu1 %vm1320_vm9, %v1308_v24 }
 0x161   : > { %3691 = vmatprep.mubr.msk.f32.mxu1 %vm3926_vm4, %v6253_v11 }
 0x162   : > { %v904_v28 = vpop.permute.xlu0 %903 }
 0x163   : > { %1007 = vst.msk [vmem:[#allocation2 + $0xa0] sm:$0xff] %vm986_vm7, %v904_v28  ;;  %v928_v2 = vpop.permute.xlu1 %927 }
 0x164   : > { %1019 = vst.msk [vmem:[#allocation2 + $0x100] sm:$0xff] %vm986_vm7, %v928_v2 }
 0x166   : > { %v1153_v42 = vpop.permute.xlu0 %1152 }
 0x167   : > { %1256 = vst.msk [vmem:[#allocation2 + $0xa0] sm:$0xff] %vm1235_vm8, %v1153_v42  ;;  %v1177_v47 = vpop.permute.xlu1 %1176 }
 0x168   : > { %1268 = vst.msk [vmem:[#allocation2 + $0x100] sm:$0xff] %vm1235_vm8, %v1177_v47 }
 0x16a   : > { %v408_v34 = vpop.permute.xlu0 %407 }
 0x16b   : > { %510 = vst.msk [vmem:[#allocation2 + $0xa8] sm:$0xff] %vm488_vm5, %v408_v34  ;;  %v432_v3 = vpop.permute.xlu1 %431 }
 0x16c   : > { %v4770_v4 = vpop.f32.mrb[0].mxu0  ;;  %522 = vst.msk [vmem:[#allocation2 + $0x108] sm:$0xff] %vm488_vm5, %v432_v3 }
 0x16d   : > { %v3597_v58 = vpop.f32.mrb[1].mxu0  ;;  %v1759_v55 = vrot.slane %v4770_v4, 1  ;;  %v2001_v37 = vrot.slane %v4770_v4, 2  ;;  %v2243_v12 = vrot.slane %v4770_v4, 3  ;;  %v2485_v13 = vrot.slane %v4770_v4, 4 }
 0x16e   : > { %v657_v48 = vpop.permute.xlu0 %656  ;;  %v1297_v6 = vld [vmem:[#allocation2 + $0xa0] sm:$0xff] }
 0x16f   : > { %759 = vst.msk [vmem:[#allocation2 + $0xa8] sm:$0xff] %vm737_vm6, %v657_v48  ;;  %3656 = vmatmul.mubr.msk.f32.gmra.mrb[40].mxu0 %vm1320_vm9, %v1297_v6  ;;  %v681_v7 = vpop.permute.xlu1 %680  ;;  %v1309_v9 = vld [vmem:[#allocation2 + $0x100] sm:$0xff] }
 0x170   : > { %3658 = vmatprep.mubr.msk.f32.mxu0 %vm3926_vm4, %v6253_v11  ;;  %771 = vst.msk [vmem:[#allocation2 + $0x108] sm:$0xff] %vm737_vm6, %v681_v7  ;;  %3692 = vmatmul.mubr.msk.f32.gmra.mrb[12].mxu1 %vm1320_vm9, %v1309_v9 }
 0x171   : > { %3694 = vmatprep.mubr.msk.f32.mxu1 %vm3926_vm4, %v6253_v11 }
 0x172   : > { %v906_v10 = vpop.permute.xlu0 %905 }
 0x173   : > { %1008 = vst.msk [vmem:[#allocation2 + $0xa8] sm:$0xff] %vm986_vm7, %v906_v10  ;;  %v4786_v14 = vpop.f32.mrb[2].mxu0  ;;  %v930_v38 = vpop.permute.xlu1 %929 }
 0x174   : > { %v1760_v61 = vrot.slane %v4786_v14, 1  ;;  %v3600_v22 = vpop.f32.mrb[3].mxu0  ;;  %v2002_v0 = vrot.slane %v4786_v14, 2  ;;  %v2244_v19 = vrot.slane %v4786_v14, 3  ;;  %v2486_v1 = vrot.slane %v4786_v14, 4  ;;  %1020 = vst.msk [vmem:[#allocation2 + $0x108] sm:$0xff] %vm986_vm7, %v930_v38 }
 0x176   : > { %v1155_v25 = vpop.permute.xlu0 %1154  ;;  %v1761_v16 = vsel %vm1444_vm1, %v1759_v55, %v1760_v61  ;;  %v2003_v50 = vsel %vm2000_vm10, %v2001_v37, %v2002_v0  ;;  %v2245_v27 = vsel %vm2242_vm11, %v2243_v12, %v2244_v19  ;;  %v2487_v52 = vsel %vm2484_vm12, %v2485_v13, %v2486_v1 }
 0x177   : > { %1257 = vst.msk [vmem:[#allocation2 + $0xa8] sm:$0xff] %vm1235_vm8, %v1155_v25  ;;  %1840 = vrot.lane.b32.xlu0 %v1761_v16, %s3930_s6  ;;  %v1179_v51 = vpop.permute.xlu1 %1178 }
 0x178   : > { %1269 = vst.msk [vmem:[#allocation2 + $0x108] sm:$0xff] %vm1235_vm8, %v1179_v51 }
 0x17a   : > { %v410_v18 = vpop.permute.xlu0 %409 }
 0x17b   : > { %511 = vst.msk [vmem:[#allocation2 + $0xb0] sm:$0xff] %vm488_vm5, %v410_v18  ;;  %2082 = vrot.lane.b32.xlu0 %v2003_v50, %s3931_s7  ;;  %v4802_v15 = vpop.f32.mrb[4].mxu0  ;;  %v434_v31 = vpop.permute.xlu1 %433 }
 0x17c   : > { %v1762_v32 = vrot.slane %v4802_v15, 1  ;;  %v3603_v21 = vpop.f32.mrb[5].mxu0  ;;  %v2004_v56 = vrot.slane %v4802_v15, 2  ;;  %v2246_v26 = vrot.slane %v4802_v15, 3  ;;  %v2488_v35 = vrot.slane %v4802_v15, 4  ;;  %523 = vst.msk [vmem:[#allocation2 + $0x110] sm:$0xff] %vm488_vm5, %v434_v31 }
 0x17e   : > { %v659_v17 = vpop.permute.xlu0 %658  ;;  %v1298_v36 = vld [vmem:[#allocation2 + $0xa8] sm:$0xff]  ;;  %v1763_v40 = vsel %vm1444_vm1, %v1760_v61, %v1762_v32  ;;  %v2005_v23 = vsel %vm2000_vm10, %v2002_v0, %v2004_v56  ;;  %v2247_v29 = vsel %vm2242_vm11, %v2244_v19, %v2246_v26  ;;  %v2489_v41 = vsel %vm2484_vm12, %v2486_v1, %v2488_v35 }
 0x17f   : > { %760 = vst.msk [vmem:[#allocation2 + $0xb0] sm:$0xff] %vm737_vm6, %v659_v17  ;;  %3659 = vmatmul.mubr.msk.f32.gmra.mrb[42].mxu0 %vm1320_vm9, %v1298_v36  ;;  %2324 = vrot.lane.b32.xlu0 %v2245_v27, %s3932_s8  ;;  %v683_v39 = vpop.permute.xlu1 %682  ;;  %v1310_v43 = vld [vmem:[#allocation2 + $0x108] sm:$0xff] }
 0x180   : > { %1842 = vrot.lane.b32.xlu1 %v1763_v40, %s3930_s6  ;;  %3661 = vmatprep.mubr.msk.f32.mxu0 %vm3926_vm4, %v6253_v11  ;;  %772 = vst.msk [vmem:[#allocation2 + $0x110] sm:$0xff] %vm737_vm6, %v683_v39 }
 0x181   : > { %3695 = vmatmul.mubr.msk.f32.gmra.mrb[14].mxu1 %vm1320_vm9, %v1310_v43 }
 0x182   : > { %v908_v45 = vpop.permute.xlu0 %907  ;;  %3697 = vmatprep.mubr.msk.f32.mxu1 %vm3926_vm4, %v6253_v11 }
 0x183   : > { %1009 = vst.msk [vmem:[#allocation2 + $0xb0] sm:$0xff] %vm986_vm7, %v908_v45  ;;  %2566 = vrot.lane.b32.xlu0 %v2487_v52, %s3933_s9  ;;  %v4825_v44 = vpop.f32.mrb[6].mxu0  ;;  %v932_v53 = vpop.permute.xlu1 %931 }
 0x184   : > { %2084 = vrot.lane.b32.xlu1 %v2005_v23, %s3931_s7  ;;  %v1764_v30 = vrot.slane %v4825_v44, 1  ;;  %v2006_v46 = vrot.slane %v4825_v44, 2  ;;  %v2248_v49 = vrot.slane %v4825_v44, 3  ;;  %v3606_v63 = vpop.f32.mrb[7].mxu0  ;;  %v2490_v57 = vrot.slane %v4825_v44, 4  ;;  %1021 = vst.msk [vmem:[#allocation2 + $0x110] sm:$0xff] %vm986_vm7, %v932_v53 }
 0x186   : > { %v1157_v54 = vpop.permute.xlu0 %1156  ;;  %v1765_v5 = vsel %vm1444_vm1, %v1762_v32, %v1764_v30  ;;  %v2007_v59 = vsel %vm2000_vm10, %v2004_v56, %v2006_v46  ;;  %v2249_v60 = vsel %vm2242_vm11, %v2246_v26, %v2248_v49  ;;  %v2491_v20 = vsel %vm2484_vm12, %v2488_v35, %v2490_v57 }
 0x187   : > { %1258 = vst.msk [vmem:[#allocation2 + $0xb0] sm:$0xff] %vm1235_vm8, %v1157_v54  ;;  %1844 = vrot.lane.b32.xlu0 %v1765_v5, %s3930_s6  ;;  %v1181_v33 = vpop.permute.xlu1 %1180 }
 0x188   : > { %2326 = vrot.lane.b32.xlu1 %v2247_v29, %s3932_s8  ;;  %1270 = vst.msk [vmem:[#allocation2 + $0x110] sm:$0xff] %vm1235_vm8, %v1181_v33 }
 0x18a   : > { %v412_v24 = vpop.permute.xlu0 %411 }
 0x18b   : > { %512 = vst.msk [vmem:[#allocation2 + $0xb8] sm:$0xff] %vm488_vm5, %v412_v24  ;;  %2086 = vrot.lane.b32.xlu0 %v2007_v59, %s3931_s7  ;;  %v4843_v62 = vpop.f32.mrb[8].mxu0  ;;  %v436_v28 = vpop.permute.xlu1 %435 }
 0x18c   : > { %2568 = vrot.lane.b32.xlu1 %v2489_v41, %s3933_s9  ;;  %v3609_v2 = vpop.f32.mrb[9].mxu0  ;;  %v1766_v42 = vrot.slane %v4843_v62, 1  ;;  %v2008_v47 = vrot.slane %v4843_v62, 2  ;;  %524 = vst.msk [vmem:[#allocation2 + $0x118] sm:$0xff] %vm488_vm5, %v436_v28  ;;  %v2250_v34 = vrot.slane %v4843_v62, 3  ;;  %v2492_v3 = vrot.slane %v4843_v62, 4 }
 0x18e   : > { %v661_v58 = vpop.permute.xlu0 %660  ;;  %v1299_v48 = vld [vmem:[#allocation2 + $0xb0] sm:$0xff]  ;;  %v1767_v6 = vsel %vm1444_vm1, %v1764_v30, %v1766_v42  ;;  %v2009_v7 = vsel %vm2000_vm10, %v2006_v46, %v2008_v47  ;;  %v2251_v9 = vsel %vm2242_vm11, %v2248_v49, %v2250_v34  ;;  %v4855_v10 = vsel %vm2484_vm12, %v2490_v57, %v2492_v3 }
 0x18f   : > { %761 = vst.msk [vmem:[#allocation2 + $0xb8] sm:$0xff] %vm737_vm6, %v661_v58  ;;  %3662 = vmatmul.mubr.msk.f32.gmra.mrb[44].mxu0 %vm1320_vm9, %v1299_v48  ;;  %2328 = vrot.lane.b32.xlu0 %v2249_v60, %s3932_s8  ;;  %v685_v55 = vpop.permute.xlu1 %684  ;;  %v1311_v37 = vld [vmem:[#allocation2 + $0x110] sm:$0xff] }
 0x190   : > { %3664 = vmatprep.mubr.msk.f32.mxu0 %vm3926_vm4, %v6253_v11  ;;  %773 = vst.msk [vmem:[#allocation2 + $0x118] sm:$0xff] %vm737_vm6, %v685_v55  ;;  %3698 = vmatmul.mubr.msk.f32.gmra.mrb[16].mxu1 %vm1320_vm9, %v1311_v37 }
 0x191   : > { %3700 = vmatprep.mubr.msk.f32.mxu1 %vm3926_vm4, %v6253_v11 }
 0x192   : > { %v910_v12 = vpop.permute.xlu0 %909 }
 0x193   : > { %1010 = vst.msk [vmem:[#allocation2 + $0xb8] sm:$0xff] %vm986_vm7, %v910_v12  ;;  %2570 = vrot.lane.b32.xlu0 %v2491_v20, %s3933_s9  ;;  %v4868_v13 = vpop.f32.mrb[10].mxu0  ;;  %v934_v38 = vpop.permute.xlu1 %933 }
 0x194   : > { %6300 = vst [vmem:[#allocation3_spill] sm:$0xff] %v4868_v13  ;;  %v1768_v61 = vrot.slane %v4868_v13, 1  ;;  %v2010_v22 = vrot.slane %v4868_v13, 2  ;;  %v3612_v0 = vpop.f32.mrb[11].mxu0  ;;  %v2252_v19 = vrot.slane %v4868_v13, 3  ;;  %1022 = vst.msk [vmem:[#allocation2 + $0x118] sm:$0xff] %vm986_vm7, %v934_v38 }
 0x195   : > { %v2494_v1 = vrot.slane %v4868_v13, 4 }
 0x196   : > { %v1159_v25 = vpop.permute.xlu0 %1158  ;;  %v1769_v16 = vsel %vm1444_vm1, %v1766_v42, %v1768_v61  ;;  %v2011_v50 = vsel %vm2000_vm10, %v2008_v47, %v2010_v22  ;;  %v2253_v27 = vsel %vm2242_vm11, %v2250_v34, %v2252_v19 }
 0x197   : > { %v4879_v52 = vsel %vm2484_vm12, %v2492_v3, %v2494_v1  ;;  %1259 = vst.msk [vmem:[#allocation2 + $0xb8] sm:$0xff] %vm1235_vm8, %v1159_v25  ;;  %1846 = vrot.lane.b32.xlu0 %v1767_v6, %s3930_s6  ;;  %1848 = vrot.lane.b32.xlu1 %v1769_v16, %s3930_s6  ;;  %v1183_v51 = vpop.permute.xlu1 %1182 }
 0x198   : > { %1271 = vst.msk [vmem:[#allocation2 + $0x118] sm:$0xff] %vm1235_vm8, %v1183_v51 }
 0x19a   : > { %v414_v18 = vpop.permute.xlu0 %413 }
 0x19b   : > { %513 = vst.msk [vmem:[#allocation2 + $0xc0] sm:$0xff] %vm488_vm5, %v414_v18  ;;  %2088 = vrot.lane.b32.xlu0 %v2009_v7, %s3931_s7  ;;  %2090 = vrot.lane.b32.xlu1 %v2011_v50, %s3931_s7  ;;  %v4888_v31 = vpop.f32.mrb[12].mxu0  ;;  %v438_v32 = vpop.permute.xlu1 %437 }
 0x19c   : > { %6301 = vst [vmem:[#allocation4_spill] sm:$0xff] %v4888_v31  ;;  %v3615_v21 = vpop.f32.mrb[13].mxu0  ;;  %v1770_v56 = vrot.slane %v4888_v31, 1  ;;  %v2012_v26 = vrot.slane %v4888_v31, 2  ;;  %525 = vst.msk [vmem:[#allocation2 + $0x120] sm:$0xff] %vm488_vm5, %v438_v32  ;;  %v2254_v35 = vrot.slane %v4888_v31, 3 }
 0x19d   : > { %v2496_v17 = vrot.slane %v4888_v31, 4 }
 0x19e   : > { %v663_v36 = vpop.permute.xlu0 %662  ;;  %v1300_v40 = vld [vmem:[#allocation2 + $0xb8] sm:$0xff]  ;;  %v1771_v23 = vsel %vm1444_vm1, %v1768_v61, %v1770_v56  ;;  %v2013_v29 = vsel %vm2000_vm10, %v2010_v22, %v2012_v26  ;;  %v4898_v41 = vsel %vm2242_vm11, %v2252_v19, %v2254_v35 }
 0x19f   : > { %v4901_v39 = vsel %vm2484_vm12, %v2494_v1, %v2496_v17  ;;  %762 = vst.msk [vmem:[#allocation2 + $0xc0] sm:$0xff] %vm737_vm6, %v663_v36  ;;  %3665 = vmatmul.mubr.msk.f32.gmra.mrb[46].mxu0 %vm1320_vm9, %v1300_v40  ;;  %2330 = vrot.lane.b32.xlu0 %v2251_v9, %s3932_s8  ;;  %v687_v43 = vpop.permute.xlu1 %686  ;;  %v1312_v45 = vld [vmem:[#allocation2 + $0x118] sm:$0xff] }
 0x1a0   : > { %2332 = vrot.lane.b32.xlu1 %v2253_v27, %s3932_s8  ;;  %3667 = vmatprep.mubr.msk.f32.mxu0 %vm3926_vm4, %v6253_v11  ;;  %774 = vst.msk [vmem:[#allocation2 + $0x120] sm:$0xff] %vm737_vm6, %v687_v43 }
 0x1a1   : > { %3701 = vmatmul.mubr.msk.f32.gmra.mrb[18].mxu1 %vm1320_vm9, %v1312_v45 }
 0x1a2   : > { %v912_v53 = vpop.permute.xlu0 %911  ;;  %3703 = vmatprep.mubr.msk.f32.mxu1 %vm3926_vm4, %v6253_v11 }
 0x1a3   : > { %1011 = vst.msk [vmem:[#allocation2 + $0xc0] sm:$0xff] %vm986_vm7, %v912_v53  ;;  %1850 = vrot.lane.b32.xlu0 %v1771_v23, %s3930_s6  ;;  %v4915_v30 = vpop.f32.mrb[14].mxu0  ;;  %v936_v46 = vpop.permute.xlu1 %935 }
 0x1a4   : > { %6302 = vst [vmem:[#allocation5_spill] sm:$0xff] %v4915_v30  ;;  %v1772_v49 = vrot.slane %v4915_v30, 1  ;;  %v2014_v63 = vrot.slane %v4915_v30, 2  ;;  %1023 = vst.msk [vmem:[#allocation2 + $0x120] sm:$0xff] %vm986_vm7, %v936_v46  ;;  %v3618_v57 = vpop.f32.mrb[15].mxu0  ;;  %v2256_v54 = vrot.slane %v4915_v30, 3 }
 0x1a5   : > { %v2498_v5 = vrot.slane %v4915_v30, 4 }
 0x1a6   : > { %v1161_v59 = vpop.permute.xlu0 %1160  ;;  %v1773_v60 = vsel %vm1444_vm1, %v1770_v56, %v1772_v49  ;;  %v2015_v20 = vsel %vm2000_vm10, %v2012_v26, %v2014_v63  ;;  %v4925_v33 = vsel %vm2242_vm11, %v2254_v35, %v2256_v54 }
 0x1a7   : > { %v4928_v24 = vsel %vm2484_vm12, %v2496_v17, %v2498_v5  ;;  %1260 = vst.msk [vmem:[#allocation2 + $0xc0] sm:$0xff] %vm1235_vm8, %v1161_v59  ;;  %2092 = vrot.lane.b32.xlu0 %v2013_v29, %s3931_s7  ;;  %1852 = vrot.lane.b32.xlu1 %v1773_v60, %s3930_s6  ;;  %v1185_v28 = vpop.permute.xlu1 %1184 }
 0x1a8   : > { %1272 = vst.msk [vmem:[#allocation2 + $0x120] sm:$0xff] %vm1235_vm8, %v1185_v28 }
 0x1aa   : > { %v416_v2 = vpop.permute.xlu0 %415 }
 0x1ab   : > { %514 = vst.msk [vmem:[#allocation2 + $0xc8] sm:$0xff] %vm488_vm5, %v416_v2  ;;  %2094 = vrot.lane.b32.xlu1 %v2015_v20, %s3931_s7  ;;  %v4936_v42 = vpop.f32.mrb[16].mxu0  ;;  %v440_v47 = vpop.permute.xlu1 %439 }
 0x1ac   : > { %6303 = vst [vmem:[#allocation6_spill] sm:$0xff] %v4936_v42  ;;  %v3621_v34 = vpop.f32.mrb[17].mxu0  ;;  %526 = vst.msk [vmem:[#allocation2 + $0x128] sm:$0xff] %vm488_vm5, %v440_v47  ;;  %v1774_v3 = vrot.slane %v4936_v42, 1  ;;  %v2016_v58 = vrot.slane %v4936_v42, 2  ;;  %v2258_v48 = vrot.slane %v4936_v42, 3 }
 0x1ad   : > { %v2500_v6 = vrot.slane %v4936_v42, 4 }
 0x1ae   : > { %v665_v7 = vpop.permute.xlu0 %664  ;;  %v1301_v9 = vld [vmem:[#allocation2 + $0xc0] sm:$0xff]  ;;  %v4944_v55 = vsel %vm1444_vm1, %v1772_v49, %v1774_v3  ;;  %v4947_v37 = vsel %vm2000_vm10, %v2014_v63, %v2016_v58  ;;  %v4950_v12 = vsel %vm2242_vm11, %v2256_v54, %v2258_v48 }
 0x1af   : > { %v4953_v38 = vsel %vm2484_vm12, %v2498_v5, %v2500_v6  ;;  %763 = vst.msk [vmem:[#allocation2 + $0xc8] sm:$0xff] %vm737_vm6, %v665_v7  ;;  %3668 = vmatmul.mubr.msk.f32.gmra.mrb[48].mxu0 %vm1320_vm9, %v1301_v9  ;;  %v1313_v61 = vld [vmem:[#allocation2 + $0x120] sm:$0xff]  ;;  %v689_v22 = vpop.permute.xlu1 %688 }
 0x1b0   : > { %3670 = vmatprep.mubr.msk.f32.mxu0 %vm3926_vm4, %v6253_v11  ;;  %3704 = vmatmul.mubr.msk.f32.gmra.mrb[20].mxu1 %vm1320_vm9, %v1313_v61  ;;  %775 = vst.msk [vmem:[#allocation2 + $0x128] sm:$0xff] %vm737_vm6, %v689_v22 }
 0x1b1   : > { %3706 = vmatprep.mubr.msk.f32.mxu1 %vm3926_vm4, %v6253_v11 }
 0x1b2   : > { %v914_v0 = vpop.permute.xlu0 %913 }
 0x1b3   : > { %1012 = vst.msk [vmem:[#allocation2 + $0xc8] sm:$0xff] %vm986_vm7, %v914_v0  ;;  %v4964_v19 = vpop.f32.mrb[18].mxu0  ;;  %v938_v1 = vpop.permute.xlu1 %937 }
 0x1b4   : > { %6304 = vst [vmem:[#allocation7_spill] sm:$0xff] %v4964_v19  ;;  %v3624_v25 = vpop.f32.mrb[19].mxu0  ;;  %1024 = vst.msk [vmem:[#allocation2 + $0x128] sm:$0xff] %vm986_vm7, %v938_v1  ;;  %v1776_v16 = vrot.slane %v4964_v19, 1  ;;  %v2018_v50 = vrot.slane %v4964_v19, 2  ;;  %v2260_v27 = vrot.slane %v4964_v19, 3 }
 0x1b5   : > { %v2502_v51 = vrot.slane %v4964_v19, 4 }
 0x1b6   : > { %v1163_v18 = vpop.permute.xlu0 %1162  ;;  %v4972_v32 = vsel %vm1444_vm1, %v1774_v3, %v1776_v16  ;;  %v4975_v21 = vsel %vm2000_vm10, %v2016_v58, %v2018_v50  ;;  %v4978_v56 = vsel %vm2242_vm11, %v2258_v48, %v2260_v27 }
 0x1b7   : > { %v4981_v26 = vsel %vm2484_vm12, %v2500_v6, %v2502_v51  ;;  %1261 = vst.msk [vmem:[#allocation2 + $0xc8] sm:$0xff] %vm1235_vm8, %v1163_v18  ;;  %v1187_v35 = vpop.permute.xlu1 %1186 }
 0x1b8   : > { %1273 = vst.msk [vmem:[#allocation2 + $0x128] sm:$0xff] %vm1235_vm8, %v1187_v35 }
 0x1ba   : > { %v442_v17 = vpop.permute.xlu0 %441 }
 0x1bb   : > { %v4985_v36 = vpop.f32.mrb[20].mxu0  ;;  %527 = vst.msk [vmem:[#allocation2 + $0x130] sm:$0xff] %vm488_vm5, %v442_v17  ;;  %v691_v40 = vpop.permute.xlu1 %690 }
 0x1bc   : > { %v3627_v23 = vpop.f32.mrb[21].mxu0  ;;  %v1778_v29 = vrot.slane %v4985_v36, 1  ;;  %v2020_v43 = vrot.slane %v4985_v36, 2  ;;  %v2262_v45 = vrot.slane %v4985_v36, 3  ;;  %v2504_v53 = vrot.slane %v4985_v36, 4  ;;  %776 = vst.msk [vmem:[#allocation2 + $0x130] sm:$0xff] %vm737_vm6, %v691_v40 }
 0x1be   : > { %v1302_v46 = vld [vmem:[#allocation2 + $0xc8] sm:$0xff]  ;;  %v940_v49 = vpop.permute.xlu0 %939  ;;  %v4994_v63 = vsel %vm1444_vm1, %v1776_v16, %v1778_v29  ;;  %v4997_v57 = vsel %vm2000_vm10, %v2018_v50, %v2020_v43  ;;  %v5000_v54 = vsel %vm2242_vm11, %v2260_v27, %v2262_v45  ;;  %v5003_v5 = vsel %vm2484_vm12, %v2502_v51, %v2504_v53 }
 0x1bf   : > { %6305 = vst [vmem:[#allocation8_spill] sm:$0xff] %v5003_v5  ;;  %3671 = vmatmul.mubr.msk.f32.gmra.mrb[50].mxu0 %vm1320_vm9, %v1302_v46  ;;  %1025 = vst.msk [vmem:[#allocation2 + $0x130] sm:$0xff] %vm986_vm7, %v940_v49  ;;  %v1314_v59 = vld [vmem:[#allocation2 + $0x128] sm:$0xff]  ;;  %v1189_v60 = vpop.permute.xlu1 %1188 }
 0x1c0   : > { %3707 = vmatmul.mubr.msk.f32.gmra.mrb[22].mxu1 %vm1320_vm9, %v1314_v59  ;;  %1274 = vst.msk [vmem:[#allocation2 + $0x130] sm:$0xff] %vm1235_vm8, %v1189_v60 }
 0x1c1   : > { %3709 = vmatprep.mubr.msk.f32.mxu1 %vm3926_vm4, %v6253_v11 }
 0x1c3   : > { %v5011_v20 = vpop.f32.mrb[22].mxu0  ;;  %v444_v28 = vpop.permute.xlu0 %443 }
 0x1c4   : > { %v1780_v2 = vrot.slane %v5011_v20, 1  ;;  %v3630_v47 = vpop.f32.mrb[23].mxu0  ;;  %v2022_v34 = vrot.slane %v5011_v20, 2  ;;  %v2264_v3 = vrot.slane %v5011_v20, 3  ;;  %v2506_v58 = vrot.slane %v5011_v20, 4  ;;  %528 = vst.msk [vmem:[#allocation2 + $0x138] sm:$0xff] %vm488_vm5, %v444_v28  ;;  %v693_v48 = vpop.permute.xlu1 %692 }
 0x1c5   : > { %777 = vst.msk [vmem:[#allocation2 + $0x138] sm:$0xff] %vm737_vm6, %v693_v48 }
 0x1c6   : > { %v1781_v6 = vsel %vm1444_vm1, %v1778_v29, %v1780_v2  ;;  %v2023_v7 = vsel %vm2000_vm10, %v2020_v43, %v2022_v34  ;;  %v2265_v9 = vsel %vm2242_vm11, %v2262_v45, %v2264_v3  ;;  %v2507_v61 = vsel %vm2484_vm12, %v2504_v53, %v2506_v58 }
 0x1c7   : > { %1860 = vrot.lane.b32.xlu1 %v1781_v6, %s3930_s6  ;;  %v942_v22 = vpop.permute.xlu0 %941  ;;  %v1315_v0 = vld [vmem:[#allocation2 + $0x130] sm:$0xff] }
 0x1c8   : > { %1026 = vst.msk [vmem:[#allocation2 + $0x138] sm:$0xff] %vm986_vm7, %v942_v22  ;;  %v1191_v1 = vpop.permute.xlu1 %1190  ;;  %3710 = vmatmul.mubr.msk.f32.gmra.mrb[24].mxu1 %vm1320_vm9, %v1315_v0 }
 0x1c9   : > { %1275 = vst.msk [vmem:[#allocation2 + $0x138] sm:$0xff] %vm1235_vm8, %v1191_v1  ;;  %3712 = vmatprep.mubr.msk.f32.mxu1 %vm3926_vm4, %v6253_v11 }
 0x1cb   : > { %2102 = vrot.lane.b32.xlu1 %v2023_v7, %s3931_s7  ;;  %v5030_v25 = vpop.f32.mrb[24].mxu0  ;;  %v446_v16 = vpop.permute.xlu0 %445 }
 0x1cc   : > { %v1782_v50 = vrot.slane %v5030_v25, 1  ;;  %v3633_v27 = vpop.f32.mrb[25].mxu0  ;;  %v2024_v51 = vrot.slane %v5030_v25, 2  ;;  %v2266_v18 = vrot.slane %v5030_v25, 3  ;;  %v2508_v35 = vrot.slane %v5030_v25, 4  ;;  %529 = vst.msk [vmem:[#allocation2 + $0x140] sm:$0xff] %vm488_vm5, %v446_v16  ;;  %v695_v17 = vpop.permute.xlu1 %694 }
 0x1cd   : > { %778 = vst.msk [vmem:[#allocation2 + $0x140] sm:$0xff] %vm737_vm6, %v695_v17 }
 0x1ce   : > { %v1783_v40 = vsel %vm1444_vm1, %v1780_v2, %v1782_v50  ;;  %v2025_v23 = vsel %vm2000_vm10, %v2022_v34, %v2024_v51  ;;  %v2267_v29 = vsel %vm2242_vm11, %v2264_v3, %v2266_v18  ;;  %v2509_v43 = vsel %vm2484_vm12, %v2506_v58, %v2508_v35 }
 0x1cf   : > { %2344 = vrot.lane.b32.xlu1 %v2265_v9, %s3932_s8  ;;  %1862 = vrot.lane.b32.xlu0 %v1783_v40, %s3930_s6  ;;  %v944_v45 = vpop.permute.xlu0 %943 }
 0x1d0   : > { %1027 = vst.msk [vmem:[#allocation2 + $0x140] sm:$0xff] %vm986_vm7, %v944_v45  ;;  %v1193_v53 = vpop.permute.xlu1 %1192  ;;  %v1316_v46 = vld [vmem:[#allocation2 + $0x138] sm:$0xff] }
 0x1d1   : > { %1276 = vst.msk [vmem:[#allocation2 + $0x140] sm:$0xff] %vm1235_vm8, %v1193_v53  ;;  %3713 = vmatmul.mubr.msk.f32.gmra.mrb[26].mxu1 %vm1320_vm9, %v1316_v46 }
 0x1d2   : > { %3715 = vmatprep.mubr.msk.f32.mxu1 %vm3926_vm4, %v6253_v11 }
 0x1d3   : > { %2586 = vrot.lane.b32.xlu1 %v2507_v61, %s3933_s9  ;;  %2104 = vrot.lane.b32.xlu0 %v2025_v23, %s3931_s7  ;;  %v5051_v49 = vpop.f32.mrb[26].mxu0 }
 0x1d4   : > { %v1784_v59 = vrot.slane %v5051_v49, 1  ;;  %v2026_v60 = vrot.slane %v5051_v49, 2  ;;  %v2268_v28 = vrot.slane %v5051_v49, 3  ;;  %v3636_v2 = vpop.f32.mrb[27].mxu0  ;;  %v2510_v47 = vrot.slane %v5051_v49, 4 }
 0x1d6   : > { %v1785_v34 = vsel %vm1444_vm1, %v1782_v50, %v1784_v59  ;;  %v2027_v3 = vsel %vm2000_vm10, %v2024_v51, %v2026_v60  ;;  %v2269_v58 = vsel %vm2242_vm11, %v2266_v18, %v2268_v28  ;;  %v2511_v48 = vsel %vm2484_vm12, %v2508_v35, %v2510_v47 }
 0x1d7   : > { %2346 = vrot.lane.b32.xlu0 %v2267_v29, %s3932_s8  ;;  %1864 = vrot.lane.b32.xlu1 %v1785_v34, %s3930_s6 }
 0x1d8   : > { %v1317_v6 = vld [vmem:[#allocation2 + $0x140] sm:$0xff] }
 0x1d9   : > { %3716 = vmatmul.mubr.msk.f32.gmra.mrb[28].mxu1 %vm1320_vm9, %v1317_v6 }
 0x1da   : > { %3738 = vmatprep.mubr.msk.f32.mxu1 %vm3926_vm4, %v6253_v11 }
 0x1db   : > { %2588 = vrot.lane.b32.xlu0 %v2509_v43, %s3933_s9  ;;  %2106 = vrot.lane.b32.xlu1 %v2027_v3, %s3931_s7 }
 0x1df   : > { %2348 = vrot.lane.b32.xlu1 %v2269_v58, %s3932_s8 }
 0x1e2   : > { %v5069_v7 = vpop.f32.mrb[28].mxu0 }
 0x1e3   : > { %6306 = vst [vmem:[#allocation9_spill] sm:$0xff] %v5069_v7  ;;  %v5071_v9 = vpop.f32.mrb[0].mxu1  ;;  %2590 = vrot.lane.b32.xlu1 %v2511_v48, %s3933_s9  ;;  %v3639_v61 = vpop.f32.mrb[29].mxu0  ;;  %v1786_v22 = vrot.slane %v5069_v7, 1  ;;  %v2028_v0 = vrot.slane %v5069_v7, 2  ;;  %v2270_v1 = vrot.slane %v5069_v7, 3 }
 0x1e4   : > { %6307 = vst [vmem:[#allocation10_spill] sm:$0xff] %v5071_v9  ;;  %v3675_v16 = vpop.f32.mrb[1].mxu1  ;;  %v2512_v50 = vrot.slane %v5069_v7, 4  ;;  %v6258_v45 = vrot.slane %v5071_v9, 1 }
 0x1e5   : > { %v1787_v27 = vsel %vm1444_vm1, %v1784_v59, %v1786_v22  ;;  %v2029_v51 = vsel %vm2000_vm10, %v2026_v60, %v2028_v0  ;;  %v2271_v18 = vsel %vm2242_vm11, %v2268_v28, %v2270_v1  ;;  %v6257_v59 = vrot.slane %v5071_v9, 2 }
 0x1e6   : > { %v2513_v35 = vsel %vm2484_vm12, %v2510_v47, %v2512_v50  ;;  %1866 = vrot.lane.b32.xlu0 %v1787_v27, %s3930_s6  ;;  %v6256_v60 = vrot.slane %v5071_v9, 3  ;;  %v6255_v28 = vrot.slane %v5071_v9, 4 }
 0x1e9   : > { %v5097_v2 = vpop.permute.xlu0 %1840 }
 0x1ea   : > { %2108 = vrot.lane.b32.xlu0 %v2029_v51, %s3931_s7 }
 0x1ed   : > { %v5131_v51 = vpop.permute.xlu0 %2082 }
 0x1ee   : > { %2350 = vrot.lane.b32.xlu0 %v2271_v18, %s3932_s8 }
 0x1f1   : > { %v5134_v18 = vpop.permute.xlu0 %2324 }
 0x1f2   : > { %v5085_v17 = vpop.f32.mrb[30].mxu0 }
 0x1f3   : > { %6308 = vst [vmem:[#allocation11_spill] sm:$0xff] %v5085_v17  ;;  %v3642_v40 = vpop.f32.mrb[31].mxu0  ;;  %v1788_v23 = vrot.slane %v5085_v17, 1  ;;  %v2030_v29 = vrot.slane %v5085_v17, 2  ;;  %v2272_v43 = vrot.slane %v5085_v17, 3  ;;  %v2514_v46 = vrot.slane %v5085_v17, 4 }
 0x1f4   : > { %v5091_v53 = vpop.f32.mrb[2].mxu1 }
 0x1f5   : > { %6309 = vst [vmem:[#allocation12_spill] sm:$0xff] %v5091_v53  ;;  %v1789_v47 = vsel %vm1444_vm1, %v1786_v22, %v1788_v23  ;;  %v2031_v34 = vsel %vm2000_vm10, %v2028_v0, %v2030_v29  ;;  %v2273_v3 = vsel %vm2242_vm11, %v2270_v1, %v2272_v43  ;;  %v3678_v58 = vpop.f32.mrb[3].mxu1  ;;  %v1812_v48 = vrot.slane %v5091_v53, 1 }
 0x1f6   : > { %1868 = vrot.lane.b32.xlu1 %v1789_v47, %s3930_s6  ;;  %v5105_v6 = vsel %vm2484_vm12, %v2512_v50, %v2514_v46  ;;  %v2054_v61 = vrot.slane %v5091_v53, 2  ;;  %v2296_v16 = vrot.slane %v5091_v53, 3  ;;  %v2538_v0 = vrot.slane %v5091_v53, 4 }
 0x1f7   : > { %v5112_v22 = vsel %vm1444_vm1, %v6258_v45, %v1812_v48 }
 0x1f8   : > { %6310 = vst [vmem:[#allocation13_spill] sm:$0xff] %v5112_v22  ;;  %v5118_v1 = vsel %vm2000_vm10, %v6257_v59, %v2054_v61  ;;  %v5123_v50 = vsel %vm2242_vm11, %v6256_v60, %v2296_v16  ;;  %v5128_v27 = vsel %vm2484_vm12, %v6255_v28, %v2538_v0 }
 0x1f9   : > { %6311 = vst [vmem:[#allocation14_spill] sm:$0xff] %v5118_v1  ;;  %6312 = vst [vmem:[#allocation15_spill] sm:$0xff] %v5123_v50 }
 0x1fa   : > { %6313 = vst [vmem:[#allocation16_spill] sm:$0xff] %v5128_v27  ;;  %2110 = vrot.lane.b32.xlu1 %v2031_v34, %s3931_s7  ;;  %v5158_v27 = vpop.permute.xlu0 %2566 }
 0x1fe   : > { %2352 = vrot.lane.b32.xlu1 %v2273_v3, %s3932_s8  ;;  %v5176_v50 = vpop.permute.xlu0 %1844 }
 0x202   : > { %2574 = vrot.lane.b32.xlu1 %v4879_v52, %s3933_s9  ;;  %v5138_v40 = vpop.f32.mrb[32].mxu0 }
 0x203   : > { %6314 = vst [vmem:[#allocation17_spill] sm:$0xff] %v5138_v40  ;;  %v3645_v47 = vpop.f32.mrb[33].mxu0  ;;  %v1790_v58 = vrot.slane %v5138_v40, 1  ;;  %v2032_v11 = vrot.slane %v5138_v40, 2  ;;  %v2274_v28 = vrot.slane %v5138_v40, 3  ;;  %v2516_v34 = vrot.slane %v5138_v40, 4 }
 0x204   : > { %v5143_v60 = vpop.f32.mrb[4].mxu1 }
 0x205   : > { %6315 = vst [vmem:[#allocation18_spill] sm:$0xff] %v5143_v60  ;;  %v1791_v3 = vsel %vm1444_vm1, %v1788_v23, %v1790_v58  ;;  %v2033_v59 = vsel %vm2000_vm10, %v2030_v29, %v2032_v11  ;;  %v3681_v45 = vpop.f32.mrb[5].mxu1  ;;  %v5149_v52 = vsel %vm2242_vm11, %v2272_v43, %v2274_v28  ;;  %v1814_v47 = vrot.slane %v5143_v60, 1 }
 0x206   : > { %1870 = vrot.lane.b32.xlu0 %v1791_v3, %s3930_s6  ;;  %v5154_v8 = vsel %vm2484_vm12, %v2514_v46, %v2516_v34  ;;  %v2056_v53 = vrot.slane %v5143_v60, 2  ;;  %v2298_v19 = vrot.slane %v5143_v60, 3  ;;  %v2540_v29 = vrot.slane %v5143_v60, 4  ;;  %v5170_v3 = vpop.permute.xlu1 %1842 }
 0x207   : > { %v5161_v23 = vsel %vm1444_vm1, %v1812_v48, %v1814_v47 }
 0x208   : > { %6316 = vst [vmem:[#allocation19_spill] sm:$0xff] %v5161_v23  ;;  %v5165_v43 = vsel %vm2000_vm10, %v2054_v61, %v2056_v53  ;;  %v5168_v45 = vsel %vm2242_vm11, %v2296_v16, %v2298_v19  ;;  %v5173_v46 = vsel %vm2484_vm12, %v2538_v0, %v2540_v29  ;;  %v5185_v16 = vpop.permute.xlu0 %2086 }
 0x209   : > { %6317 = vst [vmem:[#allocation20_spill] sm:$0xff] %v5165_v43  ;;  %6318 = vst [vmem:[#allocation21_spill] sm:$0xff] %v5168_v45 }
 0x20a   : > { %6319 = vst [vmem:[#allocation22_spill] sm:$0xff] %v5173_v46  ;;  %2112 = vrot.lane.b32.xlu0 %v2033_v59, %s3931_s7  ;;  %v5180_v48 = vpop.permute.xlu1 %2084 }
 0x20e   : > { %2572 = vrot.lane.b32.xlu0 %v4855_v10, %s3933_s9  ;;  %v5193_v10 = vpop.permute.xlu1 %2326 }
 0x212   : > { %2592 = vrot.lane.b32.xlu0 %v2513_v35, %s3933_s9  ;;  %v5183_v61 = vpop.f32.mrb[34].mxu0 }
 0x213   : > { %6320 = vst [vmem:[#allocation23_spill] sm:$0xff] %v5183_v61  ;;  %v3648_v60 = vpop.f32.mrb[35].mxu0  ;;  %v1792_v45 = vrot.slane %v5183_v61, 1  ;;  %v2034_v0 = vrot.slane %v5183_v61, 2  ;;  %v2276_v59 = vrot.slane %v5183_v61, 3  ;;  %v2518_v43 = vrot.slane %v5183_v61, 4 }
 0x214   : > { %v5190_v46 = vpop.f32.mrb[6].mxu1 }
 0x215   : > { %6321 = vst [vmem:[#allocation24_spill] sm:$0xff] %v5190_v46  ;;  %v1793_v23 = vsel %vm1444_vm1, %v1790_v58, %v1792_v45  ;;  %v2035_v35 = vsel %vm2000_vm10, %v2032_v11, %v2034_v0  ;;  %v3684_v42 = vpop.f32.mrb[7].mxu1  ;;  %v5198_v1 = vsel %vm2242_vm11, %v2274_v28, %v2276_v59  ;;  %v1816_v60 = vrot.slane %v5190_v46, 1 }
 0x216   : > { %1854 = vrot.lane.b32.xlu0 %v4944_v55, %s3930_s6  ;;  %1872 = vrot.lane.b32.xlu1 %v1793_v23, %s3930_s6  ;;  %v5205_v30 = vsel %vm2484_vm12, %v2516_v34, %v2518_v43  ;;  %v2058_v61 = vrot.slane %v5190_v46, 2  ;;  %v2300_v58 = vrot.slane %v5190_v46, 3  ;;  %v2542_v42 = vrot.slane %v5190_v46, 4  ;;  %v5219_v55 = vpop.permute.xlu0 %2328  ;;  %v5225_v23 = vpop.permute.xlu1 %2568 }
 0x217   : > { %v5210_v11 = vsel %vm1444_vm1, %v1814_v47, %v1816_v60 }
 0x218   : > { %6322 = vst [vmem:[#allocation25_spill] sm:$0xff] %v5210_v11  ;;  %v5214_v28 = vsel %vm2000_vm10, %v2056_v53, %v2058_v61  ;;  %v5217_v22 = vsel %vm2242_vm11, %v2298_v19, %v2300_v58  ;;  %v5222_v34 = vsel %vm2484_vm12, %v2540_v29, %v2542_v42 }
 0x219   : > { %6323 = vst [vmem:[#allocation26_spill] sm:$0xff] %v5214_v28  ;;  %6324 = vst [vmem:[#allocation27_spill] sm:$0xff] %v5217_v22 }
 0x21a   : > { %6325 = vst [vmem:[#allocation28_spill] sm:$0xff] %v5222_v34  ;;  %2114 = vrot.lane.b32.xlu1 %v2035_v35, %s3931_s7  ;;  %v5229_v47 = vpop.permute.xlu0 %2570  ;;  %v5231_v46 = vpop.permute.xlu1 %1848 }
 0x21b   : > { %6326 = vst [vmem:[#allocation29_spill] sm:$0xff] %v5231_v46 }
 0x21e   : > { %2594 = vrot.lane.b32.xlu1 %v5105_v6, %s3933_s9  ;;  %v5249_v17 = vpop.permute.xlu1 %2090 }
 0x21f   : > { %6329 = vst [vmem:[#allocation32_spill] sm:$0xff] %v5249_v17 }
 0x222   : > { %1856 = vrot.lane.b32.xlu1 %v4972_v32, %s3930_s6  ;;  %v5235_v19 = vpop.f32.mrb[36].mxu0 }
 0x223   : > { %6327 = vst [vmem:[#allocation30_spill] sm:$0xff] %v5235_v19  ;;  %v3651_v53 = vpop.f32.mrb[37].mxu0  ;;  %v1794_v29 = vrot.slane %v5235_v19, 1  ;;  %v5238_v34 = vpop.f32.mrb[8].mxu1  ;;  %v2036_v35 = vrot.slane %v5235_v19, 2  ;;  %v2278_v22 = vrot.slane %v5235_v19, 3 }
 0x224   : > { %6328 = vst [vmem:[#allocation31_spill] sm:$0xff] %v5238_v34  ;;  %v2520_v6 = vrot.slane %v5235_v19, 4  ;;  %v3687_v28 = vpop.f32.mrb[9].mxu1  ;;  %v1818_v11 = vrot.slane %v5238_v34, 1  ;;  %v2060_v40 = vrot.slane %v5238_v34, 2  ;;  %v2302_v32 = vrot.slane %v5238_v34, 3  ;;  %v5247_v53 = vpop.permute.xlu0 %1846 }
 0x225   : > { %v2544_v31 = vrot.slane %v5238_v34, 4  ;;  %v1795_v13 = vsel %vm1444_vm1, %v1792_v45, %v1794_v29  ;;  %v2037_v9 = vsel %vm2000_vm10, %v2034_v0, %v2036_v35  ;;  %v5254_v5 = vsel %vm2242_vm11, %v2276_v59, %v2278_v22 }
 0x226   : > { %v5257_v28 = vsel %vm2484_vm12, %v2518_v43, %v2520_v6  ;;  %1874 = vrot.lane.b32.xlu0 %v1795_v13, %s3930_s6  ;;  %v5261_v19 = vsel %vm1444_vm1, %v1816_v60, %v1818_v11  ;;  %v5264_v34 = vsel %vm2000_vm10, %v2058_v61, %v2060_v40  ;;  %v5267_v7 = vsel %vm2242_vm11, %v2300_v58, %v2302_v32  ;;  %v5276_v43 = vpop.permute.xlu1 %2332 }
 0x227   : > { %6330 = vst [vmem:[#allocation33_spill] sm:$0xff] %v5261_v19  ;;  %6331 = vst [vmem:[#allocation34_spill] sm:$0xff] %v5264_v34  ;;  %v5270_v45 = vsel %vm2484_vm12, %v2542_v42, %v2544_v31 }
 0x228   : > { %6332 = vst [vmem:[#allocation35_spill] sm:$0xff] %v5267_v7  ;;  %6333 = vst [vmem:[#allocation36_spill] sm:$0xff] %v5270_v45  ;;  %v5274_v0 = vpop.permute.xlu0 %2088 }
 0x229   : > { %6334 = vst [vmem:[#allocation37_spill] sm:$0xff] %v5276_v43 }
 0x22a   : > { %2334 = vrot.lane.b32.xlu0 %v4898_v41, %s3932_s8  ;;  %v5280_v13 = vpop.permute.xlu1 %1852 }
 0x22b   : > { %6335 = vst [vmem:[#allocation38_spill] sm:$0xff] %v5280_v13 }
 0x22c   : > { %v5282_v61 = vpop.permute.xlu0 %2330 }
 0x22e   : > { %2354 = vrot.lane.b32.xlu0 %v5149_v52, %s3932_s8 }
 0x232   : > { %2096 = vrot.lane.b32.xlu0 %v4947_v37, %s3931_s7  ;;  %v5286_v59 = vpop.f32.mrb[38].mxu0 }
 0x233   : > { %6336 = vst [vmem:[#allocation39_spill] sm:$0xff] %v5286_v59  ;;  %v3654_v60 = vpop.f32.mrb[39].mxu0  ;;  %v1796_v58 = vrot.slane %v5286_v59, 1  ;;  %v5289_v41 = vpop.f32.mrb[10].mxu1  ;;  %v2038_v42 = vrot.slane %v5286_v59, 2  ;;  %v2280_v45 = vrot.slane %v5286_v59, 3 }
 0x234   : > { %6337 = vst [vmem:[#allocation40_spill] sm:$0xff] %v5289_v41  ;;  %v2522_v52 = vrot.slane %v5286_v59, 4  ;;  %v3690_v7 = vpop.f32.mrb[11].mxu1  ;;  %v1820_v34 = vrot.slane %v5289_v41, 1  ;;  %v2062_v19 = vrot.slane %v5289_v41, 2  ;;  %v2304_v37 = vrot.slane %v5289_v41, 3  ;;  %v5298_v60 = vpop.permute.xlu1 %2094 }
 0x235   : > { %v2546_v13 = vrot.slane %v5289_v41, 4  ;;  %6338 = vst [vmem:[#allocation41_spill] sm:$0xff] %v5298_v60  ;;  %v1797_v43 = vsel %vm1444_vm1, %v1794_v29, %v1796_v58  ;;  %v2039_v17 = vsel %vm2000_vm10, %v2036_v35, %v2038_v42  ;;  %v5303_v46 = vsel %vm2242_vm11, %v2278_v22, %v2280_v45  ;;  %v5319_v35 = vpop.permute.xlu0 %1850 }
 0x236   : > { %v5306_v59 = vsel %vm2484_vm12, %v2520_v6, %v2522_v52  ;;  %2116 = vrot.lane.b32.xlu0 %v2037_v9, %s3931_s7  ;;  %1876 = vrot.lane.b32.xlu1 %v1797_v43, %s3930_s6  ;;  %v5311_v7 = vsel %vm1444_vm1, %v1818_v11, %v1820_v34  ;;  %v5314_v41 = vsel %vm2000_vm10, %v2060_v40, %v2062_v19 }
 0x237   : > { %v5317_v29 = vsel %vm2242_vm11, %v2302_v32, %v2304_v37  ;;  %v5322_v22 = vsel %vm2484_vm12, %v2544_v31, %v2546_v13  ;;  %v1960_v6 = vadd.f32 %v5097_v2, %v4770_v4  ;;  %v5343_v4 = vld [vmem:[%s6251_s2] ss:$0 sm:$0xff] }
 0x239   : > { %v1861_v9 = vpop.permute.xlu1 %1860  ;;  %v2202_v43 = vadd.f32 %v5131_v51, %v1960_v6  ;;  %v5332_v11 = vpop.permute.xlu0 %2092  ;;  %v1961_v51 = vadd.f32 %v5170_v3, %v4786_v14 }
 0x23a   : > { %2576 = vrot.lane.b32.xlu0 %v4901_v39, %s3933_s9  ;;  %2336 = vrot.lane.b32.xlu1 %v4925_v33, %s3932_s8  ;;  %v1970_v60 = vadd.f32 %v1861_v9, %v4985_v36 }
 0x23b   : > { %v2444_v40 = vadd.f32 %v5134_v18, %v2202_v43 }
 0x23d   : > { %v2103_v32 = vpop.permute.xlu1 %2102  ;;  %v2686_v31 = vadd.f32 %v5158_v27, %v2444_v40  ;;  %v2203_v40 = vadd.f32 %v5180_v48, %v1961_v51 }
 0x23e   : > { %2596 = vrot.lane.b32.xlu0 %v5154_v8, %s3933_s9  ;;  %2356 = vrot.lane.b32.xlu1 %v5198_v1, %s3932_s8  ;;  %v2212_v39 = vadd.f32 %v2103_v32, %v1970_v60 }
 0x23f   : > { %v2733_v27 = vadd.f32 %v5343_v4, %v2686_v31 }
 0x241   : > { %v2345_v33 = vpop.permute.xlu1 %2344  ;;  %v1863_v2 = vpop.permute.xlu0 %1862 }
 0x242   : > { %v2454_v36 = vadd.f32 %v2345_v33, %v2212_v39  ;;  %1858 = vrot.lane.b32.xlu0 %v4994_v63, %s3930_s6  ;;  %2098 = vrot.lane.b32.xlu1 %v4975_v21, %s3931_s7  ;;  %v5352_v8 = vpop.f32.mrb[40].mxu0 }
 0x243   : > { %v3657_v1 = vpop.f32.mrb[41].mxu0  ;;  %v1798_v18 = vrot.slane %v5352_v8, 1  ;;  %v5355_v60 = vpop.f32.mrb[12].mxu1  ;;  %v2040_v6 = vrot.slane %v5352_v8, 2  ;;  %v2282_v14 = vrot.slane %v5352_v8, 3  ;;  %v6279_v3 = vrot.slane %v5352_v8, 4 }
 0x244   : > { %6339 = vst [vmem:[#allocation42_spill] sm:$0xff] %v5355_v60  ;;  %v3693_v9 = vpop.f32.mrb[13].mxu1  ;;  %v1822_v43 = vrot.slane %v5355_v60, 1  ;;  %v6280_v63 = vrot.slane %v5355_v60, 2 }
 0x245   : > { %v2587_v32 = vpop.permute.xlu1 %2586  ;;  %v2105_v31 = vpop.permute.xlu0 %2104  ;;  %v1799_v39 = vsel %vm1444_vm1, %v1796_v58, %v1798_v18  ;;  %v5370_v33 = vsel %vm2000_vm10, %v2038_v42, %v2040_v6  ;;  %v5375_v1 = vsel %vm2242_vm11, %v2280_v45, %v2282_v14  ;;  %v5380_v9 = vsel %vm2484_vm12, %v2522_v52, %v6279_v3 }
 0x246   : > { %v2696_v21 = vadd.f32 %v2587_v32, %v2454_v36  ;;  %2338 = vrot.lane.b32.xlu0 %v4950_v12, %s3932_s8  ;;  %2118 = vrot.lane.b32.xlu1 %v2039_v17, %s3931_s7  ;;  %v5389_v58 = vsel %vm1444_vm1, %v1820_v34, %v1822_v43  ;;  %v5394_v45 = vsel %vm2000_vm10, %v2062_v19, %v6280_v63  ;;  %v6340_v42 = vrot.slane %v5355_v60, 3 }
 0x247   : > { %v6341_v52 = vrot.slane %v5355_v60, 4  ;;  %v2445_v17 = vadd.f32 %v5193_v10, %v2203_v40  ;;  %v1971_v34 = vadd.f32 %v1863_v2, %v5011_v20  ;;  %v2773_v36 = vmax.f32 %v2733_v27, 0.0 }
 0x248   : > { %v5399_v48 = vsel %vm2242_vm11, %v2304_v37, %v6340_v42  ;;  %v2743_v51 = vadd.f32 %v5343_v4, %v2696_v21  ;;  %v1962_v3 = vadd.f32 %v5176_v50, %v4802_v15 }
 0x249   : > { %v5404_v12 = vsel %vm2484_vm12, %v2546_v13, %v6341_v52  ;;  %v2347_v32 = vpop.permute.xlu0 %2346  ;;  %v1865_v19 = vpop.permute.xlu1 %1864  ;;  %v2687_v37 = vadd.f32 %v5225_v23, %v2445_v17  ;;  %v2213_v63 = vadd.f32 %v2105_v31, %v1971_v34 }
 0x24a   : > { %v2783_v42 = vmax.f32 %v2743_v51, 0.0  ;;  %2358 = vrot.lane.b32.xlu0 %v5254_v5, %s3932_s8  ;;  %2578 = vrot.lane.b32.xlu1 %v4928_v24, %s3933_s9  ;;  %v2204_v20 = vadd.f32 %v5185_v16, %v1962_v3  ;;  %v1972_v5 = vadd.f32 %v1865_v19, %v5030_v25 }
 0x24b   : > { %v2455_v13 = vadd.f32 %v2347_v32, %v2213_v63  ;;  %v2734_v21 = vadd.f32 %v5343_v4, %v2687_v37 }
 0x24c   : > { %v5417_v10 = vmax.f32 %v2773_v36, %v2783_v42  ;;  %v2446_v15 = vadd.f32 %v5219_v55, %v2204_v20 }
 0x24d   : > { %v2589_v2 = vpop.permute.xlu0 %2588  ;;  %v2107_v27 = vpop.permute.xlu1 %2106  ;;  %v2774_v3 = vmax.f32 %v2734_v21, 0.0 }
 0x24e   : > { %v2697_v50 = vadd.f32 %v2589_v2, %v2455_v13  ;;  %2100 = vrot.lane.b32.xlu0 %v4997_v57, %s3931_s7  ;;  %2598 = vrot.lane.b32.xlu1 %v5205_v30, %s3933_s9  ;;  %v2688_v24 = vadd.f32 %v5229_v47, %v2446_v15  ;;  %v2214_v40 = vadd.f32 %v2107_v27, %v1972_v5  ;;  %v2861_v17 = vrot.slane %v5417_v10, 1 }
 0x24f   : > { %v6343_v27 = vrot.slane %v5355_v60, 2 }
 0x250   : > { %v2744_v16 = vadd.f32 %v5343_v4, %v2697_v50  ;;  %v2735_v52 = vadd.f32 %v5343_v4, %v2688_v24  ;;  %v6345_v24 = vrot.slane %v5355_v60, 3 }
 0x251   : > { %v2349_v23 = vpop.permute.xlu1 %2348 }
 0x252   : > { %v2784_v63 = vmax.f32 %v2744_v16, 0.0  ;;  %2580 = vrot.lane.b32.xlu0 %v4953_v38, %s3933_s9  ;;  %1878 = vrot.lane.b32.xlu1 %v1799_v39, %s3930_s6  ;;  %v5431_v55 = vpop.f32.mrb[42].mxu0  ;;  %v2456_v51 = vadd.f32 %v2349_v23, %v2214_v40  ;;  %v6346_v16 = vrot.slane %v5355_v60, 4 }
 0x253   : > { %v3660_v57 = vpop.f32.mrb[43].mxu0  ;;  %v1800_v30 = vrot.slane %v5431_v55, 1  ;;  %v2042_v47 = vrot.slane %v5431_v55, 2  ;;  %v2284_v25 = vrot.slane %v5431_v55, 3  ;;  %v2526_v31 = vrot.slane %v5431_v55, 4 }
 0x254   : > { %v2842_v34 = vmax.f32 %v2774_v3, %v2784_v63  ;;  %v5439_v38 = vpop.f32.mrb[14].mxu1  ;;  %v2775_v3 = vmax.f32 %v2735_v52, 0.0 }
 0x255   : > { %6342 = vst [vmem:[#allocation43_spill] sm:$0xff] %v5439_v38  ;;  %v2591_v39 = vpop.permute.xlu1 %2590  ;;  %v1801_v36 = vsel %vm1444_vm1, %v1798_v18, %v1800_v30  ;;  %v1824_v32 = vrot.slane %v5439_v38, 1  ;;  %v3696_v19 = vpop.f32.mrb[15].mxu1  ;;  %v2066_v37 = vrot.slane %v5439_v38, 2  ;;  %v5449_v42 = vsel %vm2000_vm10, %v2040_v6, %v2042_v47 }
 0x256   : > { %v2862_v20 = vrot.slane %v2842_v34, 1  ;;  %v2698_v13 = vadd.f32 %v2591_v39, %v2456_v51  ;;  %2600 = vrot.lane.b32.xlu0 %v5257_v28, %s3933_s9  ;;  %2340 = vrot.lane.b32.xlu1 %v4978_v56, %s3932_s8  ;;  %v5458_v18 = vsel %vm2242_vm11, %v2282_v14, %v2284_v25  ;;  %v2308_v2 = vrot.slane %v5439_v38, 3 }
 0x257   : > { %v1825_v6 = vsel %vm1444_vm1, %v1822_v43, %v1824_v32  ;;  %v5467_v21 = vsel %vm2000_vm10, %v6343_v27, %v2066_v37  ;;  %v6344_v28 = vrot.slane %v5352_v8, 4  ;;  %v2550_v15 = vrot.slane %v5439_v38, 4 }
 0x258   : > { %v2745_v14 = vadd.f32 %v5343_v4, %v2698_v13  ;;  %v2863_v50 = vsel %vm1444_vm1, %v2861_v17, %v2862_v20  ;;  %v5480_v43 = vsel %vm2242_vm11, %v6345_v24, %v2308_v2 }
 0x259   : > { %v5472_v56 = vsel %vm2484_vm12, %v6344_v28, %v2526_v31  ;;  %v2890_v5 = vmax.f32 %v5417_v10, %v2863_v50  ;;  %v5486_v23 = vsel %vm2484_vm12, %v6346_v16, %v2550_v15  ;;  %v6349_v16 = vmov 0.0|0.0  }
 0x25a   : > { %v2785_v63 = vmax.f32 %v2745_v14, 0.0  ;;  %2360 = vrot.lane.b32.xlu1 %v5303_v46, %s3932_s8  ;;  %1880 = vrot.lane.b32.xlu0 %v1801_v36, %s3930_s6 }
 0x25c   : > { %v5491_v40 = vmax.f32 %v2775_v3, %v2785_v63  ;;  %v1867_v63 = vpop.permute.xlu0 %1866 }
 0x25e   : > { %v6281_v57 = vrot.slane %v5491_v40, 1  ;;  %2120 = vrot.lane.b32.xlu1 %v5370_v33, %s3931_s7 }
 0x260   : > { %v2865_v10 = vsel %vm1444_vm1, %v2862_v20, %v6281_v57 }
 0x261   : > { %v2891_v17 = vmax.f32 %v2842_v34, %v2865_v10 }
 0x262   : > { %2582 = vrot.lane.b32.xlu1 %v4981_v26, %s3933_s9  ;;  %v5501_v52 = vpop.f32.mrb[44].mxu0 }
 0x263   : > { %6347 = vst [vmem:[#allocation44_spill] sm:$0xff] %v5501_v52  ;;  %v3663_v46 = vpop.f32.mrb[45].mxu0  ;;  %v3793_v51 = vpack.c.bf16 %v2891_v17, %v2890_v5  ;;  %v1802_v39 = vrot.slane %v5501_v52, 1  ;;  %v5504_v36 = vpop.f32.mrb[16].mxu1  ;;  %v2044_v19 = vrot.slane %v5501_v52, 2  ;;  %v2286_v33 = vrot.slane %v5501_v52, 3 }
 0x264   : > { %6348 = vst [vmem:[#allocation45_spill] sm:$0xff] %v5504_v36  ;;  %v3699_v13 = vpop.f32.mrb[17].mxu1  ;;  %v1826_v27 = vrot.slane %v5504_v36, 1  ;;  %v2068_v34 = vrot.slane %v5504_v36, 2  ;;  %v2528_v20 = vrot.slane %v5501_v52, 4  ;;  %v2310_v26 = vrot.slane %v5504_v36, 3 }
 0x265   : > { %3794 = vmatpush3.bf16.msra.mxu1 %v3793_v51  ;;  %v1803_v28 = vsel %vm1444_vm1, %v1800_v30, %v1802_v39  ;;  %v2045_v14 = vsel %vm2000_vm10, %v2042_v47, %v2044_v19  ;;  %v5515_v50 = vsel %vm2242_vm11, %v2284_v25, %v2286_v33  ;;  %v2552_v24 = vrot.slane %v5504_v36, 4 }
 0x266   : > { %2602 = vrot.lane.b32.xlu1 %v5306_v59, %s3933_s9  ;;  %v5521_v5 = vsel %vm1444_vm1, %v1824_v32, %v1826_v27  ;;  %3795 = vmatprep.subr.bf16.mxu1 %v6349_v16  ;;  %v5525_v3 = vsel %vm2000_vm10, %v2066_v37, %v2068_v34  ;;  %v5528_v30 = vsel %vm2484_vm12, %v2526_v31, %v2528_v20  ;;  %v2109_v59 = vpop.permute.xlu0 %2108 }
 0x267   : > { %v5531_v47 = vsel %vm2242_vm11, %v2308_v2, %v2310_v26  ;;  %v5534_v25 = vsel %vm2484_vm12, %v2550_v15, %v2552_v24 }
 0x268   : > { %v5539_v32 = vpop.permute.xlu1 %1868 }
 0x26a   : > { %1882 = vrot.lane.b32.xlu1 %v1803_v28, %s3930_s6  ;;  %v2351_v46 = vpop.permute.xlu0 %2350 }
 0x26c   : > { %v5553_v57 = vpop.permute.xlu1 %2110 }
 0x26e   : > { %1900 = vrot.lane.b32.xlu1 %v5311_v7, %s3930_s6 }
 0x272   : > { %1904 = vrot.lane.b32.xlu1 %v1825_v6, %s3930_s6  ;;  %v5542_v37 = vpop.f32.mrb[46].mxu0 }
 0x273   : > { %6350 = vst [vmem:[#allocation46_spill] sm:$0xff] %v5542_v37  ;;  %v3666_v31 = vpop.f32.mrb[47].mxu0  ;;  %v1804_v2 = vrot.slane %v5542_v37, 1  ;;  %v2046_v10 = vrot.slane %v5542_v37, 2  ;;  %v2288_v15 = vrot.slane %v5542_v37, 3  ;;  %v2530_v17 = vrot.slane %v5542_v37, 4 }
 0x274   : > { %v5548_v51 = vpop.f32.mrb[18].mxu1 }
 0x275   : > { %6351 = vst [vmem:[#allocation47_spill] sm:$0xff] %v5548_v51  ;;  %v1805_v7 = vsel %vm1444_vm1, %v1802_v39, %v1804_v2  ;;  %v2047_v13 = vsel %vm2000_vm10, %v2044_v19, %v2046_v10  ;;  %v3702_v28 = vpop.f32.mrb[19].mxu1  ;;  %v1828_v6 = vrot.slane %v5548_v51, 1  ;;  %v5559_v31 = vsel %vm2242_vm11, %v2286_v33, %v2288_v15 }
 0x276   : > { %2362 = vrot.lane.b32.xlu1 %v5375_v1, %s3932_s8  ;;  %1884 = vrot.lane.b32.xlu0 %v1805_v7, %s3930_s6  ;;  %v2070_v36 = vrot.slane %v5548_v51, 2  ;;  %v5563_v38 = vsel %vm2484_vm12, %v2528_v20, %v2530_v17  ;;  %v2312_v39 = vrot.slane %v5548_v51, 3  ;;  %v2554_v28 = vrot.slane %v5548_v51, 4  ;;  %v2353_v20 = vpop.permute.xlu1 %2352 }
 0x277   : > { %v5567_v19 = vsel %vm1444_vm1, %v1826_v27, %v1828_v6  ;;  %v1963_v27 = vadd.f32 %v5247_v53, %v4825_v44 }
 0x278   : > { %v5570_v37 = vpop.permute.xlu0 %1870  ;;  %v5573_v1 = vsel %vm2000_vm10, %v2068_v34, %v2070_v36  ;;  %v5576_v33 = vsel %vm2242_vm11, %v2310_v26, %v2312_v39  ;;  %v5579_v7 = vsel %vm2484_vm12, %v2552_v24, %v2554_v28 }
 0x279   : > { %v2205_v34 = vadd.f32 %v5274_v0, %v1963_v27 }
 0x27a   : > { %2124 = vrot.lane.b32.xlu1 %v2045_v14, %s3931_s7  ;;  %1902 = vrot.lane.b32.xlu0 %v5389_v58, %s3930_s6  ;;  %v1973_v14 = vadd.f32 %v1867_v63, %v5051_v49  ;;  %v2575_v52 = vpop.permute.xlu1 %2574 }
 0x27b   : > { %v2447_v26 = vadd.f32 %v5282_v61, %v2205_v34 }
 0x27c   : > { %v5586_v51 = vpop.permute.xlu0 %2112  ;;  %v2215_v58 = vadd.f32 %v2109_v59, %v1973_v14 }
 0x27e   : > { %2142 = vrot.lane.b32.xlu1 %v5314_v41, %s3931_s7  ;;  %2342 = vrot.lane.b32.xlu0 %v5000_v54, %s3932_s8  ;;  %v2457_v53 = vadd.f32 %v2351_v46, %v2215_v58 }
 0x280   : > { %v2573_v24 = vpop.permute.xlu0 %2572 }
 0x281   : > { %v2689_v60 = vadd.f32 %v2573_v24, %v2447_v26 }
 0x282   : > { %2146 = vrot.lane.b32.xlu1 %v5467_v21, %s3931_s7  ;;  %2122 = vrot.lane.b32.xlu0 %v5449_v42, %s3931_s7  ;;  %v5599_v44 = vpop.f32.mrb[48].mxu0 }
 0x283   : > { %6352 = vst [vmem:[#allocation48_spill] sm:$0xff] %v5599_v44  ;;  %v3669_v0 = vpop.f32.mrb[49].mxu0  ;;  %v1806_v54 = vrot.slane %v5599_v44, 1  ;;  %v5602_v41 = vpop.f32.mrb[20].mxu1  ;;  %v2048_v49 = vrot.slane %v5599_v44, 2  ;;  %v6290_v61 = vrot.slane %v5599_v44, 3  ;;  %v2736_v46 = vadd.f32 %v5343_v4, %v2689_v60 }
 0x284   : > { %6353 = vst [vmem:[#allocation49_spill] sm:$0xff] %v5602_v41  ;;  %v2593_v63 = vpop.permute.xlu0 %2592  ;;  %v3705_v59 = vpop.f32.mrb[21].mxu1  ;;  %v1830_v27 = vrot.slane %v5602_v41, 1  ;;  %v6289_v21 = vrot.slane %v5602_v41, 2  ;;  %v6288_v42 = vrot.slane %v5599_v44, 4  ;;  %v6291_v34 = vrot.slane %v5602_v41, 3 }
 0x285   : > { %v2699_v26 = vadd.f32 %v2593_v63, %v2457_v53  ;;  %v1807_v14 = vsel %vm1444_vm1, %v1804_v2, %v1806_v54  ;;  %v5613_v24 = vsel %vm2000_vm10, %v2046_v10, %v2048_v49  ;;  %v5624_v0 = vsel %vm2242_vm11, %v2288_v15, %v6290_v61  ;;  %v6354_v10 = vld [vmem:[#allocation29_spill] sm:$0xff]  ;;  %v6357_v63 = vld [vmem:[#allocation32_spill] sm:$0xff] }
 0x286   : > { %2604 = vrot.lane.b32.xlu1 %v5380_v9, %s3933_s9  ;;  %2126 = vrot.lane.b32.xlu0 %v2047_v13, %s3931_s7  ;;  %v5619_v58 = vsel %vm1444_vm1, %v1828_v6, %v1830_v27  ;;  %v5629_v60 = vsel %vm2000_vm10, %v2070_v36, %v6289_v21  ;;  %v2556_v2 = vrot.slane %v5602_v41, 4  ;;  %v1964_v9 = vadd.f32 %v6354_v10, %v4843_v62 }
 0x287   : > { %v2746_v13 = vadd.f32 %v5343_v4, %v2699_v26  ;;  %v5638_v6 = vsel %vm2484_vm12, %v2530_v17, %v6288_v42  ;;  %v5643_v15 = vsel %vm2242_vm11, %v2312_v39, %v6291_v34  ;;  %v2776_v62 = vmax.f32 %v2736_v46, 0.0  ;;  %v6358_v26 = vld [vmem:[#allocation37_spill] sm:$0xff] }
 0x288   : > { %6355 = vst [vmem:[#allocation29_spill] sm:$0xff] %v5643_v15  ;;  %v5645_v53 = vpop.permute.xlu1 %1872  ;;  %v5648_v36 = vsel %vm2484_vm12, %v2554_v28, %v2556_v2  ;;  %v2206_v59 = vadd.f32 %v6357_v63, %v1964_v9  ;;  %v6359_v42 = vld [vmem:[#allocation9_spill] sm:$0xff]  ;;  %v6361_v9 = vrot.slane %v5491_v40, 1 }
 0x289   : > { %6356 = vst [vmem:[#allocation50_spill] sm:$0xff] %v5648_v36  ;;  %v2786_v10 = vmax.f32 %v2746_v13, 0.0  ;;  %v1974_v21 = vadd.f32 %v5539_v32, %v6359_v42  ;;  %v6360_v36 = vld [vmem:[#allocation8_spill] sm:$0xff] }
 0x28a   : > { %2144 = vrot.lane.b32.xlu0 %v5394_v45, %s3931_s7  ;;  %v2448_v17 = vadd.f32 %v6358_v26, %v2206_v59 }
 0x28b   : > { %v2844_v61 = vmax.f32 %v2776_v62, %v2786_v10  ;;  %v2216_v34 = vadd.f32 %v5553_v57, %v1974_v21  ;;  %v5675_v62 = vpop.permute.xlu0 %1854 }
 0x28c   : > { %v5656_v39 = vpop.permute.xlu1 %2114  ;;  %v2690_v15 = vadd.f32 %v2575_v52, %v2448_v17 }
 0x28d   : > { %v2866_v28 = vrot.slane %v2844_v61, 1  ;;  %v2458_v46 = vadd.f32 %v2353_v20, %v2216_v34 }
 0x28e   : > { %2584 = vrot.lane.b32.xlu0 %v6360_v36, %s3933_s9  ;;  %v2737_v32 = vadd.f32 %v5343_v4, %v2690_v15 }
 0x28f   : > { %v2867_v45 = vsel %vm1444_vm1, %v6361_v9, %v2866_v28 }
 0x290   : > { %v2595_v13 = vpop.permute.xlu1 %2594  ;;  %v2892_v63 = vmax.f32 %v5491_v40, %v2867_v45  ;;  %v2777_v17 = vmax.f32 %v2737_v32, 0.0  ;;  %v6366_v32 = vrot.slane %v5599_v44, 3 }
 0x291   : > { %v2700_v42 = vadd.f32 %v2595_v13, %v2458_v46  ;;  %v6364_v13 = vld [vmem:[#allocation10_spill] sm:$0xff] }
 0x292   : > { %1886 = vrot.lane.b32.xlu0 %v1807_v14, %s3930_s6  ;;  %v5667_v59 = vpop.f32.mrb[50].mxu0 }
 0x293   : > { %6362 = vst [vmem:[#allocation32_spill] sm:$0xff] %v5667_v59  ;;  %v2747_v57 = vadd.f32 %v5343_v4, %v2700_v42  ;;  %v3672_v52 = vpop.f32.mrb[51].mxu0  ;;  %v1808_v21 = vrot.slane %v5667_v59, 1  ;;  %v2050_v20 = vrot.slane %v5667_v59, 2  ;;  %v5672_v34 = vpop.f32.mrb[22].mxu1  ;;  %v2292_v36 = vrot.slane %v5667_v59, 3 }
 0x294   : > { %6363 = vst [vmem:[#allocation37_spill] sm:$0xff] %v5672_v34  ;;  %v3708_v40 = vpop.f32.mrb[23].mxu1  ;;  %v1832_v15 = vrot.slane %v5672_v34, 1  ;;  %v2074_v14 = vrot.slane %v5672_v34, 2  ;;  %v2534_v10 = vrot.slane %v5667_v59, 4  ;;  %v2316_v26 = vrot.slane %v5672_v34, 3 }
 0x295   : > { %v2787_v46 = vmax.f32 %v2747_v57, 0.0  ;;  %v1809_v9 = vsel %vm1444_vm1, %v1806_v54, %v1808_v21  ;;  %v2051_v45 = vsel %vm2000_vm10, %v2048_v49, %v2050_v20  ;;  %v6365_v42 = vrot.slane %v6364_v13, 1 }
 0x296   : > { %1906 = vrot.lane.b32.xlu0 %v5521_v5, %s3930_s6  ;;  %1888 = vrot.lane.b32.xlu1 %v1809_v9, %s3930_s6  ;;  %v5692_v40 = vsel %vm1444_vm1, %v1830_v27, %v1832_v15  ;;  %v5697_v57 = vsel %vm2242_vm11, %v6366_v32, %v2292_v36  ;;  %v2558_v54 = vrot.slane %v5672_v34, 4  ;;  %v6367_v5 = vrot.slane %v6364_v13, 2 }
 0x297   : > { %v5689_v52 = vsel %vm1444_vm1, %v1808_v21, %v6365_v42  ;;  %v5700_v49 = vmax.f32 %v2777_v17, %v2787_v46  ;;  %v6368_v21 = vrot.slane %v5602_v41, 2  ;;  %v6369_v27 = vrot.slane %v5599_v44, 4 }
 0x298   : > { %v5705_v9 = vsel %vm2000_vm10, %v2050_v20, %v6367_v5  ;;  %v5717_v32 = vpop.permute.xlu0 %1874  ;;  %v6370_v17 = vrot.slane %v6364_v13, 3  ;;  %v6371_v20 = vrot.slane %v5602_v41, 3 }
 0x299   : > { %v5710_v42 = vsel %vm2000_vm10, %v6368_v21, %v2074_v14  ;;  %v5715_v59 = vsel %vm2484_vm12, %v6369_v27, %v2534_v10  ;;  %v6372_v21 = vrot.slane %v6364_v13, 4  ;;  %v5735_v27 = vsel %vm2484_vm12, %v2556_v2, %v2558_v54 }
 0x29a   : > { %v5722_v46 = vsel %vm2242_vm11, %v2292_v36, %v6370_v17  ;;  %v5727_v5 = vsel %vm2242_vm11, %v6371_v20, %v2316_v26  ;;  %6373 = vst [vmem:[#allocation9_spill] sm:$0xff] %v5735_v27  ;;  %v6297_v44 = vrot.slane %v5700_v49, 1  ;;  %2364 = vrot.lane.b32.xlu0 %v5458_v18, %s3932_s8  ;;  %1908 = vrot.lane.b32.xlu1 %v5567_v19, %s3930_s6 }
 0x29b   : > { %v5732_v34 = vsel %vm2484_vm12, %v2534_v10, %v6372_v21  ;;  %v5745_v17 = vpop.f32.mrb[24].mxu1 }
 0x29c   : > { %v2869_v36 = vsel %vm1444_vm1, %v2866_v28, %v6297_v44  ;;  %6374 = vst [vmem:[#allocation8_spill] sm:$0xff] %v5745_v17  ;;  %v2335_v20 = vpop.permute.xlu0 %2334  ;;  %v3711_v21 = vpop.f32.mrb[25].mxu1  ;;  %v1834_v2 = vrot.slane %v5745_v17, 1  ;;  %v2076_v41 = vrot.slane %v5745_v17, 2  ;;  %v2318_v13 = vrot.slane %v5745_v17, 3 }
 0x29d   : > { %v2893_v10 = vmax.f32 %v2844_v61, %v2869_v36  ;;  %v2560_v18 = vrot.slane %v5745_v17, 4 }
 0x29e   : > { %2368 = vrot.lane.b32.xlu0 %v5559_v31, %s3932_s8  ;;  %2366 = vrot.lane.b32.xlu1 %v5515_v50, %s3932_s8  ;;  %v5756_v28 = vsel %vm1444_vm1, %v1832_v15, %v1834_v2  ;;  %v5759_v61 = vsel %vm2000_vm10, %v2074_v14, %v2076_v41  ;;  %v5762_v36 = vsel %vm2242_vm11, %v2316_v26, %v2318_v13  ;;  %v5772_v50 = vpop.permute.xlu1 %1856 }
 0x29f   : > { %v3796_v19 = vpack.c.bf16 %v2893_v10, %v2892_v63  ;;  %6375 = vst [vmem:[#allocation51_spill] sm:$0xff] %v5762_v36  ;;  %v5765_v21 = vsel %vm2484_vm12, %v2558_v54, %v2560_v18 }
 0x2a0   : > { %6376 = vst [vmem:[#allocation52_spill] sm:$0xff] %v5765_v21  ;;  %v2355_v44 = vpop.permute.xlu0 %2354 }
 0x2a1   : > { %3797 = vmatpush3.bf16.msra.mxu1 %v3796_v19 }
 0x2a2   : > { %3798 = vmatprep.subr.bf16.mxu1 %v6349_v16  ;;  %2386 = vrot.lane.b32.xlu0 %v5399_v48, %s3932_s8  ;;  %v6378_v48 = vld [vmem:[#allocation3_spill] sm:$0xff] }
 0x2a3   : > { %2384 = vrot.lane.b32.xlu1 %v5317_v29, %s3932_s8  ;;  %v1965_v10 = vadd.f32 %v5319_v35, %v6378_v48  ;;  %v6381_v35 = vld [vmem:[#allocation11_spill] sm:$0xff] }
 0x2a4   : > { %v5774_v31 = vpop.permute.xlu0 %2096  ;;  %v5776_v63 = vpop.f32.mrb[26].mxu1 }
 0x2a5   : > { %6377 = vst [vmem:[#allocation53_spill] sm:$0xff] %v5776_v63  ;;  %v3714_v15 = vpop.f32.mrb[27].mxu1  ;;  %v1836_v14 = vrot.slane %v5776_v63, 1  ;;  %v2078_v26 = vrot.slane %v5776_v63, 2  ;;  %v2320_v54 = vrot.slane %v5776_v63, 3  ;;  %v2562_v29 = vrot.slane %v5776_v63, 4 }
 0x2a6   : > { %2128 = vrot.lane.b32.xlu0 %v5613_v24, %s3931_s7  ;;  %v2207_v63 = vadd.f32 %v5332_v11, %v1965_v10 }
 0x2a7   : > { %2388 = vrot.lane.b32.xlu1 %v5480_v43, %s3932_s8  ;;  %v5789_v19 = vsel %vm1444_vm1, %v1834_v2, %v1836_v14  ;;  %v5792_v15 = vsel %vm2000_vm10, %v2076_v41, %v2078_v26  ;;  %v5795_v17 = vsel %vm2242_vm11, %v2318_v13, %v2320_v54  ;;  %v5802_v43 = vsel %vm2484_vm12, %v2560_v18, %v2562_v29 }
 0x2a8   : > { %6379 = vst [vmem:[#allocation3_spill] sm:$0xff] %v5795_v17  ;;  %v5797_v21 = vpop.permute.xlu0 %2116  ;;  %v5799_v24 = vpop.permute.xlu1 %1876  ;;  %6380 = vst [vmem:[#allocation54_spill] sm:$0xff] %v5802_v43  ;;  %v1975_v41 = vadd.f32 %v5570_v37, %v6381_v35  ;;  %v2449_v2 = vadd.f32 %v2335_v20, %v2207_v63 }
 0x2aa   : > { %2148 = vrot.lane.b32.xlu0 %v5525_v3, %s3931_s7  ;;  %v2217_v17 = vadd.f32 %v5586_v51, %v1975_v41 }
 0x2ab   : > { %2130 = vrot.lane.b32.xlu1 %v2051_v45, %s3931_s7 }
 0x2ac   : > { %v2577_v13 = vpop.permute.xlu0 %2576  ;;  %v2337_v48 = vpop.permute.xlu1 %2336  ;;  %v2459_v43 = vadd.f32 %v2355_v44, %v2217_v17 }
 0x2ad   : > { %v2691_v36 = vadd.f32 %v2577_v13, %v2449_v2  ;;  %v1714_v27 = vpop.f32.mrb[28].mxu1  ;;  %v6384_v2 = vld [vmem:[#allocation41_spill] sm:$0xff] }
 0x2ae   : > { %2606 = vrot.lane.b32.xlu0 %v5472_v56, %s3933_s9  ;;  %v1838_v11 = vrot.slane %v1714_v27, 1  ;;  %v2080_v3 = vrot.slane %v1714_v27, 2  ;;  %v2322_v18 = vrot.slane %v1714_v27, 3  ;;  %v2564_v45 = vrot.slane %v1714_v27, 4  ;;  %v3717_v10 = vpop.f32.mrb[29].mxu1 }
 0x2af   : > { %2150 = vrot.lane.b32.xlu1 %v5573_v1, %s3931_s7  ;;  %v2738_v1 = vadd.f32 %v5343_v4, %v2691_v36  ;;  %v6382_v36 = vld [vmem:[#allocation4_spill] sm:$0xff] }
 0x2b0   : > { %v2597_v37 = vpop.permute.xlu0 %2596  ;;  %v2357_v20 = vpop.permute.xlu1 %2356  ;;  %v5816_v63 = vsel %vm1444_vm1, %v1836_v14, %v1838_v11  ;;  %v5819_v51 = vsel %vm2000_vm10, %v2078_v26, %v2080_v3  ;;  %v5822_v35 = vsel %vm2242_vm11, %v2320_v54, %v2322_v18  ;;  %v5825_v56 = vsel %vm2484_vm12, %v2562_v29, %v2564_v45  ;;  %v6383_v54 = vld [vmem:[#allocation38_spill] sm:$0xff] }
 0x2b1   : > { %v2701_v41 = vadd.f32 %v2597_v37, %v2459_v43  ;;  %v2778_v14 = vmax.f32 %v2738_v1, 0.0  ;;  %v6386_v18 = vrot.slane %v5700_v49, 1 }
 0x2b2   : > { %2610 = vrot.lane.b32.xlu0 %v5563_v38, %s3933_s9  ;;  %v1966_v38 = vadd.f32 %v6383_v54, %v6382_v36 }
 0x2b3   : > { %2608 = vrot.lane.b32.xlu1 %v5528_v30, %s3933_s9  ;;  %v2748_v44 = vadd.f32 %v5343_v4, %v2701_v41 }
 0x2b4   : > { %v5833_v27 = vpop.permute.xlu0 %1858  ;;  %v5835_v17 = vpop.permute.xlu1 %2098  ;;  %v2208_v13 = vadd.f32 %v6384_v2, %v1966_v38 }
 0x2b5   : > { %v2788_v26 = vmax.f32 %v2748_v44, 0.0 }
 0x2b6   : > { %2628 = vrot.lane.b32.xlu0 %v5404_v12, %s3933_s9  ;;  %v6385_v12 = vld [vmem:[#allocation17_spill] sm:$0xff] }
 0x2b7   : > { %2626 = vrot.lane.b32.xlu1 %v5322_v22, %s3933_s9  ;;  %v2846_v29 = vmax.f32 %v2778_v14, %v2788_v26  ;;  %v1976_v3 = vadd.f32 %v5645_v53, %v6385_v12  ;;  %v2450_v22 = vadd.f32 %v2337_v48, %v2208_v13 }
 0x2b8   : > { %v2339_v43 = vpop.permute.xlu0 %2338  ;;  %v5843_v30 = vpop.permute.xlu1 %2118 }
 0x2b9   : > { %v2870_v11 = vrot.slane %v2846_v29, 1  ;;  %v2218_v41 = vadd.f32 %v5656_v39, %v1976_v3 }
 0x2ba   : > { %1890 = vrot.lane.b32.xlu0 %v5689_v52, %s3930_s6  ;;  %v6388_v52 = vld [vmem:[#allocation5_spill] sm:$0xff] }
 0x2bb   : > { %2630 = vrot.lane.b32.xlu1 %v5486_v23, %s3933_s9  ;;  %v2871_v45 = vsel %vm1444_vm1, %v6386_v18, %v2870_v11  ;;  %v6387_v23 = vld [vmem:[#allocation13_spill] sm:$0xff]  ;;  %v1967_v53 = vadd.f32 %v5675_v62, %v6388_v52  ;;  %v2460_v48 = vadd.f32 %v2357_v20, %v2218_v41 }
 0x2bc   : > { %v2359_v10 = vpop.permute.xlu0 %2358  ;;  %v2579_v37 = vpop.permute.xlu1 %2578  ;;  %v2894_v1 = vmax.f32 %v5700_v49, %v2871_v45 }
 0x2bd   : > { %v2692_v44 = vadd.f32 %v2579_v37, %v2450_v22  ;;  %v2209_v36 = vadd.f32 %v5774_v31, %v1967_v53 }
 0x2be   : > { %1910 = vrot.lane.b32.xlu0 %v5619_v58, %s3930_s6  ;;  %v6389_v58 = vld [vmem:[#allocation23_spill] sm:$0xff] }
 0x2bf   : > { %1892 = vrot.lane.b32.xlu1 %v6387_v23, %s3930_s6  ;;  %v2739_v49 = vadd.f32 %v5343_v4, %v2692_v44  ;;  %v1977_v39 = vadd.f32 %v5717_v32, %v6389_v58  ;;  %v2451_v38 = vadd.f32 %v2339_v43, %v2209_v36 }
 0x2c0   : > { %v5863_v14 = vpop.permute.xlu0 %2100  ;;  %v2599_v26 = vpop.permute.xlu1 %2598 }
 0x2c1   : > { %v2702_v54 = vadd.f32 %v2599_v26, %v2460_v48  ;;  %v2219_v31 = vadd.f32 %v5797_v21, %v1977_v39  ;;  %v2779_v13 = vmax.f32 %v2739_v49, 0.0 }
 0x2c2   : > { %2370 = vrot.lane.b32.xlu0 %v5624_v0, %s3932_s8 }
 0x2c3   : > { %1912 = vrot.lane.b32.xlu1 %v5692_v40, %s3930_s6  ;;  %v2749_v62 = vadd.f32 %v5343_v4, %v2702_v54  ;;  %v2461_v0 = vadd.f32 %v2359_v10, %v2219_v31 }
 0x2c4   : > { %v2581_v20 = vpop.permute.xlu0 %2580  ;;  %v5874_v2 = vpop.permute.xlu1 %1878 }
 0x2c5   : > { %v2789_v12 = vmax.f32 %v2749_v62, 0.0  ;;  %v2693_v3 = vadd.f32 %v2581_v20, %v2451_v38 }
 0x2c6   : > { %2390 = vrot.lane.b32.xlu0 %v5531_v47, %s3932_s8 }
 0x2c7   : > { %2372 = vrot.lane.b32.xlu1 %v5697_v57, %s3932_s8  ;;  %v2847_v40 = vmax.f32 %v2779_v13, %v2789_v12  ;;  %v2740_v18 = vadd.f32 %v5343_v4, %v2693_v3  ;;  %v6395_v3 = vld [vmem:[#allocation29_spill] sm:$0xff] }
 0x2c8   : > { %v2601_v32 = vpop.permute.xlu0 %2600  ;;  %v2341_v43 = vpop.permute.xlu1 %2340 }
 0x2c9   : > { %v2872_v22 = vrot.slane %v2847_v40, 1  ;;  %v2703_v45 = vadd.f32 %v2601_v32, %v2461_v0  ;;  %v2780_v41 = vmax.f32 %v2740_v18, 0.0  ;;  %v6396_v0 = vld [vmem:[#allocation15_spill] sm:$0xff]  ;;  %v6398_v18 = vld [vmem:[#allocation26_spill] sm:$0xff] }
 0x2ca   : > { %2132 = vrot.lane.b32.xlu0 %v5705_v9, %s3931_s7  ;;  %v6390_v9 = vld [vmem:[#allocation14_spill] sm:$0xff] }
 0x2cb   : > { %2392 = vrot.lane.b32.xlu1 %v5576_v33, %s3932_s8  ;;  %v2750_v21 = vadd.f32 %v5343_v4, %v2703_v45  ;;  %v2873_v47 = vsel %vm1444_vm1, %v2870_v11, %v2872_v22  ;;  %v6391_v33 = vld [vmem:[#allocation6_spill] sm:$0xff] }
 0x2cc   : > { %v2361_v37 = vpop.permute.xlu1 %2360  ;;  %v1881_v57 = vpop.permute.xlu0 %1880  ;;  %v2895_v10 = vmax.f32 %v2846_v29, %v2873_v47  ;;  %v1968_v53 = vadd.f32 %v5772_v50, %v6391_v33 }
 0x2cd   : > { %v2790_v44 = vmax.f32 %v2750_v21, 0.0  ;;  %v5889_v23 = vadd.f32 %v1881_v57, %v5352_v8  ;;  %v6392_v8 = vld [vmem:[#allocation30_spill] sm:$0xff]  ;;  %v6401_v57 = vld [vmem:[#allocation39_spill] sm:$0xff] }
 0x2ce   : > { %2152 = vrot.lane.b32.xlu0 %v5629_v60, %s3931_s7  ;;  %v3799_v52 = vpack.c.bf16 %v2895_v10, %v2894_v1  ;;  %v2210_v29 = vadd.f32 %v5835_v17, %v1968_v53  ;;  %v1978_v60 = vadd.f32 %v5799_v24, %v6392_v8  ;;  %v6393_v24 = vld [vmem:[#allocation19_spill] sm:$0xff]  ;;  %v1979_v10 = vadd.f32 %v5874_v2, %v6401_v57  ;;  %v6405_v2 = vld [vmem:[#allocation21_spill] sm:$0xff] }
 0x2cf   : > { %2134 = vrot.lane.b32.xlu1 %v6390_v9, %s3931_s7  ;;  %v2848_v48 = vmax.f32 %v2780_v41, %v2790_v44  ;;  %v6402_v9 = vld [vmem:[#allocation33_spill] sm:$0xff] }
 0x2d0   : > { %3800 = vmatpush3.bf16.msra.mxu1 %v3799_v52  ;;  %v2121_v11 = vpop.permute.xlu1 %2120  ;;  %v2452_v1 = vadd.f32 %v2341_v43, %v2210_v29  ;;  %v2220_v54 = vadd.f32 %v5843_v30, %v1978_v60  ;;  %v6404_v52 = vld [vmem:[#allocation7_spill] sm:$0xff] }
 0x2d1   : > { %v2874_v26 = vrot.slane %v2848_v48, 1  ;;  %3801 = vmatprep.subr.bf16.mxu1 %v6349_v16  ;;  %v2221_v44 = vadd.f32 %v2121_v11, %v1979_v10  ;;  %v1969_v33 = vadd.f32 %v5833_v27, %v6404_v52  ;;  %v6406_v27 = vld [vmem:[#allocation51_spill] sm:$0xff] }
 0x2d2   : > { %2612 = vrot.lane.b32.xlu0 %v5638_v6, %s3933_s9  ;;  %v2462_v6 = vadd.f32 %v2361_v37, %v2220_v54  ;;  %v6399_v37 = vld [vmem:[#allocation50_spill] sm:$0xff]  ;;  %v6416_v10 = vld [vmem:[#allocation35_spill] sm:$0xff] }
 0x2d3   : > { %2154 = vrot.lane.b32.xlu1 %v5710_v42, %s3931_s7  ;;  %v2875_v50 = vsel %vm1444_vm1, %v2872_v22, %v2874_v26  ;;  %v2211_v29 = vadd.f32 %v5863_v14, %v1969_v33 }
 0x2d4   : > { %v2583_v36 = vpop.permute.xlu1 %2582  ;;  %v2896_v49 = vmax.f32 %v2847_v40, %v2875_v50  ;;  %v2813_v50 = vlaneseq }
 0x2d5   : > { %v2694_v17 = vadd.f32 %v2583_v36, %v2452_v1  ;;  %v6407_v36 = vld [vmem:[#allocation27_spill] sm:$0xff] }
 0x2d6   : > { %2632 = vrot.lane.b32.xlu0 %v5534_v25, %s3933_s9 }
 0x2d7   : > { %2614 = vrot.lane.b32.xlu1 %v5715_v59, %s3933_s9  ;;  %v2741_v42 = vadd.f32 %v5343_v4, %v2694_v17  ;;  %v6394_v59 = vld [vmem:[#allocation25_spill] sm:$0xff] }
 0x2d8   : > { %v2603_v58 = vpop.permute.xlu1 %2602 }
 0x2d9   : > { %v2704_v39 = vadd.f32 %v2603_v58, %v2462_v6  ;;  %v2781_v62 = vmax.f32 %v2741_v42, 0.0  ;;  %v2816_v6 = vshrl.u32 %v2813_v50, 7  ;;  %v6409_v58 = vld [vmem:[#allocation3_spill] sm:$0xff] }
 0x2da   : > { %1894 = vrot.lane.b32.xlu0 %v6393_v24, %s3930_s6 }
 0x2db   : > { %2634 = vrot.lane.b32.xlu1 %v5579_v7, %s3933_s9  ;;  %v2751_v30 = vadd.f32 %v5343_v4, %v2704_v39 }
 0x2dc   : > { %v1883_v38 = vpop.permute.xlu1 %1882 }
 0x2dd   : > { %v2791_v20 = vmax.f32 %v2751_v30, 0.0  ;;  %v5918_v25 = vadd.f32 %v1883_v38, %v5431_v55  ;;  %v2814_v38 = vand.u32 127, %v2813_v50 }
 0x2de   : > { %1914 = vrot.lane.b32.xlu0 %v5756_v28, %s3930_s6 }
 0x2df   : > { %1896 = vrot.lane.b32.xlu1 %v6394_v59, %s3930_s6  ;;  %v5924_v31 = vmax.f32 %v2781_v62, %v2791_v20  ;;  %v2821_v62 = vmul.u32 2, %v2816_v6 }
 0x2e0   : > { %v5926_v13 = vpop.permute.xlu1 %1900 }
 0x2e1   : > { %v2876_v7 = vrot.slane %v5924_v31, 1  ;;  %vm2826_vm15 = vcmp.eq.s32.totalorder %v2814_v38, %v2821_v62 }
 0x2e2   : > { %2374 = vrot.lane.b32.xlu0 %v5722_v46, %s3932_s8 }
 0x2e3   : > { %1916 = vrot.lane.b32.xlu1 %v5789_v19, %s3930_s6  ;;  %v2877_v55 = vsel %vm1444_vm1, %v2874_v26, %v2876_v7  ;;  %v6397_v19 = vld [vmem:[#allocation20_spill] sm:$0xff] }
 0x2e4   : > { %v5936_v28 = vpop.permute.xlu1 %1904  ;;  %v2897_v12 = vmax.f32 %v2848_v48, %v2877_v55  ;;  %v2817_v55 = vadd.s32 8, %v2816_v6 }
 0x2e6   : > { %2394 = vrot.lane.b32.xlu0 %v6395_v3, %s3932_s8  ;;  %v3802_v40 = vpack.c.bf16 %v2897_v12, %v2896_v49 }
 0x2e7   : > { %2376 = vrot.lane.b32.xlu1 %v6396_v0, %s3932_s8 }
 0x2e8   : > { %3803 = vmatpush3.bf16.msra.mxu1 %v3802_v40  ;;  %v2363_v32 = vpop.permute.xlu1 %2362  ;;  %v5942_v46 = vpop.permute.xlu0 %1884 }
 0x2e9   : > { %3804 = vmatprep.subr.bf16.mxu1 %v6349_v16  ;;  %v2463_v53 = vadd.f32 %v2363_v32, %v2221_v44  ;;  %v2822_v32 = vmul.u32 2, %v2817_v55  ;;  %v6417_v44 = vld [vmem:[#allocation54_spill] sm:$0xff] }
 0x2ea   : > { %2136 = vrot.lane.b32.xlu0 %v6397_v19, %s3931_s7 }
 0x2eb   : > { %2396 = vrot.lane.b32.xlu1 %v5727_v5, %s3932_s8  ;;  %vm2827_vm2 = vcmp.eq.s32.totalorder %v2814_v38, %v2822_v32 }
 0x2ec   : > { %v5949_v43 = vpop.permute.xlu1 %2124  ;;  %v5951_v22 = vpop.permute.xlu0 %1902 }
 0x2ee   : > { %2156 = vrot.lane.b32.xlu0 %v5759_v61, %s3931_s7  ;;  %v6400_v61 = vld [vmem:[#allocation16_spill] sm:$0xff] }
 0x2ef   : > { %2138 = vrot.lane.b32.xlu1 %v6398_v18, %s3931_s7  ;;  %v2818_v18 = vadd.s32 16, %v2816_v6 }
 0x2f0   : > { %v5957_v45 = vpop.permute.xlu1 %2142  ;;  %v2343_v21 = vpop.permute.xlu0 %2342 }
 0x2f1   : > { %v2453_v11 = vadd.f32 %v2343_v21, %v2211_v29  ;;  %v2823_v57 = vmul.u32 2, %v2818_v18  ;;  %v2820_v29 = vadd.s32 32, %v2816_v6 }
 0x2f2   : > { %2616 = vrot.lane.b32.xlu0 %v5732_v34, %s3933_s9 }
 0x2f3   : > { %2158 = vrot.lane.b32.xlu1 %v5792_v15, %s3931_s7  ;;  %v6403_v15 = vld [vmem:[#allocation9_spill] sm:$0xff]  ;;  %vm2828_vm3 = vcmp.eq.s32.totalorder %v2814_v38, %v2823_v57 }
 0x2f4   : > { %v5963_v5 = vpop.permute.xlu1 %2146  ;;  %v5965_v47 = vpop.permute.xlu0 %2122 }
 0x2f6   : > { %2636 = vrot.lane.b32.xlu0 %v6399_v37, %s3933_s9  ;;  %v6415_v37 = vmov 0.0  }
 0x2f7   : > { %2618 = vrot.lane.b32.xlu1 %v6400_v61, %s3933_s9  ;;  %v6026_v61 = vsel %vm2826_vm15, 1.0, %v6415_v37  ;;  %v6038_v52 = vsel %vm2827_vm2, 1.0, %v6415_v37 }
 0x2f8   : > { %v5973_v41 = vpop.permute.xlu0 %2126  ;;  %v2605_v34 = vpop.permute.xlu1 %2604 }
 0x2f9   : > { %v2705_v26 = vadd.f32 %v2605_v34, %v2463_v53  ;;  %v2819_v34 = vadd.s32 24, %v2816_v6  ;;  %v6418_v53 = vld [vmem:[#allocation36_spill] sm:$0xff] }
 0x2fa   : > { %1898 = vrot.lane.b32.xlu0 %v6402_v9, %s3930_s6 }
 0x2fb   : > { %2638 = vrot.lane.b32.xlu1 %v6403_v15, %s3933_s9  ;;  %v2752_v60 = vadd.f32 %v5343_v4, %v2705_v26  ;;  %v2824_v33 = vmul.u32 2, %v2819_v34 }
 0x2fc   : > { %v5981_v48 = vpop.permute.xlu0 %2144 }
 0x2fd   : > { %v2792_v54 = vmax.f32 %v2752_v60, 0.0  ;;  %vm2829_vm5 = vcmp.eq.s32.totalorder %v2814_v38, %v2824_v33 }
 0x2fe   : > { %2378 = vrot.lane.b32.xlu0 %v6405_v2, %s3932_s8 }
 0x2ff   : > { %1918 = vrot.lane.b32.xlu1 %v5816_v63, %s3930_s6  ;;  %v6408_v63 = vld [vmem:[#allocation34_spill] sm:$0xff] }
 0x300   : > { %v2585_v8 = vpop.permute.xlu0 %2584 }
 0x301   : > { %v2695_v1 = vadd.f32 %v2585_v8, %v2453_v11  ;;  %v6051_v11 = vsel %vm2828_vm3, 1.0, %v6415_v37  ;;  %v2825_v8 = vmul.u32 2, %v2820_v29 }
 0x302   : > { %2398 = vrot.lane.b32.xlu0 %v6406_v27, %s3932_s8 }
 0x303   : > { %2380 = vrot.lane.b32.xlu1 %v6407_v36, %s3932_s8  ;;  %v2742_v14 = vadd.f32 %v5343_v4, %v2695_v1  ;;  %v6410_v4 = vld [vmem:[#allocation22_spill] sm:$0xff]  ;;  %v6064_v1 = vsel %vm2829_vm5, 1.0, %v6415_v37  ;;  %vm2830_vm6 = vcmp.eq.s32.totalorder %v2814_v38, %v2825_v8 }
 0x304   : > { %v5994_v49 = vpop.permute.xlu0 %1886  ;;  %v6075_v36 = vsel %vm2830_vm6, 1.0, %v6415_v37 }
 0x305   : > { %v2782_v17 = vmax.f32 %v2742_v14, 0.0  ;;  %v2223_v14 = vadd.f32 %v5949_v43, %v5918_v25 }
 0x306   : > { %2140 = vrot.lane.b32.xlu0 %v6408_v63, %s3931_s7  ;;  %v6420_v63 = vld [vmem:[#allocation31_spill] sm:$0xff] }
 0x307   : > { %2400 = vrot.lane.b32.xlu1 %v6409_v58, %s3932_s8  ;;  %v2850_v42 = vmax.f32 %v2782_v17, %v2792_v54  ;;  %v6419_v54 = vld [vmem:[#allocation44_spill] sm:$0xff]  ;;  %v1990_v58 = vadd.f32 %v5926_v13, %v6420_v63 }
 0x308   : > { %v6000_v39 = vpop.permute.xlu0 %1906  ;;  %v6002_v24 = vpop.permute.xlu1 %1888  ;;  %v1982_v17 = vadd.f32 %v5942_v46, %v6419_v54 }
 0x309   : > { %v2878_v30 = vrot.slane %v2850_v42, 1  ;;  %v2232_v25 = vadd.f32 %v5957_v45, %v1990_v58 }
 0x30a   : > { %2620 = vrot.lane.b32.xlu0 %v6410_v4, %s3933_s9 }
 0x30b   : > { %2160 = vrot.lane.b32.xlu1 %v5819_v51, %s3931_s7  ;;  %v2879_v20 = vsel %vm1444_vm1, %v2876_v7, %v2878_v30  ;;  %v2899_v59 = vmax.f32 %v2850_v42, %v2878_v30  ;;  %v6413_v51 = vld [vmem:[#allocation52_spill] sm:$0xff]  ;;  %v2224_v30 = vadd.f32 %v5973_v41, %v1982_v17  ;;  %v6097_v41 = vld [vmem:[%s6251_s2] ss:$0 sm:$0xff] }
 0x30c   : > { %v2898_v12 = vmax.f32 %v5924_v31, %v2879_v20  ;;  %v2365_v3 = vpop.permute.xlu0 %2364  ;;  %v6012_v0 = vpop.permute.xlu1 %1908  ;;  %v6414_v7 = vld [vmem:[#allocation28_spill] sm:$0xff]  ;;  %v6422_v20 = vld [vmem:[#allocation42_spill] sm:$0xff] }
 0x30e   : > { %v3805_v19 = vpack.c.bf16 %v2899_v59, %v2898_v12  ;;  %2640 = vrot.lane.b32.xlu0 %v6413_v51, %s3933_s9 }
 0x30f   : > { %2622 = vrot.lane.b32.xlu1 %v6414_v7, %s3933_s9 }
 0x310   : > { %3807 = vmatpush3.bf16.msk.msra.mxu1 %vm6015_vm14, %v3805_v19  ;;  %v2369_v31 = vpop.permute.xlu0 %2368  ;;  %v2367_v21 = vpop.permute.xlu1 %2366 }
 0x311   : > { %3808 = vmatprep.subr.bf16.mxu1 %v6349_v16  ;;  %v2465_v42 = vadd.f32 %v2367_v21, %v2223_v14  ;;  %v2466_v43 = vadd.f32 %v2369_v31, %v2224_v30 }
 0x312   : > { %2382 = vrot.lane.b32.xlu0 %v6416_v10, %s3932_s8 }
 0x313   : > { %2642 = vrot.lane.b32.xlu1 %v6417_v44, %s3933_s9  ;;  %3739 = vmatmul.mubr.msk.f32.vlgmr.msra.gmra.mrb[30].mxu1 %vm2900_vm0, %v6026_v61 }
 0x314   : > { %v2387_v9 = vpop.permute.xlu0 %2386  ;;  %3741 = vmatprep.mubr.msk.f32.mxu1 %vm3926_vm4, %v6415_v37 }
 0x315   : > { %v2385_v15 = vpop.permute.xlu1 %2384 }
 0x316   : > { %2624 = vrot.lane.b32.xlu0 %v6418_v53, %s3933_s9  ;;  %v2474_v55 = vadd.f32 %v2385_v15, %v2232_v25 }
 0x317   : > { %2402 = vrot.lane.b32.xlu1 %v5822_v35, %s3932_s8  ;;  %3742 = vmatmul.mubr.msk.f32.gmra.mrb[32].mxu1 %vm2900_vm0, %v6038_v52 }
 0x318   : > { %v6046_v26 = vpop.permute.xlu0 %2128  ;;  %3744 = vmatprep.mubr.msk.f32.mxu1 %vm3926_vm4, %v6415_v37 }
 0x319   : > { %v2389_v2 = vpop.permute.xlu1 %2388 }
 0x31b   : > { %2644 = vrot.lane.b32.xlu1 %v5825_v56, %s3933_s9  ;;  %3745 = vmatmul.mubr.msk.f32.gmra.mrb[34].mxu1 %vm2900_vm0, %v6051_v11  ;;  %v2222_v56 = vadd.f32 %v5965_v47, %v5889_v23  ;;  %v6421_v23 = vld [vmem:[#allocation40_spill] sm:$0xff] }
 0x31c   : > { %v6057_v35 = vpop.permute.xlu0 %2148  ;;  %3747 = vmatprep.mubr.msk.f32.mxu1 %vm3926_vm4, %v6415_v37  ;;  %v1991_v47 = vadd.f32 %v5951_v22, %v6421_v23  ;;  %v1992_v22 = vadd.f32 %v5936_v28, %v6422_v20 }
 0x31d   : > { %v6059_v60 = vpop.permute.xlu1 %2130  ;;  %v2464_v6 = vadd.f32 %v2365_v3, %v2222_v56 }
 0x31e   : > { %v2233_v46 = vadd.f32 %v5981_v48, %v1991_v47  ;;  %v2234_v45 = vadd.f32 %v5963_v5, %v1992_v22 }
 0x31f   : > { %3748 = vmatmul.mubr.msk.f32.gmra.mrb[36].mxu1 %vm2900_vm0, %v6064_v1 }
 0x320   : > { %v2607_v50 = vpop.permute.xlu0 %2606  ;;  %3750 = vmatprep.mubr.msk.f32.mxu1 %vm3926_vm4, %v6415_v37  ;;  %v2475_v59 = vadd.f32 %v2387_v9, %v2233_v46  ;;  %v2476_v18 = vadd.f32 %v2389_v2, %v2234_v45 }
 0x321   : > { %v6070_v27 = vpop.permute.xlu1 %2150  ;;  %v2706_v38 = vadd.f32 %v2607_v50, %v2464_v6 }
 0x323   : > { %3751 = vmatmul.mubr.msk.f32.gmra.mrb[38].mxu1 %vm2900_vm0, %v6075_v36  ;;  %v2753_v12 = vadd.f32 %v6097_v41, %v2706_v38 }
 0x324   : > { %v2611_v62 = vpop.permute.xlu0 %2610  ;;  %3773 = vmatprep.mubr.msk.f32.mxu1 %vm3926_vm4, %v6415_v37 }
 0x325   : > { %v2609_v4 = vpop.permute.xlu1 %2608  ;;  %v2708_v3 = vadd.f32 %v2611_v62, %v2466_v43  ;;  %v2793_v21 = vmax.f32 %v2753_v12, 0.0 }
 0x326   : > { %v2707_v13 = vadd.f32 %v2609_v4, %v2465_v42 }
 0x327   : > { %v2755_v57 = vadd.f32 %v6097_v41, %v2708_v3  ;;  %v6425_v3 = vld [vmem:[#allocation48_spill] sm:$0xff] }
 0x328   : > { %v2629_v32 = vpop.permute.xlu0 %2628  ;;  %v2754_v48 = vadd.f32 %v6097_v41, %v2707_v13  ;;  %v6423_v13 = vld [vmem:[#allocation46_spill] sm:$0xff] }
 0x329   : > { %v2627_v19 = vpop.permute.xlu1 %2626  ;;  %v2717_v51 = vadd.f32 %v2629_v32, %v2475_v59  ;;  %v2795_v56 = vmax.f32 %v2755_v57, 0.0  ;;  %v1983_v43 = vadd.f32 %v5994_v49, %v6423_v13  ;;  %v1984_v32 = vadd.f32 %v6002_v24, %v6425_v3  ;;  %v6427_v3 = vld [vmem:[#allocation32_spill] sm:$0xff] }
 0x32a   : > { %v2716_v7 = vadd.f32 %v2627_v19, %v2474_v55  ;;  %v2794_v34 = vmax.f32 %v2754_v48, 0.0  ;;  %v6424_v55 = vld [vmem:[#allocation43_spill] sm:$0xff] }
 0x32b   : > { %v2764_v28 = vadd.f32 %v6097_v41, %v2717_v51  ;;  %v2225_v59 = vadd.f32 %v6046_v26, %v1983_v43  ;;  %v1993_v12 = vadd.f32 %v6000_v39, %v6424_v55 }
 0x32c   : > { %v2763_v31 = vadd.f32 %v6097_v41, %v2716_v7  ;;  %v6105_v10 = vpop.permute.xlu0 %1890  ;;  %v2226_v7 = vadd.f32 %v6059_v60, %v1984_v32 }
 0x32d   : > { %v2631_v44 = vpop.permute.xlu1 %2630  ;;  %v2804_v9 = vmax.f32 %v2764_v28, 0.0  ;;  %v2235_v51 = vadd.f32 %v6057_v35, %v1993_v12  ;;  %v6426_v28 = vld [vmem:[#allocation45_spill] sm:$0xff] }
 0x32e   : > { %v2803_v15 = vmax.f32 %v2763_v31, 0.0  ;;  %v2718_v33 = vadd.f32 %v2631_v44, %v2476_v18  ;;  %v1994_v49 = vadd.f32 %v6012_v0, %v6426_v28 }
 0x32f   : > { %v3018_v5 = vmax.f32 %v2794_v34, %v2804_v9 }
 0x330   : > { %v3017_v53 = vmax.f32 %v2793_v21, %v2803_v15  ;;  %v2765_v29 = vadd.f32 %v6097_v41, %v2718_v33  ;;  %v6108_v8 = vpop.permute.xlu0 %1910  ;;  %v2236_v39 = vadd.f32 %v6070_v27, %v1994_v49 }
 0x331   : > { %v6110_v2 = vpop.permute.xlu1 %1892  ;;  %v3038_v50 = vrot.slane %v3018_v5, 1 }
 0x332   : > { %v3037_v14 = vrot.slane %v3017_v53, 1  ;;  %v2805_v54 = vmax.f32 %v2765_v29, 0.0 }
 0x334   : > { %v3039_v17 = vsel %vm1444_vm1, %v3037_v14, %v3038_v50  ;;  %v3019_v6 = vmax.f32 %v2795_v56, %v2805_v54  ;;  %v2371_v58 = vpop.permute.xlu0 %2370 }
 0x335   : > { %v3066_v63 = vmax.f32 %v3017_v53, %v3039_v17  ;;  %v6113_v23 = vpop.permute.xlu1 %1912  ;;  %v2467_v19 = vadd.f32 %v2371_v58, %v2225_v59 }
 0x336   : > { %v3040_v47 = vrot.slane %v3019_v6, 1 }
 0x338   : > { %v3041_v42 = vsel %vm1444_vm1, %v3038_v50, %v3040_v47  ;;  %v2391_v30 = vpop.permute.xlu0 %2390 }
 0x339   : > { %v2373_v38 = vpop.permute.xlu1 %2372  ;;  %v3067_v62 = vmax.f32 %v3018_v5, %v3041_v42  ;;  %v2477_v31 = vadd.f32 %v2391_v30, %v2235_v51 }
 0x33a   : > { %v2468_v21 = vadd.f32 %v2373_v38, %v2226_v7  ;;  %v6429_v7 = vld [vmem:[#allocation10_spill] sm:$0xff] }
 0x33b   : > { %v3809_v4 = vpack.c.bf16 %v3067_v62, %v3066_v63 }
 0x33c   : > { %v2133_v25 = vpop.permute.xlu0 %2132 }
 0x33d   : > { %3810 = vmatpush3.bf16.msra.mxu1 %v3809_v4  ;;  %v2393_v46 = vpop.permute.xlu1 %2392 }
 0x33e   : > { %3811 = vmatprep.subr.bf16.mxu1 %v6349_v16  ;;  %v2478_v9 = vadd.f32 %v2393_v46, %v2236_v39  ;;  %v6430_v39 = vld [vmem:[#allocation49_spill] sm:$0xff] }
 0x340   : > { %v2153_v20 = vpop.permute.xlu0 %2152 }
 0x341   : > { %v2135_v22 = vpop.permute.xlu1 %2134 }
 0x344   : > { %v2613_v45 = vpop.permute.xlu0 %2612 }
 0x345   : > { %v2155_v48 = vpop.permute.xlu1 %2154  ;;  %v2709_v18 = vadd.f32 %v2613_v45, %v2467_v19 }
 0x347   : > { %v2756_v44 = vadd.f32 %v6097_v41, %v2709_v18  ;;  %v1986_v18 = vadd.f32 %v6110_v2, %v6429_v7 }
 0x348   : > { %v2633_v26 = vpop.permute.xlu0 %2632 }
 0x349   : > { %v2615_v57 = vpop.permute.xlu1 %2614  ;;  %v2719_v24 = vadd.f32 %v2633_v26, %v2477_v31  ;;  %v2796_v33 = vmax.f32 %v2756_v44, 0.0  ;;  %v2228_v26 = vadd.f32 %v2135_v22, %v1986_v18  ;;  %v1996_v44 = vadd.f32 %v6113_v23, %v6430_v39  ;;  %v6432_v18 = vld [vmem:[#allocation37_spill] sm:$0xff] }
 0x34a   : > { %v2710_v34 = vadd.f32 %v2615_v57, %v2468_v21 }
 0x34b   : > { %v2766_v15 = vadd.f32 %v6097_v41, %v2719_v24 }
 0x34c   : > { %v6131_v35 = vpop.permute.xlu0 %1894  ;;  %v2757_v0 = vadd.f32 %v6097_v41, %v2710_v34 }
 0x34d   : > { %v2635_v60 = vpop.permute.xlu1 %2634  ;;  %v2806_v5 = vmax.f32 %v2766_v15, 0.0 }
 0x34e   : > { %v2720_v53 = vadd.f32 %v2635_v60, %v2478_v9  ;;  %v2797_v54 = vmax.f32 %v2757_v0, 0.0 }
 0x34f   : > { %v3020_v29 = vmax.f32 %v2796_v33, %v2806_v5 }
 0x350   : > { %v2767_v56 = vadd.f32 %v6097_v41, %v2720_v53  ;;  %v6135_v50 = vpop.permute.xlu0 %1914 }
 0x351   : > { %v6137_v27 = vpop.permute.xlu1 %1896  ;;  %v3042_v14 = vrot.slane %v3020_v29, 1 }
 0x352   : > { %v2807_v17 = vmax.f32 %v2767_v56, 0.0 }
 0x353   : > { %v3043_v58 = vsel %vm1444_vm1, %v3040_v47, %v3042_v14  ;;  %v1985_v47 = vadd.f32 %v6105_v10, %v6427_v3 }
 0x354   : > { %v6139_v63 = vmax.f32 %v2797_v54, %v2807_v17  ;;  %v2375_v42 = vpop.permute.xlu0 %2374  ;;  %v3068_v38 = vmax.f32 %v3019_v6, %v3043_v58  ;;  %v6428_v6 = vld [vmem:[#allocation47_spill] sm:$0xff] }
 0x355   : > { %v6142_v30 = vpop.permute.xlu1 %1916  ;;  %v2227_v45 = vadd.f32 %v2133_v25, %v1985_v47  ;;  %v1995_v51 = vadd.f32 %v6108_v8, %v6428_v6  ;;  %v2238_v25 = vadd.f32 %v2155_v48, %v1996_v44  ;;  %v6434_v44 = vld [vmem:[#allocation8_spill] sm:$0xff] }
 0x356   : > { %v3044_v62 = vrot.slane %v6139_v63, 1 }
 0x357   : > { %v2469_v28 = vadd.f32 %v2375_v42, %v2227_v45  ;;  %v2237_v21 = vadd.f32 %v2153_v20, %v1995_v51 }
 0x358   : > { %v3045_v4 = vsel %vm1444_vm1, %v3042_v14, %v3044_v62  ;;  %v2395_v46 = vpop.permute.xlu0 %2394 }
 0x359   : > { %v2377_v13 = vpop.permute.xlu1 %2376  ;;  %v3069_v43 = vmax.f32 %v3020_v29, %v3045_v4  ;;  %v2479_v24 = vadd.f32 %v2395_v46, %v2237_v21 }
 0x35a   : > { %v2470_v10 = vadd.f32 %v2377_v13, %v2228_v26 }
 0x35b   : > { %v3812_v59 = vpack.c.bf16 %v3069_v43, %v3068_v38 }
 0x35c   : > { %v2137_v55 = vpop.permute.xlu0 %2136 }
 0x35d   : > { %3813 = vmatpush3.bf16.msra.mxu1 %v3812_v59  ;;  %v2397_v12 = vpop.permute.xlu1 %2396  ;;  %v6431_v59 = vld [vmem:[#allocation12_spill] sm:$0xff] }
 0x35e   : > { %3814 = vmatprep.subr.bf16.mxu1 %v6349_v16  ;;  %v2480_v33 = vadd.f32 %v2397_v12, %v2238_v25  ;;  %v1987_v12 = vadd.f32 %v6131_v35, %v6431_v59 }
 0x360   : > { %v2157_v32 = vpop.permute.xlu0 %2156  ;;  %v2229_v51 = vadd.f32 %v2137_v55, %v1987_v12 }
 0x361   : > { %v2139_v19 = vpop.permute.xlu1 %2138 }
 0x364   : > { %v2617_v49 = vpop.permute.xlu0 %2616 }
 0x365   : > { %v2159_v31 = vpop.permute.xlu1 %2158  ;;  %v2711_v57 = vadd.f32 %v2617_v49, %v2469_v28  ;;  %v1997_v28 = vadd.f32 %v6135_v50, %v6432_v18 }
 0x367   : > { %v2758_v15 = vadd.f32 %v6097_v41, %v2711_v57  ;;  %v2239_v57 = vadd.f32 %v2157_v32, %v1997_v28 }
 0x368   : > { %v2637_v34 = vpop.permute.xlu0 %2636 }
 0x369   : > { %v2619_v9 = vpop.permute.xlu1 %2618  ;;  %v2721_v8 = vadd.f32 %v2637_v34, %v2479_v24  ;;  %v2798_v20 = vmax.f32 %v2758_v15, 0.0  ;;  %v1998_v24 = vadd.f32 %v6142_v30, %v6434_v44 }
 0x36a   : > { %v2712_v60 = vadd.f32 %v2619_v9, %v2470_v10 }
 0x36b   : > { %v2768_v2 = vadd.f32 %v6097_v41, %v2721_v8  ;;  %v2240_v50 = vadd.f32 %v2159_v31, %v1998_v24  ;;  %v6435_v8 = vld [vmem:[#allocation24_spill] sm:$0xff] }
 0x36c   : > { %v1899_v5 = vpop.permute.xlu0 %1898  ;;  %v2759_v53 = vadd.f32 %v6097_v41, %v2712_v60 }
 0x36d   : > { %v2639_v0 = vpop.permute.xlu1 %2638  ;;  %v2808_v22 = vmax.f32 %v2768_v2, 0.0  ;;  %v1989_v60 = vadd.f32 %v1899_v5, %v6435_v8 }
 0x36e   : > { %v2722_v29 = vadd.f32 %v2639_v0, %v2480_v33  ;;  %v2799_v17 = vmax.f32 %v2759_v53, 0.0 }
 0x36f   : > { %v3022_v23 = vmax.f32 %v2798_v20, %v2808_v22 }
 0x370   : > { %v2769_v56 = vadd.f32 %v6097_v41, %v2722_v29  ;;  %v2379_v14 = vpop.permute.xlu0 %2378  ;;  %v6436_v29 = vld [vmem:[#allocation53_spill] sm:$0xff] }
 0x371   : > { %v1919_v54 = vpop.permute.xlu1 %1918  ;;  %v3046_v48 = vrot.slane %v3022_v23, 1  ;;  %v2471_v21 = vadd.f32 %v2379_v14, %v2229_v51 }
 0x372   : > { %v2809_v58 = vmax.f32 %v2769_v56, 0.0 }
 0x373   : > { %v3047_v38 = vsel %vm1444_vm1, %v3044_v62, %v3046_v48  ;;  %v6433_v62 = vld [vmem:[#allocation18_spill] sm:$0xff] }
 0x374   : > { %v6159_v42 = vmax.f32 %v2799_v17, %v2809_v58  ;;  %v2399_v4 = vpop.permute.xlu0 %2398  ;;  %v3070_v13 = vmax.f32 %v6139_v63, %v3047_v38  ;;  %v1988_v49 = vadd.f32 %v6137_v27, %v6433_v62 }
 0x375   : > { %v2381_v46 = vpop.permute.xlu1 %2380  ;;  %v2481_v55 = vadd.f32 %v2399_v4, %v2239_v57 }
 0x376   : > { %v3048_v43 = vrot.slane %v6159_v42, 1  ;;  %v2230_v39 = vadd.f32 %v2139_v19, %v1988_v49 }
 0x378   : > { %v3049_v3 = vsel %vm1444_vm1, %v3046_v48, %v3048_v43  ;;  %v2141_v47 = vpop.permute.xlu0 %2140  ;;  %v2472_v10 = vadd.f32 %v2381_v46, %v2230_v39 }
 0x379   : > { %v2401_v45 = vpop.permute.xlu1 %2400  ;;  %v3071_v6 = vmax.f32 %v3022_v23, %v3049_v3  ;;  %v2231_v19 = vadd.f32 %v2141_v47, %v1989_v60  ;;  %v1999_v23 = vadd.f32 %v1919_v54, %v6436_v29 }
 0x37a   : > { %v2482_v33 = vadd.f32 %v2401_v45, %v2240_v50 }
 0x37b   : > { %v3815_v7 = vpack.c.bf16 %v3071_v6, %v3070_v13 }
 0x37c   : > { %v2621_v63 = vpop.permute.xlu0 %2620 }
 0x37d   : > { %3816 = vmatpush3.bf16.msra.mxu1 %v3815_v7  ;;  %v2161_v26 = vpop.permute.xlu1 %2160  ;;  %v2713_v35 = vadd.f32 %v2621_v63, %v2471_v21 }
 0x37e   : > { %3817 = vmatprep.subr.bf16.mxu1 %v6349_v16  ;;  %v2241_v48 = vadd.f32 %v2161_v26, %v1999_v23 }
 0x37f   : > { %v2760_v25 = vadd.f32 %v6097_v41, %v2713_v35 }
 0x380   : > { %v2641_v34 = vpop.permute.xlu0 %2640 }
 0x381   : > { %v2623_v9 = vpop.permute.xlu1 %2622  ;;  %v2723_v27 = vadd.f32 %v2641_v34, %v2481_v55  ;;  %v2800_v20 = vmax.f32 %v2760_v25, 0.0 }
 0x382   : > { %v2714_v15 = vadd.f32 %v2623_v9, %v2472_v10 }
 0x383   : > { %v2770_v32 = vadd.f32 %v6097_v41, %v2723_v27 }
 0x384   : > { %v2383_v2 = vpop.permute.xlu0 %2382  ;;  %v2761_v30 = vadd.f32 %v6097_v41, %v2714_v15 }
 0x385   : > { %v2643_v0 = vpop.permute.xlu1 %2642  ;;  %v2810_v22 = vmax.f32 %v2770_v32, 0.0  ;;  %v2473_v56 = vadd.f32 %v2383_v2, %v2231_v19 }
 0x386   : > { %v2724_v53 = vadd.f32 %v2643_v0, %v2482_v33  ;;  %v2801_v38 = vmax.f32 %v2761_v30, 0.0 }
 0x387   : > { %v3024_v31 = vmax.f32 %v2800_v20, %v2810_v22 }
 0x388   : > { %v2771_v14 = vadd.f32 %v6097_v41, %v2724_v53  ;;  %v2625_v17 = vpop.permute.xlu0 %2624 }
 0x389   : > { %v2403_v5 = vpop.permute.xlu1 %2402  ;;  %v3050_v58 = vrot.slane %v3024_v31, 1  ;;  %v2715_v46 = vadd.f32 %v2625_v17, %v2473_v56 }
 0x38a   : > { %v2811_v4 = vmax.f32 %v2771_v14, 0.0  ;;  %v2483_v59 = vadd.f32 %v2403_v5, %v2241_v48 }
 0x38b   : > { %v3051_v12 = vsel %vm1444_vm1, %v3048_v43, %v3050_v58  ;;  %v2762_v54 = vadd.f32 %v6097_v41, %v2715_v46 }
 0x38c   : > { %v3025_v13 = vmax.f32 %v2801_v38, %v2811_v4  ;;  %v3072_v47 = vmax.f32 %v6159_v42, %v3051_v12 }
 0x38d   : > { %v2645_v3 = vpop.permute.xlu1 %2644  ;;  %v2802_v28 = vmax.f32 %v2762_v54, 0.0 }
 0x38e   : > { %v3052_v45 = vrot.slane %v3025_v13, 1  ;;  %v2725_v6 = vadd.f32 %v2645_v3, %v2483_v59 }
 0x390   : > { %v2772_v51 = vadd.f32 %v6097_v41, %v2725_v6  ;;  %v3053_v7 = vsel %vm1444_vm1, %v3050_v58, %v3052_v45 }
 0x391   : > { %v3073_v18 = vmax.f32 %v3024_v31, %v3053_v7 }
 0x392   : > { %v2812_v62 = vmax.f32 %v2772_v51, 0.0 }
 0x393   : > { %v3818_v49 = vpack.c.bf16 %v3073_v18, %v3072_v47 }
 0x394   : > { %v3026_v21 = vmax.f32 %v2802_v28, %v2812_v62 }
 0x395   : > { %3819 = vmatpush3.bf16.msra.mxu1 %v3818_v49 }
 0x396   : > { %v3054_v63 = vrot.slane %v3026_v21, 1  ;;  %3820 = vmatprep.subr.bf16.mxu1 %v6349_v16 }
 0x398   : > { %v3055_v42 = vsel %vm1444_vm1, %v3052_v45, %v3054_v63  ;;  %v3075_v43 = vmax.f32 %v3026_v21, %v3054_v63  ;;  %vm3010_vm1 = vcmask 48128  }
 0x399   : > { %v3074_v26 = vmax.f32 %v3025_v13, %v3055_v42 }
 0x39b   : > { %v3821_v57 = vpack.c.bf16 %v3075_v43, %v3074_v26 }
 0x39d   : > { %3823 = vmatpush3.bf16.msk.msra.mxu1 %vm6015_vm14, %v3821_v57 }
 0x3a0   : > { %3774 = vmatmul.mubr.msk.f32.vlgmr.msra.gmra.mrb[40].mxu1 %vm2900_vm0, %v6026_v61 }
 0x3a1   : > { %3776 = vmatprep.mubr.msk.f32.mxu1 %vm3926_vm4, %v6415_v37 }
 0x3a4   : > { %3777 = vmatmul.mubr.msk.f32.gmra.mrb[42].mxu1 %vm2900_vm0, %v6038_v52 }
 0x3a5   : > { %3779 = vmatprep.mubr.msk.f32.mxu1 %vm3926_vm4, %v6415_v37 }
 0x3a8   : > { %3780 = vmatmul.mubr.msk.f32.gmra.mrb[44].mxu1 %vm2900_vm0, %v6051_v11 }
 0x3a9   : > { %3782 = vmatprep.mubr.msk.f32.mxu1 %vm3926_vm4, %v6415_v37 }
 0x3ac   : > { %3783 = vmatmul.mubr.msk.f32.gmra.mrb[46].mxu1 %vm2900_vm0, %v6064_v1 }
 0x3ad   : > { %3785 = vmatprep.mubr.msk.f32.mxu1 %vm3926_vm4, %v6415_v37  ;;  %vm3015_vm4 = vcmask 46080  }
 0x3b0   : > { %3786 = vmatmul.mubr.msk.f32.gmra.mrb[48].mxu1 %vm2900_vm0, %v6075_v36 }
 0x3e6   : > { %v2986_v16 = vpop.f32.mrb[30].mxu1 }
 0x3e7   : > { %3011 = vst.msk [vmem:[%s6212_s28] sm:$0xff] %vm3010_vm1, %v2986_v16  ;;  %v3740_v40 = vpop.f32.mrb[31].mxu1 }
 0x3ea   : > { %v2991_v37 = vpop.f32.mrb[32].mxu1 }
 0x3eb   : > { %3012 = vst.msk [vmem:[%s6212_s28 + $0x8] sm:$0xff] %vm3010_vm1, %v2991_v37  ;;  %v3743_v61 = vpop.f32.mrb[33].mxu1 }
 0x3ee   : > { %v2996_v52 = vpop.f32.mrb[34].mxu1 }
 0x3ef   : > { %3013 = vst.msk [vmem:[%s6212_s28 + $0x10] sm:$0xff] %vm3010_vm1, %v2996_v52  ;;  %v3746_v11 = vpop.f32.mrb[35].mxu1 }
 0x3f2   : > { %v3001_v1 = vpop.f32.mrb[36].mxu1 }
 0x3f3   : > { %3014 = vst.msk [vmem:[%s6212_s28 + $0x18] sm:$0xff] %vm3010_vm1, %v3001_v1  ;;  %v3749_v36 = vpop.f32.mrb[37].mxu1 }
 0x3f6   : > { %v3006_v41 = vpop.f32.mrb[38].mxu1 }
 0x3f7   : > { %3016 = vst.msk [vmem:[%s6212_s28 + $0x20] sm:$0x3f] %vm3015_vm4, %v3006_v41  ;;  %v3752_v39 = vpop.f32.mrb[39].mxu1 }
 0x473   : > { %v3145_v35 = vpop.f32.mrb[40].mxu1 }
 0x474   : > { %3511 = vst.msk [vmem:[%s6212_s28 + $0x28] sm:$0xff] %vm3010_vm1, %v3145_v35  ;;  %v3775_v44 = vpop.f32.mrb[41].mxu1 }
 0x477   : > { %v3150_v24 = vpop.f32.mrb[42].mxu1 }
 0x478   : > { %3512 = vst.msk [vmem:[%s6212_s28 + $0x30] sm:$0xff] %vm3010_vm1, %v3150_v24  ;;  %v3778_v55 = vpop.f32.mrb[43].mxu1 }
 0x47b   : > { %v3155_v10 = vpop.f32.mrb[44].mxu1 }
 0x47c   : > { %3513 = vst.msk [vmem:[%s6212_s28 + $0x38] sm:$0xff] %vm3010_vm1, %v3155_v10  ;;  %v3781_v34 = vpop.f32.mrb[45].mxu1 }
 0x47f   : > { %v3160_v9 = vpop.f32.mrb[46].mxu1 }
 0x480   : > { %3514 = vst.msk [vmem:[%s6212_s28 + $0x40] sm:$0xff] %vm3010_vm1, %v3160_v9  ;;  %v3784_v50 = vpop.f32.mrb[47].mxu1 }
 0x483   : > { %v3165_v25 = vpop.f32.mrb[48].mxu1 }
 0x484   : > { %3515 = vst.msk [vmem:[%s6212_s28 + $0x48] sm:$0x3f] %vm3015_vm4, %v3165_v25  ;;  %v3787_v27 = vpop.f32.mrb[49].mxu1 }
 0x485 PF: > { %s13_s16 = sadd.s32 1, %s3920_s16   ;;  %s6437_s12 = smov %s3912_s14 }
 0x486   : > { %p10_p7 = scmp.ge.s32.totalorder %s13_s16, 40   ;;  %s6438_s13 = smov %s3916_s15 }
 0x487   : > { %s6439_s14 = smov %s6442_s17  ;;  %s6440_s15 = smov %s6446_s18 }
 0x488   :  { %12 = sbr.rel (!%p10_p7) target bundleno = 3 (0x3), region = 68 }

// kernel: network_forward.4
= control target key start
LH: loop header
LB: loop body
LE: loop exit
PB: predicated region body
PF: predicated region fallthrough
CT: control target
= control target key end

     0   :  { %s1495_s12 = smov 0   ;;  %s1497_s13 = smov 0   ;;  %s1967_s0 = inlined_call_operand.vmem [shape: f32[2,1452,6], index: 0, kind: input, shape index: {}]   ;;  %s1968_s1 = inlined_call_operand.vmem [shape: f32[30,80], index: 1, kind: input, shape index: {}]   ;;  %s1969_s2 = inlined_call_operand.vmem [shape: f32[1,16], index: 2, kind: input, shape index: {}]   ;;  %s1970_s3 = inlined_call_operand.vmem [shape: f32[2,17,17,16], index: 3, kind: output, shape index: {}]  }
   0x1   :  { %s1499_s14 = smov 0   ;;  %s1501_s15 = smov 0  }
   0x2   :  { %s1503_s16 = smov 0  }
   0x3 LB: > { %s22_s17 = sadd.s32 1, %s1453_s14  ;;  %s25_s18 = sadd.s32 1, %s1457_s15  ;;  %s1461_s16 = sphi %s1503_s16, %s13_s16   ;;  %s1457_s15 = sphi %s1501_s15, %s1974_s15   ;;  %s1453_s14 = sphi %s1499_s14, %s1973_s14   ;;  %s1449_s13 = sphi %s1497_s13, %s1972_s13   ;;  %s1445_s12 = sphi %s1495_s12, %s1971_s12  }
   0x4   : > { %p23_p0 = scmp.ge.s32.totalorder %s22_s17, 17  ;;  %p1199_p1 = scmp.ge.s32.totalorder %s1461_s16, 1 }
   0x5   : > { %p151_p2 = scmp.lt.s32.totalorder %s1461_s16, 35 }
   0x6   : > { %s1976_s17 = smov (%p23_p0, %s22_s17), 0  ;;  %s1978_s18 = smov (!%p23_p0, %s25_s18), %s1457_s15 }
   0x7   : > { %p152_p3 = pnand %p1199_p1, %p151_p2  ;;  %p27_p4 = scmp.ge.s32.totalorder %s1978_s18, 2 }
   0x8   : > { %p179_p5 = scmp.lt.s32.totalorder (!%p152_p3), %s1449_s13, 1  ;;  %v510_v0 = vld [vmem:[%s1968_s1] sm:$0xff] (!%p152_p3)  ;;  %v511_v1 = vld [vmem:[%s1968_s1 + $0x8] sm:$0xff] (!%p152_p3)  ;;  %v1463_v2 = vmov (!%p152_p3), 0.0|0.0   ;;  %s193_s23 = smul.u32 (!%p152_p3), 76, %s1445_s12  ;;  %v512_v4 = vld [vmem:[%s1968_s1 + $0x10] sm:$0xff] (!%p152_p3) }
   0x9   : > { %s1980_s18 = smov (%p27_p4, %s1978_s18), 0  ;;  %155 = sbr.rel (%p152_p3) target bundleno = 852 (0x354), region = 32 }
   0xa   : > { %1351 = vmatprep.subr.bf16.mxu0 (!%p152_p3), %v1463_v2  ;;  %v1352_v3 = vpack.c.bf16 (!%p152_p3), %v511_v1, %v510_v0  ;;  %1364 = vmatprep.subr.bf16.mxu1 (!%p152_p3), %v1463_v2  ;;  %v513_v5 = vld [vmem:[%s1968_s1 + $0x18] sm:$0x3f] (!%p152_p3)  ;;  %vm548_vm0 = vcmask (!%p152_p3), 1045504   ;;  %vm1464_vm1 = vmmov (!%p152_p3), 1   ;;  %s1465_s6 = smov (!%p152_p3), 18   ;;  %s1466_s7 = smov (!%p152_p3), 6  }
   0xb   : > { %v1355_v6 = vpack.c.bf16 (!%p152_p3), %v513_v5, %v512_v4  ;;  %vm1356_vm2 = vmpackc.low (!%p152_p3), %vm548_vm0, %vm1464_vm1  ;;  %vm1467_vm3 = vmmov (!%p152_p3), 0   ;;  %v1468_v11 = vmov (!%p152_p3), 0.0   ;;  %s1469_s8 = smov (!%p152_p3), 24   ;;  %s1470_s9 = smov (!%p152_p3), 12   ;;  %vm206_vm4 = vcmask (!%p152_p3), 48128  }
   0xc   : > { %1353 = vmatpush3.bf16.msra.mxu0 (!%p152_p3), %v1352_v3  ;;  %1366 = vmatpush3.bf16.msra.mxu1 (!%p152_p3), %v1352_v3  ;;  %vm276_vm5 = vcmask (!%p152_p3), 97328   ;;  %vm346_vm6 = vcmask (!%p152_p3), 146528   ;;  %vm416_vm7 = vcmask (!%p152_p3), 195728   ;;  %vm486_vm8 = vcmask (!%p152_p3), 244928   ;;  %s1471_s10 = smov (!%p152_p3), 112   ;;  %s1472_s11 = smov (!%p152_p3), 96  }
   0xd   : > { %1354 = vmatprep.subr.bf16.mxu0 (!%p152_p3), %v1463_v2  ;;  %1365 = vmatprep.subr.bf16.mxu1 (!%p152_p3), %v1463_v2  ;;  %vm514_vm9 = vcmask (!%p152_p3), 244736   ;;  %vm681_vm10 = vcmask (!%p152_p3), 1046528   ;;  %vm848_vm11 = vcmask (!%p152_p3), 1043456   ;;  %vm792_vm12 = vcmask (!%p152_p3), 1044480   ;;  %s1473_s19 = smov (!%p152_p3), 64   ;;  %s1474_s20 = smov (!%p152_p3), 80  }
   0xe   : > { %1299 = vmatprep.mubr.msk.f32.mxu0 (!%p152_p3), %vm1467_vm3, %v1468_v11  ;;  %1320 = vmatprep.mubr.msk.f32.mxu1 (!%p152_p3), %vm1467_vm3, %v1468_v11  ;;  %vm217_vm13 = vcmask (!%p152_p3), 44032   ;;  %vm952_vm14 = vcmask (!%p152_p3), 1041408   ;;  %vm287_vm15 = vcmask (!%p152_p3), 93232   ;;  %vm427_vm1 = vcmask (!%p152_p3), 191632   ;;  %p186_p6 = scmp.lt.s32.totalorder (!%p152_p3), %s1445_s12, 16 }
  0x10   : > { %s1982_s13 = smov (!%p179_p5, %s1449_s13), 1  ;;  %1357 = vmatpush3.bf16.msk.msra.mxu0 %vm1356_vm2, %v1355_v6  ;;  %1367 = vmatpush3.bf16.msk.msra.mxu1 %vm1356_vm2, %v1355_v6  ;;  %vm497_vm2 = vcmask 240832   ;;  %s1984_s12 = smov (!%p186_p6, %s1445_s12), 16 }
  0x11   : > { %s1368_s24 = smul.u32 1456, %s1982_s13  ;;  %1358 = vmatprep.subr.bf16.mxu1 %v1463_v2 }
  0x13   : > { %s183_s4 = scalar_lea.vmem %s1967_s0, %s1368_s24  ;;  %s1369_s24 = smul.u32 3, %s1984_s12 }
  0x14   : > { %s1551_s5 = scalar_lea.vmem %s183_s4, %s193_s23  ;;  %s1370_s23 = smul.u32 51, %s1982_s13 }
  0x15   : > { %v1224_v7 = vld [vmem:[%s1551_s5 + $0x72] sm:$0xff]  ;;  %v1202_v8 = vld [vmem:[%s1551_s5 + $0x26] sm:$0xff]  ;;  %v1225_v15 = vld [vmem:[%s1551_s5 + $0x7a] sm:$0xff] }
  0x16   : > { %383 = vrot.lane.b32.xlu1 %v1224_v7, %s1465_s6  ;;  %243 = vrot.lane.b32.xlu0 %v1202_v8, %s1466_s7  ;;  %v1235_v9 = vld [vmem:[%s1551_s5 + $0x98] sm:$0xff]  ;;  %v1213_v10 = vld [vmem:[%s1551_s5 + $0x4c] sm:$0xff]  ;;  %s190_s25 = sadd.s32 %s1370_s23, %s1369_s24 }
  0x17   : > { %v1214_v12 = vld [vmem:[%s1551_s5 + $0x54] sm:$0xff]  ;;  %v1236_v14 = vld [vmem:[%s1551_s5 + $0xa0] sm:$0xff]  ;;  %v196_v19 = vld [vmem:[%s1551_s5 + $0x8] sm:$0xff]  ;;  %s1201_s26 = sshll.u32 %s190_s25, 3 }
  0x18   : > { %v1203_v13 = vld [vmem:[%s1551_s5 + $0x2e] sm:$0xff]  ;;  %v1215_v16 = vld [vmem:[%s1551_s5 + $0x5c] sm:$0xff]  ;;  %208 = vst.msk [vmem:[#allocation2 + $0x8] sm:$0xff] %vm206_vm4, %v196_v19  ;;  %v1216_v25 = vld [vmem:[%s1551_s5 + $0x64] sm:$0xff]  ;;  %s192_s29 = scalar_lea.vmem %s1970_s3, %s1201_s26 }
  0x19   : > { %v1204_v17 = vld [vmem:[%s1551_s5 + $0x36] sm:$0xff]  ;;  %v195_v18 = vld [vmem:[%s1551_s5] sm:$0xff]  ;;  %v1237_v22 = vld [vmem:[%s1551_s5 + $0xa8] sm:$0xff] }
  0x1a   : > { %453 = vrot.lane.b32.xlu1 %v1235_v9, %s1469_s8  ;;  %313 = vrot.lane.b32.xlu0 %v1213_v10, %s1470_s9  ;;  %207 = vst.msk [vmem:[#allocation2] sm:$0xff] %vm206_vm4, %v195_v18  ;;  %v197_v20 = vld [vmem:[%s1551_s5 + $0x10] sm:$0xff]  ;;  %v198_v21 = vld [vmem:[%s1551_s5 + $0x18] sm:$0xff] }
  0x1b   : > { %209 = vst.msk [vmem:[#allocation2 + $0x10] sm:$0xff] %vm206_vm4, %v197_v20  ;;  %210 = vst.msk [vmem:[#allocation2 + $0x18] sm:$0xff] %vm206_vm4, %v198_v21  ;;  %v1226_v23 = vld [vmem:[%s1551_s5 + $0x82] sm:$0xff]  ;;  %v1238_v27 = vld [vmem:[%s1551_s5 + $0xb0] sm:$0xff] }
  0x1c   : > { %v199_v24 = vld [vmem:[%s1551_s5 + $0x20] sm:$0xff]  ;;  %v1227_v28 = vld [vmem:[%s1551_s5 + $0x8a] sm:$0xff]  ;;  %v202_v29 = vld [vmem:[%s1551_s5 + $0x38] sm:$0xff] }
  0x1d   : > { %211 = vst.msk [vmem:[#allocation2 + $0x20] sm:$0xff] %vm206_vm4, %v199_v24  ;;  %v1205_v26 = vld [vmem:[%s1551_s5 + $0x3e] sm:$0xff]  ;;  %214 = vst.msk [vmem:[#allocation2 + $0x38] sm:$0xff] %vm206_vm4, %v202_v29  ;;  %v200_v30 = vld [vmem:[%s1551_s5 + $0x28] sm:$0xff] }
  0x1e   : > { %315 = vrot.lane.b32.xlu1 %v1214_v12, %s1470_s9  ;;  %245 = vrot.lane.b32.xlu0 %v1203_v13, %s1466_s7  ;;  %212 = vst.msk [vmem:[#allocation2 + $0x28] sm:$0xff] %vm206_vm4, %v200_v30  ;;  %v1217_v31 = vld [vmem:[%s1551_s5 + $0x6c] sm:$0xff]  ;;  %v1239_v33 = vld [vmem:[%s1551_s5 + $0xb8] sm:$0xff] }
  0x1f   : > { %v1206_v32 = vld [vmem:[%s1551_s5 + $0x46] sm:$0xff]  ;;  %v1228_v34 = vld [vmem:[%s1551_s5 + $0x92] sm:$0xff]  ;;  %v1209_v35 = vld [vmem:[%s1551_s5 + $0x5e] sm:$0xff] }
  0x20   : > { %v1207_v36 = vld [vmem:[%s1551_s5 + $0x4e] sm:$0xff]  ;;  %v1220_v37 = vld [vmem:[%s1551_s5 + $0x84] sm:$0xff]  ;;  %v1229_v42 = vld [vmem:[%s1551_s5 + $0x9a] sm:$0xff] }
  0x21   : > { %v1218_v38 = vld [vmem:[%s1551_s5 + $0x74] sm:$0xff]  ;;  %v203_v39 = vld [vmem:[%s1551_s5 + $0x40] sm:$0xff]  ;;  %v1231_v41 = vld [vmem:[%s1551_s5 + $0xaa] sm:$0xff] }
  0x22   : > { %455 = vrot.lane.b32.xlu1 %v1236_v14, %s1469_s8  ;;  %385 = vrot.lane.b32.xlu0 %v1225_v15, %s1465_s6  ;;  %215 = vst.msk [vmem:[#allocation2 + $0x40] sm:$0xff] %vm206_vm4, %v203_v39  ;;  %v201_v40 = vld [vmem:[%s1551_s5 + $0x30] sm:$0xff]  ;;  %v1240_v44 = vld [vmem:[%s1551_s5 + $0xc0] sm:$0xff] }
  0x23   : > { %213 = vst.msk [vmem:[#allocation2 + $0x30] sm:$0xff] %vm206_vm4, %v201_v40  ;;  %v1242_v43 = vld [vmem:[%s1551_s5 + $0xd0] sm:$0xff]  ;;  %v1210_v45 = vld [vmem:[%s1551_s5 + $0x66] sm:$0xff]  ;;  %v1219_v48 = vld [vmem:[%s1551_s5 + $0x7c] sm:$0xff] }
  0x24   : > { %v1208_v46 = vld [vmem:[%s1551_s5 + $0x56] sm:$0xff]  ;;  %v1221_v47 = vld [vmem:[%s1551_s5 + $0x8c] sm:$0xff]  ;;  %v1230_v51 = vld [vmem:[%s1551_s5 + $0xa2] sm:$0xff] }
  0x25   : > { %v204_v49 = vld [vmem:[%s1551_s5 + $0x48] sm:$0xff]  ;;  %v1232_v50 = vld [vmem:[%s1551_s5 + $0xb2] sm:$0xff]  ;;  %v1233_v56 = vld [vmem:[%s1551_s5 + $0xba] sm:$0xff] }
  0x26   : > { %317 = vrot.lane.b32.xlu1 %v1215_v16, %s1470_s9  ;;  %247 = vrot.lane.b32.xlu0 %v1204_v17, %s1466_s7  ;;  %216 = vst.msk [vmem:[#allocation2 + $0x48] sm:$0xff] %vm206_vm4, %v204_v49  ;;  %v1243_v52 = vld [vmem:[%s1551_s5 + $0xd8] sm:$0xff]  ;;  %v1241_v53 = vld [vmem:[%s1551_s5 + $0xc8] sm:$0xff] }
  0x27   : > { %v1211_v54 = vld [vmem:[%s1551_s5 + $0x6e] sm:$0xff]  ;;  %v1244_v57 = vld [vmem:[%s1551_s5 + $0xe0] sm:$0xff] }
  0x28   : > { %v1222_v55 = vld [vmem:[%s1551_s5 + $0x94] sm:$0xff] }
  0x2a   : > { %457 = vrot.lane.b32.xlu1 %v1237_v22, %s1469_s8  ;;  %387 = vrot.lane.b32.xlu0 %v1226_v23, %s1465_s6 }
  0x2e   : > { %319 = vrot.lane.b32.xlu1 %v1216_v25, %s1470_s9  ;;  %249 = vrot.lane.b32.xlu0 %v1205_v26, %s1466_s7 }
  0x32   : > { %459 = vrot.lane.b32.xlu1 %v1238_v27, %s1469_s8  ;;  %389 = vrot.lane.b32.xlu0 %v1227_v28, %s1465_s6 }
  0x36   : > { %321 = vrot.lane.b32.xlu1 %v1217_v31, %s1470_s9  ;;  %251 = vrot.lane.b32.xlu0 %v1206_v32, %s1466_s7 }
  0x3a   : > { %461 = vrot.lane.b32.xlu1 %v1239_v33, %s1469_s8  ;;  %391 = vrot.lane.b32.xlu0 %v1228_v34, %s1465_s6 }
  0x3e   : > { %257 = vrot.lane.b32.xlu1 %v1209_v35, %s1466_s7  ;;  %253 = vrot.lane.b32.xlu0 %v1207_v36, %s1466_s7 }
  0x42   : > { %327 = vrot.lane.b32.xlu1 %v1220_v37, %s1470_s9  ;;  %323 = vrot.lane.b32.xlu0 %v1218_v38, %s1470_s9 }
  0x46   : > { %397 = vrot.lane.b32.xlu1 %v1231_v41, %s1465_s6  ;;  %393 = vrot.lane.b32.xlu0 %v1229_v42, %s1465_s6 }
  0x4a   : > { %467 = vrot.lane.b32.xlu1 %v1242_v43, %s1469_s8  ;;  %463 = vrot.lane.b32.xlu0 %v1240_v44, %s1469_s8 }
  0x4e   : > { %259 = vrot.lane.b32.xlu1 %v1210_v45, %s1466_s7  ;;  %255 = vrot.lane.b32.xlu0 %v1208_v46, %s1466_s7 }
  0x52   : > { %329 = vrot.lane.b32.xlu1 %v1221_v47, %s1470_s9  ;;  %325 = vrot.lane.b32.xlu0 %v1219_v48, %s1470_s9 }
  0x56   : > { %399 = vrot.lane.b32.xlu1 %v1232_v50, %s1465_s6  ;;  %395 = vrot.lane.b32.xlu0 %v1230_v51, %s1465_s6 }
  0x5a   : > { %469 = vrot.lane.b32.xlu1 %v1243_v52, %s1469_s8  ;;  %465 = vrot.lane.b32.xlu0 %v1241_v53, %s1469_s8 }
  0x5e   : > { %261 = vrot.lane.b32.xlu0 %v1211_v54, %s1466_s7  ;;  %331 = vrot.lane.b32.xlu1 %v1222_v55, %s1470_s9 }
  0x62   : > { %401 = vrot.lane.b32.xlu0 %v1233_v56, %s1465_s6  ;;  %471 = vrot.lane.b32.xlu1 %v1244_v57, %s1469_s8 }
  0x88   : > { %v384_v58 = vpop.permute.xlu1 %383  ;;  %v244_v59 = vpop.permute.xlu0 %243 }
  0x89   : > { %277 = vst.msk [vmem:[#allocation2] sm:$0xff] %vm276_vm5, %v244_v59 }
  0x8c   : > { %v454_v60 = vpop.permute.xlu1 %453  ;;  %v314_v61 = vpop.permute.xlu0 %313 }
  0x8d   : > { %347 = vst.msk [vmem:[#allocation2] sm:$0xff] %vm346_vm6, %v314_v61 }
  0x8e   : > { %417 = vst.msk [vmem:[#allocation2] sm:$0xff] %vm416_vm7, %v384_v58 }
  0x8f   : > { %487 = vst.msk [vmem:[#allocation2] sm:$0xff] %vm486_vm8, %v454_v60 }
  0x90   : > { %v316_v62 = vpop.permute.xlu1 %315  ;;  %v246_v63 = vpop.permute.xlu0 %245 }
  0x91   : > { %278 = vst.msk [vmem:[#allocation2 + $0x8] sm:$0xff] %vm276_vm5, %v246_v63 }
  0x92   : > { %348 = vst.msk [vmem:[#allocation2 + $0x8] sm:$0xff] %vm346_vm6, %v316_v62 }
  0x94   : > { %v456_v0 = vpop.permute.xlu1 %455  ;;  %v386_v1 = vpop.permute.xlu0 %385 }
  0x95   : > { %418 = vst.msk [vmem:[#allocation2 + $0x8] sm:$0xff] %vm416_vm7, %v386_v1 }
  0x96   : > { %488 = vst.msk [vmem:[#allocation2 + $0x8] sm:$0xff] %vm486_vm8, %v456_v0  ;;  %v499_v3 = vld [vmem:[#allocation2] sm:$0xff] }
  0x97   : > { %1300 = vmatmul.mubr.msk.f32.vlgmr.msra.gmra.mrb[0].mxu0 %vm514_vm9, %v499_v3 }
  0x98   : > { %v318_v4 = vpop.permute.xlu1 %317  ;;  %v248_v5 = vpop.permute.xlu0 %247  ;;  %1302 = vmatprep.mubr.msk.f32.mxu0 %vm1467_vm3, %v1468_v11 }
  0x99   : > { %279 = vst.msk [vmem:[#allocation2 + $0x10] sm:$0xff] %vm276_vm5, %v248_v5 }
  0x9a   : > { %349 = vst.msk [vmem:[#allocation2 + $0x10] sm:$0xff] %vm346_vm6, %v318_v4 }
  0x9c   : > { %v458_v6 = vpop.permute.xlu1 %457  ;;  %v388_v7 = vpop.permute.xlu0 %387 }
  0x9d   : > { %419 = vst.msk [vmem:[#allocation2 + $0x10] sm:$0xff] %vm416_vm7, %v388_v7  ;;  %v500_v8 = vld [vmem:[#allocation2 + $0x8] sm:$0xff] }
  0x9e   : > { %489 = vst.msk [vmem:[#allocation2 + $0x10] sm:$0xff] %vm486_vm8, %v458_v6  ;;  %1303 = vmatmul.mubr.msk.f32.gmra.mrb[2].mxu0 %vm514_vm9, %v500_v8 }
  0x9f   : > { %1305 = vmatprep.mubr.msk.f32.mxu0 %vm1467_vm3, %v1468_v11 }
  0xa0   : > { %v320_v9 = vpop.permute.xlu1 %319  ;;  %v250_v10 = vpop.permute.xlu0 %249 }
  0xa1   : > { %280 = vst.msk [vmem:[#allocation2 + $0x18] sm:$0xff] %vm276_vm5, %v250_v10 }
  0xa2   : > { %350 = vst.msk [vmem:[#allocation2 + $0x18] sm:$0xff] %vm346_vm6, %v320_v9 }
  0xa4   : > { %v460_v12 = vpop.permute.xlu1 %459  ;;  %v390_v13 = vpop.permute.xlu0 %389 }
  0xa5   : > { %420 = vst.msk [vmem:[#allocation2 + $0x18] sm:$0xff] %vm416_vm7, %v390_v13  ;;  %v501_v14 = vld [vmem:[#allocation2 + $0x10] sm:$0xff] }
  0xa6   : > { %490 = vst.msk [vmem:[#allocation2 + $0x18] sm:$0xff] %vm486_vm8, %v460_v12  ;;  %1306 = vmatmul.mubr.msk.f32.gmra.mrb[4].mxu0 %vm514_vm9, %v501_v14 }
  0xa7   : > { %1308 = vmatprep.mubr.msk.f32.mxu0 %vm1467_vm3, %v1468_v11 }
  0xa8   : > { %v322_v15 = vpop.permute.xlu1 %321  ;;  %v252_v16 = vpop.permute.xlu0 %251 }
  0xa9   : > { %281 = vst.msk [vmem:[#allocation2 + $0x20] sm:$0xff] %vm276_vm5, %v252_v16 }
  0xaa   : > { %351 = vst.msk [vmem:[#allocation2 + $0x20] sm:$0xff] %vm346_vm6, %v322_v15 }
  0xac   : > { %v462_v17 = vpop.permute.xlu1 %461  ;;  %v392_v18 = vpop.permute.xlu0 %391 }
  0xad   : > { %421 = vst.msk [vmem:[#allocation2 + $0x20] sm:$0xff] %vm416_vm7, %v392_v18  ;;  %v502_v19 = vld [vmem:[#allocation2 + $0x18] sm:$0xff] }
  0xae   : > { %491 = vst.msk [vmem:[#allocation2 + $0x20] sm:$0xff] %vm486_vm8, %v462_v17  ;;  %1309 = vmatmul.mubr.msk.f32.gmra.mrb[6].mxu0 %vm514_vm9, %v502_v19 }
  0xaf   : > { %1311 = vmatprep.mubr.msk.f32.mxu0 %vm1467_vm3, %v1468_v11 }
  0xb0   : > { %v258_v20 = vpop.permute.xlu1 %257  ;;  %v254_v21 = vpop.permute.xlu0 %253 }
  0xb1   : > { %284 = vst.msk [vmem:[#allocation2 + $0x38] sm:$0xff] %vm276_vm5, %v258_v20  ;;  %282 = vst.msk [vmem:[#allocation2 + $0x28] sm:$0xff] %vm276_vm5, %v254_v21 }
  0xb4   : > { %v328_v22 = vpop.permute.xlu1 %327  ;;  %v324_v23 = vpop.permute.xlu0 %323 }
  0xb5   : > { %354 = vst.msk [vmem:[#allocation2 + $0x38] sm:$0xff] %vm346_vm6, %v328_v22  ;;  %352 = vst.msk [vmem:[#allocation2 + $0x28] sm:$0xff] %vm346_vm6, %v324_v23  ;;  %v503_v24 = vld [vmem:[#allocation2 + $0x20] sm:$0xff] }
  0xb6   : > { %1312 = vmatmul.mubr.msk.f32.gmra.mrb[8].mxu0 %vm514_vm9, %v503_v24 }
  0xb7   : > { %1314 = vmatprep.mubr.msk.f32.mxu0 %vm1467_vm3, %v1468_v11 }
  0xb8   : > { %v398_v25 = vpop.permute.xlu1 %397  ;;  %v394_v26 = vpop.permute.xlu0 %393 }
  0xb9   : > { %424 = vst.msk [vmem:[#allocation2 + $0x38] sm:$0xff] %vm416_vm7, %v398_v25  ;;  %422 = vst.msk [vmem:[#allocation2 + $0x28] sm:$0xff] %vm416_vm7, %v394_v26 }
  0xbc   : > { %v468_v27 = vpop.permute.xlu1 %467  ;;  %v464_v28 = vpop.permute.xlu0 %463 }
  0xbd   : > { %494 = vst.msk [vmem:[#allocation2 + $0x38] sm:$0xff] %vm486_vm8, %v468_v27  ;;  %492 = vst.msk [vmem:[#allocation2 + $0x28] sm:$0xff] %vm486_vm8, %v464_v28 }
  0xc0   : > { %v260_v29 = vpop.permute.xlu1 %259  ;;  %v256_v30 = vpop.permute.xlu0 %255 }
  0xc1   : > { %285 = vst.msk [vmem:[#allocation2 + $0x40] sm:$0xff] %vm276_vm5, %v260_v29  ;;  %283 = vst.msk [vmem:[#allocation2 + $0x30] sm:$0xff] %vm276_vm5, %v256_v30 }
  0xc4   : > { %v330_v31 = vpop.permute.xlu1 %329  ;;  %v326_v32 = vpop.permute.xlu0 %325  ;;  %v504_v33 = vld [vmem:[#allocation2 + $0x28] sm:$0xff]  ;;  %v506_v34 = vld [vmem:[#allocation2 + $0x38] sm:$0xff] }
  0xc5   : > { %355 = vst.msk [vmem:[#allocation2 + $0x40] sm:$0xff] %vm346_vm6, %v330_v31  ;;  %353 = vst.msk [vmem:[#allocation2 + $0x30] sm:$0xff] %vm346_vm6, %v326_v32  ;;  %1315 = vmatmul.mubr.msk.f32.gmra.mrb[10].mxu0 %vm514_vm9, %v504_v33  ;;  %1321 = vmatmul.mubr.msk.f32.vlgmr.msra.gmra.mrb[0].mxu1 %vm514_vm9, %v506_v34 }
  0xc6   : > { %1317 = vmatprep.mubr.msk.f32.mxu0 %vm1467_vm3, %v1468_v11  ;;  %1323 = vmatprep.mubr.msk.f32.mxu1 %vm1467_vm3, %v1468_v11 }
  0xc8   : > { %v400_v35 = vpop.permute.xlu1 %399  ;;  %v396_v36 = vpop.permute.xlu0 %395 }
  0xc9   : > { %425 = vst.msk [vmem:[#allocation2 + $0x40] sm:$0xff] %vm416_vm7, %v400_v35  ;;  %423 = vst.msk [vmem:[#allocation2 + $0x30] sm:$0xff] %vm416_vm7, %v396_v36 }
  0xcc   : > { %v470_v37 = vpop.permute.xlu1 %469  ;;  %v466_v38 = vpop.permute.xlu0 %465 }
  0xcd   : > { %495 = vst.msk [vmem:[#allocation2 + $0x40] sm:$0xff] %vm486_vm8, %v470_v37  ;;  %493 = vst.msk [vmem:[#allocation2 + $0x30] sm:$0xff] %vm486_vm8, %v466_v38 }
  0xd0   : > { %v262_v39 = vpop.permute.xlu0 %261  ;;  %v332_v40 = vpop.permute.xlu1 %331 }
  0xd1   : > { %286 = vst.msk [vmem:[#allocation2 + $0x48] sm:$0xff] %vm276_vm5, %v262_v39  ;;  %vm1006_vm5 = vcmask 1040384  }
  0xd2   : > { %356 = vst.msk [vmem:[#allocation2 + $0x48] sm:$0xff] %vm346_vm6, %v332_v40  ;;  %vm996_vm6 = vcmask 269312  }
  0xd4   : > { %v402_v41 = vpop.permute.xlu0 %401  ;;  %v472_v42 = vpop.permute.xlu1 %471  ;;  %v505_v43 = vld [vmem:[#allocation2 + $0x30] sm:$0xff]  ;;  %v507_v44 = vld [vmem:[#allocation2 + $0x40] sm:$0xff] }
  0xd5   : > { %426 = vst.msk [vmem:[#allocation2 + $0x48] sm:$0xff] %vm416_vm7, %v402_v41  ;;  %1318 = vmatmul.mubr.msk.f32.gmra.mrb[12].mxu0 %vm514_vm9, %v505_v43  ;;  %1324 = vmatmul.mubr.msk.f32.gmra.mrb[2].mxu1 %vm514_vm9, %v507_v44 }
  0xd6   : > { %496 = vst.msk [vmem:[#allocation2 + $0x48] sm:$0xff] %vm486_vm8, %v472_v42  ;;  %1326 = vmatprep.mubr.msk.f32.mxu1 %vm1467_vm3, %v1468_v11 }
  0xdd   : > { %v508_v45 = vld [vmem:[#allocation2 + $0x48] sm:$0xff] }
  0xde   : > { %1327 = vmatmul.mubr.msk.f32.gmra.mrb[4].mxu1 %vm514_vm9, %v508_v45 }
  0xdf   : > { %1329 = vmatprep.mubr.msk.f32.mxu1 %vm1467_vm3, %v1468_v11 }
 0x16a   : > { %v1726_v46 = vpop.f32.mrb[0].mxu0 }
 0x16b   : > { %v1301_v47 = vpop.f32.mrb[1].mxu0  ;;  %v682_v49 = vrot.slane %v1726_v46, 1  ;;  %v737_v50 = vrot.slane %v1726_v46, 2  ;;  %v849_v51 = vrot.slane %v1726_v46, 4  ;;  %v793_v52 = vrot.slane %v1726_v46, 3 }
 0x171   : > { %v1728_v48 = vpop.f32.mrb[2].mxu0 }
 0x172   : > { %v1304_v53 = vpop.f32.mrb[3].mxu0  ;;  %v683_v54 = vrot.slane %v1728_v48, 1  ;;  %v738_v55 = vrot.slane %v1728_v48, 2  ;;  %v850_v56 = vrot.slane %v1728_v48, 4  ;;  %v794_v57 = vrot.slane %v1728_v48, 3 }
 0x174   : > { %v684_v58 = vsel %vm681_vm10, %v682_v49, %v683_v54  ;;  %v739_v59 = vsel %vm548_vm0, %v737_v50, %v738_v55  ;;  %v851_v60 = vsel %vm848_vm11, %v849_v51, %v850_v56  ;;  %v1742_v61 = vsel %vm792_vm12, %v793_v52, %v794_v57 }
 0x175   : > { %701 = vrot.lane.b32.xlu0 %v684_v58, %s1471_s10 }
 0x179   : > { %756 = vrot.lane.b32.xlu0 %v739_v59, %s1472_s11  ;;  %v1746_v62 = vpop.f32.mrb[4].mxu0 }
 0x17a   : > { %v1307_v63 = vpop.f32.mrb[5].mxu0  ;;  %v796_v0 = vrot.slane %v1746_v62, 3  ;;  %v685_v1 = vrot.slane %v1746_v62, 1  ;;  %v740_v3 = vrot.slane %v1746_v62, 2  ;;  %v852_v4 = vrot.slane %v1746_v62, 4 }
 0x17c   : > { %v797_v5 = vsel %vm792_vm12, %v794_v57, %v796_v0  ;;  %v1754_v6 = vsel %vm681_vm10, %v683_v54, %v685_v1  ;;  %v1757_v7 = vsel %vm548_vm0, %v738_v55, %v740_v3  ;;  %v1760_v8 = vsel %vm848_vm11, %v850_v56, %v852_v4 }
 0x17d   : > { %868 = vrot.lane.b32.xlu0 %v851_v60, %s1473_s19 }
 0x181   : > { %814 = vrot.lane.b32.xlu0 %v797_v5, %s1474_s20  ;;  %v1764_v9 = vpop.f32.mrb[6].mxu0 }
 0x182   : > { %v1310_v10 = vpop.f32.mrb[7].mxu0  ;;  %v687_v12 = vrot.slane %v1764_v9, 1  ;;  %v742_v13 = vrot.slane %v1764_v9, 2  ;;  %v798_v14 = vrot.slane %v1764_v9, 3  ;;  %v854_v15 = vrot.slane %v1764_v9, 4 }
 0x184   : > { %v1771_v16 = vsel %vm681_vm10, %v685_v1, %v687_v12  ;;  %v1774_v17 = vsel %vm548_vm0, %v740_v3, %v742_v13  ;;  %v1777_v18 = vsel %vm792_vm12, %v796_v0, %v798_v14  ;;  %v1780_v19 = vsel %vm848_vm11, %v852_v4, %v854_v15 }
 0x189   : > { %v1782_v20 = vpop.f32.mrb[8].mxu0 }
 0x18a   : > { %v1313_v21 = vpop.f32.mrb[9].mxu0  ;;  %v689_v22 = vrot.slane %v1782_v20, 1  ;;  %v744_v23 = vrot.slane %v1782_v20, 2  ;;  %v800_v24 = vrot.slane %v1782_v20, 3  ;;  %v856_v25 = vrot.slane %v1782_v20, 4 }
 0x18c   : > { %v690_v26 = vsel %vm681_vm10, %v687_v12, %v689_v22  ;;  %v1790_v27 = vsel %vm548_vm0, %v742_v13, %v744_v23  ;;  %v1793_v28 = vsel %vm792_vm12, %v798_v14, %v800_v24  ;;  %v1796_v29 = vsel %vm848_vm11, %v854_v15, %v856_v25 }
 0x198   : > { %v1798_v30 = vpop.f32.mrb[10].mxu0  ;;  %v1800_v31 = vpop.f32.mrb[0].mxu1 }
 0x199   : > { %v1322_v32 = vpop.f32.mrb[1].mxu1  ;;  %v1316_v33 = vpop.f32.mrb[11].mxu0  ;;  %v691_v34 = vrot.slane %v1798_v30, 1  ;;  %v746_v35 = vrot.slane %v1798_v30, 2  ;;  %v802_v36 = vrot.slane %v1798_v30, 3  ;;  %v858_v37 = vrot.slane %v1798_v30, 4 }
 0x19a   : > { %v695_v44 = vrot.slane %v1800_v31, 1  ;;  %v750_v45 = vrot.slane %v1800_v31, 2  ;;  %v806_v47 = vrot.slane %v1800_v31, 3  ;;  %v862_v49 = vrot.slane %v1800_v31, 4 }
 0x19b   : > { %v692_v38 = vsel %vm681_vm10, %v689_v22, %v691_v34  ;;  %v747_v39 = vsel %vm548_vm0, %v744_v23, %v746_v35  ;;  %v803_v40 = vsel %vm792_vm12, %v800_v24, %v802_v36  ;;  %v859_v41 = vsel %vm848_vm11, %v856_v25, %v858_v37 }
 0x1a8   : > { %v1810_v42 = vpop.f32.mrb[12].mxu0  ;;  %v1812_v43 = vpop.f32.mrb[2].mxu1 }
 0x1a9   : > { %v1325_v50 = vpop.f32.mrb[3].mxu1  ;;  %v697_v51 = vrot.slane %v1812_v43, 1  ;;  %v1319_v52 = vpop.f32.mrb[13].mxu0  ;;  %v752_v53 = vrot.slane %v1812_v43, 2  ;;  %v808_v54 = vrot.slane %v1812_v43, 3  ;;  %v864_v55 = vrot.slane %v1812_v43, 4 }
 0x1aa   : > { %v693_v56 = vrot.slane %v1810_v42, 1  ;;  %v748_v57 = vrot.slane %v1810_v42, 2  ;;  %v804_v58 = vrot.slane %v1810_v42, 3  ;;  %v860_v59 = vrot.slane %v1810_v42, 4 }
 0x1ab   : > { %v698_v60 = vsel %vm681_vm10, %v695_v44, %v697_v51  ;;  %v753_v63 = vsel %vm548_vm0, %v750_v45, %v752_v53  ;;  %v809_v0 = vsel %vm792_vm12, %v806_v47, %v808_v54  ;;  %v865_v1 = vsel %vm848_vm11, %v862_v49, %v864_v55 }
 0x1ac   : > { %715 = vrot.lane.b32.xlu1 %v698_v60, %s1471_s10  ;;  %v696_v3 = vsel %vm681_vm10, %v693_v56, %v695_v44  ;;  %v751_v4 = vsel %vm548_vm0, %v748_v57, %v750_v45  ;;  %v694_v5 = vsel %vm681_vm10, %v691_v34, %v693_v56  ;;  %v807_v10 = vsel %vm792_vm12, %v804_v58, %v806_v47 }
 0x1ad   : > { %v749_v12 = vsel %vm548_vm0, %v746_v35, %v748_v57  ;;  %v863_v13 = vsel %vm848_vm11, %v860_v59, %v862_v49  ;;  %v805_v14 = vsel %vm792_vm12, %v802_v36, %v804_v58  ;;  %v861_v15 = vsel %vm848_vm11, %v858_v37, %v860_v59 }
 0x1b0   : > { %770 = vrot.lane.b32.xlu1 %v753_v63, %s1472_s11 }
 0x1b1   : > { %v663_v21 = vpop.f32.mrb[4].mxu1 }
 0x1b2   : > { %v699_v22 = vrot.slane %v663_v21, 1  ;;  %v754_v23 = vrot.slane %v663_v21, 2  ;;  %v810_v24 = vrot.slane %v663_v21, 3  ;;  %v866_v25 = vrot.slane %v663_v21, 4  ;;  %v1328_v32 = vpop.f32.mrb[5].mxu1 }
 0x1b4   : > { %826 = vrot.lane.b32.xlu1 %v809_v0, %s1474_s20  ;;  %v811_v33 = vsel %vm792_vm12, %v808_v54, %v810_v24  ;;  %v700_v34 = vsel %vm681_vm10, %v697_v51, %v699_v22  ;;  %v755_v35 = vsel %vm548_vm0, %v752_v53, %v754_v23  ;;  %v867_v36 = vsel %vm848_vm11, %v864_v55, %v866_v25 }
 0x1b5   : > { %828 = vrot.lane.b32.xlu0 %v811_v33, %s1474_s20  ;;  %vm357_vm0 = vcmask 142432  }
 0x1b8   : > { %882 = vrot.lane.b32.xlu1 %v865_v1, %s1473_s19 }
 0x1b9   : > { %705 = vrot.lane.b32.xlu0 %v1771_v16, %s1471_s10  ;;  %v1234_v16 = vld [vmem:[%s1551_s5 + $0xc2] sm:$0xf] }
 0x1bc   : > { %812 = vrot.lane.b32.xlu1 %v1742_v61, %s1474_s20  ;;  %v205_v61 = vld [vmem:[%s1551_s5 + $0x50] sm:$0xf] }
 0x1bd   : > { %760 = vrot.lane.b32.xlu0 %v1774_v17, %s1472_s11  ;;  %218 = vst.msk [vmem:[#allocation2 + $0x50] sm:$0xf] %vm217_vm13, %v205_v61  ;;  %v1223_v17 = vld [vmem:[%s1551_s5 + $0x9c] sm:$0xf] }
 0x1c0   : > { %703 = vrot.lane.b32.xlu1 %v1754_v6, %s1471_s10 }
 0x1c1   : > { %707 = vrot.lane.b32.xlu0 %v690_v26, %s1471_s10 }
 0x1c4   : > { %717 = vrot.lane.b32.xlu1 %v700_v34, %s1471_s10 }
 0x1c5   : > { %709 = vrot.lane.b32.xlu0 %v692_v38, %s1471_s10 }
 0x1c8   : > { %758 = vrot.lane.b32.xlu1 %v1757_v7, %s1472_s11 }
 0x1c9   : > { %764 = vrot.lane.b32.xlu0 %v747_v39, %s1472_s11 }
 0x1cc   : > { %772 = vrot.lane.b32.xlu1 %v755_v35, %s1472_s11 }
 0x1cd   : > { %820 = vrot.lane.b32.xlu0 %v803_v40, %s1474_s20 }
 0x1d0   : > { %870 = vrot.lane.b32.xlu1 %v1760_v8, %s1473_s19  ;;  %v1212_v8 = vld [vmem:[%s1551_s5 + $0x76] sm:$0xf] }
 0x1d1   : > { %876 = vrot.lane.b32.xlu0 %v859_v41, %s1473_s19 }
 0x1d4   : > { %816 = vrot.lane.b32.xlu1 %v1777_v18, %s1474_s20 }
 0x1d5   : > { %713 = vrot.lane.b32.xlu0 %v696_v3, %s1471_s10  ;;  %v1905_v3 = vld [vmem:[%s1969_s2] ss:$0 sm:$0xff] }
 0x1d8   : > { %762 = vrot.lane.b32.xlu1 %v1790_v27, %s1472_s11 }
 0x1d9   : > { %768 = vrot.lane.b32.xlu0 %v751_v4, %s1472_s11 }
 0x1dc   : > { %711 = vrot.lane.b32.xlu1 %v694_v5, %s1471_s10 }
 0x1dd   : > { %824 = vrot.lane.b32.xlu0 %v807_v10, %s1474_s20 }
 0x1e0   : > { %766 = vrot.lane.b32.xlu1 %v749_v12, %s1472_s11 }
 0x1e1   : > { %880 = vrot.lane.b32.xlu0 %v863_v13, %s1473_s19 }
 0x1e4   : > { %822 = vrot.lane.b32.xlu1 %v805_v14, %s1474_s20 }
 0x1e5   : > { %872 = vrot.lane.b32.xlu0 %v1780_v19, %s1473_s19 }
 0x1e7   : > { %v702_v6 = vpop.permute.xlu0 %701 }
 0x1e8   : > { %v728_v7 = vadd.f32 %v702_v6, %v1726_v46  ;;  %878 = vrot.lane.b32.xlu1 %v861_v15, %s1473_s19  ;;  %v1245_v46 = vld [vmem:[%s1551_s5 + $0xe8] sm:$0xf] }
 0x1e9   : > { %818 = vrot.lane.b32.xlu0 %v1793_v28, %s1474_s20 }
 0x1eb   : > { %v757_v18 = vpop.permute.xlu0 %756 }
 0x1ec   : > { %884 = vrot.lane.b32.xlu1 %v867_v36, %s1473_s19  ;;  %v783_v32 = vadd.f32 %v757_v18, %v728_v7 }
 0x1ed   : > { %263 = vrot.lane.b32.xlu0 %v1212_v8, %s1466_s7 }
 0x1ef   : > { %v1895_v19 = vpop.permute.xlu0 %868 }
 0x1f0   : > { %874 = vrot.lane.b32.xlu1 %v1796_v29, %s1473_s19 }
 0x1f1   : > { %403 = vrot.lane.b32.xlu0 %v1234_v16, %s1465_s6 }
 0x1f3   : > { %v815_v28 = vpop.permute.xlu0 %814 }
 0x1f4   : > { %333 = vrot.lane.b32.xlu1 %v1223_v17, %s1470_s9 }
 0x1f8   : > { %473 = vrot.lane.b32.xlu1 %v1245_v46, %s1469_s8 }
 0x21e   : > { %v716_v26 = vpop.permute.xlu1 %715 }
 0x21f   : > { %v735_v57 = vadd.f32 %v716_v26, %v1800_v31 }
 0x222   : > { %v771_v27 = vpop.permute.xlu1 %770 }
 0x223   : > { %v790_v59 = vadd.f32 %v771_v27, %v735_v57 }
 0x226   : > { %v827_v37 = vpop.permute.xlu1 %826 }
 0x227   : > { %v1897_v38 = vpop.permute.xlu0 %828  ;;  %v846_v63 = vadd.f32 %v827_v37, %v790_v59 }
 0x22a   : > { %v883_v39 = vpop.permute.xlu1 %882 }
 0x22b   : > { %v706_v40 = vpop.permute.xlu0 %705  ;;  %v902_v1 = vadd.f32 %v883_v39, %v846_v63 }
 0x22c   : > { %v730_v15 = vadd.f32 %v706_v40, %v1746_v62 }
 0x22d   : > { %v918_v31 = vadd.f32 %v1905_v3, %v902_v1 }
 0x22e   : > { %v813_v29 = vpop.permute.xlu1 %812 }
 0x22f   : > { %v761_v41 = vpop.permute.xlu0 %760  ;;  %v927_v35 = vmax.f32 %v918_v31, 0.0  ;;  %v839_v61 = vadd.f32 %v813_v29, %v783_v32 }
 0x230   : > { %v785_v33 = vadd.f32 %v761_v41, %v730_v15 }
 0x231   : > { %v958_v18 = vrot.slane %v927_v35, 6 }
 0x232   : > { %v704_v44 = vpop.permute.xlu1 %703 }
 0x233   : > { %v1899_v45 = vpop.permute.xlu0 %707  ;;  %v729_v21 = vadd.f32 %v704_v44, %v1728_v48 }
 0x236   : > { %v718_v47 = vpop.permute.xlu1 %717 }
 0x237   : > { %v710_v49 = vpop.permute.xlu0 %709  ;;  %v736_v62 = vadd.f32 %v718_v47, %v1812_v43 }
 0x238   : > { %v732_v10 = vadd.f32 %v710_v49, %v1782_v20 }
 0x23a   : > { %v759_v50 = vpop.permute.xlu1 %758 }
 0x23b   : > { %v765_v51 = vpop.permute.xlu0 %764  ;;  %v784_v34 = vadd.f32 %v759_v50, %v729_v21  ;;  %v731_v50 = vadd.f32 %v1899_v45, %v1764_v9 }
 0x23c   : > { %v787_v14 = vadd.f32 %v765_v51, %v732_v10 }
 0x23d   : > { %v840_v46 = vadd.f32 %v815_v28, %v784_v34 }
 0x23e   : > { %v773_v52 = vpop.permute.xlu1 %772 }
 0x23f   : > { %v821_v53 = vpop.permute.xlu0 %820  ;;  %v791_v27 = vadd.f32 %v773_v52, %v736_v62 }
 0x240   : > { %v843_v24 = vadd.f32 %v821_v53, %v787_v14 }
 0x241   : > { %v847_v53 = vadd.f32 %v1897_v38, %v791_v27 }
 0x242   : > { %v871_v54 = vpop.permute.xlu1 %870 }
 0x243   : > { %v877_v55 = vpop.permute.xlu0 %876  ;;  %v896_v40 = vadd.f32 %v871_v54, %v840_v46 }
 0x244   : > { %v899_v36 = vadd.f32 %v877_v55, %v843_v24 }
 0x245   : > { %v912_v54 = vadd.f32 %v1905_v3, %v896_v40 }
 0x246   : > { %v817_v56 = vpop.permute.xlu1 %816  ;;  %v915_v37 = vadd.f32 %v1905_v3, %v899_v36 }
 0x247   : > { %v714_v58 = vpop.permute.xlu0 %713  ;;  %v841_v6 = vadd.f32 %v817_v56, %v785_v33 }
 0x248   : > { %v734_v4 = vadd.f32 %v714_v58, %v1810_v42  ;;  %v924_v51 = vmax.f32 %v915_v37, 0.0 }
 0x24a   : > { %v763_v60 = vpop.permute.xlu1 %762 }
 0x24b   : > { %v769_v0 = vpop.permute.xlu0 %768  ;;  %v786_v57 = vadd.f32 %v763_v60, %v731_v50 }
 0x24c   : > { %v789_v13 = vadd.f32 %v769_v0, %v734_v4  ;;  %v953_v0 = vrot.slane %v924_v51, 6 }
 0x24e   : > { %v712_v5 = vpop.permute.xlu1 %711 }
 0x24f   : > { %v825_v12 = vpop.permute.xlu0 %824  ;;  %v733_v20 = vadd.f32 %v712_v5, %v1798_v30  ;;  %v895_v30 = vadd.f32 %v1895_v19, %v839_v61  ;;  %v921_v5 = vmax.f32 %v912_v54, 0.0 }
 0x250   : > { %v845_v22 = vadd.f32 %v825_v12, %v789_v13 }
 0x251   : > { %v911_v19 = vadd.f32 %v1905_v3, %v895_v30 }
 0x252   : > { %v767_v23 = vpop.permute.xlu1 %766 }
 0x253   : > { %v881_v25 = vpop.permute.xlu0 %880  ;;  %v788_v48 = vadd.f32 %v767_v23, %v733_v20  ;;  %v920_v45 = vmax.f32 %v911_v19, 0.0  ;;  %v929_v23 = vlaneseq }
 0x254   : > { %v901_v42 = vadd.f32 %v881_v25, %v845_v22 }
 0x255   : > { %v930_v46 = vand.u32 127, %v929_v23 }
 0x256   : > { %v917_v8 = vadd.f32 %v1905_v3, %v901_v42  ;;  %v823_v16 = vpop.permute.xlu1 %822 }
 0x257   : > { %v873_v17 = vpop.permute.xlu0 %872  ;;  %v844_v39 = vadd.f32 %v823_v16, %v788_v48 }
 0x258   : > { %v926_v26 = vmax.f32 %v917_v8, 0.0  ;;  %v897_v7 = vadd.f32 %v873_v17, %v841_v6  ;;  %v932_v8 = vshrl.u32 %v929_v23, 7 }
 0x25a   : > { %v956_v29 = vrot.slane %v926_v26, 6  ;;  %v913_v41 = vadd.f32 %v1905_v3, %v897_v7  ;;  %v879_v44 = vpop.permute.xlu1 %878  ;;  %v933_v27 = vadd.s32 8, %v932_v8 }
 0x25b   : > { %v900_v49 = vadd.f32 %v879_v44, %v844_v39  ;;  %v819_v43 = vpop.permute.xlu0 %818 }
 0x25c   : > { %v959_v47 = vsel %vm952_vm14, %v956_v29, %v958_v18  ;;  %v922_v28 = vmax.f32 %v913_v41, 0.0  ;;  %v842_v4 = vadd.f32 %v819_v43, %v786_v57  ;;  %v936_v40 = vmul.u32 2, %v933_v27 }
 0x25d   : > { %v916_v52 = vadd.f32 %v1905_v3, %v900_v49 }
 0x25e   : > { %v969_v55 = vmax.f32 %v922_v28, %v959_v47  ;;  %v885_v56 = vpop.permute.xlu1 %884  ;;  %vm939_vm7 = vcmp.eq.s32.totalorder %v930_v46, %v936_v40 }
 0x25f   : > { %v925_v58 = vmax.f32 %v916_v52, 0.0  ;;  %v903_v59 = vadd.f32 %v885_v56, %v847_v53  ;;  %v264_v63 = vpop.permute.xlu0 %263  ;;  %v1260_v43 = vsel %vm939_vm7, 1.0, %v1468_v11 }
 0x260   : > { %288 = vst.msk [vmem:[#allocation2 + $0x50] sm:$0xf] %vm287_vm15, %v264_v63  ;;  %v980_v24 = vrot.slane %v969_v55, 1 }
 0x261   : > { %v954_v1 = vrot.slane %v925_v58, 6  ;;  %v919_v9 = vadd.f32 %v1905_v3, %v903_v59 }
 0x262   : > { %v875_v10 = vpop.permute.xlu1 %874 }
 0x263   : > { %v955_v38 = vsel %vm952_vm14, %v953_v0, %v954_v1  ;;  %v957_v12 = vsel %vm952_vm14, %v954_v1, %v956_v29  ;;  %v928_v13 = vmax.f32 %v919_v9, 0.0  ;;  %v898_v31 = vadd.f32 %v875_v10, %v842_v4  ;;  %v404_v22 = vpop.permute.xlu0 %403 }
 0x264   : > { %v967_v14 = vmax.f32 %v920_v45, %v955_v38  ;;  %v968_v60 = vmax.f32 %v921_v5, %v957_v12  ;;  %v934_v29 = vadd.s32 16, %v932_v8 }
 0x265   : > { %v960_v15 = vrot.slane %v928_v13, 6  ;;  %v914_v21 = vadd.f32 %v1905_v3, %v898_v31 }
 0x266   : > { %v977_v25 = vrot.slane %v967_v14, 1  ;;  %v978_v32 = vrot.slane %v968_v60, 1  ;;  %v334_v33 = vpop.permute.xlu1 %333  ;;  %v937_v49 = vmul.u32 2, %v934_v29 }
 0x267   : > { %v971_v34 = vmax.f32 %v924_v51, %v960_v15  ;;  %v961_v42 = vsel %vm952_vm14, %v958_v18, %v960_v15  ;;  %v923_v35 = vmax.f32 %v914_v21, 0.0  ;;  %358 = vst.msk [vmem:[#allocation2 + $0x50] sm:$0xf] %vm357_vm0, %v334_v33  ;;  %v935_v18 = vmul.u32 2, %v932_v8 }
 0x268   : > { %v979_v36 = vsel %vm681_vm10, %v977_v25, %v978_v32  ;;  %v981_v20 = vsel %vm681_vm10, %v978_v32, %v980_v24  ;;  %428 = vst.msk [vmem:[#allocation2 + $0x50] sm:$0xf] %vm427_vm1, %v404_v22  ;;  %vm940_vm8 = vcmp.eq.s32.totalorder %v930_v46, %v937_v49 }
 0x269   : > { %v970_v61 = vmax.f32 %v923_v35, %v961_v42  ;;  %v991_v3 = vmax.f32 %v967_v14, %v979_v36  ;;  %v992_v6 = vmax.f32 %v968_v60, %v981_v20  ;;  %v984_v62 = vrot.slane %v971_v34, 1 }
 0x26a   : > { %v474_v16 = vpop.permute.xlu1 %473  ;;  %vm938_vm4 = vcmp.eq.s32.totalorder %v930_v46, %v935_v18  ;;  %v1261_v47 = vsel %vm940_vm8, 1.0, %v1468_v11 }
 0x26b   : > { %v982_v48 = vrot.slane %v970_v61, 1  ;;  %v1359_v17 = vpack.c.bf16 %v992_v6, %v991_v3  ;;  %498 = vst.msk [vmem:[#allocation2 + $0x50] sm:$0xf] %vm497_vm2, %v474_v16  ;;  %v995_v44 = vmax.f32 %v971_v34, %v984_v62 }
 0x26d   : > { %v985_v26 = vsel %vm681_vm10, %v982_v48, %v984_v62  ;;  %1360 = vmatpush3.bf16.msra.mxu1 %v1359_v17  ;;  %v983_v7 = vsel %vm681_vm10, %v980_v24, %v982_v48 }
 0x26e   : > { %v994_v37 = vmax.f32 %v970_v61, %v985_v26  ;;  %1361 = vmatprep.subr.bf16.mxu1 %v1463_v2  ;;  %v993_v39 = vmax.f32 %v969_v55, %v983_v7  ;;  %v1259_v2 = vsel %vm938_vm4, 1.0, %v1468_v11 }
 0x270   : > { %v1362_v30 = vpack.c.bf16 %v994_v37, %v993_v39 }
 0x272   : > { %1363 = vmatpush3.bf16.msra.mxu1 %v1362_v30  ;;  %v509_v41 = vld [vmem:[#allocation2 + $0x50] sm:$0xf] }
 0x273   : > { %1340 = vmatprep.subr.mxu1 %v1468_v11  ;;  %1330 = vmatmul.mubr.msk.f32.gmra.mrb[6].mxu1 %vm514_vm9, %v509_v41  ;;  %vm1090_vm9 = vcmask 130048  }
 0x274   : > { %1342 = vmatprep.mubr.msk.f32.mxu1 %vm1467_vm3, %v1468_v11 }
 0x276   : > { %1341 = vmatpush3.msk.msra.mxu1 %vm1006_vm5, %v995_v44 }
 0x277   : > { %1343 = vmatmul.mubr.msk.f32.vlgmr.msra.gmra.mrb[8].mxu1 %vm996_vm6, %v1259_v2 }
 0x278   : > { %1345 = vmatprep.mubr.msk.f32.mxu1 %vm1467_vm3, %v1468_v11 }
 0x27b   : > { %1346 = vmatmul.mubr.msk.f32.gmra.mrb[10].mxu1 %vm996_vm6, %v1260_v43 }
 0x27c   : > { %1348 = vmatprep.mubr.msk.f32.mxu1 %vm1467_vm3, %v1468_v11  ;;  %vm1093_vm3 = vcmask 122880  }
 0x27f   : > { %1349 = vmatmul.mubr.msk.f32.gmra.mrb[12].mxu1 %vm996_vm6, %v1261_v47 }
 0x346   : > { %v668_v28 = vpop.f32.mrb[6].mxu1 }
 0x347   : > { %v1331_v50 = vpop.f32.mrb[7].mxu1 }
 0x34a   : > { %v1076_v51 = vpop.f32.mrb[8].mxu1 }
 0x34b   : > { %1091 = vst.msk [vmem:[%s192_s29] sm:$0xff] %vm1090_vm9, %v1076_v51  ;;  %v1344_v52 = vpop.f32.mrb[9].mxu1 }
 0x34e   : > { %v1081_v53 = vpop.f32.mrb[10].mxu1 }
 0x34f   : > { %1092 = vst.msk [vmem:[%s192_s29 + $0x8] sm:$0xff] %vm1090_vm9, %v1081_v53  ;;  %v1347_v11 = vpop.f32.mrb[11].mxu1 }
 0x352   : > { %v1086_v19 = vpop.f32.mrb[12].mxu1 }
 0x353   : > { %1094 = vst.msk [vmem:[%s192_s29 + $0x10] sm:$0x1] %vm1093_vm3, %v1086_v19  ;;  %v1350_v54 = vpop.f32.mrb[13].mxu1 }
 0x354 PF: > { %s13_s16 = sadd.s32 1, %s1461_s16   ;;  %s1971_s12 = smov %s1453_s14 }
 0x355   : > { %p10_p7 = scmp.ge.s32.totalorder %s13_s16, 36   ;;  %s1972_s13 = smov %s1457_s15 }
 0x356   : > { %s1973_s14 = smov %s1976_s17  ;;  %s1974_s15 = smov %s1980_s18 }
 0x357   :  { %12 = sbr.rel (!%p10_p7) target bundleno = 3 (0x3), region = 67 }

// kernel: network_forward.5
= control target key start
LH: loop header
LB: loop body
LE: loop exit
PB: predicated region body
PF: predicated region fallthrough
CT: control target
= control target key end

     0   :  { %v3778_v47 = vmov 1983009808   ;;  %v636_v49 = vlaneseq  ;;  %s5824_s0 = inlined_call_operand.vmem [shape: f32[2,4624], index: 0, kind: input, shape index: {}]   ;;  %s5825_s1 = inlined_call_operand.vmem [shape: f32[4624,128], index: 1, kind: input, shape index: {}]   ;;  %s5826_s2 = inlined_call_operand.vmem [shape: f32[1,128], index: 2, kind: input, shape index: {}]   ;;  %s5827_s3 = inlined_call_operand.vmem [shape: f32[128,128], index: 3, kind: input, shape index: {}]   ;;  %s5828_s4 = inlined_call_operand.vmem [shape: f32[1,128], index: 4, kind: input, shape index: {}]   ;;  %s5829_s5 = inlined_call_operand.vmem [shape: f32[128,128], index: 5, kind: input, shape index: {}]   ;;  %s5830_s6 = inlined_call_operand.vmem [shape: f32[1,128], index: 6, kind: input, shape index: {}]   ;;  %s5831_s7 = inlined_call_operand.hbm [shape: f32[2,128], index: 7, kind: output, shape index: {}]  }
   0x1   :  { %v53_v0 = vld [vmem:[%s5825_s1 + $0x80] sm:$0xff]  ;;  %v54_v1 = vld [vmem:[%s5825_s1 + $0x88] sm:$0xff]  ;;  %v55_v11 = vld [vmem:[%s5825_s1 + $0x90] sm:$0xff]  ;;  %v634_v48 = vunpack.c.l.s4 %v3778_v47 }
   0x2   :  { %v37_v2 = vld [vmem:[%s5825_s1] sm:$0xff]  ;;  %v3113_v3 = vpack.c.bf16 %v54_v1, %v53_v0  ;;  %v38_v4 = vld [vmem:[%s5825_s1 + $0x8] sm:$0xff]  ;;  %v56_v13 = vld [vmem:[%s5825_s1 + $0x98] sm:$0xff]  ;;  %v637_v0 = vshrl.u32 %v636_v49, 7 }
   0x3   :  { %v85_v5 = vld [vmem:[%s5825_s1 + $0x180] sm:$0xff]  ;;  %v86_v6 = vld [vmem:[%s5825_s1 + $0x188] sm:$0xff]  ;;  %v3115_v7 = vpack.c.bf16 %v38_v4, %v37_v2  ;;  %v39_v14 = vld [vmem:[%s5825_s1 + $0x10] sm:$0xff]  ;;  %v3117_v16 = vpack.c.bf16 %v56_v13, %v55_v11  ;;  %v635_v63 = vunpack.c.0.s8 %v634_v48 }
   0x4   :  { %v3145_v8 = vpack.c.bf16 %v86_v6, %v85_v5  ;;  %v69_v9 = vld [vmem:[%s5825_s1 + $0x100] sm:$0xff]  ;;  %v70_v10 = vld [vmem:[%s5825_s1 + $0x108] sm:$0xff]  ;;  %3114 = vmatprep.subr.bf16.mxu0 %v3113_v3  ;;  %v40_v15 = vld [vmem:[%s5825_s1 + $0x18] sm:$0xff] }
   0x5   :  { %v3147_v12 = vpack.c.bf16 %v70_v10, %v69_v9  ;;  %3116 = vmatpush3.bf16.msra.mxu0 %v3115_v7  ;;  %v3119_v17 = vpack.c.bf16 %v40_v15, %v39_v14  ;;  %v87_v18 = vld [vmem:[%s5825_s1 + $0x190] sm:$0xff]  ;;  %v88_v19 = vld [vmem:[%s5825_s1 + $0x198] sm:$0xff]  ;;  %v57_v23 = vld [vmem:[%s5825_s1 + $0xa0] sm:$0xff]  ;;  %v3973_v13 = vsub.s32 %v635_v63, %v637_v0 }
   0x6   :  { %3146 = vmatprep.subr.bf16.mxu1 %v3145_v8  ;;  %v71_v20 = vld [vmem:[%s5825_s1 + $0x110] sm:$0xff]  ;;  %v3149_v21 = vpack.c.bf16 %v88_v19, %v87_v18  ;;  %v72_v22 = vld [vmem:[%s5825_s1 + $0x118] sm:$0xff]  ;;  %v58_v24 = vld [vmem:[%s5825_s1 + $0xa8] sm:$0xff]  ;;  %3118 = vmatprep.subr.bf16.mxu0 %v3117_v16 }
   0x7   :  { %3148 = vmatpush3.bf16.msra.mxu1 %v3147_v12  ;;  %v3151_v25 = vpack.c.bf16 %v72_v22, %v71_v20  ;;  %v3121_v26 = vpack.c.bf16 %v58_v24, %v57_v23  ;;  %v41_v27 = vld [vmem:[%s5825_s1 + $0x20] sm:$0xff]  ;;  %v42_v28 = vld [vmem:[%s5825_s1 + $0x28] sm:$0xff]  ;;  %v59_v35 = vld [vmem:[%s5825_s1 + $0xb0] sm:$0xff] }
   0x8   :  { %v89_v29 = vld [vmem:[%s5825_s1 + $0x1a0] sm:$0xff]  ;;  %3150 = vmatprep.subr.bf16.mxu1 %v3149_v21  ;;  %v90_v30 = vld [vmem:[%s5825_s1 + $0x1a8] sm:$0xff]  ;;  %v3123_v33 = vpack.c.bf16 %v42_v28, %v41_v27  ;;  %v60_v36 = vld [vmem:[%s5825_s1 + $0xb8] sm:$0xff] }
   0x9   :  { %v73_v31 = vld [vmem:[%s5825_s1 + $0x120] sm:$0xff]  ;;  %v74_v32 = vld [vmem:[%s5825_s1 + $0x128] sm:$0xff]  ;;  %3120 = vmatpush3.bf16.msra.mxu0 %v3119_v17  ;;  %v3153_v34 = vpack.c.bf16 %v90_v30, %v89_v29  ;;  %v43_v37 = vld [vmem:[%s5825_s1 + $0x30] sm:$0xff]  ;;  %v3125_v39 = vpack.c.bf16 %v60_v36, %v59_v35 }
   0xa   :  { %3122 = vmatprep.subr.bf16.mxu0 %v3121_v26  ;;  %v3155_v38 = vpack.c.bf16 %v74_v32, %v73_v31  ;;  %v44_v40 = vld [vmem:[%s5825_s1 + $0x38] sm:$0xff]  ;;  %v91_v41 = vld [vmem:[%s5825_s1 + $0x1b0] sm:$0xff]  ;;  %v61_v46 = vld [vmem:[%s5825_s1 + $0xc0] sm:$0xff] }
   0xb   :  { %3152 = vmatpush3.bf16.msra.mxu1 %v3151_v25  ;;  %v92_v42 = vld [vmem:[%s5825_s1 + $0x1b8] sm:$0xff]  ;;  %v75_v44 = vld [vmem:[%s5825_s1 + $0x130] sm:$0xff]  ;;  %v62_v50 = vld [vmem:[%s5825_s1 + $0xc8] sm:$0xff]  ;;  %v3127_v51 = vpack.c.bf16 %v44_v40, %v43_v37 }
   0xc   :  { %3154 = vmatprep.subr.bf16.mxu1 %v3153_v34  ;;  %v3157_v43 = vpack.c.bf16 %v92_v42, %v91_v41  ;;  %v76_v45 = vld [vmem:[%s5825_s1 + $0x138] sm:$0xff]  ;;  %v93_v52 = vld [vmem:[%s5825_s1 + $0x1c0] sm:$0xff]  ;;  %v94_v53 = vld [vmem:[%s5825_s1 + $0x1c8] sm:$0xff]  ;;  %v3129_v55 = vpack.c.bf16 %v62_v50, %v61_v46 }
   0xd   :  { %3124 = vmatpush3.bf16.msra.mxu0 %v3123_v33  ;;  %v3159_v54 = vpack.c.bf16 %v76_v45, %v75_v44  ;;  %v45_v56 = vld [vmem:[%s5825_s1 + $0x40] sm:$0xff]  ;;  %v46_v57 = vld [vmem:[%s5825_s1 + $0x48] sm:$0xff]  ;;  %v3161_v59 = vpack.c.bf16 %v94_v53, %v93_v52  ;;  %v63_v61 = vld [vmem:[%s5825_s1 + $0xd0] sm:$0xff] }
   0xe   :  { %3126 = vmatprep.subr.bf16.mxu0 %v3125_v39  ;;  %v77_v58 = vld [vmem:[%s5825_s1 + $0x140] sm:$0xff]  ;;  %v78_v60 = vld [vmem:[%s5825_s1 + $0x148] sm:$0xff]  ;;  %v64_v62 = vld [vmem:[%s5825_s1 + $0xd8] sm:$0xff]  ;;  %v3131_v3 = vpack.c.bf16 %v46_v57, %v45_v56 }
   0xf   :  { %3156 = vmatpush3.bf16.msra.mxu1 %v3155_v38  ;;  %v95_v1 = vld [vmem:[%s5825_s1 + $0x1d0] sm:$0xff]  ;;  %v96_v2 = vld [vmem:[%s5825_s1 + $0x1d8] sm:$0xff]  ;;  %v3163_v4 = vpack.c.bf16 %v78_v60, %v77_v58  ;;  %v3133_v5 = vpack.c.bf16 %v64_v62, %v63_v61  ;;  %v65_v11 = vld [vmem:[%s5825_s1 + $0xe0] sm:$0xff] }
  0x10   :  { %3158 = vmatprep.subr.bf16.mxu1 %v3157_v43  ;;  %v47_v6 = vld [vmem:[%s5825_s1 + $0x50] sm:$0xff]  ;;  %v48_v7 = vld [vmem:[%s5825_s1 + $0x58] sm:$0xff]  ;;  %v3165_v9 = vpack.c.bf16 %v96_v2, %v95_v1  ;;  %v66_v12 = vld [vmem:[%s5825_s1 + $0xe8] sm:$0xff] }
  0x11   :  { %3128 = vmatpush3.bf16.msra.mxu0 %v3127_v51  ;;  %v79_v8 = vld [vmem:[%s5825_s1 + $0x150] sm:$0xff]  ;;  %v80_v10 = vld [vmem:[%s5825_s1 + $0x158] sm:$0xff]  ;;  %v97_v14 = vld [vmem:[%s5825_s1 + $0x1e0] sm:$0xff]  ;;  %v3135_v16 = vpack.c.bf16 %v48_v7, %v47_v6  ;;  %v3137_v19 = vpack.c.bf16 %v66_v12, %v65_v11 }
  0x12   :  { %3130 = vmatprep.subr.bf16.mxu0 %v3129_v55  ;;  %v98_v15 = vld [vmem:[%s5825_s1 + $0x1e8] sm:$0xff]  ;;  %v49_v17 = vld [vmem:[%s5825_s1 + $0x60] sm:$0xff]  ;;  %v3167_v18 = vpack.c.bf16 %v80_v10, %v79_v8  ;;  %v67_v25 = vld [vmem:[%s5825_s1 + $0xf0] sm:$0xff] }
  0x13   :  { %3160 = vmatpush3.bf16.msra.mxu1 %v3159_v54  ;;  %v50_v20 = vld [vmem:[%s5825_s1 + $0x68] sm:$0xff]  ;;  %v81_v21 = vld [vmem:[%s5825_s1 + $0x160] sm:$0xff]  ;;  %v3169_v23 = vpack.c.bf16 %v98_v15, %v97_v14  ;;  %v68_v26 = vld [vmem:[%s5825_s1 + $0xf8] sm:$0xff] }
  0x14   :  { %3162 = vmatprep.subr.bf16.mxu1 %v3161_v59  ;;  %v27_v22 = vld [vmem:[%s5824_s0] sm:$0xff]  ;;  %v82_v24 = vld [vmem:[%s5825_s1 + $0x168] sm:$0xff]  ;;  %v99_v29 = vld [vmem:[%s5825_s1 + $0x1f0] sm:$0xff]  ;;  %v3139_v31 = vpack.c.bf16 %v50_v20, %v49_v17  ;;  %v3141_v35 = vpack.c.bf16 %v68_v26, %v67_v25 }
  0x15   :  { %3132 = vmatpush3.bf16.msra.mxu0 %v3131_v3  ;;  %v639_v27 = vrot.slane %v27_v22, %v3973_v13  ;;  %v632_v28 = vcombine.high %v27_v22, %v27_v22  ;;  %v100_v30 = vld [vmem:[%s5825_s1 + $0x1f8] sm:$0xff]  ;;  %v3171_v34 = vpack.c.bf16 %v82_v24, %v81_v21  ;;  %v51_v36 = vld [vmem:[%s5825_s1 + $0x70] sm:$0xff]  ;;  %v117_v41 = vld [vmem:[%s5825_s1 + $0x280] sm:$0xff] }
  0x16   :  { %3134 = vmatprep.subr.bf16.mxu0 %v3133_v5  ;;  %v52_v37 = vld [vmem:[%s5825_s1 + $0x78] sm:$0xff]  ;;  %v83_v38 = vld [vmem:[%s5825_s1 + $0x170] sm:$0xff]  ;;  %v3173_v39 = vpack.c.bf16 %v100_v30, %v99_v29  ;;  %v118_v42 = vld [vmem:[%s5825_s1 + $0x288] sm:$0xff] }
  0x17   :  { %3164 = vmatpush3.bf16.msra.mxu1 %v3163_v4  ;;  %v647_v32 = vcombine.high %v639_v27, %v639_v27  ;;  %v646_v33 = vrot.slane %v632_v28, %v3973_v13  ;;  %v84_v40 = vld [vmem:[%s5825_s1 + $0x178] sm:$0xff]  ;;  %v149_v44 = vld [vmem:[%s5825_s1 + $0x380] sm:$0xff]  ;;  %v150_v45 = vld [vmem:[%s5825_s1 + $0x388] sm:$0xff]  ;;  %v3143_v46 = vpack.c.bf16 %v52_v37, %v51_v36  ;;  %v3177_v48 = vpack.c.bf16 %v118_v42, %v117_v41 }
  0x18   :  { %3166 = vmatprep.subr.bf16.mxu1 %v3165_v9  ;;  %v3175_v47 = vpack.c.bf16 %v84_v40, %v83_v38  ;;  %v101_v49 = vld [vmem:[%s5825_s1 + $0x200] sm:$0xff]  ;;  %v102_v50 = vld [vmem:[%s5825_s1 + $0x208] sm:$0xff]  ;;  %v3209_v52 = vpack.c.bf16 %v150_v45, %v149_v44  ;;  %v119_v54 = vld [vmem:[%s5825_s1 + $0x290] sm:$0xff] }
  0x19   :  { %3136 = vmatpush3.bf16.msra.mxu0 %v3135_v16  ;;  %895 = vmatprep.mubr.f32.mxu0 %v647_v32  ;;  %v648_v43 = vcombine.high %v646_v33, %v646_v33  ;;  %v133_v51 = vld [vmem:[%s5825_s1 + $0x300] sm:$0xff]  ;;  %v134_v53 = vld [vmem:[%s5825_s1 + $0x308] sm:$0xff]  ;;  %v120_v55 = vld [vmem:[%s5825_s1 + $0x298] sm:$0xff]  ;;  %v3179_v58 = vpack.c.bf16 %v102_v50, %v101_v49 }
  0x1a   :  { %3138 = vmatprep.subr.bf16.mxu0 %v3137_v19  ;;  %v151_v56 = vld [vmem:[%s5825_s1 + $0x390] sm:$0xff]  ;;  %v152_v57 = vld [vmem:[%s5825_s1 + $0x398] sm:$0xff]  ;;  %v3211_v59 = vpack.c.bf16 %v134_v53, %v133_v51  ;;  %v3181_v60 = vpack.c.bf16 %v120_v55, %v119_v54  ;;  %v121_v2 = vld [vmem:[%s5825_s1 + $0x2a0] sm:$0xff] }
  0x1b   :  { %3168 = vmatpush3.bf16.msra.mxu1 %v3167_v18  ;;  %965 = vmatprep.mubr.f32.mxu1 %v648_v43  ;;  %v103_v61 = vld [vmem:[%s5825_s1 + $0x210] sm:$0xff]  ;;  %v104_v62 = vld [vmem:[%s5825_s1 + $0x218] sm:$0xff]  ;;  %v3213_v0 = vpack.c.bf16 %v152_v57, %v151_v56  ;;  %v122_v3 = vld [vmem:[%s5825_s1 + $0x2a8] sm:$0xff] }
  0x1c   :  { %3170 = vmatprep.subr.bf16.mxu1 %v3169_v23  ;;  %v135_v63 = vld [vmem:[%s5825_s1 + $0x310] sm:$0xff]  ;;  %v136_v1 = vld [vmem:[%s5825_s1 + $0x318] sm:$0xff]  ;;  %v153_v4 = vld [vmem:[%s5825_s1 + $0x3a0] sm:$0xff]  ;;  %v3183_v6 = vpack.c.bf16 %v104_v62, %v103_v61  ;;  %v3185_v8 = vpack.c.bf16 %v122_v3, %v121_v2 }
  0x1d   :  { %3140 = vmatpush3.bf16.msra.mxu0 %v3139_v31  ;;  %v154_v5 = vld [vmem:[%s5825_s1 + $0x3a8] sm:$0xff]  ;;  %v3215_v7 = vpack.c.bf16 %v136_v1, %v135_v63  ;;  %v105_v9 = vld [vmem:[%s5825_s1 + $0x220] sm:$0xff]  ;;  %v123_v15 = vld [vmem:[%s5825_s1 + $0x2b0] sm:$0xff] }
  0x1e   :  { %3142 = vmatprep.subr.bf16.mxu0 %v3141_v35  ;;  %v106_v10 = vld [vmem:[%s5825_s1 + $0x228] sm:$0xff]  ;;  %v137_v11 = vld [vmem:[%s5825_s1 + $0x320] sm:$0xff]  ;;  %v3217_v12 = vpack.c.bf16 %v154_v5, %v153_v4  ;;  %v124_v16 = vld [vmem:[%s5825_s1 + $0x2b8] sm:$0xff] }
  0x1f   :  { %3172 = vmatpush3.bf16.msra.mxu1 %v3171_v34  ;;  %v138_v14 = vld [vmem:[%s5825_s1 + $0x328] sm:$0xff]  ;;  %v155_v17 = vld [vmem:[%s5825_s1 + $0x3b0] sm:$0xff]  ;;  %v156_v18 = vld [vmem:[%s5825_s1 + $0x3b8] sm:$0xff]  ;;  %v3187_v19 = vpack.c.bf16 %v106_v10, %v105_v9  ;;  %v3189_v21 = vpack.c.bf16 %v124_v16, %v123_v15 }
  0x20   :  { %3174 = vmatprep.subr.bf16.mxu1 %v3173_v39  ;;  %v3219_v20 = vpack.c.bf16 %v138_v14, %v137_v11  ;;  %v107_v22 = vld [vmem:[%s5825_s1 + $0x230] sm:$0xff]  ;;  %v108_v23 = vld [vmem:[%s5825_s1 + $0x238] sm:$0xff]  ;;  %v3221_v25 = vpack.c.bf16 %v156_v18, %v155_v17  ;;  %v126_v28 = vld [vmem:[%s5825_s1 + $0x2c8] sm:$0xff] }
  0x21   :  { %3144 = vmatpush3.bf16.msra.mxu0 %v3143_v46  ;;  %v139_v24 = vld [vmem:[%s5825_s1 + $0x330] sm:$0xff]  ;;  %v140_v26 = vld [vmem:[%s5825_s1 + $0x338] sm:$0xff]  ;;  %v157_v29 = vld [vmem:[%s5825_s1 + $0x3c0] sm:$0xff]  ;;  %v3191_v32 = vpack.c.bf16 %v108_v23, %v107_v22 }
  0x22   :  { %3178 = vmatprep.subr.bf16.mxu0 %v3177_v48  ;;  %v158_v30 = vld [vmem:[%s5825_s1 + $0x3c8] sm:$0xff]  ;;  %v3223_v35 = vpack.c.bf16 %v140_v26, %v139_v24  ;;  %v109_v37 = vld [vmem:[%s5825_s1 + $0x240] sm:$0xff]  ;;  %v127_v42 = vld [vmem:[%s5825_s1 + $0x2d0] sm:$0xff] }
  0x23   :  { %3176 = vmatpush3.bf16.msra.mxu1 %v3175_v47  ;;  %v28_v31 = vld [vmem:[%s5824_s0 + $0x8] sm:$0xff]  ;;  %v141_v39 = vld [vmem:[%s5825_s1 + $0x340] sm:$0xff]  ;;  %v3225_v40 = vpack.c.bf16 %v158_v30, %v157_v29  ;;  %v128_v43 = vld [vmem:[%s5825_s1 + $0x2d8] sm:$0xff] }
  0x24   :  { %3210 = vmatprep.subr.bf16.mxu1 %v3209_v52  ;;  %896 = vmatmul.mubr.f32.vlgmr.msra.gmra.mrb[0].mxu0 %v639_v27  ;;  %v125_v27 = vld [vmem:[%s5825_s1 + $0x2c0] sm:$0xff]  ;;  %v649_v34 = vcombine.high %v28_v31, %v28_v31  ;;  %v110_v38 = vld [vmem:[%s5825_s1 + $0x248] sm:$0xff]  ;;  %v159_v46 = vld [vmem:[%s5825_s1 + $0x3d0] sm:$0xff]  ;;  %v3197_v51 = vpack.c.bf16 %v128_v43, %v127_v42 }
  0x25   :  { %3180 = vmatpush3.bf16.msra.mxu0 %v3179_v58  ;;  %v3193_v36 = vpack.c.bf16 %v126_v28, %v125_v27  ;;  %v142_v41 = vld [vmem:[%s5825_s1 + $0x348] sm:$0xff]  ;;  %v160_v47 = vld [vmem:[%s5825_s1 + $0x3d8] sm:$0xff]  ;;  %v3195_v48 = vpack.c.bf16 %v110_v38, %v109_v37  ;;  %v111_v52 = vld [vmem:[%s5825_s1 + $0x250] sm:$0xff] }
  0x26   :  { %966 = vmatmul.mubr.f32.vlgmr.msra.gmra.mrb[0].mxu1 %v646_v33  ;;  %3182 = vmatprep.subr.bf16.mxu0 %v3181_v60  ;;  %v4134_v33 = vrot.slane %v28_v31, %v3973_v13  ;;  %v4157_v45 = vrot.slane %v649_v34, %v3973_v13  ;;  %v3227_v50 = vpack.c.bf16 %v142_v41, %v141_v39  ;;  %v112_v53 = vld [vmem:[%s5825_s1 + $0x258] sm:$0xff]  ;;  %v143_v54 = vld [vmem:[%s5825_s1 + $0x350] sm:$0xff]  ;;  %v129_v57 = vld [vmem:[%s5825_s1 + $0x2e0] sm:$0xff] }
  0x27   :  { %3212 = vmatpush3.bf16.msra.mxu1 %v3211_v59  ;;  %v3229_v55 = vpack.c.bf16 %v160_v47, %v159_v46  ;;  %v144_v56 = vld [vmem:[%s5825_s1 + $0x358] sm:$0xff]  ;;  %v130_v58 = vld [vmem:[%s5825_s1 + $0x2e8] sm:$0xff]  ;;  %v161_v59 = vld [vmem:[%s5825_s1 + $0x3e0] sm:$0xff]  ;;  %v3199_v61 = vpack.c.bf16 %v112_v53, %v111_v52 }
  0x28   :  { %3214 = vmatprep.subr.bf16.mxu1 %v3213_v0  ;;  %v664_v44 = vcombine.high %v4134_v33, %v4134_v33  ;;  %v665_v49 = vcombine.high %v4157_v45, %v4157_v45  ;;  %v162_v60 = vld [vmem:[%s5825_s1 + $0x3e8] sm:$0xff]  ;;  %v3231_v62 = vpack.c.bf16 %v144_v56, %v143_v54  ;;  %v3201_v63 = vpack.c.bf16 %v130_v58, %v129_v57  ;;  %v113_v0 = vld [vmem:[%s5825_s1 + $0x260] sm:$0xff]  ;;  %v131_v5 = vld [vmem:[%s5825_s1 + $0x2f0] sm:$0xff] }
  0x29   :  { %3184 = vmatpush3.bf16.msra.mxu0 %v3183_v6  ;;  %v114_v1 = vld [vmem:[%s5825_s1 + $0x268] sm:$0xff]  ;;  %v145_v2 = vld [vmem:[%s5825_s1 + $0x360] sm:$0xff]  ;;  %v3233_v3 = vpack.c.bf16 %v162_v60, %v161_v59  ;;  %v132_v6 = vld [vmem:[%s5825_s1 + $0x2f8] sm:$0xff] }
  0x2a   :  { %3186 = vmatprep.subr.bf16.mxu0 %v3185_v8  ;;  %1035 = vmatprep.mubr.f32.mxu0 %v664_v44  ;;  %v146_v4 = vld [vmem:[%s5825_s1 + $0x368] sm:$0xff]  ;;  %v164_v8 = vld [vmem:[%s5825_s1 + $0x3f8] sm:$0xff]  ;;  %v3203_v9 = vpack.c.bf16 %v114_v1, %v113_v0  ;;  %v3205_v11 = vpack.c.bf16 %v132_v6, %v131_v5  ;;  %v147_v15 = vld [vmem:[%s5825_s1 + $0x370] sm:$0xff] }
  0x2b   :  { %3216 = vmatpush3.bf16.msra.mxu1 %v3215_v7  ;;  %1105 = vmatprep.mubr.f32.mxu1 %v665_v49  ;;  %v163_v7 = vld [vmem:[%s5825_s1 + $0x3f0] sm:$0xff]  ;;  %v3235_v10 = vpack.c.bf16 %v146_v4, %v145_v2  ;;  %v116_v14 = vld [vmem:[%s5825_s1 + $0x278] sm:$0xff]  ;;  %v181_v18 = vld [vmem:[%s5825_s1 + $0x480] sm:$0xff] }
  0x2c   :  { %3218 = vmatprep.subr.bf16.mxu1 %v3217_v12  ;;  %v115_v12 = vld [vmem:[%s5825_s1 + $0x270] sm:$0xff]  ;;  %v3237_v16 = vpack.c.bf16 %v164_v8, %v163_v7  ;;  %v148_v17 = vld [vmem:[%s5825_s1 + $0x378] sm:$0xff]  ;;  %v165_v23 = vld [vmem:[%s5825_s1 + $0x400] sm:$0xff] }
  0x2d   :  { %3188 = vmatpush3.bf16.msra.mxu0 %v3187_v19  ;;  %v182_v19 = vld [vmem:[%s5825_s1 + $0x488] sm:$0xff]  ;;  %v3207_v22 = vpack.c.bf16 %v116_v14, %v115_v12  ;;  %v3239_v24 = vpack.c.bf16 %v148_v17, %v147_v15  ;;  %v197_v27 = vld [vmem:[%s5825_s1 + $0x500] sm:$0xff]  ;;  %v183_v30 = vld [vmem:[%s5825_s1 + $0x490] sm:$0xff] }
  0x2e   :  { %3190 = vmatprep.subr.bf16.mxu0 %v3189_v21  ;;  %v214_v21 = vld [vmem:[%s5825_s1 + $0x588] sm:$0xff]  ;;  %v184_v31 = vld [vmem:[%s5825_s1 + $0x498] sm:$0xff]  ;;  %v29_v37 = vld [vmem:[%s5824_s0 + $0x10] sm:$0xff] }
  0x2f   :  { %3220 = vmatpush3.bf16.msra.mxu1 %v3219_v20  ;;  %v213_v20 = vld [vmem:[%s5825_s1 + $0x580] sm:$0xff]  ;;  %v166_v26 = vld [vmem:[%s5825_s1 + $0x408] sm:$0xff]  ;;  %v216_v34 = vld [vmem:[%s5825_s1 + $0x598] sm:$0xff]  ;;  %v3245_v38 = vpack.c.bf16 %v184_v31, %v183_v30  ;;  %v4276_v42 = vrot.slane %v29_v37, %v3973_v13  ;;  %v666_v43 = vcombine.high %v29_v37, %v29_v37 }
  0x30   :  { %3222 = vmatprep.subr.bf16.mxu1 %v3221_v25  ;;  %v3241_v25 = vpack.c.bf16 %v182_v19, %v181_v18  ;;  %v198_v28 = vld [vmem:[%s5825_s1 + $0x508] sm:$0xff]  ;;  %v3273_v29 = vpack.c.bf16 %v214_v21, %v213_v20  ;;  %v167_v39 = vld [vmem:[%s5825_s1 + $0x410] sm:$0xff]  ;;  %v200_v46 = vld [vmem:[%s5825_s1 + $0x518] sm:$0xff] }
  0x31   :  { %3192 = vmatpush3.bf16.msra.mxu0 %v3191_v32  ;;  %v215_v32 = vld [vmem:[%s5825_s1 + $0x590] sm:$0xff]  ;;  %v185_v47 = vld [vmem:[%s5825_s1 + $0x4a0] sm:$0xff]  ;;  %v4297_v52 = vrot.slane %v666_v43, %v3973_v13  ;;  %v170_v56 = vld [vmem:[%s5825_s1 + $0x428] sm:$0xff] }
  0x32   :  { %3194 = vmatprep.subr.bf16.mxu0 %v3193_v36  ;;  %v3275_v36 = vpack.c.bf16 %v198_v28, %v197_v27  ;;  %v199_v41 = vld [vmem:[%s5825_s1 + $0x510] sm:$0xff]  ;;  %v3277_v44 = vpack.c.bf16 %v216_v34, %v215_v32  ;;  %v217_v49 = vld [vmem:[%s5825_s1 + $0x5a0] sm:$0xff]  ;;  %v202_v59 = vld [vmem:[%s5825_s1 + $0x528] sm:$0xff] }
  0x33   :  { %3224 = vmatpush3.bf16.msra.mxu1 %v3223_v35  ;;  %v3243_v35 = vpack.c.bf16 %v166_v26, %v165_v23  ;;  %v201_v57 = vld [vmem:[%s5825_s1 + $0x520] sm:$0xff]  ;;  %v187_v60 = vld [vmem:[%s5825_s1 + $0x4b0] sm:$0xff]  ;;  %v172_v4 = vld [vmem:[%s5825_s1 + $0x438] sm:$0xff] }
  0x34   :  { %3226 = vmatprep.subr.bf16.mxu1 %v3225_v40  ;;  %v168_v40 = vld [vmem:[%s5825_s1 + $0x418] sm:$0xff]  ;;  %v3283_v1 = vpack.c.bf16 %v202_v59, %v201_v57  ;;  %v203_v5 = vld [vmem:[%s5825_s1 + $0x530] sm:$0xff]  ;;  %v189_v8 = vld [vmem:[%s5825_s1 + $0x4c0] sm:$0xff] }
  0x35   :  { %3196 = vmatpush3.bf16.msra.mxu0 %v3195_v48  ;;  %v186_v48 = vld [vmem:[%s5825_s1 + $0x4a8] sm:$0xff]  ;;  %v3247_v53 = vpack.c.bf16 %v168_v40, %v167_v39  ;;  %v204_v7 = vld [vmem:[%s5825_s1 + $0x538] sm:$0xff]  ;;  %v205_v18 = vld [vmem:[%s5825_s1 + $0x540] sm:$0xff] }
  0x36   :  { %3198 = vmatprep.subr.bf16.mxu0 %v3197_v51  ;;  %v681_v51 = vcombine.high %v4276_v42, %v4276_v42  ;;  %v3249_v54 = vpack.c.bf16 %v186_v48, %v185_v47  ;;  %v3287_v14 = vpack.c.bf16 %v204_v7, %v203_v5  ;;  %v174_v17 = vld [vmem:[%s5825_s1 + $0x448] sm:$0xff]  ;;  %v191_v21 = vld [vmem:[%s5825_s1 + $0x4d0] sm:$0xff]  ;;  %v208_v32 = vld [vmem:[%s5825_s1 + $0x558] sm:$0xff] }
  0x37   :  { %3228 = vmatpush3.bf16.msra.mxu1 %v3227_v50  ;;  %v218_v50 = vld [vmem:[%s5825_s1 + $0x5a8] sm:$0xff]  ;;  %v223_v23 = vld [vmem:[%s5825_s1 + $0x5d0] sm:$0xff]  ;;  %v193_v34 = vld [vmem:[%s5825_s1 + $0x4e0] sm:$0xff] }
  0x38   :  { %3230 = vmatprep.subr.bf16.mxu1 %v3229_v55  ;;  %v169_v55 = vld [vmem:[%s5825_s1 + $0x420] sm:$0xff]  ;;  %v3281_v58 = vpack.c.bf16 %v218_v50, %v217_v49  ;;  %v206_v20 = vld [vmem:[%s5825_s1 + $0x548] sm:$0xff]  ;;  %v175_v28 = vld [vmem:[%s5825_s1 + $0x450] sm:$0xff] }
  0x39   :  { %3200 = vmatpush3.bf16.msra.mxu0 %v3199_v61  ;;  %v188_v61 = vld [vmem:[%s5825_s1 + $0x4b8] sm:$0xff]  ;;  %v3251_v0 = vpack.c.bf16 %v170_v56, %v169_v55  ;;  %v3291_v26 = vpack.c.bf16 %v206_v20, %v205_v18  ;;  %v207_v30 = vld [vmem:[%s5825_s1 + $0x550] sm:$0xff]  ;;  %v226_v37 = vld [vmem:[%s5825_s1 + $0x5e8] sm:$0xff] }
  0x3a   :  { %3202 = vmatprep.subr.bf16.mxu0 %v3201_v63  ;;  %v220_v63 = vld [vmem:[%s5825_s1 + $0x5b8] sm:$0xff]  ;;  %v3253_v2 = vpack.c.bf16 %v188_v61, %v187_v60  ;;  %v3295_v39 = vpack.c.bf16 %v208_v32, %v207_v30  ;;  %v178_v43 = vld [vmem:[%s5825_s1 + $0x468] sm:$0xff]  ;;  %v195_v48 = vld [vmem:[%s5825_s1 + $0x4f0] sm:$0xff] }
  0x3b   :  { %3232 = vmatpush3.bf16.msra.mxu1 %v3231_v62  ;;  %v219_v62 = vld [vmem:[%s5825_s1 + $0x5b0] sm:$0xff]  ;;  %v210_v47 = vld [vmem:[%s5825_s1 + $0x568] sm:$0xff]  ;;  %v196_v49 = vld [vmem:[%s5825_s1 + $0x4f8] sm:$0xff] }
  0x3c   :  { %3234 = vmatprep.subr.bf16.mxu1 %v3233_v3  ;;  %v171_v3 = vld [vmem:[%s5825_s1 + $0x430] sm:$0xff]  ;;  %v3285_v6 = vpack.c.bf16 %v220_v63, %v219_v62  ;;  %v3269_v55 = vpack.c.bf16 %v196_v49, %v195_v48  ;;  %v180_v57 = vld [vmem:[%s5825_s1 + $0x478] sm:$0xff]  ;;  %v245_v60 = vld [vmem:[%s5825_s1 + $0x680] sm:$0xff] }
  0x3d   :  { %3204 = vmatpush3.bf16.msra.mxu0 %v3203_v9  ;;  %v190_v9 = vld [vmem:[%s5825_s1 + $0x4c8] sm:$0xff]  ;;  %v3255_v12 = vpack.c.bf16 %v172_v4, %v171_v3  ;;  %v227_v50 = vld [vmem:[%s5825_s1 + $0x5f0] sm:$0xff]  ;;  %v212_v59 = vld [vmem:[%s5825_s1 + $0x578] sm:$0xff] }
  0x3e   :  { %3206 = vmatprep.subr.bf16.mxu0 %v3205_v11  ;;  %v222_v11 = vld [vmem:[%s5825_s1 + $0x5c8] sm:$0xff]  ;;  %v3257_v15 = vpack.c.bf16 %v190_v9, %v189_v8  ;;  %v179_v56 = vld [vmem:[%s5825_s1 + $0x470] sm:$0xff]  ;;  %v277_v62 = vld [vmem:[%s5825_s1 + $0x780] sm:$0xff] }
  0x3f   :  { %3236 = vmatpush3.bf16.msra.mxu1 %v3235_v10  ;;  %v221_v10 = vld [vmem:[%s5825_s1 + $0x5c0] sm:$0xff]  ;;  %v246_v61 = vld [vmem:[%s5825_s1 + $0x688] sm:$0xff]  ;;  %v247_v9 = vld [vmem:[%s5825_s1 + $0x690] sm:$0xff] }
  0x40   :  { %3238 = vmatprep.subr.bf16.mxu1 %v3237_v16  ;;  %v173_v16 = vld [vmem:[%s5825_s1 + $0x440] sm:$0xff]  ;;  %v3289_v19 = vpack.c.bf16 %v222_v11, %v221_v10  ;;  %v278_v63 = vld [vmem:[%s5825_s1 + $0x788] sm:$0xff]  ;;  %v3305_v3 = vpack.c.bf16 %v246_v61, %v245_v60  ;;  %v248_v10 = vld [vmem:[%s5825_s1 + $0x698] sm:$0xff] }
  0x41   :  { %3208 = vmatpush3.bf16.msra.mxu0 %v3207_v22  ;;  %v192_v22 = vld [vmem:[%s5825_s1 + $0x4d8] sm:$0xff]  ;;  %v229_v4 = vld [vmem:[%s5825_s1 + $0x600] sm:$0xff]  ;;  %v230_v5 = vld [vmem:[%s5825_s1 + $0x608] sm:$0xff]  ;;  %v3337_v7 = vpack.c.bf16 %v278_v63, %v277_v62  ;;  %v3309_v18 = vpack.c.bf16 %v248_v10, %v247_v9 }
  0x42   :  { %3242 = vmatprep.subr.bf16.mxu0 %v3241_v25  ;;  %v3259_v25 = vpack.c.bf16 %v174_v17, %v173_v16  ;;  %v3261_v27 = vpack.c.bf16 %v192_v22, %v191_v21  ;;  %v262_v8 = vld [vmem:[%s5825_s1 + $0x708] sm:$0xff]  ;;  %v3307_v16 = vpack.c.bf16 %v230_v5, %v229_v4  ;;  %v232_v20 = vld [vmem:[%s5825_s1 + $0x618] sm:$0xff]  ;;  %v263_v21 = vld [vmem:[%s5825_s1 + $0x710] sm:$0xff] }
  0x43   :  { %3240 = vmatpush3.bf16.msra.mxu1 %v3239_v24  ;;  %v224_v24 = vld [vmem:[%s5825_s1 + $0x5d8] sm:$0xff]  ;;  %v267_v48 = vld [vmem:[%s5825_s1 + $0x730] sm:$0xff]  ;;  %v270_v61 = vld [vmem:[%s5825_s1 + $0x748] sm:$0xff] }
  0x44   :  { %3274 = vmatprep.subr.bf16.mxu1 %v3273_v29  ;;  %1036 = vmatmul.mubr.f32.vlgmr.msra.gmra.mrb[2].mxu0 %v4134_v33  ;;  %v3279_v33 = vpack.c.bf16 %v200_v46, %v199_v41  ;;  %v176_v29 = vld [vmem:[%s5825_s1 + $0x458] sm:$0xff]  ;;  %v3293_v31 = vpack.c.bf16 %v224_v24, %v223_v23  ;;  %v177_v41 = vld [vmem:[%s5825_s1 + $0x460] sm:$0xff]  ;;  %v255_v62 = vld [vmem:[%s5825_s1 + $0x6d0] sm:$0xff] }
  0x45   :  { %3244 = vmatpush3.bf16.msra.mxu0 %v3243_v35  ;;  %1175 = vmatprep.mubr.f32.mxu0 %v681_v51  ;;  %v194_v35 = vld [vmem:[%s5825_s1 + $0x4e8] sm:$0xff]  ;;  %v228_v51 = vld [vmem:[%s5825_s1 + $0x5f8] sm:$0xff]  ;;  %v249_v24 = vld [vmem:[%s5825_s1 + $0x6a0] sm:$0xff] }
  0x46   :  { %1106 = vmatmul.mubr.f32.vlgmr.msra.gmra.mrb[2].mxu1 %v4157_v45  ;;  %3246 = vmatprep.subr.bf16.mxu0 %v3245_v38  ;;  %v682_v45 = vcombine.high %v4297_v52, %v4297_v52  ;;  %v3263_v38 = vpack.c.bf16 %v176_v29, %v175_v28  ;;  %v3265_v40 = vpack.c.bf16 %v194_v35, %v193_v34  ;;  %v264_v23 = vld [vmem:[%s5825_s1 + $0x718] sm:$0xff]  ;;  %v282_v28 = vld [vmem:[%s5825_s1 + $0x7a8] sm:$0xff]  ;;  %v265_v35 = vld [vmem:[%s5825_s1 + $0x720] sm:$0xff] }
  0x47   :  { %3276 = vmatpush3.bf16.msra.mxu1 %v3275_v36  ;;  %v225_v36 = vld [vmem:[%s5825_s1 + $0x5e0] sm:$0xff]  ;;  %v234_v34 = vld [vmem:[%s5825_s1 + $0x628] sm:$0xff]  ;;  %v256_v63 = vld [vmem:[%s5825_s1 + $0x6d8] sm:$0xff] }
  0x48   :  { %3278 = vmatprep.subr.bf16.mxu1 %v3277_v44  ;;  %1245 = vmatprep.mubr.f32.mxu1 %v682_v45  ;;  %v209_v44 = vld [vmem:[%s5825_s1 + $0x560] sm:$0xff]  ;;  %v3297_v46 = vpack.c.bf16 %v226_v37, %v225_v36  ;;  %v211_v45 = vld [vmem:[%s5825_s1 + $0x570] sm:$0xff]  ;;  %v3325_v4 = vpack.c.bf16 %v256_v63, %v255_v62  ;;  %v272_v9 = vld [vmem:[%s5825_s1 + $0x758] sm:$0xff] }
  0x49   :  { %3248 = vmatpush3.bf16.msra.mxu0 %v3247_v53  ;;  %v3267_v53 = vpack.c.bf16 %v178_v43, %v177_v41  ;;  %v251_v37 = vld [vmem:[%s5825_s1 + $0x6b0] sm:$0xff]  ;;  %v257_v10 = vld [vmem:[%s5825_s1 + $0x6e0] sm:$0xff] }
  0x4a   :  { %3250 = vmatprep.subr.bf16.mxu0 %v3249_v54  ;;  %v3299_v54 = vpack.c.bf16 %v210_v47, %v209_v44  ;;  %v236_v47 = vld [vmem:[%s5825_s1 + $0x638] sm:$0xff]  ;;  %v239_v5 = vld [vmem:[%s5825_s1 + $0x650] sm:$0xff] }
  0x4b   :  { %3280 = vmatpush3.bf16.msra.mxu1 %v3279_v33  ;;  %v30_v33 = vld [vmem:[%s5824_s0 + $0x18] sm:$0xff]  ;;  %v327_v62 = vld [vmem:[%s5825_s1 + $0x910] sm:$0xff] }
  0x4c   :  { %3282 = vmatprep.subr.bf16.mxu1 %v3281_v58  ;;  %v3301_v58 = vpack.c.bf16 %v228_v51, %v227_v50  ;;  %v4468_v11 = vrot.slane %v30_v33, %v3973_v13  ;;  %v268_v50 = vld [vmem:[%s5825_s1 + $0x738] sm:$0xff]  ;;  %v253_v51 = vld [vmem:[%s5825_s1 + $0x6c0] sm:$0xff] }
  0x4d   :  { %3252 = vmatpush3.bf16.msra.mxu0 %v3251_v0  ;;  %v683_v0 = vcombine.high %v30_v33, %v30_v33  ;;  %v285_v33 = vld [vmem:[%s5825_s1 + $0x7c0] sm:$0xff] }
  0x4e   :  { %3254 = vmatprep.subr.bf16.mxu0 %v3253_v2  ;;  %v3303_v2 = vpack.c.bf16 %v212_v59, %v211_v45  ;;  %v237_v45 = vld [vmem:[%s5825_s1 + $0x640] sm:$0xff] }
  0x4f   :  { %3284 = vmatpush3.bf16.msra.mxu1 %v3283_v1  ;;  %v3271_v1 = vpack.c.bf16 %v180_v57, %v179_v56  ;;  %v3351_v56 = vpack.c.bf16 %v268_v50, %v267_v48  ;;  %v269_v59 = vld [vmem:[%s5825_s1 + $0x740] sm:$0xff]  ;;  %v294_v48 = vld [vmem:[%s5825_s1 + $0x808] sm:$0xff] }
  0x50   :  { %3286 = vmatprep.subr.bf16.mxu1 %v3285_v6  ;;  %v261_v6 = vld [vmem:[%s5825_s1 + $0x700] sm:$0xff] }
  0x51   :  { %3256 = vmatpush3.bf16.msra.mxu0 %v3255_v12  ;;  %v279_v12 = vld [vmem:[%s5825_s1 + $0x790] sm:$0xff]  ;;  %v3339_v17 = vpack.c.bf16 %v262_v8, %v261_v6  ;;  %v240_v6 = vld [vmem:[%s5825_s1 + $0x658] sm:$0xff] }
  0x52   :  { %3258 = vmatprep.subr.bf16.mxu0 %v3257_v15  ;;  %v4477_v15 = vrot.slane %v683_v0, %v3973_v13  ;;  %v287_v0 = vld [vmem:[%s5825_s1 + $0x7d0] sm:$0xff] }
  0x53   :  { %3288 = vmatpush3.bf16.msra.mxu1 %v3287_v14  ;;  %v280_v14 = vld [vmem:[%s5825_s1 + $0x798] sm:$0xff] }
  0x54   :  { %3290 = vmatprep.subr.bf16.mxu1 %v3289_v19  ;;  %v231_v19 = vld [vmem:[%s5825_s1 + $0x610] sm:$0xff]  ;;  %v3341_v22 = vpack.c.bf16 %v280_v14, %v279_v12  ;;  %v699_v29 = vcombine.high %v4477_v15, %v4477_v15  ;;  %v258_v12 = vld [vmem:[%s5825_s1 + $0x6e8] sm:$0xff]  ;;  %v289_v14 = vld [vmem:[%s5825_s1 + $0x7e0] sm:$0xff] }
  0x55   :  { %3260 = vmatpush3.bf16.msra.mxu0 %v3259_v25  ;;  %v250_v25 = vld [vmem:[%s5825_s1 + $0x6a8] sm:$0xff]  ;;  %v3311_v30 = vpack.c.bf16 %v232_v20, %v231_v19  ;;  %v3329_v19 = vpack.c.bf16 %v258_v12, %v257_v10  ;;  %v241_v20 = vld [vmem:[%s5825_s1 + $0x660] sm:$0xff] }
  0x56   :  { %3262 = vmatprep.subr.bf16.mxu0 %v3261_v27  ;;  %v281_v27 = vld [vmem:[%s5825_s1 + $0x7a0] sm:$0xff]  ;;  %v3313_v32 = vpack.c.bf16 %v250_v25, %v249_v24  ;;  %v274_v24 = vld [vmem:[%s5825_s1 + $0x768] sm:$0xff]  ;;  %v259_v25 = vld [vmem:[%s5825_s1 + $0x6f0] sm:$0xff] }
  0x57   :  { %3292 = vmatpush3.bf16.msra.mxu1 %v3291_v26  ;;  %v698_v26 = vcombine.high %v4468_v11, %v4468_v11  ;;  %v3345_v36 = vpack.c.bf16 %v282_v28, %v281_v27  ;;  %v291_v27 = vld [vmem:[%s5825_s1 + $0x7f0] sm:$0xff]  ;;  %v292_v28 = vld [vmem:[%s5825_s1 + $0x7f8] sm:$0xff]  ;;  %v298_v10 = vld [vmem:[%s5825_s1 + $0x828] sm:$0xff] }
  0x58   :  { %3294 = vmatprep.subr.bf16.mxu1 %v3293_v31  ;;  %v3343_v31 = vpack.c.bf16 %v264_v23, %v263_v21  ;;  %v242_v21 = vld [vmem:[%s5825_s1 + $0x668] sm:$0xff]  ;;  %v329_v12 = vld [vmem:[%s5825_s1 + $0x920] sm:$0xff] }
  0x59   :  { %3264 = vmatpush3.bf16.msra.mxu0 %v3263_v38  ;;  %v252_v38 = vld [vmem:[%s5825_s1 + $0x6b8] sm:$0xff] }
  0x5a   :  { %3266 = vmatprep.subr.bf16.mxu0 %v3265_v40  ;;  %v284_v40 = vld [vmem:[%s5825_s1 + $0x7b8] sm:$0xff]  ;;  %v3317_v44 = vpack.c.bf16 %v252_v38, %v251_v37  ;;  %v309_v37 = vld [vmem:[%s5825_s1 + $0x880] sm:$0xff]  ;;  %v310_v38 = vld [vmem:[%s5825_s1 + $0x888] sm:$0xff] }
  0x5b   :  { %3296 = vmatpush3.bf16.msra.mxu1 %v3295_v39  ;;  %v283_v39 = vld [vmem:[%s5825_s1 + $0x7b0] sm:$0xff] }
  0x5c   :  { %3298 = vmatprep.subr.bf16.mxu1 %v3297_v46  ;;  %v235_v46 = vld [vmem:[%s5825_s1 + $0x630] sm:$0xff]  ;;  %v3349_v49 = vpack.c.bf16 %v284_v40, %v283_v39  ;;  %v341_v39 = vld [vmem:[%s5825_s1 + $0x980] sm:$0xff]  ;;  %v342_v40 = vld [vmem:[%s5825_s1 + $0x988] sm:$0xff] }
  0x5d   :  { %3268 = vmatpush3.bf16.msra.mxu0 %v3267_v53  ;;  %v254_v53 = vld [vmem:[%s5825_s1 + $0x6c8] sm:$0xff]  ;;  %v3401_v50 = vpack.c.bf16 %v342_v40, %v341_v39  ;;  %v319_v39 = vld [vmem:[%s5825_s1 + $0x8d0] sm:$0xff]  ;;  %v320_v40 = vld [vmem:[%s5825_s1 + $0x8d8] sm:$0xff] }
  0x5e   :  { %3270 = vmatprep.subr.bf16.mxu0 %v3269_v55  ;;  %v3319_v55 = vpack.c.bf16 %v236_v47, %v235_v46  ;;  %v3321_v57 = vpack.c.bf16 %v254_v53, %v253_v51  ;;  %v3369_v46 = vpack.c.bf16 %v310_v38, %v309_v37  ;;  %v293_v47 = vld [vmem:[%s5825_s1 + $0x800] sm:$0xff]  ;;  %v326_v51 = vld [vmem:[%s5825_s1 + $0x908] sm:$0xff]  ;;  %v311_v53 = vld [vmem:[%s5825_s1 + $0x890] sm:$0xff] }
  0x5f   :  { %3300 = vmatpush3.bf16.msra.mxu1 %v3299_v54  ;;  %v286_v54 = vld [vmem:[%s5825_s1 + $0x7c8] sm:$0xff] }
  0x60   :  { %3302 = vmatprep.subr.bf16.mxu1 %v3301_v58  ;;  %v238_v58 = vld [vmem:[%s5825_s1 + $0x648] sm:$0xff]  ;;  %v3353_v60 = vpack.c.bf16 %v286_v54, %v285_v33  ;;  %v312_v33 = vld [vmem:[%s5825_s1 + $0x898] sm:$0xff] }
  0x61   :  { %3272 = vmatpush3.bf16.msra.mxu0 %v3271_v1  ;;  %v288_v1 = vld [vmem:[%s5825_s1 + $0x7d8] sm:$0xff]  ;;  %v334_v38 = vld [vmem:[%s5825_s1 + $0x948] sm:$0xff] }
  0x62   :  { %3306 = vmatprep.subr.bf16.mxu0 %v3305_v3  ;;  %v3355_v3 = vpack.c.bf16 %v270_v61, %v269_v59  ;;  %v3357_v8 = vpack.c.bf16 %v288_v1, %v287_v0  ;;  %v3373_v59 = vpack.c.bf16 %v312_v33, %v311_v53  ;;  %v296_v61 = vld [vmem:[%s5825_s1 + $0x818] sm:$0xff]  ;;  %v313_v1 = vld [vmem:[%s5825_s1 + $0x8a0] sm:$0xff] }
  0x63   :  { %3304 = vmatpush3.bf16.msra.mxu1 %v3303_v2  ;;  %v3323_v2 = vpack.c.bf16 %v238_v58, %v237_v45  ;;  %v3371_v45 = vpack.c.bf16 %v294_v48, %v293_v47  ;;  %v328_v0 = vld [vmem:[%s5825_s1 + $0x918] sm:$0xff]  ;;  %v3389_v47 = vpack.c.bf16 %v320_v40, %v319_v39  ;;  %v303_v48 = vld [vmem:[%s5825_s1 + $0x850] sm:$0xff]  ;;  %v321_v33 = vld [vmem:[%s5825_s1 + $0x8e0] sm:$0xff] }
  0x64   :  { %3338 = vmatprep.subr.bf16.mxu1 %v3337_v7  ;;  %1176 = vmatmul.mubr.f32.vlgmr.msra.gmra.mrb[4].mxu0 %v4276_v42  ;;  %v233_v42 = vld [vmem:[%s5825_s1 + $0x620] sm:$0xff]  ;;  %v271_v7 = vld [vmem:[%s5825_s1 + $0x750] sm:$0xff]  ;;  %v336_v53 = vld [vmem:[%s5825_s1 + $0x958] sm:$0xff] }
  0x65   :  { %3308 = vmatpush3.bf16.msra.mxu0 %v3307_v16  ;;  %1315 = vmatprep.mubr.f32.mxu0 %v698_v26  ;;  %v3315_v41 = vpack.c.bf16 %v234_v34, %v233_v42  ;;  %v290_v16 = vld [vmem:[%s5825_s1 + $0x7e8] sm:$0xff]  ;;  %v260_v26 = vld [vmem:[%s5825_s1 + $0x6f8] sm:$0xff]  ;;  %v243_v42 = vld [vmem:[%s5825_s1 + $0x670] sm:$0xff] }
  0x66   :  { %1246 = vmatmul.mubr.f32.vlgmr.msra.gmra.mrb[4].mxu1 %v4297_v52  ;;  %3310 = vmatprep.subr.bf16.mxu0 %v3309_v18  ;;  %v266_v52 = vld [vmem:[%s5825_s1 + $0x728] sm:$0xff]  ;;  %v3359_v18 = vpack.c.bf16 %v272_v9, %v271_v7  ;;  %v3361_v23 = vpack.c.bf16 %v290_v16, %v289_v14  ;;  %v244_v34 = vld [vmem:[%s5825_s1 + $0x678] sm:$0xff]  ;;  %v315_v16 = vld [vmem:[%s5825_s1 + $0x8b0] sm:$0xff] }
  0x67   :  { %3340 = vmatpush3.bf16.msra.mxu1 %v3339_v17  ;;  %1385 = vmatprep.mubr.f32.mxu1 %v699_v29  ;;  %v3347_v43 = vpack.c.bf16 %v266_v52, %v265_v35  ;;  %v3327_v17 = vpack.c.bf16 %v240_v6, %v239_v5  ;;  %v3331_v29 = vpack.c.bf16 %v242_v21, %v241_v20  ;;  %v275_v35 = vld [vmem:[%s5825_s1 + $0x770] sm:$0xff]  ;;  %v276_v52 = vld [vmem:[%s5825_s1 + $0x778] sm:$0xff]  ;;  %v346_v5 = vld [vmem:[%s5825_s1 + $0x9a8] sm:$0xff] }
  0x68   :  { %3342 = vmatprep.subr.bf16.mxu1 %v3341_v22  ;;  %v273_v22 = vld [vmem:[%s5825_s1 + $0x760] sm:$0xff]  ;;  %v391_v39 = vld [vmem:[%s5825_s1 + $0xb10] sm:$0xff] }
  0x69   :  { %3312 = vmatpush3.bf16.msra.mxu0 %v3311_v30  ;;  %v31_v30 = vld [vmem:[%s5824_s0 + $0x20] sm:$0xff] }
  0x6a   :  { %3314 = vmatprep.subr.bf16.mxu0 %v3313_v32  ;;  %v3333_v32 = vpack.c.bf16 %v260_v26, %v259_v25  ;;  %v4675_v54 = vrot.slane %v31_v30, %v3973_v13  ;;  %v331_v25 = vld [vmem:[%s5825_s1 + $0x930] sm:$0xff] }
  0x6b   :  { %3344 = vmatpush3.bf16.msra.mxu1 %v3343_v31  ;;  %v3363_v31 = vpack.c.bf16 %v274_v24, %v273_v22  ;;  %v300_v24 = vld [vmem:[%s5825_s1 + $0x838] sm:$0xff] }
  0x6c   :  { %3346 = vmatprep.subr.bf16.mxu1 %v3345_v36  ;;  %v3365_v36 = vpack.c.bf16 %v292_v28, %v291_v27  ;;  %v332_v27 = vld [vmem:[%s5825_s1 + $0x938] sm:$0xff]  ;;  %v317_v28 = vld [vmem:[%s5825_s1 + $0x8c0] sm:$0xff] }
  0x6d   :  { %3316 = vmatpush3.bf16.msra.mxu0 %v3315_v41  ;;  %v700_v41 = vcombine.high %v31_v30, %v31_v30  ;;  %v349_v30 = vld [vmem:[%s5825_s1 + $0x9c0] sm:$0xff] }
  0x6e   :  { %3318 = vmatprep.subr.bf16.mxu0 %v3317_v44  ;;  %v3367_v44 = vpack.c.bf16 %v276_v52, %v275_v35  ;;  %v301_v35 = vld [vmem:[%s5825_s1 + $0x840] sm:$0xff] }
  0x6f   :  { %3348 = vmatpush3.bf16.msra.mxu1 %v3347_v43  ;;  %v3335_v43 = vpack.c.bf16 %v244_v34, %v243_v42  ;;  %v3415_v42 = vpack.c.bf16 %v332_v27, %v331_v25  ;;  %v333_v52 = vld [vmem:[%s5825_s1 + $0x940] sm:$0xff]  ;;  %v358_v25 = vld [vmem:[%s5825_s1 + $0xa08] sm:$0xff] }
  0x70   :  { %3350 = vmatprep.subr.bf16.mxu1 %v3349_v49  ;;  %v325_v49 = vld [vmem:[%s5825_s1 + $0x900] sm:$0xff] }
  0x71   :  { %3320 = vmatpush3.bf16.msra.mxu0 %v3319_v55  ;;  %v343_v55 = vld [vmem:[%s5825_s1 + $0x990] sm:$0xff]  ;;  %v3403_v58 = vpack.c.bf16 %v326_v51, %v325_v49  ;;  %v304_v49 = vld [vmem:[%s5825_s1 + $0x858] sm:$0xff] }
  0x72   :  { %3322 = vmatprep.subr.bf16.mxu0 %v3321_v57  ;;  %v4684_v57 = vrot.slane %v700_v41, %v3973_v13  ;;  %v351_v41 = vld [vmem:[%s5825_s1 + $0x9d0] sm:$0xff] }
  0x73   :  { %3352 = vmatpush3.bf16.msra.mxu1 %v3351_v56  ;;  %v344_v56 = vld [vmem:[%s5825_s1 + $0x998] sm:$0xff] }
  0x74   :  { %3354 = vmatprep.subr.bf16.mxu1 %v3353_v60  ;;  %v295_v60 = vld [vmem:[%s5825_s1 + $0x810] sm:$0xff]  ;;  %v3405_v63 = vpack.c.bf16 %v344_v56, %v343_v55  ;;  %v716_v6 = vcombine.high %v4684_v57, %v4684_v57  ;;  %v322_v55 = vld [vmem:[%s5825_s1 + $0x8e8] sm:$0xff]  ;;  %v353_v56 = vld [vmem:[%s5825_s1 + $0x9e0] sm:$0xff] }
  0x75   :  { %3324 = vmatpush3.bf16.msra.mxu0 %v3323_v2  ;;  %v314_v2 = vld [vmem:[%s5825_s1 + $0x8a8] sm:$0xff]  ;;  %v3375_v7 = vpack.c.bf16 %v296_v61, %v295_v60  ;;  %v3393_v60 = vpack.c.bf16 %v322_v55, %v321_v33  ;;  %v305_v61 = vld [vmem:[%s5825_s1 + $0x860] sm:$0xff] }
  0x76   :  { %3326 = vmatprep.subr.bf16.mxu0 %v3325_v4  ;;  %v345_v4 = vld [vmem:[%s5825_s1 + $0x9a0] sm:$0xff]  ;;  %v3377_v9 = vpack.c.bf16 %v314_v2, %v313_v1  ;;  %v338_v1 = vld [vmem:[%s5825_s1 + $0x968] sm:$0xff]  ;;  %v323_v2 = vld [vmem:[%s5825_s1 + $0x8f0] sm:$0xff] }
  0x77   :  { %3356 = vmatpush3.bf16.msra.mxu1 %v3355_v3  ;;  %v715_v3 = vcombine.high %v4675_v54, %v4675_v54  ;;  %v3409_v14 = vpack.c.bf16 %v346_v5, %v345_v4  ;;  %v355_v4 = vld [vmem:[%s5825_s1 + $0x9f0] sm:$0xff]  ;;  %v356_v5 = vld [vmem:[%s5825_s1 + $0x9f8] sm:$0xff]  ;;  %v362_v33 = vld [vmem:[%s5825_s1 + $0xa28] sm:$0xff] }
  0x78   :  { %3358 = vmatprep.subr.bf16.mxu1 %v3357_v8  ;;  %v3407_v8 = vpack.c.bf16 %v328_v0, %v327_v62  ;;  %v306_v62 = vld [vmem:[%s5825_s1 + $0x868] sm:$0xff]  ;;  %v393_v55 = vld [vmem:[%s5825_s1 + $0xb20] sm:$0xff] }
  0x79   :  { %3328 = vmatpush3.bf16.msra.mxu0 %v3327_v17  ;;  %v316_v17 = vld [vmem:[%s5825_s1 + $0x8b8] sm:$0xff] }
  0x7a   :  { %3330 = vmatprep.subr.bf16.mxu0 %v3329_v19  ;;  %v348_v19 = vld [vmem:[%s5825_s1 + $0x9b8] sm:$0xff]  ;;  %v3381_v22 = vpack.c.bf16 %v316_v17, %v315_v16  ;;  %v373_v16 = vld [vmem:[%s5825_s1 + $0xa80] sm:$0xff]  ;;  %v374_v17 = vld [vmem:[%s5825_s1 + $0xa88] sm:$0xff] }
  0x7b   :  { %3360 = vmatpush3.bf16.msra.mxu1 %v3359_v18  ;;  %v347_v18 = vld [vmem:[%s5825_s1 + $0x9b0] sm:$0xff] }
  0x7c   :  { %3362 = vmatprep.subr.bf16.mxu1 %v3361_v23  ;;  %v299_v23 = vld [vmem:[%s5825_s1 + $0x830] sm:$0xff]  ;;  %v3413_v26 = vpack.c.bf16 %v348_v19, %v347_v18  ;;  %v405_v18 = vld [vmem:[%s5825_s1 + $0xb80] sm:$0xff]  ;;  %v406_v19 = vld [vmem:[%s5825_s1 + $0xb88] sm:$0xff] }
  0x7d   :  { %3332 = vmatpush3.bf16.msra.mxu0 %v3331_v29  ;;  %v318_v29 = vld [vmem:[%s5825_s1 + $0x8c8] sm:$0xff]  ;;  %v3465_v27 = vpack.c.bf16 %v406_v19, %v405_v18  ;;  %v383_v18 = vld [vmem:[%s5825_s1 + $0xad0] sm:$0xff]  ;;  %v384_v19 = vld [vmem:[%s5825_s1 + $0xad8] sm:$0xff] }
  0x7e   :  { %3334 = vmatprep.subr.bf16.mxu0 %v3333_v32  ;;  %v3383_v32 = vpack.c.bf16 %v300_v24, %v299_v23  ;;  %v3385_v34 = vpack.c.bf16 %v318_v29, %v317_v28  ;;  %v3433_v23 = vpack.c.bf16 %v374_v17, %v373_v16  ;;  %v357_v24 = vld [vmem:[%s5825_s1 + $0xa00] sm:$0xff]  ;;  %v390_v28 = vld [vmem:[%s5825_s1 + $0xb08] sm:$0xff]  ;;  %v375_v29 = vld [vmem:[%s5825_s1 + $0xa90] sm:$0xff] }
  0x7f   :  { %3364 = vmatpush3.bf16.msra.mxu1 %v3363_v31  ;;  %v350_v31 = vld [vmem:[%s5825_s1 + $0x9c8] sm:$0xff] }
  0x80   :  { %3366 = vmatprep.subr.bf16.mxu1 %v3365_v36  ;;  %v302_v36 = vld [vmem:[%s5825_s1 + $0x848] sm:$0xff]  ;;  %v3417_v37 = vpack.c.bf16 %v350_v31, %v349_v30  ;;  %v376_v30 = vld [vmem:[%s5825_s1 + $0xa98] sm:$0xff] }
  0x81   :  { %3336 = vmatpush3.bf16.msra.mxu0 %v3335_v43  ;;  %v352_v43 = vld [vmem:[%s5825_s1 + $0x9d8] sm:$0xff]  ;;  %v398_v17 = vld [vmem:[%s5825_s1 + $0xb48] sm:$0xff] }
  0x82   :  { %3370 = vmatprep.subr.bf16.mxu0 %v3369_v46  ;;  %v3419_v46 = vpack.c.bf16 %v334_v38, %v333_v52  ;;  %v3421_v51 = vpack.c.bf16 %v352_v43, %v351_v41  ;;  %v3437_v52 = vpack.c.bf16 %v376_v30, %v375_v29  ;;  %v360_v38 = vld [vmem:[%s5825_s1 + $0xa18] sm:$0xff]  ;;  %v377_v43 = vld [vmem:[%s5825_s1 + $0xaa0] sm:$0xff] }
  0x83   :  { %3368 = vmatpush3.bf16.msra.mxu1 %v3367_v44  ;;  %v3387_v44 = vpack.c.bf16 %v302_v36, %v301_v35  ;;  %v3435_v35 = vpack.c.bf16 %v358_v25, %v357_v24  ;;  %v392_v41 = vld [vmem:[%s5825_s1 + $0xb18] sm:$0xff]  ;;  %v3453_v24 = vpack.c.bf16 %v384_v19, %v383_v18  ;;  %v367_v25 = vld [vmem:[%s5825_s1 + $0xa50] sm:$0xff]  ;;  %v385_v30 = vld [vmem:[%s5825_s1 + $0xae0] sm:$0xff] }
  0x84   :  { %3402 = vmatprep.subr.bf16.mxu1 %v3401_v50  ;;  %1316 = vmatmul.mubr.f32.vlgmr.msra.gmra.mrb[6].mxu0 %v4468_v11  ;;  %v297_v11 = vld [vmem:[%s5825_s1 + $0x820] sm:$0xff]  ;;  %v335_v50 = vld [vmem:[%s5825_s1 + $0x950] sm:$0xff]  ;;  %v400_v29 = vld [vmem:[%s5825_s1 + $0xb58] sm:$0xff] }
  0x85   :  { %3372 = vmatpush3.bf16.msra.mxu0 %v3371_v45  ;;  %1455 = vmatprep.mubr.f32.mxu0 %v715_v3  ;;  %v3379_v20 = vpack.c.bf16 %v298_v10, %v297_v11  ;;  %v354_v45 = vld [vmem:[%s5825_s1 + $0x9e8] sm:$0xff]  ;;  %v324_v3 = vld [vmem:[%s5825_s1 + $0x8f8] sm:$0xff]  ;;  %v307_v11 = vld [vmem:[%s5825_s1 + $0x870] sm:$0xff] }
  0x86   :  { %1386 = vmatmul.mubr.f32.vlgmr.msra.gmra.mrb[6].mxu1 %v4477_v15  ;;  %3374 = vmatprep.subr.bf16.mxu0 %v3373_v59  ;;  %v330_v15 = vld [vmem:[%s5825_s1 + $0x928] sm:$0xff]  ;;  %v3423_v59 = vpack.c.bf16 %v336_v53, %v335_v50  ;;  %v3425_v0 = vpack.c.bf16 %v354_v45, %v353_v56  ;;  %v308_v10 = vld [vmem:[%s5825_s1 + $0x878] sm:$0xff]  ;;  %v379_v45 = vld [vmem:[%s5825_s1 + $0xab0] sm:$0xff] }
  0x87   :  { %3404 = vmatpush3.bf16.msra.mxu1 %v3403_v58  ;;  %1525 = vmatprep.mubr.f32.mxu1 %v716_v6  ;;  %v3411_v21 = vpack.c.bf16 %v330_v15, %v329_v12  ;;  %v3391_v58 = vpack.c.bf16 %v304_v49, %v303_v48  ;;  %v3395_v6 = vpack.c.bf16 %v306_v62, %v305_v61  ;;  %v339_v12 = vld [vmem:[%s5825_s1 + $0x970] sm:$0xff]  ;;  %v340_v15 = vld [vmem:[%s5825_s1 + $0x978] sm:$0xff]  ;;  %v410_v48 = vld [vmem:[%s5825_s1 + $0xba8] sm:$0xff] }
  0x88   :  { %3406 = vmatprep.subr.bf16.mxu1 %v3405_v63  ;;  %v337_v63 = vld [vmem:[%s5825_s1 + $0x960] sm:$0xff]  ;;  %v455_v18 = vld [vmem:[%s5825_s1 + $0xd10] sm:$0xff] }
  0x89   :  { %3376 = vmatpush3.bf16.msra.mxu0 %v3375_v7  ;;  %v32_v7 = vld [vmem:[%s5824_s0 + $0x28] sm:$0xff] }
  0x8a   :  { %3378 = vmatprep.subr.bf16.mxu0 %v3377_v9  ;;  %v3397_v9 = vpack.c.bf16 %v324_v3, %v323_v2  ;;  %v4882_v31 = vrot.slane %v32_v7, %v3973_v13  ;;  %v395_v2 = vld [vmem:[%s5825_s1 + $0xb30] sm:$0xff] }
  0x8b   :  { %3408 = vmatpush3.bf16.msra.mxu1 %v3407_v8  ;;  %v3427_v8 = vpack.c.bf16 %v338_v1, %v337_v63  ;;  %v364_v1 = vld [vmem:[%s5825_s1 + $0xa38] sm:$0xff] }
  0x8c   :  { %3410 = vmatprep.subr.bf16.mxu1 %v3409_v14  ;;  %v3429_v14 = vpack.c.bf16 %v356_v5, %v355_v4  ;;  %v396_v4 = vld [vmem:[%s5825_s1 + $0xb38] sm:$0xff]  ;;  %v381_v5 = vld [vmem:[%s5825_s1 + $0xac0] sm:$0xff] }
  0x8d   :  { %3380 = vmatpush3.bf16.msra.mxu0 %v3379_v20  ;;  %v717_v20 = vcombine.high %v32_v7, %v32_v7  ;;  %v413_v7 = vld [vmem:[%s5825_s1 + $0xbc0] sm:$0xff] }
  0x8e   :  { %3382 = vmatprep.subr.bf16.mxu0 %v3381_v22  ;;  %v3431_v22 = vpack.c.bf16 %v340_v15, %v339_v12  ;;  %v365_v12 = vld [vmem:[%s5825_s1 + $0xa40] sm:$0xff] }
  0x8f   :  { %3412 = vmatpush3.bf16.msra.mxu1 %v3411_v21  ;;  %v3399_v21 = vpack.c.bf16 %v308_v10, %v307_v11  ;;  %v3479_v11 = vpack.c.bf16 %v396_v4, %v395_v2  ;;  %v397_v15 = vld [vmem:[%s5825_s1 + $0xb40] sm:$0xff]  ;;  %v422_v2 = vld [vmem:[%s5825_s1 + $0xc08] sm:$0xff] }
  0x90   :  { %3414 = vmatprep.subr.bf16.mxu1 %v3413_v26  ;;  %v389_v26 = vld [vmem:[%s5825_s1 + $0xb00] sm:$0xff] }
  0x91   :  { %3384 = vmatpush3.bf16.msra.mxu0 %v3383_v32  ;;  %v407_v32 = vld [vmem:[%s5825_s1 + $0xb90] sm:$0xff]  ;;  %v3467_v36 = vpack.c.bf16 %v390_v28, %v389_v26  ;;  %v368_v26 = vld [vmem:[%s5825_s1 + $0xa58] sm:$0xff] }
  0x92   :  { %3386 = vmatprep.subr.bf16.mxu0 %v3385_v34  ;;  %v4891_v34 = vrot.slane %v717_v20, %v3973_v13  ;;  %v415_v20 = vld [vmem:[%s5825_s1 + $0xbd0] sm:$0xff] }
  0x93   :  { %3416 = vmatpush3.bf16.msra.mxu1 %v3415_v42  ;;  %v408_v42 = vld [vmem:[%s5825_s1 + $0xb98] sm:$0xff] }
  0x94   :  { %3418 = vmatprep.subr.bf16.mxu1 %v3417_v37  ;;  %v359_v37 = vld [vmem:[%s5825_s1 + $0xa10] sm:$0xff]  ;;  %v3469_v40 = vpack.c.bf16 %v408_v42, %v407_v32  ;;  %v733_v49 = vcombine.high %v4891_v34, %v4891_v34  ;;  %v386_v32 = vld [vmem:[%s5825_s1 + $0xae8] sm:$0xff]  ;;  %v417_v42 = vld [vmem:[%s5825_s1 + $0xbe0] sm:$0xff] }
  0x95   :  { %3388 = vmatpush3.bf16.msra.mxu0 %v3387_v44  ;;  %v378_v44 = vld [vmem:[%s5825_s1 + $0xaa8] sm:$0xff]  ;;  %v3439_v50 = vpack.c.bf16 %v360_v38, %v359_v37  ;;  %v3457_v37 = vpack.c.bf16 %v386_v32, %v385_v30  ;;  %v369_v38 = vld [vmem:[%s5825_s1 + $0xa60] sm:$0xff] }
  0x96   :  { %3390 = vmatprep.subr.bf16.mxu0 %v3389_v47  ;;  %v409_v47 = vld [vmem:[%s5825_s1 + $0xba0] sm:$0xff]  ;;  %v3441_v53 = vpack.c.bf16 %v378_v44, %v377_v43  ;;  %v402_v43 = vld [vmem:[%s5825_s1 + $0xb68] sm:$0xff]  ;;  %v387_v44 = vld [vmem:[%s5825_s1 + $0xaf0] sm:$0xff] }
  0x97   :  { %3420 = vmatpush3.bf16.msra.mxu1 %v3419_v46  ;;  %v732_v46 = vcombine.high %v4882_v31, %v4882_v31  ;;  %v3473_v56 = vpack.c.bf16 %v410_v48, %v409_v47  ;;  %v419_v47 = vld [vmem:[%s5825_s1 + $0xbf0] sm:$0xff]  ;;  %v420_v48 = vld [vmem:[%s5825_s1 + $0xbf8] sm:$0xff] }
  0x98   :  { %3422 = vmatprep.subr.bf16.mxu1 %v3421_v51  ;;  %v3471_v51 = vpack.c.bf16 %v392_v41, %v391_v39  ;;  %v370_v39 = vld [vmem:[%s5825_s1 + $0xa68] sm:$0xff] }
  0x99   :  { %3392 = vmatpush3.bf16.msra.mxu0 %v3391_v58  ;;  %v380_v58 = vld [vmem:[%s5825_s1 + $0xab8] sm:$0xff] }
  0x9a   :  { %3394 = vmatprep.subr.bf16.mxu0 %v3393_v60  ;;  %v412_v60 = vld [vmem:[%s5825_s1 + $0xbb8] sm:$0xff]  ;;  %v3445_v63 = vpack.c.bf16 %v380_v58, %v379_v45  ;;  %v437_v45 = vld [vmem:[%s5825_s1 + $0xc80] sm:$0xff]  ;;  %v438_v58 = vld [vmem:[%s5825_s1 + $0xc88] sm:$0xff] }
  0x9b   :  { %3424 = vmatpush3.bf16.msra.mxu1 %v3423_v59  ;;  %v411_v59 = vld [vmem:[%s5825_s1 + $0xbb0] sm:$0xff] }
  0x9c   :  { %3426 = vmatprep.subr.bf16.mxu1 %v3425_v0  ;;  %v363_v0 = vld [vmem:[%s5825_s1 + $0xa30] sm:$0xff]  ;;  %v3477_v3 = vpack.c.bf16 %v412_v60, %v411_v59  ;;  %v469_v59 = vld [vmem:[%s5825_s1 + $0xd80] sm:$0xff]  ;;  %v470_v60 = vld [vmem:[%s5825_s1 + $0xd88] sm:$0xff] }
  0x9d   :  { %3396 = vmatpush3.bf16.msra.mxu0 %v3395_v6  ;;  %v382_v6 = vld [vmem:[%s5825_s1 + $0xac8] sm:$0xff]  ;;  %v3529_v4 = vpack.c.bf16 %v470_v60, %v469_v59 }
  0x9e   :  { %3398 = vmatprep.subr.bf16.mxu0 %v3397_v9  ;;  %v3447_v9 = vpack.c.bf16 %v364_v1, %v363_v0  ;;  %v3449_v10 = vpack.c.bf16 %v382_v6, %v381_v5  ;;  %v3497_v0 = vpack.c.bf16 %v438_v58, %v437_v45  ;;  %v421_v1 = vld [vmem:[%s5825_s1 + $0xc00] sm:$0xff]  ;;  %v454_v5 = vld [vmem:[%s5825_s1 + $0xd08] sm:$0xff]  ;;  %v439_v6 = vld [vmem:[%s5825_s1 + $0xc90] sm:$0xff] }
  0x9f   :  { %3428 = vmatpush3.bf16.msra.mxu1 %v3427_v8  ;;  %v414_v8 = vld [vmem:[%s5825_s1 + $0xbc8] sm:$0xff] }
  0xa0   :  { %3430 = vmatprep.subr.bf16.mxu1 %v3429_v14  ;;  %v366_v14 = vld [vmem:[%s5825_s1 + $0xa48] sm:$0xff]  ;;  %v3481_v16 = vpack.c.bf16 %v414_v8, %v413_v7  ;;  %v440_v7 = vld [vmem:[%s5825_s1 + $0xc98] sm:$0xff] }
  0xa1   :  { %3400 = vmatpush3.bf16.msra.mxu0 %v3399_v21  ;;  %v416_v21 = vld [vmem:[%s5825_s1 + $0xbd8] sm:$0xff] }
  0xa2   :  { %3434 = vmatprep.subr.bf16.mxu0 %v3433_v23  ;;  %v3483_v23 = vpack.c.bf16 %v398_v17, %v397_v15  ;;  %v3485_v28 = vpack.c.bf16 %v416_v21, %v415_v20  ;;  %v3501_v15 = vpack.c.bf16 %v440_v7, %v439_v6  ;;  %v424_v17 = vld [vmem:[%s5825_s1 + $0xc18] sm:$0xff]  ;;  %v441_v21 = vld [vmem:[%s5825_s1 + $0xca0] sm:$0xff] }
  0xa3   :  { %3432 = vmatpush3.bf16.msra.mxu1 %v3431_v22  ;;  %v3451_v22 = vpack.c.bf16 %v366_v14, %v365_v12  ;;  %v3499_v12 = vpack.c.bf16 %v422_v2, %v421_v1  ;;  %v456_v20 = vld [vmem:[%s5825_s1 + $0xd18] sm:$0xff] }
  0xa4   :  { %3466 = vmatprep.subr.bf16.mxu1 %v3465_v27  ;;  %1456 = vmatmul.mubr.f32.vlgmr.msra.gmra.mrb[8].mxu0 %v4675_v54  ;;  %v361_v54 = vld [vmem:[%s5825_s1 + $0xa20] sm:$0xff]  ;;  %v399_v27 = vld [vmem:[%s5825_s1 + $0xb50] sm:$0xff] }
  0xa5   :  { %3436 = vmatpush3.bf16.msra.mxu0 %v3435_v35  ;;  %1595 = vmatprep.mubr.f32.mxu0 %v732_v46  ;;  %v3443_v61 = vpack.c.bf16 %v362_v33, %v361_v54  ;;  %v418_v35 = vld [vmem:[%s5825_s1 + $0xbe8] sm:$0xff]  ;;  %v388_v46 = vld [vmem:[%s5825_s1 + $0xaf8] sm:$0xff]  ;;  %v371_v54 = vld [vmem:[%s5825_s1 + $0xa70] sm:$0xff] }
  0xa6   :  { %1526 = vmatmul.mubr.f32.vlgmr.msra.gmra.mrb[8].mxu1 %v4684_v57  ;;  %3438 = vmatprep.subr.bf16.mxu0 %v3437_v52  ;;  %v394_v57 = vld [vmem:[%s5825_s1 + $0xb28] sm:$0xff]  ;;  %v3487_v52 = vpack.c.bf16 %v400_v29, %v399_v27  ;;  %v3489_v41 = vpack.c.bf16 %v418_v35, %v417_v42  ;;  %v372_v33 = vld [vmem:[%s5825_s1 + $0xa78] sm:$0xff] }
  0xa7   :  { %3468 = vmatpush3.bf16.msra.mxu1 %v3467_v36  ;;  %1665 = vmatprep.mubr.f32.mxu1 %v733_v49  ;;  %v3475_v62 = vpack.c.bf16 %v394_v57, %v393_v55  ;;  %v3455_v36 = vpack.c.bf16 %v368_v26, %v367_v25  ;;  %v3459_v49 = vpack.c.bf16 %v370_v39, %v369_v38  ;;  %v403_v55 = vld [vmem:[%s5825_s1 + $0xb70] sm:$0xff]  ;;  %v404_v57 = vld [vmem:[%s5825_s1 + $0xb78] sm:$0xff]  ;;  %v474_v25 = vld [vmem:[%s5825_s1 + $0xda8] sm:$0xff] }
  0xa8   :  { %3470 = vmatprep.subr.bf16.mxu1 %v3469_v40  ;;  %v401_v40 = vld [vmem:[%s5825_s1 + $0xb60] sm:$0xff] }
  0xa9   :  { %3440 = vmatpush3.bf16.msra.mxu0 %v3439_v50  ;;  %v33_v50 = vld [vmem:[%s5824_s0 + $0x30] sm:$0xff] }
  0xaa   :  { %3442 = vmatprep.subr.bf16.mxu0 %v3441_v53  ;;  %v3461_v53 = vpack.c.bf16 %v388_v46, %v387_v44  ;;  %v5089_v8 = vrot.slane %v33_v50, %v3973_v13 }
  0xab   :  { %3472 = vmatpush3.bf16.msra.mxu1 %v3471_v51  ;;  %v3491_v51 = vpack.c.bf16 %v402_v43, %v401_v40 }
  0xac   :  { %3474 = vmatprep.subr.bf16.mxu1 %v3473_v56  ;;  %v3493_v56 = vpack.c.bf16 %v420_v48, %v419_v47 }
  0xad   :  { %3444 = vmatpush3.bf16.msra.mxu0 %v3443_v61  ;;  %v734_v61 = vcombine.high %v33_v50, %v33_v50 }
  0xae   :  { %3446 = vmatprep.subr.bf16.mxu0 %v3445_v63  ;;  %v3495_v63 = vpack.c.bf16 %v404_v57, %v403_v55 }
  0xaf   :  { %3476 = vmatpush3.bf16.msra.mxu1 %v3475_v62  ;;  %v3463_v62 = vpack.c.bf16 %v372_v33, %v371_v54 }
  0xb0   :  { %3478 = vmatprep.subr.bf16.mxu1 %v3477_v3  ;;  %v453_v3 = vld [vmem:[%s5825_s1 + $0xd00] sm:$0xff] }
  0xb1   :  { %3448 = vmatpush3.bf16.msra.mxu0 %v3447_v9  ;;  %v471_v9 = vld [vmem:[%s5825_s1 + $0xd90] sm:$0xff]  ;;  %v3531_v14 = vpack.c.bf16 %v454_v5, %v453_v3 }
  0xb2   :  { %3450 = vmatprep.subr.bf16.mxu0 %v3449_v10  ;;  %v5098_v10 = vrot.slane %v734_v61, %v3973_v13 }
  0xb3   :  { %3480 = vmatpush3.bf16.msra.mxu1 %v3479_v11  ;;  %v472_v11 = vld [vmem:[%s5825_s1 + $0xd98] sm:$0xff] }
  0xb4   :  { %3482 = vmatprep.subr.bf16.mxu1 %v3481_v16  ;;  %v423_v16 = vld [vmem:[%s5825_s1 + $0xc10] sm:$0xff]  ;;  %v3533_v19 = vpack.c.bf16 %v472_v11, %v471_v9  ;;  %v750_v26 = vcombine.high %v5098_v10, %v5098_v10 }
  0xb5   :  { %3452 = vmatpush3.bf16.msra.mxu0 %v3451_v22  ;;  %v442_v22 = vld [vmem:[%s5825_s1 + $0xca8] sm:$0xff]  ;;  %v3503_v27 = vpack.c.bf16 %v424_v17, %v423_v16 }
  0xb6   :  { %3454 = vmatprep.subr.bf16.mxu0 %v3453_v24  ;;  %v473_v24 = vld [vmem:[%s5825_s1 + $0xda0] sm:$0xff] }
  0xb7   :  { %3484 = vmatpush3.bf16.msra.mxu1 %v3483_v23  ;;  %v749_v23 = vcombine.high %v5089_v8, %v5089_v8 }
  0xb8   :  { %3486 = vmatprep.subr.bf16.mxu1 %v3485_v28 }
  0xb9   :  { %3456 = vmatpush3.bf16.msra.mxu0 %v3455_v36 }
  0xba   :  { %3458 = vmatprep.subr.bf16.mxu0 %v3457_v37 }
  0xbb   :  { %3488 = vmatpush3.bf16.msra.mxu1 %v3487_v52 }
  0xbc   :  { %3490 = vmatprep.subr.bf16.mxu1 %v3489_v41 }
  0xbd   :  { %3460 = vmatpush3.bf16.msra.mxu0 %v3459_v49 }
  0xbe   :  { %3462 = vmatprep.subr.bf16.mxu0 %v3461_v53 }
  0xbf   :  { %3492 = vmatpush3.bf16.msra.mxu1 %v3491_v51 }
  0xc0   :  { %3494 = vmatprep.subr.bf16.mxu1 %v3493_v56 }
  0xc1   :  { %3464 = vmatpush3.bf16.msra.mxu0 %v3463_v62 }
  0xc2   :  { %3498 = vmatprep.subr.bf16.mxu0 %v3497_v0 }
  0xc3   :  { %3496 = vmatpush3.bf16.msra.mxu1 %v3495_v63 }
  0xc4   :  { %3530 = vmatprep.subr.bf16.mxu1 %v3529_v4  ;;  %1596 = vmatmul.mubr.f32.vlgmr.msra.gmra.mrb[10].mxu0 %v4882_v31 }
  0xc5   :  { %3500 = vmatpush3.bf16.msra.mxu0 %v3499_v12 }
  0xc6   :  { %1666 = vmatmul.mubr.f32.vlgmr.msra.gmra.mrb[10].mxu1 %v4891_v34 }
  0xc7   :  { %12 = vsyncpa [#allocation3], 0  ;;  %3532 = vmatpush3.bf16.msra.mxu1 %v3531_v14  ;;  %3502 = vmatprep.subr.bf16.mxu0 %v3501_v15  ;;  %v3535_v28 = vpack.c.bf16 %v456_v20, %v455_v18  ;;  %v3505_v31 = vpack.c.bf16 %v442_v22, %v441_v21  ;;  %v425_v29 = vld [vmem:[%s5825_s1 + $0xc20] sm:$0xff]  ;;  %v426_v30 = vld [vmem:[%s5825_s1 + $0xc28] sm:$0xff]  ;;  %v3537_v34 = vpack.c.bf16 %v474_v25, %v473_v24  ;;  %vm828_vm0 = vcmask 130048   ;;  %s3782_s11 = smov [#allocation2]  }
  0xc8   :  { %v457_v32 = vld [vmem:[%s5825_s1 + $0xd20] sm:$0xff]  ;;  %3534 = vmatprep.subr.bf16.mxu1 %v3533_v19  ;;  %v458_v42 = vld [vmem:[%s5825_s1 + $0xd28] sm:$0xff]  ;;  %v443_v35 = vld [vmem:[%s5825_s1 + $0xcb0] sm:$0xff]  ;;  %1735 = vmatprep.mubr.f32.mxu0 %v749_v23  ;;  %v3507_v38 = vpack.c.bf16 %v426_v30, %v425_v29  ;;  %vm3780_vm1 = vmmov 0   ;;  %s2356_s12 = sshll.u32 %s3782_s11, 4  ;;  %s2357_s12 = int_to_ptr.vmem [resolvable:$true] %s2356_s12 }
  0xc9   :  { %v444_v36 = vld [vmem:[%s5825_s1 + $0xcb8] sm:$0xff]  ;;  %v475_v52 = vld [vmem:[%s5825_s1 + $0xdb0] sm:$0xff]  ;;  %1805 = vmatprep.mubr.f32.mxu1 %v750_v26  ;;  %3504 = vmatpush3.bf16.msra.mxu0 %v3503_v27  ;;  %v3539_v39 = vpack.c.bf16 %v458_v42, %v457_v32  ;;  %v445_v48 = vld [vmem:[%s5825_s1 + $0xcc0] sm:$0xff]  ;;  %p3759_p1 = scmp.lt.s32.totalorder %s2357_s12, %s2357_s12 }
  0xca   :  { %v476_v37 = vld [vmem:[%s5825_s1 + $0xdb8] sm:$0xff]  ;;  %3506 = vmatprep.subr.bf16.mxu0 %v3505_v31  ;;  %v3509_v40 = vpack.c.bf16 %v444_v36, %v443_v35  ;;  %v427_v41 = vld [vmem:[%s5825_s1 + $0xc30] sm:$0xff]  ;;  %v446_v49 = vld [vmem:[%s5825_s1 + $0xcc8] sm:$0xff] }
  0xcb   :  { %3536 = vmatpush3.bf16.msra.mxu1 %v3535_v28  ;;  %v428_v43 = vld [vmem:[%s5825_s1 + $0xc38] sm:$0xff]  ;;  %v459_v44 = vld [vmem:[%s5825_s1 + $0xd30] sm:$0xff]  ;;  %v3541_v46 = vpack.c.bf16 %v476_v37, %v475_v52  ;;  %v477_v50 = vld [vmem:[%s5825_s1 + $0xdc0] sm:$0xff]  ;;  %v3513_v33 = vpack.c.bf16 %v446_v49, %v445_v48 }
  0xcc   :  { %3538 = vmatprep.subr.bf16.mxu1 %v3537_v34  ;;  %v460_v47 = vld [vmem:[%s5825_s1 + $0xd38] sm:$0xff]  ;;  %v478_v51 = vld [vmem:[%s5825_s1 + $0xdc8] sm:$0xff]  ;;  %v3511_v53 = vpack.c.bf16 %v428_v43, %v427_v41  ;;  %v429_v55 = vld [vmem:[%s5825_s1 + $0xc40] sm:$0xff] }
  0xcd   :  { %3508 = vmatpush3.bf16.msra.mxu0 %v3507_v38  ;;  %v3543_v54 = vpack.c.bf16 %v460_v47, %v459_v44  ;;  %v430_v56 = vld [vmem:[%s5825_s1 + $0xc48] sm:$0xff]  ;;  %v461_v57 = vld [vmem:[%s5825_s1 + $0xd40] sm:$0xff]  ;;  %v3545_v45 = vpack.c.bf16 %v478_v51, %v477_v50  ;;  %v447_v59 = vld [vmem:[%s5825_s1 + $0xcd0] sm:$0xff] }
  0xce   :  { %3510 = vmatprep.subr.bf16.mxu0 %v3509_v40  ;;  %v462_v58 = vld [vmem:[%s5825_s1 + $0xd48] sm:$0xff]  ;;  %v448_v60 = vld [vmem:[%s5825_s1 + $0xcd8] sm:$0xff]  ;;  %v479_v61 = vld [vmem:[%s5825_s1 + $0xdd0] sm:$0xff]  ;;  %v3515_v63 = vpack.c.bf16 %v430_v56, %v429_v55 }
  0xcf   :  { %3540 = vmatpush3.bf16.msra.mxu1 %v3539_v39  ;;  %v480_v62 = vld [vmem:[%s5825_s1 + $0xdd8] sm:$0xff]  ;;  %v3547_v0 = vpack.c.bf16 %v462_v58, %v461_v57  ;;  %v3517_v1 = vpack.c.bf16 %v448_v60, %v447_v59  ;;  %v431_v2 = vld [vmem:[%s5825_s1 + $0xc50] sm:$0xff]  ;;  %v449_v7 = vld [vmem:[%s5825_s1 + $0xce0] sm:$0xff] }
  0xd0   :  { %3542 = vmatprep.subr.bf16.mxu1 %v3541_v46  ;;  %v432_v3 = vld [vmem:[%s5825_s1 + $0xc58] sm:$0xff]  ;;  %v463_v4 = vld [vmem:[%s5825_s1 + $0xd50] sm:$0xff]  ;;  %v3549_v5 = vpack.c.bf16 %v480_v62, %v479_v61  ;;  %v450_v9 = vld [vmem:[%s5825_s1 + $0xce8] sm:$0xff] }
  0xd1   :  { %3512 = vmatpush3.bf16.msra.mxu0 %v3511_v53  ;;  %v464_v6 = vld [vmem:[%s5825_s1 + $0xd58] sm:$0xff]  ;;  %v481_v11 = vld [vmem:[%s5825_s1 + $0xde0] sm:$0xff]  ;;  %v482_v12 = vld [vmem:[%s5825_s1 + $0xde8] sm:$0xff]  ;;  %v3519_v14 = vpack.c.bf16 %v432_v3, %v431_v2  ;;  %v3521_v16 = vpack.c.bf16 %v450_v9, %v449_v7 }
  0xd2   :  { %3514 = vmatprep.subr.bf16.mxu0 %v3513_v33  ;;  %v3551_v15 = vpack.c.bf16 %v464_v6, %v463_v4  ;;  %v433_v17 = vld [vmem:[%s5825_s1 + $0xc60] sm:$0xff]  ;;  %v434_v18 = vld [vmem:[%s5825_s1 + $0xc68] sm:$0xff]  ;;  %v3553_v20 = vpack.c.bf16 %v482_v12, %v481_v11  ;;  %v451_v22 = vld [vmem:[%s5825_s1 + $0xcf0] sm:$0xff] }
  0xd3   :  { %3544 = vmatpush3.bf16.msra.mxu1 %v3543_v54  ;;  %v465_v19 = vld [vmem:[%s5825_s1 + $0xd60] sm:$0xff]  ;;  %v466_v21 = vld [vmem:[%s5825_s1 + $0xd68] sm:$0xff]  ;;  %v452_v23 = vld [vmem:[%s5825_s1 + $0xcf8] sm:$0xff]  ;;  %v3523_v26 = vpack.c.bf16 %v434_v18, %v433_v17 }
  0xd4   :  { %3546 = vmatprep.subr.bf16.mxu1 %v3545_v45  ;;  %v483_v24 = vld [vmem:[%s5825_s1 + $0xdf0] sm:$0xff]  ;;  %v484_v25 = vld [vmem:[%s5825_s1 + $0xdf8] sm:$0xff]  ;;  %v3555_v28 = vpack.c.bf16 %v466_v21, %v465_v19  ;;  %v3525_v31 = vpack.c.bf16 %v452_v23, %v451_v22  ;;  %v501_v35 = vld [vmem:[%s5825_s1 + $0xe80] sm:$0xff] }
  0xd5   :  { %3516 = vmatpush3.bf16.msra.mxu0 %v3515_v63  ;;  %v34_v27 = vld [vmem:[%s5824_s0 + $0x38] sm:$0xff]  ;;  %v435_v29 = vld [vmem:[%s5825_s1 + $0xc70] sm:$0xff]  ;;  %v3557_v34 = vpack.c.bf16 %v484_v25, %v483_v24  ;;  %v502_v36 = vld [vmem:[%s5825_s1 + $0xe88] sm:$0xff] }
  0xd6   :  { %3518 = vmatprep.subr.bf16.mxu0 %v3517_v1  ;;  %v436_v30 = vld [vmem:[%s5825_s1 + $0xc78] sm:$0xff]  ;;  %v467_v32 = vld [vmem:[%s5825_s1 + $0xd70] sm:$0xff]  ;;  %v533_v52 = vld [vmem:[%s5825_s1 + $0xf80] sm:$0xff]  ;;  %v751_v38 = vcombine.high %v34_v27, %v34_v27  ;;  %v3561_v41 = vpack.c.bf16 %v502_v36, %v501_v35  ;;  %v5296_v51 = vrot.slane %v34_v27, %v3973_v13 }
  0xd7   :  { %3548 = vmatpush3.bf16.msra.mxu1 %v3547_v0  ;;  %v468_v42 = vld [vmem:[%s5825_s1 + $0xd78] sm:$0xff]  ;;  %v534_v37 = vld [vmem:[%s5825_s1 + $0xf88] sm:$0xff]  ;;  %v3527_v39 = vpack.c.bf16 %v436_v30, %v435_v29  ;;  %v485_v43 = vld [vmem:[%s5825_s1 + $0xe00] sm:$0xff] }
  0xd8   :  { %3550 = vmatprep.subr.bf16.mxu1 %v3549_v5  ;;  %v3559_v40 = vpack.c.bf16 %v468_v42, %v467_v32  ;;  %v486_v44 = vld [vmem:[%s5825_s1 + $0xe08] sm:$0xff]  ;;  %v517_v46 = vld [vmem:[%s5825_s1 + $0xf00] sm:$0xff]  ;;  %v3593_v47 = vpack.c.bf16 %v534_v37, %v533_v52  ;;  %v503_v49 = vld [vmem:[%s5825_s1 + $0xe90] sm:$0xff]  ;;  %v5305_v33 = vrot.slane %v751_v38, %v3973_v13  ;;  %v766_v0 = vcombine.high %v5296_v51, %v5296_v51 }
  0xd9   :  { %3520 = vmatpush3.bf16.msra.mxu0 %v3519_v14  ;;  %v518_v48 = vld [vmem:[%s5825_s1 + $0xf08] sm:$0xff]  ;;  %v504_v50 = vld [vmem:[%s5825_s1 + $0xe98] sm:$0xff]  ;;  %v535_v53 = vld [vmem:[%s5825_s1 + $0xf90] sm:$0xff]  ;;  %v3563_v55 = vpack.c.bf16 %v486_v44, %v485_v43 }
  0xda   :  { %3522 = vmatprep.subr.bf16.mxu0 %v3521_v16  ;;  %v536_v54 = vld [vmem:[%s5825_s1 + $0xf98] sm:$0xff]  ;;  %v3595_v56 = vpack.c.bf16 %v518_v48, %v517_v46  ;;  %v3565_v57 = vpack.c.bf16 %v504_v50, %v503_v49  ;;  %v487_v45 = vld [vmem:[%s5825_s1 + $0xe10] sm:$0xff]  ;;  %v505_v62 = vld [vmem:[%s5825_s1 + $0xea0] sm:$0xff]  ;;  %v767_v3 = vcombine.high %v5305_v33, %v5305_v33 }
  0xdb   :  { %3552 = vmatpush3.bf16.msra.mxu1 %v3551_v15  ;;  %v488_v58 = vld [vmem:[%s5825_s1 + $0xe18] sm:$0xff]  ;;  %v519_v59 = vld [vmem:[%s5825_s1 + $0xf10] sm:$0xff]  ;;  %v3597_v60 = vpack.c.bf16 %v536_v54, %v535_v53  ;;  %v506_v63 = vld [vmem:[%s5825_s1 + $0xea8] sm:$0xff] }
  0xdc   :  { %3554 = vmatprep.subr.bf16.mxu1 %v3553_v20  ;;  %v520_v61 = vld [vmem:[%s5825_s1 + $0xf18] sm:$0xff]  ;;  %v537_v1 = vld [vmem:[%s5825_s1 + $0xfa0] sm:$0xff]  ;;  %v538_v2 = vld [vmem:[%s5825_s1 + $0xfa8] sm:$0xff]  ;;  %v3567_v4 = vpack.c.bf16 %v488_v58, %v487_v45  ;;  %v3569_v6 = vpack.c.bf16 %v506_v63, %v505_v62 }
  0xdd   :  { %3524 = vmatpush3.bf16.msra.mxu0 %v3523_v26  ;;  %v3599_v5 = vpack.c.bf16 %v520_v61, %v519_v59  ;;  %v490_v7 = vld [vmem:[%s5825_s1 + $0xe28] sm:$0xff]  ;;  %v521_v9 = vld [vmem:[%s5825_s1 + $0xf20] sm:$0xff]  ;;  %v3601_v11 = vpack.c.bf16 %v538_v2, %v537_v1  ;;  %v507_v12 = vld [vmem:[%s5825_s1 + $0xeb0] sm:$0xff] }
  0xde   :  { %3526 = vmatprep.subr.bf16.mxu0 %v3525_v31  ;;  %v508_v14 = vld [vmem:[%s5825_s1 + $0xeb8] sm:$0xff]  ;;  %v539_v15 = vld [vmem:[%s5825_s1 + $0xfb0] sm:$0xff]  ;;  %v509_v25 = vld [vmem:[%s5825_s1 + $0xec0] sm:$0xff] }
  0xdf   :  { %3556 = vmatpush3.bf16.msra.mxu1 %v3555_v28  ;;  %v540_v16 = vld [vmem:[%s5825_s1 + $0xfb8] sm:$0xff]  ;;  %v3573_v19 = vpack.c.bf16 %v508_v14, %v507_v12  ;;  %v491_v20 = vld [vmem:[%s5825_s1 + $0xe30] sm:$0xff]  ;;  %v510_v26 = vld [vmem:[%s5825_s1 + $0xec8] sm:$0xff] }
  0xe0   :  { %3558 = vmatprep.subr.bf16.mxu1 %v3557_v34  ;;  %v492_v21 = vld [vmem:[%s5825_s1 + $0xe38] sm:$0xff]  ;;  %v523_v22 = vld [vmem:[%s5825_s1 + $0xf30] sm:$0xff]  ;;  %v3605_v23 = vpack.c.bf16 %v540_v16, %v539_v15  ;;  %v541_v27 = vld [vmem:[%s5825_s1 + $0xfc0] sm:$0xff]  ;;  %v3577_v30 = vpack.c.bf16 %v510_v26, %v509_v25 }
  0xe1   :  { %3528 = vmatpush3.bf16.msra.mxu0 %v3527_v39  ;;  %v524_v24 = vld [vmem:[%s5825_s1 + $0xf38] sm:$0xff]  ;;  %v542_v28 = vld [vmem:[%s5825_s1 + $0xfc8] sm:$0xff]  ;;  %v3575_v31 = vpack.c.bf16 %v492_v21, %v491_v20  ;;  %v493_v32 = vld [vmem:[%s5825_s1 + $0xe40] sm:$0xff] }
  0xe2   :  { %3562 = vmatprep.subr.bf16.mxu0 %v3561_v41  ;;  %v3607_v29 = vpack.c.bf16 %v524_v24, %v523_v22  ;;  %v494_v34 = vld [vmem:[%s5825_s1 + $0xe48] sm:$0xff]  ;;  %v525_v42 = vld [vmem:[%s5825_s1 + $0xf40] sm:$0xff]  ;;  %v3609_v35 = vpack.c.bf16 %v542_v28, %v541_v27  ;;  %v511_v52 = vld [vmem:[%s5825_s1 + $0xed0] sm:$0xff] }
  0xe3   :  { %3560 = vmatpush3.bf16.msra.mxu1 %v3559_v40  ;;  %v526_v36 = vld [vmem:[%s5825_s1 + $0xf48] sm:$0xff]  ;;  %v512_v37 = vld [vmem:[%s5825_s1 + $0xed8] sm:$0xff]  ;;  %v543_v38 = vld [vmem:[%s5825_s1 + $0xfd0] sm:$0xff]  ;;  %v3579_v40 = vpack.c.bf16 %v494_v34, %v493_v32 }
  0xe4   :  { %3594 = vmatprep.subr.bf16.mxu1 %v3593_v47  ;;  %1736 = vmatmul.mubr.f32.vlgmr.msra.gmra.mrb[12].mxu0 %v5089_v8  ;;  %v489_v8 = vld [vmem:[%s5825_s1 + $0xe20] sm:$0xff]  ;;  %v544_v39 = vld [vmem:[%s5825_s1 + $0xfd8] sm:$0xff]  ;;  %v3611_v41 = vpack.c.bf16 %v526_v36, %v525_v42  ;;  %v3581_v43 = vpack.c.bf16 %v512_v37, %v511_v52  ;;  %v495_v44 = vld [vmem:[%s5825_s1 + $0xe50] sm:$0xff] }
  0xe5   :  { %3564 = vmatpush3.bf16.msra.mxu0 %v3563_v55  ;;  %1875 = vmatprep.mubr.f32.mxu0 %v766_v0  ;;  %v3571_v17 = vpack.c.bf16 %v490_v7, %v489_v8  ;;  %v496_v46 = vld [vmem:[%s5825_s1 + $0xe58] sm:$0xff]  ;;  %v527_v47 = vld [vmem:[%s5825_s1 + $0xf50] sm:$0xff]  ;;  %v3613_v48 = vpack.c.bf16 %v544_v39, %v543_v38  ;;  %v513_v50 = vld [vmem:[%s5825_s1 + $0xee0] sm:$0xff] }
  0xe6   :  { %1806 = vmatmul.mubr.f32.vlgmr.msra.gmra.mrb[12].mxu1 %v5098_v10  ;;  %3566 = vmatprep.subr.bf16.mxu0 %v3565_v57  ;;  %v522_v10 = vld [vmem:[%s5825_s1 + $0xf28] sm:$0xff]  ;;  %v528_v49 = vld [vmem:[%s5825_s1 + $0xf58] sm:$0xff]  ;;  %v545_v54 = vld [vmem:[%s5825_s1 + $0xfe0] sm:$0xff] }
  0xe7   :  { %3596 = vmatpush3.bf16.msra.mxu1 %v3595_v56  ;;  %1945 = vmatprep.mubr.f32.mxu1 %v767_v3  ;;  %v3603_v18 = vpack.c.bf16 %v522_v10, %v521_v9  ;;  %v514_v53 = vld [vmem:[%s5825_s1 + $0xee8] sm:$0xff]  ;;  %v3583_v56 = vpack.c.bf16 %v496_v46, %v495_v44  ;;  %v3615_v57 = vpack.c.bf16 %v528_v49, %v527_v47  ;;  %v497_v58 = vld [vmem:[%s5825_s1 + $0xe60] sm:$0xff]  ;;  %v515_v0 = vld [vmem:[%s5825_s1 + $0xef0] sm:$0xff] }
  0xe8   :  { %3598 = vmatprep.subr.bf16.mxu1 %v3597_v60  ;;  %v546_v55 = vld [vmem:[%s5825_s1 + $0xfe8] sm:$0xff]  ;;  %v3585_v45 = vpack.c.bf16 %v514_v53, %v513_v50  ;;  %v529_v60 = vld [vmem:[%s5825_s1 + $0xf60] sm:$0xff]  ;;  %v516_v1 = vld [vmem:[%s5825_s1 + $0xef8] sm:$0xff] }
  0xe9   :  { %3568 = vmatpush3.bf16.msra.mxu0 %v3567_v4  ;;  %v498_v59 = vld [vmem:[%s5825_s1 + $0xe68] sm:$0xff]  ;;  %v3617_v62 = vpack.c.bf16 %v546_v55, %v545_v54  ;;  %v2364_v2 = vld [vmem:[%s5826_s2] ss:$0 sm:$0xff]  ;;  %v3589_v14 = vpack.c.bf16 %v516_v1, %v515_v0  ;;  %v499_v15 = vld [vmem:[%s5825_s1 + $0xe70] sm:$0xff] }
  0xea   :  { %3570 = vmatprep.subr.bf16.mxu0 %v3569_v6  ;;  %v530_v63 = vld [vmem:[%s5825_s1 + $0xf68] sm:$0xff]  ;;  %v548_v6 = vld [vmem:[%s5825_s1 + $0xff8] sm:$0xff]  ;;  %v3587_v9 = vpack.c.bf16 %v498_v59, %v497_v58  ;;  %v565_v21 = vld [vmem:[%s5825_s1 + $0x1080] sm:$0xff] }
  0xeb   :  { %3600 = vmatpush3.bf16.msra.mxu1 %v3599_v5  ;;  %v547_v5 = vld [vmem:[%s5825_s1 + $0xff0] sm:$0xff]  ;;  %v3619_v12 = vpack.c.bf16 %v530_v63, %v529_v60  ;;  %v500_v16 = vld [vmem:[%s5825_s1 + $0xe78] sm:$0xff]  ;;  %v566_v22 = vld [vmem:[%s5825_s1 + $0x1088] sm:$0xff] }
  0xec   :  { %3602 = vmatprep.subr.bf16.mxu1 %v3601_v11  ;;  %v35_v11 = vld [vmem:[%s5824_s0 + $0x40] sm:$0xff]  ;;  %v532_v20 = vld [vmem:[%s5825_s1 + $0xf78] sm:$0xff]  ;;  %v598_v24 = vld [vmem:[%s5825_s1 + $0x1188] sm:$0xff]  ;;  %v3591_v27 = vpack.c.bf16 %v500_v16, %v499_v15 }
  0xed   :  { %3572 = vmatpush3.bf16.msra.mxu0 %v3571_v17  ;;  %v531_v17 = vld [vmem:[%s5825_s1 + $0xf70] sm:$0xff]  ;;  %v768_v25 = vcombine.high %v35_v11, %v35_v11  ;;  %v581_v32 = vld [vmem:[%s5825_s1 + $0x1100] sm:$0xff]  ;;  %v582_v42 = vld [vmem:[%s5825_s1 + $0x1108] sm:$0xff]  ;;  %v5508_v52 = vrot.slane %v35_v11, %v3973_v13 }
  0xee   :  { %3574 = vmatprep.subr.bf16.mxu0 %v3573_v19  ;;  %v3621_v19 = vpack.c.bf16 %v548_v6, %v547_v5  ;;  %v3623_v28 = vpack.c.bf16 %v532_v20, %v531_v17  ;;  %v568_v36 = vld [vmem:[%s5825_s1 + $0x1098] sm:$0xff]  ;;  %v599_v37 = vld [vmem:[%s5825_s1 + $0x1190] sm:$0xff]  ;;  %v569_v49 = vld [vmem:[%s5825_s1 + $0x10a0] sm:$0xff] }
  0xef   :  { %3604 = vmatpush3.bf16.msra.mxu1 %v3603_v18  ;;  %v600_v38 = vld [vmem:[%s5825_s1 + $0x1198] sm:$0xff]  ;;  %v5517_v39 = vrot.slane %v768_v25, %v3973_v13  ;;  %v551_v44 = vld [vmem:[%s5825_s1 + $0x1010] sm:$0xff]  ;;  %v570_v50 = vld [vmem:[%s5825_s1 + $0x10a8] sm:$0xff]  ;;  %v783_v53 = vcombine.high %v5508_v52, %v5508_v52 }
  0xf0   :  { %3606 = vmatprep.subr.bf16.mxu1 %v3605_v23  ;;  %v597_v23 = vld [vmem:[%s5825_s1 + $0x1180] sm:$0xff]  ;;  %v552_v46 = vld [vmem:[%s5825_s1 + $0x1018] sm:$0xff]  ;;  %v583_v47 = vld [vmem:[%s5825_s1 + $0x1110] sm:$0xff]  ;;  %v3661_v13 = vpack.c.bf16 %v600_v38, %v599_v37  ;;  %v3633_v58 = vpack.c.bf16 %v570_v50, %v569_v49 }
  0xf1   :  { %3576 = vmatpush3.bf16.msra.mxu0 %v3575_v31  ;;  %v3625_v31 = vpack.c.bf16 %v566_v22, %v565_v21  ;;  %v3657_v34 = vpack.c.bf16 %v598_v24, %v597_v23  ;;  %v601_v54 = vld [vmem:[%s5825_s1 + $0x11a0] sm:$0xff]  ;;  %v602_v55 = vld [vmem:[%s5825_s1 + $0x11a8] sm:$0xff]  ;;  %v572_v63 = vld [vmem:[%s5825_s1 + $0x10b8] sm:$0xff] }
  0xf2   :  { %3578 = vmatprep.subr.bf16.mxu0 %v3577_v30  ;;  %v550_v30 = vld [vmem:[%s5825_s1 + $0x1008] sm:$0xff]  ;;  %v585_v60 = vld [vmem:[%s5825_s1 + $0x1120] sm:$0xff]  ;;  %v603_v0 = vld [vmem:[%s5825_s1 + $0x11b0] sm:$0xff] }
  0xf3   :  { %3608 = vmatpush3.bf16.msra.mxu1 %v3607_v29  ;;  %v549_v29 = vld [vmem:[%s5825_s1 + $0x1000] sm:$0xff]  ;;  %v554_v59 = vld [vmem:[%s5825_s1 + $0x1028] sm:$0xff]  ;;  %v604_v1 = vld [vmem:[%s5825_s1 + $0x11b8] sm:$0xff] }
  0xf4   :  { %3610 = vmatprep.subr.bf16.mxu1 %v3609_v35  ;;  %v567_v35 = vld [vmem:[%s5825_s1 + $0x1090] sm:$0xff]  ;;  %v556_v6 = vld [vmem:[%s5825_s1 + $0x1038] sm:$0xff]  ;;  %v573_v11 = vld [vmem:[%s5825_s1 + $0x10c0] sm:$0xff] }
  0xf5   :  { %3580 = vmatpush3.bf16.msra.mxu0 %v3579_v40  ;;  %v3627_v40 = vpack.c.bf16 %v550_v30, %v549_v29  ;;  %v555_v5 = vld [vmem:[%s5825_s1 + $0x1030] sm:$0xff]  ;;  %v589_v20 = vld [vmem:[%s5825_s1 + $0x1140] sm:$0xff]  ;;  %v590_v22 = vld [vmem:[%s5825_s1 + $0x1148] sm:$0xff] }
  0xf6   :  { %3582 = vmatprep.subr.bf16.mxu0 %v3581_v43  ;;  %v3629_v43 = vpack.c.bf16 %v568_v36, %v567_v35  ;;  %v3639_v15 = vpack.c.bf16 %v556_v6, %v555_v5  ;;  %v575_v23 = vld [vmem:[%s5825_s1 + $0x10d0] sm:$0xff]  ;;  %v576_v24 = vld [vmem:[%s5825_s1 + $0x10d8] sm:$0xff]  ;;  %v577_v36 = vld [vmem:[%s5825_s1 + $0x10e0] sm:$0xff] }
  0xf7   :  { %3612 = vmatpush3.bf16.msra.mxu1 %v3611_v41  ;;  %v2401_v61 = vpop.f32.mrb[0].mxu0  ;;  %v3659_v41 = vpack.c.bf16 %v582_v42, %v581_v32  ;;  %v607_v25 = vld [vmem:[%s5825_s1 + $0x11d0] sm:$0xff]  ;;  %v3645_v29 = vpack.c.bf16 %v576_v24, %v575_v23  ;;  %v560_v32 = vld [vmem:[%s5825_s1 + $0x1058] sm:$0xff]  ;;  %v578_v37 = vld [vmem:[%s5825_s1 + $0x10e8] sm:$0xff] }
  0xf8   :  { %3614 = vmatprep.subr.bf16.mxu1 %v3613_v48  ;;  %v2402_v3 = vpop.f32.mrb[1].mxu0  ;;  %v584_v48 = vld [vmem:[%s5825_s1 + $0x1118] sm:$0xff]  ;;  %v559_v30 = vld [vmem:[%s5825_s1 + $0x1050] sm:$0xff]  ;;  %v609_v38 = vld [vmem:[%s5825_s1 + $0x11e0] sm:$0xff] }
  0xf9   :  { %v2436_v4 = vpop.f32.mrb[0].mxu1  ;;  %v2403_v8 = vadd.f32 %v2402_v3, %v2401_v61  ;;  %3584 = vmatpush3.bf16.msra.mxu0 %v3583_v56  ;;  %v784_v56 = vcombine.high %v5517_v39, %v5517_v39  ;;  %v3665_v61 = vpack.c.bf16 %v602_v55, %v601_v54  ;;  %v592_v35 = vld [vmem:[%s5825_s1 + $0x1158] sm:$0xff]  ;;  %v594_v50 = vld [vmem:[%s5825_s1 + $0x1168] sm:$0xff] }
  0xfa   :  { %v2437_v7 = vpop.f32.mrb[1].mxu1  ;;  %3586 = vmatprep.subr.bf16.mxu0 %v3585_v45  ;;  %v3663_v45 = vpack.c.bf16 %v584_v48, %v583_v47  ;;  %v562_v47 = vld [vmem:[%s5825_s1 + $0x1068] sm:$0xff]  ;;  %v580_v54 = vld [vmem:[%s5825_s1 + $0x10f8] sm:$0xff] }
  0xfb   :  { %v2438_v10 = vadd.f32 %v2437_v7, %v2436_v4  ;;  %3616 = vmatpush3.bf16.msra.mxu1 %v3615_v57  ;;  %v898_v18 = vadd.f32 %v2403_v8, %v2364_v2  ;;  %v3631_v57 = vpack.c.bf16 %v552_v46, %v551_v44  ;;  %v587_v8 = vld [vmem:[%s5825_s1 + $0x1130] sm:$0xff]  ;;  %v3669_v7 = vpack.c.bf16 %v604_v1, %v603_v0  ;;  %v561_v46 = vld [vmem:[%s5825_s1 + $0x1060] sm:$0xff] }
  0xfc   :  { %3618 = vmatprep.subr.bf16.mxu1 %v3617_v62  ;;  %v571_v62 = vld [vmem:[%s5825_s1 + $0x10b0] sm:$0xff]  ;;  %v3649_v44 = vpack.c.bf16 %v578_v37, %v577_v36 }
  0xfd   :  { %v5487_v26 = vadd.f32 %v2438_v10, %v898_v18  ;;  %3588 = vmatpush3.bf16.msra.mxu0 %v3587_v9  ;;  %v3637_v4 = vpack.c.bf16 %v572_v63, %v571_v62  ;;  %v588_v9 = vld [vmem:[%s5825_s1 + $0x1138] sm:$0xff]  ;;  %v574_v10 = vld [vmem:[%s5825_s1 + $0x10c8] sm:$0xff]  ;;  %v557_v18 = vld [vmem:[%s5825_s1 + $0x1040] sm:$0xff] }
  0xfe   :  { %3590 = vmatprep.subr.bf16.mxu0 %v3589_v14  ;;  %v606_v14 = vld [vmem:[%s5825_s1 + $0x11c8] sm:$0xff]  ;;  %v3671_v16 = vpack.c.bf16 %v588_v9, %v587_v8  ;;  %v3641_v17 = vpack.c.bf16 %v574_v10, %v573_v11  ;;  %v563_v62 = vld [vmem:[%s5825_s1 + $0x1070] sm:$0xff]  ;;  %v564_v63 = vld [vmem:[%s5825_s1 + $0x1078] sm:$0xff]  ;;  %v3779_v9 = vmov 0.0|0.0   ;;  %v3781_v10 = vmov 0.0  }
  0xff   :  { %3620 = vmatpush3.bf16.msra.mxu1 %v3619_v12  ;;  %v605_v12 = vld [vmem:[%s5825_s1 + $0x11c0] sm:$0xff]  ;;  %v3655_v5 = vpack.c.bf16 %v564_v63, %v563_v62  ;;  %v614_v8 = vld [vmem:[%s5825_s1 + $0x1208] sm:$0xff]  ;;  %v2168_v37 = vld [vmem:[%s5827_s3 + $0x30] sm:$0xff] }
 0x100   :  { %3622 = vmatprep.subr.bf16.mxu1 %v3621_v19  ;;  %v558_v19 = vld [vmem:[%s5825_s1 + $0x1048] sm:$0xff]  ;;  %v3673_v21 = vpack.c.bf16 %v606_v14, %v605_v12  ;;  %v2258_v63 = vld [vmem:[%s5829_s5 + $0x10] sm:$0xff] }
 0x101   :  { %3592 = vmatpush3.bf16.msra.mxu0 %v3591_v27  ;;  %v608_v27 = vld [vmem:[%s5825_s1 + $0x11d8] sm:$0xff]  ;;  %v2365_v11 = vld.sshfl [vmem:[%s5824_s0 + $0x48] sm:$0x3 pattern:$0x76325410] }
 0x102   :  { %3626 = vmatprep.subr.bf16.mxu0 %v3625_v31  ;;  %v3675_v31 = vpack.c.bf16 %v590_v22, %v589_v20  ;;  %v3677_v42 = vpack.c.bf16 %v608_v27, %v607_v25  ;;  %v2257_v62 = vld [vmem:[%s5829_s5 + $0x8] sm:$0xff] }
 0x103   :  { %3624 = vmatpush3.bf16.msra.mxu1 %v3623_v28  ;;  %v3643_v28 = vpack.c.bf16 %v558_v19, %v557_v18 }
 0x104   :  { %3658 = vmatprep.subr.bf16.mxu1 %v3657_v34  ;;  %1876 = vmatmul.mubr.f32.vlgmr.msra.gmra.mrb[14].mxu0 %v5296_v51  ;;  %v553_v51 = vld [vmem:[%s5825_s1 + $0x1020] sm:$0xff]  ;;  %v591_v34 = vld [vmem:[%s5825_s1 + $0x1150] sm:$0xff] }
 0x105   :  { %3628 = vmatpush3.bf16.msra.mxu0 %v3627_v40  ;;  %2015 = vmatprep.mubr.f32.mxu0 %v783_v53  ;;  %v3635_v2 = vpack.c.bf16 %v554_v59, %v553_v51  ;;  %v610_v40 = vld [vmem:[%s5825_s1 + $0x11e8] sm:$0xff]  ;;  %v579_v53 = vld [vmem:[%s5825_s1 + $0x10f0] sm:$0xff]  ;;  %v3651_v59 = vpack.c.bf16 %v562_v47, %v561_v46  ;;  %v2173_v47 = vld [vmem:[%s5827_s3 + $0x58] sm:$0xff] }
 0x106   :  { %1946 = vmatmul.mubr.f32.vlgmr.msra.gmra.mrb[14].mxu1 %v5305_v33  ;;  %3630 = vmatprep.subr.bf16.mxu0 %v3629_v43  ;;  %v586_v33 = vld [vmem:[%s5825_s1 + $0x1128] sm:$0xff]  ;;  %v3679_v43 = vpack.c.bf16 %v592_v35, %v591_v34  ;;  %v3681_v49 = vpack.c.bf16 %v610_v40, %v609_v38  ;;  %v2169_v38 = vld [vmem:[%s5827_s3 + $0x38] sm:$0xff]  ;;  %v2172_v46 = vld [vmem:[%s5827_s3 + $0x50] sm:$0xff] }
 0x107   :  { %3660 = vmatpush3.bf16.msra.mxu1 %v3659_v41  ;;  %2085 = vmatprep.mubr.f32.mxu1 %v784_v56  ;;  %v3667_v3 = vpack.c.bf16 %v586_v33, %v585_v60  ;;  %v3647_v41 = vpack.c.bf16 %v560_v32, %v559_v30  ;;  %v3653_v33 = vpack.c.bf16 %v580_v54, %v579_v53  ;;  %v2165_v32 = vld [vmem:[%s5827_s3 + $0x18] sm:$0xff]  ;;  %v2167_v35 = vld [vmem:[%s5827_s3 + $0x28] sm:$0xff] }
 0x108   :  { %3662 = vmatprep.subr.bf16.mxu1 %v3661_v13  ;;  %v593_v13 = vld [vmem:[%s5825_s1 + $0x1160] sm:$0xff]  ;;  %v3702_v40 = vpack.c.bf16 %v2169_v38, %v2168_v37 }
 0x109   :  { %3632 = vmatpush3.bf16.msra.mxu0 %v3631_v57  ;;  %v611_v57 = vld [vmem:[%s5825_s1 + $0x11f0] sm:$0xff] }
 0x10a   :  { %3634 = vmatprep.subr.bf16.mxu0 %v3633_v58 }
 0x10b   :  { %3664 = vmatpush3.bf16.msra.mxu1 %v3663_v45  ;;  %v612_v45 = vld [vmem:[%s5825_s1 + $0x11f8] sm:$0xff] }
 0x10c   :  { %3666 = vmatprep.subr.bf16.mxu1 %v3665_v61  ;;  %v3683_v61 = vpack.c.bf16 %v594_v50, %v593_v13  ;;  %v3685_v1 = vpack.c.bf16 %v612_v45, %v611_v57  ;;  %v3708_v13 = vpack.c.bf16 %v2173_v47, %v2172_v46 }
 0x10d   :  { %3636 = vmatpush3.bf16.msra.mxu0 %v3635_v2  ;;  %v595_v2 = vld [vmem:[%s5825_s1 + $0x1170] sm:$0xff] }
 0x10e   :  { %3638 = vmatprep.subr.bf16.mxu0 %v3637_v4 }
 0x10f   :  { %3668 = vmatpush3.bf16.msra.mxu1 %v3667_v3  ;;  %v596_v3 = vld [vmem:[%s5825_s1 + $0x1178] sm:$0xff] }
 0x110   :  { %3670 = vmatprep.subr.bf16.mxu1 %v3669_v7  ;;  %v3687_v6 = vpack.c.bf16 %v596_v3, %v595_v2  ;;  %v2260_v3 = vld [vmem:[%s5829_s5 + $0x20] sm:$0xff] }
 0x111   :  { %3640 = vmatpush3.bf16.msra.mxu0 %v3639_v15 }
 0x112   :  { %3642 = vmatprep.subr.bf16.mxu0 %v3641_v17 }
 0x113   :  { %3672 = vmatpush3.bf16.msra.mxu1 %v3671_v16 }
 0x114   :  { %3674 = vmatprep.subr.bf16.mxu1 %v3673_v21 }
 0x115   :  { %3644 = vmatpush3.bf16.msra.mxu0 %v3643_v28  ;;  %v2162_v28 = vld [vmem:[%s5827_s3] sm:$0xff] }
 0x116   :  { %3646 = vmatprep.subr.bf16.mxu0 %v3645_v29  ;;  %v2164_v29 = vld [vmem:[%s5827_s3 + $0x10] sm:$0xff] }
 0x117   :  { %3676 = vmatpush3.bf16.msra.mxu1 %v3675_v31  ;;  %v2471_v48 = vpop.f32.mrb[2].mxu0  ;;  %v2163_v31 = vld [vmem:[%s5827_s3 + $0x8] sm:$0xff]  ;;  %v3696_v34 = vpack.c.bf16 %v2165_v32, %v2164_v29 }
 0x118   :  { %3678 = vmatprep.subr.bf16.mxu1 %v3677_v42  ;;  %v2472_v55 = vpop.f32.mrb[3].mxu0  ;;  %v3693_v30 = vpack.c.bf16 %v2163_v31, %v2162_v28  ;;  %v2166_v42 = vld [vmem:[%s5827_s3 + $0x20] sm:$0xff] }
 0x119   :  { %v2506_v56 = vpop.f32.mrb[2].mxu1  ;;  %v2473_v58 = vadd.f32 %v2472_v55, %v2471_v48  ;;  %3648 = vmatpush3.bf16.msra.mxu0 %v3647_v41  ;;  %v3699_v36 = vpack.c.bf16 %v2167_v35, %v2166_v42  ;;  %v2170_v41 = vld [vmem:[%s5827_s3 + $0x40] sm:$0xff] }
 0x11a   :  { %v2507_v51 = vpop.f32.mrb[3].mxu1  ;;  %3650 = vmatprep.subr.bf16.mxu0 %v3649_v44  ;;  %v2174_v55 = vld [vmem:[%s5827_s3 + $0x60] sm:$0xff] }
 0x11b   :  { %v2508_v60 = vadd.f32 %v2507_v51, %v2506_v56  ;;  %3680 = vmatpush3.bf16.msra.mxu1 %v3679_v43  ;;  %v1038_v0 = vadd.f32 %v2473_v58, %v5487_v26  ;;  %v613_v26 = vld [vmem:[%s5825_s1 + $0x1200] sm:$0xff]  ;;  %v2171_v43 = vld [vmem:[%s5827_s3 + $0x48] sm:$0xff] }
 0x11c   :  { %3682 = vmatprep.subr.bf16.mxu1 %v3681_v49  ;;  %v3690_v7 = vpack.c.bf16 %v614_v8, %v613_v26  ;;  %v3705_v44 = vpack.c.bf16 %v2171_v43, %v2170_v41  ;;  %v2175_v56 = vld [vmem:[%s5827_s3 + $0x68] sm:$0xff]  ;;  %v2263_v26 = vld [vmem:[%s5829_s5 + $0x38] sm:$0xff] }
 0x11d   :  { %v1108_v4 = vadd.f32 %v2508_v60, %v1038_v0  ;;  %3652 = vmatpush3.bf16.msra.mxu0 %v3651_v59  ;;  %v3711_v45 = vpack.c.bf16 %v2175_v56, %v2174_v55  ;;  %v2176_v59 = vld [vmem:[%s5827_s3 + $0x70] sm:$0xff]  ;;  %v2177_v60 = vld [vmem:[%s5827_s3 + $0x78] sm:$0xff] }
 0x11e   :  { %3654 = vmatprep.subr.bf16.mxu0 %v3653_v33  ;;  %v2256_v33 = vld [vmem:[%s5829_s5] sm:$0xff] }
 0x11f   :  { %3684 = vmatpush3.bf16.msra.mxu1 %v3683_v61  ;;  %v3714_v61 = vpack.c.bf16 %v2177_v60, %v2176_v59  ;;  %v3717_v0 = vpack.c.bf16 %v2257_v62, %v2256_v33  ;;  %v2368_v62 = vld [vmem:[%s5830_s6] ss:$0 sm:$0xff] }
 0x120   :  { %3686 = vmatprep.subr.bf16.mxu1 %v3685_v1  ;;  %v2259_v1 = vld [vmem:[%s5829_s5 + $0x18] sm:$0xff] }
 0x121   :  { %3656 = vmatpush3.bf16.msra.mxu0 %v3655_v5  ;;  %v3720_v2 = vpack.c.bf16 %v2259_v1, %v2258_v63 }
 0x122   :  { %3689 = vmatprep.subr.bf16.mxu0 %v3779_v9 }
 0x123   :  { %3688 = vmatpush3.bf16.msra.mxu1 %v3687_v6  ;;  %v2262_v6 = vld [vmem:[%s5829_s5 + $0x30] sm:$0xff] }
 0x124   :  { %3692 = vmatprep.subr.bf16.mxu1 %v3779_v9  ;;  %2016 = vmatmul.mubr.f32.vlgmr.msra.gmra.mrb[16].mxu0 %v5508_v52  ;;  %v3726_v8 = vpack.c.bf16 %v2263_v26, %v2262_v6 }
 0x125   :  { %3691 = vmatpush3.bf16.msra.mxu0 %v3690_v7  ;;  %3040 = vmatprep.mubr.msk.f32.mxu0 %vm3780_vm1, %v3781_v10  ;;  %v2264_v7 = vld [vmem:[%s5829_s5 + $0x40] sm:$0xff] }
 0x126   :  { %2086 = vmatmul.mubr.f32.vlgmr.msra.gmra.mrb[16].mxu1 %v5517_v39  ;;  %3716 = vmatprep.subr.bf16.mxu0 %v3779_v9 }
 0x127   :  { %3075 = vmatprep.mubr.msk.f32.mxu1 %vm3780_vm1, %v3781_v10  ;;  %3694 = vmatpush3.bf16.msra.mxu1 %v3693_v30 }
 0x128   :  { %3041 = vmatmul.mubr.msk.f32.vlgmr.msra.gmra.mrb[18].mxu0 %vm828_vm0, %v2365_v11  ;;  %3695 = vmatprep.subr.bf16.mxu1 %v3779_v9  ;;  %v2265_v11 = vld [vmem:[%s5829_s5 + $0x48] sm:$0xff] }
 0x129   :  { %3110 = vmatprep.mubr.msk.f32.mxu0 %vm3780_vm1, %v3781_v10  ;;  %3718 = vmatpush3.bf16.msra.mxu0 %v3717_v0  ;;  %v3729_v10 = vpack.c.bf16 %v2265_v11, %v2264_v7 }
 0x12a   :  { %3719 = vmatprep.subr.bf16.mxu0 %v3779_v9 }
 0x12b   :  { %3697 = vmatpush3.bf16.msra.mxu1 %v3696_v34 }
 0x12c   :  { %3698 = vmatprep.subr.bf16.mxu1 %v3779_v9 }
 0x12d   :  { %3721 = vmatpush3.bf16.msra.mxu0 %v3720_v2 }
 0x12e   :  { %3722 = vmatprep.subr.bf16.mxu0 %v3779_v9 }
 0x12f   :  { %3700 = vmatpush3.bf16.msra.mxu1 %v3699_v36 }
 0x130   :  { %3701 = vmatprep.subr.bf16.mxu1 %v3779_v9 }
 0x133   :  { %3703 = vmatpush3.bf16.msra.mxu1 %v3702_v40 }
 0x134   :  { %3704 = vmatprep.subr.bf16.mxu1 %v3779_v9 }
 0x137   :  { %v2541_v12 = vpop.f32.mrb[4].mxu0  ;;  %3706 = vmatpush3.bf16.msra.mxu1 %v3705_v44 }
 0x138   :  { %v2542_v14 = vpop.f32.mrb[5].mxu0  ;;  %3707 = vmatprep.subr.bf16.mxu1 %v3779_v9 }
 0x139   :  { %v2576_v15 = vpop.f32.mrb[4].mxu1  ;;  %v2543_v52 = vadd.f32 %v2542_v14, %v2541_v12  ;;  %v2266_v12 = vld [vmem:[%s5829_s5 + $0x50] sm:$0xff]  ;;  %v2267_v14 = vld [vmem:[%s5829_s5 + $0x58] sm:$0xff] }
 0x13a   :  { %v2577_v16 = vpop.f32.mrb[5].mxu1 }
 0x13b   :  { %v2578_v39 = vadd.f32 %v2577_v16, %v2576_v15  ;;  %v1178_v17 = vadd.f32 %v2543_v52, %v1108_v4  ;;  %3709 = vmatpush3.bf16.msra.mxu1 %v3708_v13  ;;  %v2261_v4 = vld [vmem:[%s5829_s5 + $0x28] sm:$0xff]  ;;  %v3732_v15 = vpack.c.bf16 %v2267_v14, %v2266_v12  ;;  %v2268_v16 = vld [vmem:[%s5829_s5 + $0x60] sm:$0xff] }
 0x13c   :  { %3710 = vmatprep.subr.bf16.mxu1 %v3779_v9  ;;  %v3723_v5 = vpack.c.bf16 %v2261_v4, %v2260_v3 }
 0x13d   :  { %v1248_v18 = vadd.f32 %v2578_v39, %v1178_v17  ;;  %v2269_v39 = vld [vmem:[%s5829_s5 + $0x68] sm:$0xff] }
 0x13e   :  { %3724 = vmatpush3.bf16.msra.mxu0 %v3723_v5 }
 0x13f   :  { %3712 = vmatpush3.bf16.msra.mxu1 %v3711_v45  ;;  %3725 = vmatprep.subr.bf16.mxu0 %v3779_v9  ;;  %v2271_v45 = vld [vmem:[%s5829_s5 + $0x78] sm:$0xff] }
 0x140   :  { %3713 = vmatprep.subr.bf16.mxu1 %v3779_v9 }
 0x142   :  { %3727 = vmatpush3.bf16.msra.mxu0 %v3726_v8 }
 0x143   :  { %3715 = vmatpush3.bf16.msra.mxu1 %v3714_v61  ;;  %3728 = vmatprep.subr.bf16.mxu0 %v3779_v9 }
 0x146   :  { %3730 = vmatpush3.bf16.msra.mxu0 %v3729_v10 }
 0x147   :  { %3731 = vmatprep.subr.bf16.mxu0 %v3779_v9 }
 0x14a   :  { %3733 = vmatpush3.bf16.msra.mxu0 %v3732_v15 }
 0x14b   :  { %3734 = vmatprep.subr.bf16.mxu0 %v3779_v9 }
 0x157   :  { %v2611_v19 = vpop.f32.mrb[6].mxu0 }
 0x158   :  { %v2612_v20 = vpop.f32.mrb[7].mxu0 }
 0x159   :  { %v2646_v21 = vpop.f32.mrb[6].mxu1  ;;  %v2613_v22 = vadd.f32 %v2612_v20, %v2611_v19 }
 0x15a   :  { %v2647_v23 = vpop.f32.mrb[7].mxu1 }
 0x15b   :  { %v2648_v24 = vadd.f32 %v2647_v23, %v2646_v21  ;;  %v1318_v25 = vadd.f32 %v2613_v22, %v1248_v18  ;;  %v3735_v22 = vpack.c.bf16 %v2269_v39, %v2268_v16 }
 0x15d   :  { %v1388_v27 = vadd.f32 %v2648_v24, %v1318_v25  ;;  %3736 = vmatpush3.bf16.msra.mxu0 %v3735_v22 }
 0x15e   :  { %3737 = vmatprep.subr.bf16.mxu0 %v3779_v9 }
 0x177   :  { %v2681_v48 = vpop.f32.mrb[8].mxu0 }
 0x178   :  { %v2682_v49 = vpop.f32.mrb[9].mxu0 }
 0x179   :  { %v2716_v50 = vpop.f32.mrb[8].mxu1  ;;  %v2683_v53 = vadd.f32 %v2682_v49, %v2681_v48 }
 0x17a   :  { %v2717_v54 = vpop.f32.mrb[9].mxu1 }
 0x17b   :  { %v2718_v57 = vadd.f32 %v2717_v54, %v2716_v50  ;;  %v1458_v58 = vadd.f32 %v2683_v53, %v1388_v27 }
 0x17d   :  { %v1528_v51 = vadd.f32 %v2718_v57, %v1458_v58  ;;  %v2270_v57 = vld [vmem:[%s5829_s5 + $0x70] sm:$0xff]  ;;  %s3754_s5 = scalar_lea.vmem %s2357_s12, 32 }
 0x17e   :  { %v3738_v58 = vpack.c.bf16 %v2271_v45, %v2270_v57  ;;  %p3755_p0 = scmp.ne.s32.totalorder %s2357_s12, %s3754_s5  ;;  %p3760_p2 = scmp.lt.s32.totalorder %s3754_s5, %s3754_s5 }
 0x180   :  { %3739 = vmatpush3.bf16.msra.mxu0 %v3738_v58  ;;  %p3761_p3 = por %p3760_p2, %p3759_p1 }
 0x182   :  { %p3762_p4 = pnand %p3761_p3, %p3755_p0 }
 0x197   :  { %v2751_v52 = vpop.f32.mrb[10].mxu0 }
 0x198   :  { %v2752_v17 = vpop.f32.mrb[11].mxu0 }
 0x199   :  { %v2786_v18 = vpop.f32.mrb[10].mxu1  ;;  %v2753_v19 = vadd.f32 %v2752_v17, %v2751_v52 }
 0x19a   :  { %v2787_v20 = vpop.f32.mrb[11].mxu1 }
 0x19b   :  { %v2788_v21 = vadd.f32 %v2787_v20, %v2786_v18  ;;  %v1598_v23 = vadd.f32 %v2753_v19, %v1528_v51  ;;  %v2367_v51 = vld [vmem:[%s5828_s4] ss:$0 sm:$0xff] }
 0x19d   :  { %v1668_v24 = vadd.f32 %v2788_v21, %v1598_v23 }
 0x1b7   :  { %v2821_v25 = vpop.f32.mrb[12].mxu0 }
 0x1b8   :  { %v2822_v27 = vpop.f32.mrb[13].mxu0 }
 0x1b9   :  { %v2856_v28 = vpop.f32.mrb[12].mxu1  ;;  %v2823_v31 = vadd.f32 %v2822_v27, %v2821_v25 }
 0x1ba   :  { %v2857_v29 = vpop.f32.mrb[13].mxu1 }
 0x1bb   :  { %v2858_v30 = vadd.f32 %v2857_v29, %v2856_v28  ;;  %v1738_v32 = vadd.f32 %v2823_v31, %v1668_v24 }
 0x1bd   :  { %v1808_v34 = vadd.f32 %v2858_v30, %v1738_v32 }
 0x1d7   :  { %v2891_v42 = vpop.f32.mrb[14].mxu0 }
 0x1d8   :  { %v2892_v35 = vpop.f32.mrb[15].mxu0 }
 0x1d9   :  { %v2926_v36 = vpop.f32.mrb[14].mxu1  ;;  %v2893_v37 = vadd.f32 %v2892_v35, %v2891_v42 }
 0x1da   :  { %v2927_v38 = vpop.f32.mrb[15].mxu1 }
 0x1db   :  { %v2928_v40 = vadd.f32 %v2927_v38, %v2926_v36  ;;  %v1878_v41 = vadd.f32 %v2893_v37, %v1808_v34 }
 0x1dd   :  { %v1948_v43 = vadd.f32 %v2928_v40, %v1878_v41 }
 0x1f7   :  { %v2961_v44 = vpop.f32.mrb[16].mxu0 }
 0x1f8   :  { %v2962_v46 = vpop.f32.mrb[17].mxu0 }
 0x1f9   :  { %v2996_v47 = vpop.f32.mrb[16].mxu1  ;;  %v2963_v9 = vadd.f32 %v2962_v46, %v2961_v44 }
 0x1fa   :  { %v2997_v13 = vpop.f32.mrb[17].mxu1 }
 0x1fb   :  { %v2998_v48 = vadd.f32 %v2997_v13, %v2996_v47  ;;  %v2018_v49 = vadd.f32 %v2963_v9, %v1948_v43  ;;  %v2157_v50 = vpop.f32.mrb[18].mxu0 }
 0x1fc   :  { %v3042_v53 = vpop.f32.mrb[19].mxu0 }
 0x1fd   :  { %v2088_v54 = vadd.f32 %v2998_v48, %v2018_v49 }
 0x1ff   :  { %v2158_v55 = vadd.f32 %v2157_v50, %v2088_v54 }
 0x201   :  { %v2161_v56 = vmax.f32 %v2158_v55, 0.0 }
 0x203   :  { %3076 = vmatmul.mubr.f32.vlgmr.msra.gmra.mrb[18].mxu1 %v2161_v56 }
 0x2d6   :  { %v2251_v59 = vpop.f32.mrb[18].mxu1 }
 0x2d7   :  { %v2252_v60 = vadd.f32 %v2367_v51, %v2251_v59  ;;  %v3077_v61 = vpop.f32.mrb[19].mxu1 }
 0x2d9   :  { %v2255_v33 = vmax.f32 %v2252_v60, 0.0 }
 0x2db   :  { %3111 = vmatmul.mubr.f32.vlgmr.msra.gmra.mrb[20].mxu0 %v2255_v33 }
 0x3ae   :  { %v2345_v63 = vpop.f32.mrb[20].mxu0 }
 0x3af   :  { %v2346_v0 = vadd.f32 %v2368_v62, %v2345_v63  ;;  %v3112_v1 = vpop.f32.mrb[21].mxu0 }
 0x3b1   :  { %2349 = vst [vmem:[#allocation2] sm:$0x3] %v2346_v0 }
 0x3b2   :  { %3765 = shalt.err (!%p3762_p4)
}
 0x3b3   :  { %s3766_s14 = scalar_lea.hbm %s5831_s7, 32 }
 0x3b4   :  { %p3767_p5 = scmp.ne.s32.totalorder %s5831_s7, %s3766_s14  ;;  %p3770_p6 = scmp.lt.u32.totalorder %s3766_s14, %s5831_s7 }
 0x3b6   :  { %p3772_p7 = pnand %p3770_p6, %p3767_p5 }
 0x3b8   :  { %3775 = shalt.err (!%p3772_p7)
}
 0x3b9   :  { %2359 = dma.vmem_to_hbm [thread:$0]  %s2357_s12, 32, %s5831_s7, [#allocation3]  }
 0x3ba   :  { %3776 = dma.done.wait [#allocation3], 32  }
 0x3bb   :  { %3777 = vsyncadd [#allocation3], 4294967264 }
 0x3bc   :  { %2363 = vsyncpa [#allocation3], 1 }

</bundles_post_ra>
